<compile_context>
chip_gen: v6e
topology: v6e:2x2x1
jax: 0.10.0
libtpu: 0.0.40
codegen_flags: <defaults>
</compile_context>

<pallas_src>
from functools import partial

import jax
import jax.numpy as jnp
from jax.experimental import pallas as pl
from jax.experimental.pallas import tpu as pltpu


_VMEM_LIMIT = 48 * 1024 * 1024   # < v7x 64 MiB physical, > default scoped limit
_STEM_CIN_P = 32                 # RGB input padded 3 -> 32 channels
_STEM_COUT_P = 128               # lane-dense stem output, carried into layer1


# ---------------------------------------------------------------------------------------
# Fused conv kernel:
#   [BN+ReLU] -> zero-pad halo in VMEM scratch -> KH*KW accumulating MXU matmuls
#   (bf16 in / fp32 accumulate in VMEM scratch) -> +bias [-> +residual] -> bf16 store
# ---------------------------------------------------------------------------------------
def _conv_kernel(*refs, KH, KW, pad, act, has_res):
    it = iter(refs)
    x_ref = next(it)
    s_ref = next(it) if act else None
    t_ref = next(it) if act else None
    w_ref = next(it)
    b_ref = next(it)
    r_ref = next(it) if has_res else None
    o_ref = next(it)
    pad_ref = next(it) if pad else None
    acc_ref = next(it) if KH * KW > 1 else None

    Nb, H, W, Cin = x_ref.shape
    _, Ho, Wo, Cout = o_ref.shape
    M = Nb * Ho * Wo

    if act:                                             # fused inference BN + ReLU
        x = x_ref[...].astype(jnp.float32)
        s = s_ref[...].reshape(1, 1, 1, Cin)
        t = t_ref[...].reshape(1, 1, 1, Cin)
        xb = jnp.maximum(x * s + t, 0.0).astype(jnp.bfloat16)
    else:
        xb = x_ref[...].astype(jnp.bfloat16)

    if pad:                                             # halo handled in VMEM, not HBM
        pad_ref[...] = jnp.zeros(pad_ref.shape, pad_ref.dtype)
        pad_ref[:, pad:pad + H, pad:pad + W, :] = xb

    if KH * KW == 1:                                    # 1x1 shortcut conv
        acc = jnp.dot(xb.reshape(M, Cin), w_ref[0],
                      preferred_element_type=jnp.float32)
    else:                                               # static unroll over taps
        for idx in range(KH * KW):
            kh, kw = divmod(idx, KW)
            if pad:
                tap = pad_ref[:, kh:kh + Ho, kw:kw + Wo, :]
            else:
                tap = xb[:, kh:kh + Ho, kw:kw + Wo, :]
            prod = jnp.dot(tap.reshape(M, Cin), w_ref[idx],
                           preferred_element_type=jnp.float32)
            if idx == 0:
                acc_ref[...] = prod
            else:
                acc_ref[...] += prod
        acc = acc_ref[...]

    acc = acc + b_ref[...]                              # (1, Cout) bias broadcast
    out = acc.reshape(Nb, Ho, Wo, Cout)
    if has_res:
        out = out + r_ref[...].astype(jnp.float32)      # fused wide_basic shortcut add
    o_ref[...] = out.astype(o_ref.dtype)


def _pick_nb(N, M):
    """Group Nb images into the matmul M dim when the spatial tile is small (8x8 stage),
    while keeping >= 2 grid points so both v7x TensorCores get work."""
    want = max(1, 256 // M)
    best = 1
    for cand in range(1, N + 1):
        if N % cand == 0 and cand <= want and N // cand >= 2:
            best = cand
    return best


def conv2d_fused(x, p, *, KH, pad, scale=None, shift=None, residual=None):
    """Stride-1 KHxKH conv on NHWC bf16 input with optional fused pre-BN+ReLU and
    fused residual add.  p['w'] is (KH*KH, Cin, Cout) bf16, p['b'] is (1, Cout) f32."""
    N, H, W, Cin = x.shape
    KK, Cin_w, Cout = p['w'].shape
    assert KK == KH * KH and Cin_w == Cin, (p['w'].shape, x.shape, KH)
    Ho, Wo = H + 2 * pad - KH + 1, W + 2 * pad - KH + 1
    act = scale is not None
    has_res = residual is not None
    Nb = _pick_nb(N, Ho * Wo)

    in_specs = [pl.BlockSpec((Nb, H, W, Cin), lambda n: (n, 0, 0, 0))]
    args = [x]
    if act:
        in_specs += [pl.BlockSpec((1, Cin), lambda n: (0, 0)),
                     pl.BlockSpec((1, Cin), lambda n: (0, 0))]
        args += [scale, shift]
    in_specs += [pl.BlockSpec((KK, Cin, Cout), lambda n: (0, 0, 0)),   # weights resident
                 pl.BlockSpec((1, Cout), lambda n: (0, 0))]
    args += [p['w'], p['b']]
    if has_res:
        in_specs.append(pl.BlockSpec((Nb, Ho, Wo, Cout), lambda n: (n, 0, 0, 0)))
        args.append(residual)

    scratch = []
    if pad:
        scratch.append(pltpu.VMEM((Nb, H + 2 * pad, W + 2 * pad, Cin), jnp.bfloat16))
    if KK > 1:
        scratch.append(pltpu.VMEM((Nb * Ho * Wo, Cout), jnp.float32))

    return pl.pallas_call(
        partial(_conv_kernel, KH=KH, KW=KH, pad=pad, act=act, has_res=has_res),
        out_shape=jax.ShapeDtypeStruct((N, Ho, Wo, Cout), jnp.bfloat16),
        grid=(N // Nb,),
        in_specs=in_specs,
        out_specs=pl.BlockSpec((Nb, Ho, Wo, Cout), lambda n: (n, 0, 0, 0)),
        scratch_shapes=scratch,
        compiler_params=pltpu.CompilerParams(
            dimension_semantics=("parallel",),
            vmem_limit_bytes=_VMEM_LIMIT),
    )(*args)


# ---------------------------------------------------------------------------------------
# Final fused BN + ReLU + 8x8 global average pool (== F.relu(bn1) -> F.avg_pool2d(.,8))
# ---------------------------------------------------------------------------------------
def _bn_relu_gap_kernel(x_ref, s_ref, t_ref, o_ref):
    x = x_ref[...].astype(jnp.float32)                  # (1, HW, C)
    s = s_ref[...].reshape(1, 1, -1)
    t = t_ref[...].reshape(1, 1, -1)
    y = jnp.maximum(x * s + t, 0.0)
    o_ref[...] = jnp.mean(y, axis=1, keepdims=True)     # (1, 1, C)


def bn_relu_global_avg_pool(x, scale, shift):
    N, H, W, C = x.shape
    HW = H * W
    out = pl.pallas_call(
        _bn_relu_gap_kernel,
        out_shape=jax.ShapeDtypeStruct((N, 1, C), jnp.float32),
        grid=(N,),
        in_specs=[pl.BlockSpec((1, HW, C), lambda n: (n, 0, 0)),
                  pl.BlockSpec((1, C), lambda n: (0, 0)),
                  pl.BlockSpec((1, C), lambda n: (0, 0))],
        out_specs=pl.BlockSpec((1, 1, C), lambda n: (n, 0, 0)),
        compiler_params=pltpu.CompilerParams(
            dimension_semantics=("parallel",),
            vmem_limit_bytes=_VMEM_LIMIT),
    )(x.reshape(N, HW, C), scale, shift)
    return out.reshape(N, C)


# ---------------------------------------------------------------------------------------
# WRN-28-10 config + parameter packing (weights pre-reshaped (K*K, Cin_p, Cout_p) bf16)
# ---------------------------------------------------------------------------------------
def wrn_28_10_config():
    depth, widen = 28, 10
    n = (depth - 4) // 6                                # 4 wide_basic blocks per stage
    stages = [16, 16 * widen, 32 * widen, 64 * widen]
    cfg, cin = [], stages[0]
    for cout, stride0 in zip(stages[1:], (1, 2, 2)):
        for b in range(n):
            stride = stride0 if b == 0 else 1
            cfg.append(dict(cin=cin, cout=cout, stride=stride,
                            has_shortcut=(stride != 1 or cin != cout)))
            cin = cout
    return stages, cfg


def _conv_param(key, cin, cout, k, cin_p=None, cout_p=None):
    cin_p = cin if cin_p is None else cin_p
    cout_p = cout if cout_p is None else cout_p
    kw_key, kb_key = jax.random.split(key)
    std = 1.0 / float(k * k * cin) ** 0.5
    w = std * jax.random.normal(kw_key, (k, k, cin, cout), jnp.float32)
    w = jnp.pad(w, ((0, 0), (0, 0), (0, cin_p - cin), (0, cout_p - cout)))
    b = 0.1 * jax.random.normal(kb_key, (cout,), jnp.float32)
    b = jnp.pad(b, (0, cout_p - cout)).reshape(1, cout_p)
    return {'w': w.reshape(k * k, cin_p, cout_p).astype(jnp.bfloat16), 'b': b}


def _bn_param(key, c, c_p=None, eps=1e-5):
    c_p = c if c_p is None else c_p
    k1, k2, k3, k4 = jax.random.split(key, 4)
    gamma = 1.0 + 0.1 * jax.random.normal(k1, (c,), jnp.float32)
    beta = 0.1 * jax.random.normal(k2, (c,), jnp.float32)
    mean = 0.1 * jax.random.normal(k3, (c,), jnp.float32)
    var = jnp.abs(1.0 + 0.1 * jax.random.normal(k4, (c,), jnp.float32))
    scale = gamma * jax.lax.rsqrt(var + eps)
    shift = beta - mean * scale
    # padded channels get scale = shift = 0 so they stay exactly zero through BN+ReLU
    scale = jnp.pad(scale, (0, c_p - c)).reshape(1, c_p)
    shift = jnp.pad(shift, (0, c_p - c)).reshape(1, c_p)
    return scale, shift


def init_params(key):
    stages, cfg = wrn_28_10_config()
    keys = jax.random.split(key, 2 + len(cfg))
    params = {'conv1': _conv_param(keys[0], 3, stages[0], 3,
                                   cin_p=_STEM_CIN_P, cout_p=_STEM_COUT_P),
              'blocks': []}
    for i, c in enumerate(cfg):
        ks = jax.random.split(keys[1 + i], 5)
        cin_p = _STEM_COUT_P if c['cin'] == stages[0] else c['cin']
        blk = {}
        blk['bn1_scale'], blk['bn1_shift'] = _bn_param(ks[0], c['cin'], cin_p)
        blk['conv1'] = _conv_param(ks[1], c['cin'], c['cout'], 3, cin_p=cin_p)
        blk['bn2_scale'], blk['bn2_shift'] = _bn_param(ks[2], c['cout'])
        blk['conv2'] = _conv_param(ks[3], c['cout'], c['cout'], 3)
        if c['has_shortcut']:
            blk['shortcut'] = _conv_param(ks[4], c['cin'], c['cout'], 1, cin_p=cin_p)
        params['blocks'].append(blk)
    params['bn_last_scale'], params['bn_last_shift'] = _bn_param(keys[-1], stages[3])
    return params


# ---------------------------------------------------------------------------------------
# Full forward (== Wide_ResNet_encoder.forward / Wide_ResNet_28_10.forward, eval mode)
# ---------------------------------------------------------------------------------------
@jax.jit
def wide_resnet_encoder_forward(params, x_nchw):
    _, cfg = wrn_28_10_config()
    # single layout conversion at the model boundary; pad RGB 3 -> 32 input channels
    x = jnp.transpose(x_nchw, (0, 2, 3, 1)).astype(jnp.float32)
    x = jnp.pad(x, ((0, 0), (0, 0), (0, 0), (0, _STEM_CIN_P - x.shape[-1])))
    x = x.astype(jnp.bfloat16)

    out = conv2d_fused(x, params['conv1'], KH=3, pad=1)          # stem (16 real / 128 ch)

    for c, blk in zip(cfg, params['blocks']):
        h = conv2d_fused(out, blk['conv1'], KH=3, pad=1,
                         scale=blk['bn1_scale'], shift=blk['bn1_shift'])
        if c['has_shortcut']:
            sc_in = out if c['stride'] == 1 else out[:, ::2, ::2, :]   # exact for 1x1
            sc = conv2d_fused(sc_in, blk['shortcut'], KH=1, pad=0)
        else:
            sc = out
        if c['stride'] == 1:
            out = conv2d_fused(h, blk['conv2'], KH=3, pad=1,
                               scale=blk['bn2_scale'], shift=blk['bn2_shift'],
                               residual=sc)
        else:
            # stride-2 conv == stride-1 conv sampled at even output positions (exact)
            y = conv2d_fused(h, blk['conv2'], KH=3, pad=1,
                             scale=blk['bn2_scale'], shift=blk['bn2_shift'])
            y = y[:, ::2, ::2, :]
            out = (y.astype(jnp.float32) + sc.astype(jnp.float32)).astype(jnp.bfloat16)

    return bn_relu_global_avg_pool(out, params['bn_last_scale'],
                                   params['bn_last_shift'])       # (N, 640)


# ---------------------------------------------------------------------------------------
# Pure-JAX reference mirroring the kernel numerics (bf16 storage, fp32 accumulation)
# ---------------------------------------------------------------------------------------
def _ref_conv(x, w3, b, *, k, stride, pad):
    cin_p = w3.shape[1]
    w = w3.reshape(k, k, cin_p, -1)
    y = jax.lax.conv_general_dilated(
        x.astype(jnp.bfloat16), w, window_strides=(stride, stride),
        padding=[(pad, pad), (pad, pad)],
        dimension_numbers=('NHWC', 'HWIO', 'NHWC'),
        preferred_element_type=jnp.float32)
    return y + b.reshape(1, 1, 1, -1)


def _ref_act(x, scale, shift):
    xf = x.astype(jnp.float32)
    y = jnp.maximum(xf * scale.reshape(1, 1, 1, -1) + shift.reshape(1, 1, 1, -1), 0.0)
    return y.astype(jnp.bfloat16)


def _ref_forward(params, x_nchw):
    _, cfg = wrn_28_10_config()
    x = jnp.transpose(x_nchw, (0, 2, 3, 1)).astype(jnp.float32)
    x = jnp.pad(x, ((0, 0), (0, 0), (0, 0), (0, _STEM_CIN_P - x.shape[-1])))
    x = x.astype(jnp.bfloat16)
    out = _ref_conv(x, params['conv1']['w'], params['conv1']['b'],
                    k=3, stride=1, pad=1).astype(jnp.bfloat16)
    for c, blk in zip(cfg, params['blocks']):
        a1 = _ref_act(out, blk['bn1_scale'], blk['bn1_shift'])
        h = _ref_conv(a1, blk['conv1']['w'], blk['conv1']['b'],
                      k=3, stride=1, pad=1).astype(jnp.bfloat16)
        a2 = _ref_act(h, blk['bn2_scale'], blk['bn2_shift'])
        if c['has_shortcut']:
            x_sc = out if c['stride'] == 1 else out[:, ::2, ::2, :]
            sc = _ref_conv(x_sc, blk['shortcut']['w'], blk['shortcut']['b'],
                           k=1, stride=1, pad=0).astype(jnp.bfloat16)
        else:
            sc = out
        y = _ref_conv(a2, blk['conv2']['w'], blk['conv2']['b'],
                      k=3, stride=c['stride'], pad=1)
        if c['stride'] == 1:
            out = (y + sc.astype(jnp.float32)).astype(jnp.bfloat16)
        else:
            out = (y.astype(jnp.bfloat16).astype(jnp.float32)
                   + sc.astype(jnp.float32)).astype(jnp.bfloat16)
    outf = out.astype(jnp.float32)
    s = params['bn_last_scale'].reshape(1, 1, 1, -1)
    t = params['bn_last_shift'].reshape(1, 1, 1, -1)
    return jnp.mean(jnp.maximum(outf * s + t, 0.0), axis=(1, 2))


def _max_rel_err(got, want):
    got = got.astype(jnp.float32)
    want = want.astype(jnp.float32)
    err = float(jnp.max(jnp.abs(got - want)))
    return err / (float(jnp.max(jnp.abs(want))) + 1e-6)


if __name__ == "__main__":
    key = jax.random.PRNGKey(0)
    kp, kx, ku = jax.random.split(key, 3)

    # --- unit check: fused conv kernel vs lax.conv (stride 1 and stride-2-by-subsample) --
    xu = jax.random.normal(ku, (2, 16, 16, 32), jnp.float32).astype(jnp.bfloat16)
    cp = _conv_param(jax.random.PRNGKey(7), 32, 160, 3)
    su, tu = _bn_param(jax.random.PRNGKey(8), 32)
    y1 = conv2d_fused(xu, cp, KH=3, pad=1, scale=su, shift=tu)
    y1r = _ref_conv(_ref_act(xu, su, tu), cp['w'], cp['b'], k=3, stride=1, pad=1)
    assert _max_rel_err(y1, y1r) < 2e-2, _max_rel_err(y1, y1r)
    y2 = y1[:, ::2, ::2, :]
    y2r = _ref_conv(_ref_act(xu, su, tu), cp['w'], cp['b'], k=3, stride=2, pad=1)
    assert _max_rel_err(y2, y2r) < 2e-2, _max_rel_err(y2, y2r)

    # --- full Wide_ResNet_encoder forward on a CIFAR-sized batch -------------------------
    params = init_params(kp)
    x = jax.random.normal(kx, (2, 3, 32, 32), jnp.float32)        # NCHW, CIFAR-sized

    rep = jax.block_until_ready(wide_resnet_encoder_forward(params, x))
    assert rep.shape == (2, 640), rep.shape
    assert bool(jnp.all(jnp.isfinite(rep)))

    rep_ref = _ref_forward(params, x)
    err = _max_rel_err(rep, rep_ref)
    assert err < 4e-2, err

    print("KERNEL_OK")
</pallas_src>

<mosaic_0001>
module attributes {stable_mosaic.version = 11 : i64} {
  func.func @_conv_kernel(%arg0: i32, %arg1: memref<1x16x16x32xbf16, #tpu.memory_space<vmem>>, %arg2: memref<1x32xf32, #tpu.memory_space<vmem>>, %arg3: memref<1x32xf32, #tpu.memory_space<vmem>>, %arg4: memref<9x32x160xbf16, #tpu.memory_space<vmem>>, %arg5: memref<1x160xf32, #tpu.memory_space<vmem>>, %arg6: memref<1x16x16x160xbf16, #tpu.memory_space<vmem>>, %arg7: memref<1x18x18x32xbf16, #tpu.memory_space<vmem>>, %arg8: memref<256x160xf32, #tpu.memory_space<vmem>>) attributes {dimension_semantics = [#tpu.dimension_semantics<parallel>], iteration_bounds = array<i64: 2>, scalar_prefetch = 0 : i64, scratch_operands = 2 : i64, tpu.core_type = #tpu.core_type<tc>, window_params = [{transform_indices = @transform_0, window_bounds = array<i64: 1, 16, 16, 32>}, {pipeline_mode = #tpu.pipeline_mode<synchronous>, transform_indices = @transform_1, window_bounds = array<i64: 1, 32>}, {pipeline_mode = #tpu.pipeline_mode<synchronous>, transform_indices = @transform_2, window_bounds = array<i64: 1, 32>}, {pipeline_mode = #tpu.pipeline_mode<synchronous>, transform_indices = @transform_3, window_bounds = array<i64: 9, 32, 160>}, {pipeline_mode = #tpu.pipeline_mode<synchronous>, transform_indices = @transform_4, window_bounds = array<i64: 1, 160>}, {transform_indices = @transform_5, window_bounds = array<i64: 1, 16, 16, 160>}]} {
    %c0 = arith.constant 0 : index
    %c0_0 = arith.constant 0 : index
    %c0_1 = arith.constant 0 : index
    %c0_2 = arith.constant 0 : index
    %0 = vector.load %arg1[%c0, %c0_0, %c0_1, %c0_2] : memref<1x16x16x32xbf16, #tpu.memory_space<vmem>>, vector<1x16x16x32xbf16>
    %1 = arith.extf %0 : vector<1x16x16x32xbf16> to vector<1x16x16x32xf32>
    %c0_3 = arith.constant 0 : index
    %c0_4 = arith.constant 0 : index
    %2 = vector.load %arg2[%c0_3, %c0_4] : memref<1x32xf32, #tpu.memory_space<vmem>>, vector<1x32xf32>
    %3 = vector.shape_cast %2 : vector<1x32xf32> to vector<1x1x1x32xf32>
    %c0_5 = arith.constant 0 : index
    %c0_6 = arith.constant 0 : index
    %4 = vector.load %arg3[%c0_5, %c0_6] : memref<1x32xf32, #tpu.memory_space<vmem>>, vector<1x32xf32>
    %5 = vector.shape_cast %4 : vector<1x32xf32> to vector<1x1x1x32xf32>
    %6 = vector.broadcast %3 : vector<1x1x1x32xf32> to vector<1x16x16x32xf32>
    %7 = arith.mulf %1, %6 : vector<1x16x16x32xf32>
    %8 = vector.broadcast %5 : vector<1x1x1x32xf32> to vector<1x16x16x32xf32>
    %9 = arith.addf %7, %8 : vector<1x16x16x32xf32>
    %cst = arith.constant 0.000000e+00 : f32
    %10 = vector.broadcast %cst : f32 to vector<1x16x16x32xf32>
    %11 = arith.maximumf %9, %10 : vector<1x16x16x32xf32>
    %12 = arith.truncf %11 : vector<1x16x16x32xf32> to vector<1x16x16x32xbf16>
    %cst_7 = arith.constant 0.000000e+00 : bf16
    %13 = vector.broadcast %cst_7 : bf16 to vector<1x18x18x32xbf16>
    %c0_8 = arith.constant 0 : index
    %c0_9 = arith.constant 0 : index
    %c0_10 = arith.constant 0 : index
    %c0_11 = arith.constant 0 : index
    %14 = vector.load %arg7[%c0_8, %c0_9, %c0_10, %c0_11] : memref<1x18x18x32xbf16, #tpu.memory_space<vmem>>, vector<1x18x18x32xbf16>
    tpu.vector_store %arg7[%c0_8, %c0_9, %c0_10, %c0_11], %13 {strides = array<i32>} : memref<1x18x18x32xbf16, #tpu.memory_space<vmem>>, vector<1x18x18x32xbf16>,
    %c0_12 = arith.constant 0 : index
    %c1 = arith.constant 1 : index
    %c1_13 = arith.constant 1 : index
    %c0_14 = arith.constant 0 : index
    %15 = vector.load %arg7[%c0_12, %c1, %c1_13, %c0_14] : memref<1x18x18x32xbf16, #tpu.memory_space<vmem>>, vector<1x16x16x32xbf16>
    tpu.vector_store %arg7[%c0_12, %c1, %c1_13, %c0_14], %12 {strides = array<i32>} : memref<1x18x18x32xbf16, #tpu.memory_space<vmem>>, vector<1x16x16x32xbf16>,
    %c0_15 = arith.constant 0 : index
    %c0_16 = arith.constant 0 : index
    %c0_17 = arith.constant 0 : index
    %c0_18 = arith.constant 0 : index
    %16 = vector.load %arg7[%c0_15, %c0_16, %c0_17, %c0_18] : memref<1x18x18x32xbf16, #tpu.memory_space<vmem>>, vector<1x16x16x32xbf16>
    %17 = vector.shape_cast %16 : vector<1x16x16x32xbf16> to vector<256x32xbf16>
    %c0_19 = arith.constant 0 : index
    %c0_20 = arith.constant 0 : index
    %c0_21 = arith.constant 0 : index
    %18 = vector.load %arg4[%c0_19, %c0_20, %c0_21] : memref<9x32x160xbf16, #tpu.memory_space<vmem>>, vector<1x32x160xbf16>
    %19 = vector.shape_cast %18 : vector<1x32x160xbf16> to vector<32x160xbf16>
    %cst_22 = arith.constant dense<0.000000e+00> : vector<256x160xf32>
    %20 = tpu.matmul %17, %19, %cst_22 {dimension_numbers = #tpu.dot_dimension_numbers<[1], [0], [0], [1], [0, 0, 1, 1], [], []>} : vector<256x32xbf16>, vector<32x160xbf16>, vector<256x160xf32> -> vector<256x160xf32>
    %c0_23 = arith.constant 0 : index
    %c0_24 = arith.constant 0 : index
    %21 = vector.load %arg8[%c0_23, %c0_24] : memref<256x160xf32, #tpu.memory_space<vmem>>, vector<256x160xf32>
    tpu.vector_store %arg8[%c0_23, %c0_24], %20 {strides = array<i32>} : memref<256x160xf32, #tpu.memory_space<vmem>>, vector<256x160xf32>,
    %c0_25 = arith.constant 0 : index
    %c0_26 = arith.constant 0 : index
    %c1_27 = arith.constant 1 : index
    %c0_28 = arith.constant 0 : index
    %22 = vector.load %arg7[%c0_25, %c0_26, %c1_27, %c0_28] : memref<1x18x18x32xbf16, #tpu.memory_space<vmem>>, vector<1x16x16x32xbf16>
    %23 = vector.shape_cast %22 : vector<1x16x16x32xbf16> to vector<256x32xbf16>
    %c1_29 = arith.constant 1 : index
    %c0_30 = arith.constant 0 : index
    %c0_31 = arith.constant 0 : index
    %24 = vector.load %arg4[%c1_29, %c0_30, %c0_31] : memref<9x32x160xbf16, #tpu.memory_space<vmem>>, vector<1x32x160xbf16>
    %25 = vector.shape_cast %24 : vector<1x32x160xbf16> to vector<32x160xbf16>
    %cst_32 = arith.constant dense<0.000000e+00> : vector<256x160xf32>
    %26 = tpu.matmul %23, %25, %cst_32 {dimension_numbers = #tpu.dot_dimension_numbers<[1], [0], [0], [1], [0, 0, 1, 1], [], []>} : vector<256x32xbf16>, vector<32x160xbf16>, vector<256x160xf32> -> vector<256x160xf32>
    %c0_33 = arith.constant 0 : index
    %c0_34 = arith.constant 0 : index
    %27 = vector.load %arg8[%c0_33, %c0_34] : memref<256x160xf32, #tpu.memory_space<vmem>>, vector<256x160xf32>
    %28 = arith.addf %27, %26 : vector<256x160xf32>
    %c0_35 = arith.constant 0 : index
    %c0_36 = arith.constant 0 : index
    %29 = vector.load %arg8[%c0_35, %c0_36] : memref<256x160xf32, #tpu.memory_space<vmem>>, vector<256x160xf32>
    tpu.vector_store %arg8[%c0_35, %c0_36], %28 {strides = array<i32>} : memref<256x160xf32, #tpu.memory_space<vmem>>, vector<256x160xf32>,
    %c0_37 = arith.constant 0 : index
    %c0_38 = arith.constant 0 : index
    %c2 = arith.constant 2 : index
    %c0_39 = arith.constant 0 : index
    %30 = vector.load %arg7[%c0_37, %c0_38, %c2, %c0_39] : memref<1x18x18x32xbf16, #tpu.memory_space<vmem>>, vector<1x16x16x32xbf16>
    %31 = vector.shape_cast %30 : vector<1x16x16x32xbf16> to vector<256x32xbf16>
    %c2_40 = arith.constant 2 : index
    %c0_41 = arith.constant 0 : index
    %c0_42 = arith.constant 0 : index
    %32 = vector.load %arg4[%c2_40, %c0_41, %c0_42] : memref<9x32x160xbf16, #tpu.memory_space<vmem>>, vector<1x32x160xbf16>
    %33 = vector.shape_cast %32 : vector<1x32x160xbf16> to vector<32x160xbf16>
    %cst_43 = arith.constant dense<0.000000e+00> : vector<256x160xf32>
    %34 = tpu.matmul %31, %33, %cst_43 {dimension_numbers = #tpu.dot_dimension_numbers<[1], [0], [0], [1], [0, 0, 1, 1], [], []>} : vector<256x32xbf16>, vector<32x160xbf16>, vector<256x160xf32> -> vector<256x160xf32>
    %c0_44 = arith.constant 0 : index
    %c0_45 = arith.constant 0 : index
    %35 = vector.load %arg8[%c0_44, %c0_45] : memref<256x160xf32, #tpu.memory_space<vmem>>, vector<256x160xf32>
    %36 = arith.addf %35, %34 : vector<256x160xf32>
    %c0_46 = arith.constant 0 : index
    %c0_47 = arith.constant 0 : index
    %37 = vector.load %arg8[%c0_46, %c0_47] : memref<256x160xf32, #tpu.memory_space<vmem>>, vector<256x160xf32>
    tpu.vector_store %arg8[%c0_46, %c0_47], %36 {strides = array<i32>} : memref<256x160xf32, #tpu.memory_space<vmem>>, vector<256x160xf32>,
    %c0_48 = arith.constant 0 : index
    %c1_49 = arith.constant 1 : index
    %c0_50 = arith.constant 0 : index
    %c0_51 = arith.constant 0 : index
    %38 = vector.load %arg7[%c0_48, %c1_49, %c0_50, %c0_51] : memref<1x18x18x32xbf16, #tpu.memory_space<vmem>>, vector<1x16x16x32xbf16>
    %39 = vector.shape_cast %38 : vector<1x16x16x32xbf16> to vector<256x32xbf16>
    %c3 = arith.constant 3 : index
    %c0_52 = arith.constant 0 : index
    %c0_53 = arith.constant 0 : index
    %40 = vector.load %arg4[%c3, %c0_52, %c0_53] : memref<9x32x160xbf16, #tpu.memory_space<vmem>>, vector<1x32x160xbf16>
    %41 = vector.shape_cast %40 : vector<1x32x160xbf16> to vector<32x160xbf16>
    %cst_54 = arith.constant dense<0.000000e+00> : vector<256x160xf32>
    %42 = tpu.matmul %39, %41, %cst_54 {dimension_numbers = #tpu.dot_dimension_numbers<[1], [0], [0], [1], [0, 0, 1, 1], [], []>} : vector<256x32xbf16>, vector<32x160xbf16>, vector<256x160xf32> -> vector<256x160xf32>
    %c0_55 = arith.constant 0 : index
    %c0_56 = arith.constant 0 : index
    %43 = vector.load %arg8[%c0_55, %c0_56] : memref<256x160xf32, #tpu.memory_space<vmem>>, vector<256x160xf32>
    %44 = arith.addf %43, %42 : vector<256x160xf32>
    %c0_57 = arith.constant 0 : index
    %c0_58 = arith.constant 0 : index
    %45 = vector.load %arg8[%c0_57, %c0_58] : memref<256x160xf32, #tpu.memory_space<vmem>>, vector<256x160xf32>
    tpu.vector_store %arg8[%c0_57, %c0_58], %44 {strides = array<i32>} : memref<256x160xf32, #tpu.memory_space<vmem>>, vector<256x160xf32>,
    %c0_59 = arith.constant 0 : index
    %c1_60 = arith.constant 1 : index
    %c1_61 = arith.constant 1 : index
    %c0_62 = arith.constant 0 : index
    %46 = vector.load %arg7[%c0_59, %c1_60, %c1_61, %c0_62] : memref<1x18x18x32xbf16, #tpu.memory_space<vmem>>, vector<1x16x16x32xbf16>
    %47 = vector.shape_cast %46 : vector<1x16x16x32xbf16> to vector<256x32xbf16>
    %c4 = arith.constant 4 : index
    %c0_63 = arith.constant 0 : index
    %c0_64 = arith.constant 0 : index
    %48 = vector.load %arg4[%c4, %c0_63, %c0_64] : memref<9x32x160xbf16, #tpu.memory_space<vmem>>, vector<1x32x160xbf16>
    %49 = vector.shape_cast %48 : vector<1x32x160xbf16> to vector<32x160xbf16>
    %cst_65 = arith.constant dense<0.000000e+00> : vector<256x160xf32>
    %50 = tpu.matmul %47, %49, %cst_65 {dimension_numbers = #tpu.dot_dimension_numbers<[1], [0], [0], [1], [0, 0, 1, 1], [], []>} : vector<256x32xbf16>, vector<32x160xbf16>, vector<256x160xf32> -> vector<256x160xf32>
    %c0_66 = arith.constant 0 : index
    %c0_67 = arith.constant 0 : index
    %51 = vector.load %arg8[%c0_66, %c0_67] : memref<256x160xf32, #tpu.memory_space<vmem>>, vector<256x160xf32>
    %52 = arith.addf %51, %50 : vector<256x160xf32>
    %c0_68 = arith.constant 0 : index
    %c0_69 = arith.constant 0 : index
    %53 = vector.load %arg8[%c0_68, %c0_69] : memref<256x160xf32, #tpu.memory_space<vmem>>, vector<256x160xf32>
    tpu.vector_store %arg8[%c0_68, %c0_69], %52 {strides = array<i32>} : memref<256x160xf32, #tpu.memory_space<vmem>>, vector<256x160xf32>,
    %c0_70 = arith.constant 0 : index
    %c1_71 = arith.constant 1 : index
    %c2_72 = arith.constant 2 : index
    %c0_73 = arith.constant 0 : index
    %54 = vector.load %arg7[%c0_70, %c1_71, %c2_72, %c0_73] : memref<1x18x18x32xbf16, #tpu.memory_space<vmem>>, vector<1x16x16x32xbf16>
    %55 = vector.shape_cast %54 : vector<1x16x16x32xbf16> to vector<256x32xbf16>
    %c5 = arith.constant 5 : index
    %c0_74 = arith.constant 0 : index
    %c0_75 = arith.constant 0 : index
    %56 = vector.load %arg4[%c5, %c0_74, %c0_75] : memref<9x32x160xbf16, #tpu.memory_space<vmem>>, vector<1x32x160xbf16>
    %57 = vector.shape_cast %56 : vector<1x32x160xbf16> to vector<32x160xbf16>
    %cst_76 = arith.constant dense<0.000000e+00> : vector<256x160xf32>
    %58 = tpu.matmul %55, %57, %cst_76 {dimension_numbers = #tpu.dot_dimension_numbers<[1], [0], [0], [1], [0, 0, 1, 1], [], []>} : vector<256x32xbf16>, vector<32x160xbf16>, vector<256x160xf32> -> vector<256x160xf32>
    %c0_77 = arith.constant 0 : index
    %c0_78 = arith.constant 0 : index
    %59 = vector.load %arg8[%c0_77, %c0_78] : memref<256x160xf32, #tpu.memory_space<vmem>>, vector<256x160xf32>
    %60 = arith.addf %59, %58 : vector<256x160xf32>
    %c0_79 = arith.constant 0 : index
    %c0_80 = arith.constant 0 : index
    %61 = vector.load %arg8[%c0_79, %c0_80] : memref<256x160xf32, #tpu.memory_space<vmem>>, vector<256x160xf32>
    tpu.vector_store %arg8[%c0_79, %c0_80], %60 {strides = array<i32>} : memref<256x160xf32, #tpu.memory_space<vmem>>, vector<256x160xf32>,
    %c0_81 = arith.constant 0 : index
    %c2_82 = arith.constant 2 : index
    %c0_83 = arith.constant 0 : index
    %c0_84 = arith.constant 0 : index
    %62 = vector.load %arg7[%c0_81, %c2_82, %c0_83, %c0_84] : memref<1x18x18x32xbf16, #tpu.memory_space<vmem>>, vector<1x16x16x32xbf16>
    %63 = vector.shape_cast %62 : vector<1x16x16x32xbf16> to vector<256x32xbf16>
    %c6 = arith.constant 6 : index
    %c0_85 = arith.constant 0 : index
    %c0_86 = arith.constant 0 : index
    %64 = vector.load %arg4[%c6, %c0_85, %c0_86] : memref<9x32x160xbf16, #tpu.memory_space<vmem>>, vector<1x32x160xbf16>
    %65 = vector.shape_cast %64 : vector<1x32x160xbf16> to vector<32x160xbf16>
    %cst_87 = arith.constant dense<0.000000e+00> : vector<256x160xf32>
    %66 = tpu.matmul %63, %65, %cst_87 {dimension_numbers = #tpu.dot_dimension_numbers<[1], [0], [0], [1], [0, 0, 1, 1], [], []>} : vector<256x32xbf16>, vector<32x160xbf16>, vector<256x160xf32> -> vector<256x160xf32>
    %c0_88 = arith.constant 0 : index
    %c0_89 = arith.constant 0 : index
    %67 = vector.load %arg8[%c0_88, %c0_89] : memref<256x160xf32, #tpu.memory_space<vmem>>, vector<256x160xf32>
    %68 = arith.addf %67, %66 : vector<256x160xf32>
    %c0_90 = arith.constant 0 : index
    %c0_91 = arith.constant 0 : index
    %69 = vector.load %arg8[%c0_90, %c0_91] : memref<256x160xf32, #tpu.memory_space<vmem>>, vector<256x160xf32>
    tpu.vector_store %arg8[%c0_90, %c0_91], %68 {strides = array<i32>} : memref<256x160xf32, #tpu.memory_space<vmem>>, vector<256x160xf32>,
    %c0_92 = arith.constant 0 : index
    %c2_93 = arith.constant 2 : index
    %c1_94 = arith.constant 1 : index
    %c0_95 = arith.constant 0 : index
    %70 = vector.load %arg7[%c0_92, %c2_93, %c1_94, %c0_95] : memref<1x18x18x32xbf16, #tpu.memory_space<vmem>>, vector<1x16x16x32xbf16>
    %71 = vector.shape_cast %70 : vector<1x16x16x32xbf16> to vector<256x32xbf16>
    %c7 = arith.constant 7 : index
    %c0_96 = arith.constant 0 : index
    %c0_97 = arith.constant 0 : index
    %72 = vector.load %arg4[%c7, %c0_96, %c0_97] : memref<9x32x160xbf16, #tpu.memory_space<vmem>>, vector<1x32x160xbf16>
    %73 = vector.shape_cast %72 : vector<1x32x160xbf16> to vector<32x160xbf16>
    %cst_98 = arith.constant dense<0.000000e+00> : vector<256x160xf32>
    %74 = tpu.matmul %71, %73, %cst_98 {dimension_numbers = #tpu.dot_dimension_numbers<[1], [0], [0], [1], [0, 0, 1, 1], [], []>} : vector<256x32xbf16>, vector<32x160xbf16>, vector<256x160xf32> -> vector<256x160xf32>
    %c0_99 = arith.constant 0 : index
    %c0_100 = arith.constant 0 : index
    %75 = vector.load %arg8[%c0_99, %c0_100] : memref<256x160xf32, #tpu.memory_space<vmem>>, vector<256x160xf32>
    %76 = arith.addf %75, %74 : vector<256x160xf32>
    %c0_101 = arith.constant 0 : index
    %c0_102 = arith.constant 0 : index
    %77 = vector.load %arg8[%c0_101, %c0_102] : memref<256x160xf32, #tpu.memory_space<vmem>>, vector<256x160xf32>
    tpu.vector_store %arg8[%c0_101, %c0_102], %76 {strides = array<i32>} : memref<256x160xf32, #tpu.memory_space<vmem>>, vector<256x160xf32>,
    %c0_103 = arith.constant 0 : index
    %c2_104 = arith.constant 2 : index
    %c2_105 = arith.constant 2 : index
    %c0_106 = arith.constant 0 : index
    %78 = vector.load %arg7[%c0_103, %c2_104, %c2_105, %c0_106] : memref<1x18x18x32xbf16, #tpu.memory_space<vmem>>, vector<1x16x16x32xbf16>
    %79 = vector.shape_cast %78 : vector<1x16x16x32xbf16> to vector<256x32xbf16>
    %c8 = arith.constant 8 : index
    %c0_107 = arith.constant 0 : index
    %c0_108 = arith.constant 0 : index
    %80 = vector.load %arg4[%c8, %c0_107, %c0_108] : memref<9x32x160xbf16, #tpu.memory_space<vmem>>, vector<1x32x160xbf16>
    %81 = vector.shape_cast %80 : vector<1x32x160xbf16> to vector<32x160xbf16>
    %cst_109 = arith.constant dense<0.000000e+00> : vector<256x160xf32>
    %82 = tpu.matmul %79, %81, %cst_109 {dimension_numbers = #tpu.dot_dimension_numbers<[1], [0], [0], [1], [0, 0, 1, 1], [], []>} : vector<256x32xbf16>, vector<32x160xbf16>, vector<256x160xf32> -> vector<256x160xf32>
    %c0_110 = arith.constant 0 : index
    %c0_111 = arith.constant 0 : index
    %83 = vector.load %arg8[%c0_110, %c0_111] : memref<256x160xf32, #tpu.memory_space<vmem>>, vector<256x160xf32>
    %84 = arith.addf %83, %82 : vector<256x160xf32>
    %c0_112 = arith.constant 0 : index
    %c0_113 = arith.constant 0 : index
    %85 = vector.load %arg8[%c0_112, %c0_113] : memref<256x160xf32, #tpu.memory_space<vmem>>, vector<256x160xf32>
    tpu.vector_store %arg8[%c0_112, %c0_113], %84 {strides = array<i32>} : memref<256x160xf32, #tpu.memory_space<vmem>>, vector<256x160xf32>,
    %c0_114 = arith.constant 0 : index
    %c0_115 = arith.constant 0 : index
    %86 = vector.load %arg8[%c0_114, %c0_115] : memref<256x160xf32, #tpu.memory_space<vmem>>, vector<256x160xf32>
    %c0_116 = arith.constant 0 : index
    %c0_117 = arith.constant 0 : index
    %87 = vector.load %arg5[%c0_116, %c0_117] : memref<1x160xf32, #tpu.memory_space<vmem>>, vector<1x160xf32>
    %88 = vector.broadcast %87 : vector<1x160xf32> to vector<256x160xf32>
    %89 = arith.addf %86, %88 : vector<256x160xf32>
    %90 = vector.shape_cast %89 : vector<256x160xf32> to vector<1x16x16x160xf32>
    %91 = arith.truncf %90 : vector<1x16x16x160xf32> to vector<1x16x16x160xbf16>
    %c0_118 = arith.constant 0 : index
    %c0_119 = arith.constant 0 : index
    %c0_120 = arith.constant 0 : index
    %c0_121 = arith.constant 0 : index
    %92 = vector.load %arg6[%c0_118, %c0_119, %c0_120, %c0_121] : memref<1x16x16x160xbf16, #tpu.memory_space<vmem>>, vector<1x16x16x160xbf16>
    tpu.vector_store %arg6[%c0_118, %c0_119, %c0_120, %c0_121], %91 {strides = array<i32>} : memref<1x16x16x160xbf16, #tpu.memory_space<vmem>>, vector<1x16x16x160xbf16>,
    return
  }
  func.func @transform_0(%arg0: i32) -> (i32, i32, i32, i32) {
    %c0_i32 = arith.constant 0 : i32
    %c0_i32_0 = arith.constant 0 : i32
    %c0_i32_1 = arith.constant 0 : i32
    %c0_i32_2 = arith.constant 0 : i32
    return %arg0, %c0_i32, %c0_i32_0, %c0_i32_1 : i32, i32, i32, i32
  }
  func.func @transform_1(%arg0: i32) -> (i32, i32) {
    %c0_i32 = arith.constant 0 : i32
    %c0_i32_0 = arith.constant 0 : i32
    %c0_i32_1 = arith.constant 0 : i32
    return %c0_i32, %c0_i32_0 : i32, i32
  }
  func.func @transform_2(%arg0: i32) -> (i32, i32) {
    %c0_i32 = arith.constant 0 : i32
    %c0_i32_0 = arith.constant 0 : i32
    %c0_i32_1 = arith.constant 0 : i32
    return %c0_i32, %c0_i32_0 : i32, i32
  }
  func.func @transform_3(%arg0: i32) -> (i32, i32, i32) {
    %c0_i32 = arith.constant 0 : i32
    %c0_i32_0 = arith.constant 0 : i32
    %c0_i32_1 = arith.constant 0 : i32
    %c0_i32_2 = arith.constant 0 : i32
    return %c0_i32, %c0_i32_0, %c0_i32_1 : i32, i32, i32
  }
  func.func @transform_4(%arg0: i32) -> (i32, i32) {
    %c0_i32 = arith.constant 0 : i32
    %c0_i32_0 = arith.constant 0 : i32
    %c0_i32_1 = arith.constant 0 : i32
    return %c0_i32, %c0_i32_0 : i32, i32
  }
  func.func @transform_5(%arg0: i32) -> (i32, i32, i32, i32) {
    %c0_i32 = arith.constant 0 : i32
    %c0_i32_0 = arith.constant 0 : i32
    %c0_i32_1 = arith.constant 0 : i32
    %c0_i32_2 = arith.constant 0 : i32
    return %arg0, %c0_i32, %c0_i32_0, %c0_i32_1 : i32, i32, i32, i32
  }
}

</mosaic_0001>

<bundles_post_ra>
// kernel: tpu_custom_call.1
= control target key start
LH: loop header
LB: loop body
LE: loop exit
PB: predicated region body
PF: predicated region fallthrough
CT: control target
= control target key end

     0   :  { %s11364_s0 = inlined_call_operand.hbm [shape: bf16[2,16,16,32], index: 0, kind: input, shape index: {}]   ;;  %s11365_s1 = inlined_call_operand.vmem [shape: f32[1,32], index: 1, kind: input, shape index: {}]   ;;  %s11366_s2 = inlined_call_operand.hbm [shape: f32[1,32], index: 2, kind: input, shape index: {}]   ;;  %s11367_s3 = inlined_call_operand.hbm [shape: bf16[9,32,160], index: 3, kind: input, shape index: {}]   ;;  %s11368_s4 = inlined_call_operand.vmem [shape: f32[1,160], index: 4, kind: input, shape index: {}]   ;;  %s11369_s5 = inlined_call_operand.hbm [shape: bf16[2,16,16,160], index: 5, kind: output, shape index: {}]  }
   0x1   :  { %11374 = sst [smem:[#allocation15_spill]] %s11366_s2 }
   0x2   :  { %10 = vsyncpa [#allocation5], 0 }
   0x3   :  { %12 = vsyncpa [#allocation5 + $0x1], 0 }
   0x4   :  { %13 = vsyncpa [#allocation8], 0 }
   0x5   :  { %14 = vsyncpa [#allocation6], 0 }
   0x6   :  { %16 = vsyncpa [#allocation6 + $0x1], 0  ;;  %s9030_s18 = smov 0   ;;  %s9032_s19 = smov 0  }
   0x7   :  { %s9034_s20 = smov 0   ;;  %s9036_s21 = smov 0  }
   0x8 LB: > { %s9051_s22 = sadd.s32 4294967295, %s8987_s21   ;;  %s8056_s23 = sadd.s32 4294967294, %s8987_s21   ;;  %s8987_s21 = sphi %s9036_s21, %s11408_s21   ;;  %s8983_s20 = sphi %s9034_s20, %s11407_s20   ;;  %s8979_s19 = sphi %s9032_s19, %s11406_s19   ;;  %s8975_s18 = sphi %s9030_s18, %s11405_s18  }
   0x9   : > { %s9055_s24 = sadd.s32 1, %s8987_s21   ;;  %s29_s25 = sadd.s32 1, %s8983_s20 }
   0xa   : > { %s26_s26 = ssub.s32 %s8987_s21, %s9055_s24  ;;  %p36_p0 = scmp.ne.s32.totalorder %s8983_s20, %s8979_s19 }
   0xb   : > { %p27_p1 = scmp.eq.s32.totalorder %s26_s26, 0  ;;  %p37_p2 = scmp.eq.s32.totalorder %s8987_s21, 0 }
   0xc   : > { %p42_p3 = scmp.ne.s32.totalorder %s8979_s19, %s8975_s18  ;;  %p11370_p4 = scmp.eq.s32.totalorder %s9051_s22, 0 }
   0xd   : > { %s9067_s27 = scalar_select %p27_p1, %s8983_s20, %s29_s25  }
   0xe   : > { %p9069_p5 = por %p37_p2, %p36_p0  ;;  %p9075_p6 = por %p11370_p4, %p42_p3 }
   0xf   : > { %11375 = sst [smem:[#allocation14_spill]] %s9067_s27  ;;  %p150_p7 = scmp.eq.s32.totalorder %s9051_s22, 1 }
  0x10   : > { %s11377_s29 = scalar_select %p9075_p6, 1, 0 }
  0x11   : > { %p156_p8 = scmp.eq.s32.totalorder %s8056_s23, 1  ;;  %p8057_p9 = scmp.ge.s32.totalorder %s8987_s21, 1 }
  0x12   : > { %p163_p10 = scmp.lt.s32.totalorder %s8987_s21, 3  ;;  %p9082_p11 = por %p150_p7, %p36_p0 }
  0x13   : > { %p9086_p12 = por %p156_p8, %p42_p3  ;;  %s8989_s8 = smov [#allocation7]  }
  0x14   : > { %s11378_s30 = scalar_select %p9082_p11, 1, 0 }
  0x15   : > { %s11379_s6 = scalar_select %p9086_p12, 1, 0 }
  0x16   : > { %p9090_p13 = pnand %p8057_p9, %p163_p10  ;;  %s179_s9 = sshll.u32 %s8989_s8, 4  ;;  %s180_s9 = int_to_ptr.vmem [resolvable:$true] %s179_s9 }
  0x17   : > { %p8690_p4 = scmp.lt.s32.totalorder %s8987_s21, 2  ;;  %p11381_p0 = scmp.eq.s32.totalorder %s9051_s22, 0 }
  0x18   : > { %s11380_s7 = scalar_select %p9090_p13, 1, 0 }
  0x19   : > { %p8673_p2 = pneg %p9090_p13  ;;  %p9106_p3 = pnand %p8690_p4, %p9069_p5 }
  0x1a   : > { %s8990_s12 = smov [#allocation9]   ;;  %s8850_s14 = scalar_lea.vmem %s180_s9, 16 }
  0x1b   : > { %p9100_p7 = pnand %p8673_p2, %p11381_p0  ;;  %s189_s13 = sshll.u32 %s8990_s12, 4  ;;  %s190_s13 = int_to_ptr.vmem [resolvable:$true] %s189_s13 }
  0x1c   : > { %p8851_p9 = scmp.ne.s32.totalorder %s180_s9, %s8850_s14  ;;  %s8857_s15 = scalar_lea.vmem %s180_s9, 32 }
  0x1d   : > { %p8841_p8 = pneg %p9100_p7  ;;  %p8858_p0 = scmp.lt.s32.totalorder %s180_s9, %s180_s9 }
  0x1e   : > { %p8859_p1 = scmp.lt.s32.totalorder %s8857_s15, %s8850_s14 }
  0x1f   : > { %p8853_p10 = pnand %p8851_p9, %p8841_p8 }
  0x20   : > { %p8860_p12 = por %p8859_p1, %p8858_p0 }
  0x21   : > { %p8854_p2 = pneg %p8853_p10 }
  0x23   : > { %p8861_p11 = pnand %p8860_p12, %p8854_p2 }
  0x25   : > { %8864 = shalt.err (!%p8861_p11)
}
  0x26   : > { %s11384_s2 = sld [smem:[#allocation15_spill]]  ;;  %s206_s23 = sand.u32 1, %s8983_s20  }
  0x27   : > { %s8876_s25 = scalar_lea.vmem %s190_s13, 4608  ;;  %p8884_p10 = scmp.lt.s32.totalorder %s190_s13, %s190_s13 }
  0x28   : > { %p8877_p4 = scmp.ne.s32.totalorder %s190_s13, %s8876_s25  ;;  %p8885_p6 = scmp.lt.s32.totalorder %s8876_s25, %s8876_s25 }
  0x2a   : > { %p8879_p5 = pnand %p8877_p4, %p8841_p8  ;;  %p8886_p1 = por %p8885_p6, %p8884_p10 }
  0x2c   : > { %8676 = dma.hbm_to_vmem [thread:$0]  (!%p9100_p7), %s11384_s2, 16, %s180_s9, [#allocation8]  }
  0x2d   : > { %p8880_p9 = pneg %p8879_p5 }
  0x2f   : > { %p8887_p12 = pnand %p8886_p1, %p8880_p9 }
  0x31   : > { %8890 = shalt.err (!%p8887_p12)
}
  0x32   : > { %s8991_s26 = smov 128   ;;  %s8992_s28 = smov 8  }
  0x33   : > { %8679 = dma.hbm_to_vmem [thread:$0]  (!%p9100_p7), %s11367_s3, 4608, %s190_s13, [#allocation8], %s8991_s26, %s8991_s26, %s8992_s28  }
  0x34   : > { %s8061_s12 = sshll.u32 %s206_s23, 7  ;;  %s8512_s14 = sshll.u32 %s8987_s21, 11 }
  0x35   : > { %s9133_s17 = scalar_lea.hbm %s11364_s0, %s8512_s14  ;;  %s210_s25 = scalar_lea.vmem [#allocation4], %s8061_s12 }
  0x36   : > { %s217_s2 = sshll.u32 %s210_s25, 4  ;;  %s9137_s27 = scalar_lea.sflag [#allocation5], %s206_s23  ;;  %s9135_s2 = int_to_ptr.vmem [resolvable:$true] %s217_s2 }
  0x37   : > { %s8891_s10 = scalar_lea.hbm %s9133_s17, 2048  ;;  %p8893_p11 = pneg %p9106_p3 }
  0x38   : > { %p8892_p6 = scmp.ne.s32.totalorder %s9133_s17, %s8891_s10  ;;  %s8896_s28 = scalar_lea.hbm %s11364_s0, 4096 }
  0x39   : > { %p8897_p2 = scmp.lt.s32.totalorder %s9133_s17, %s11364_s0  ;;  %p8898_p0 = scmp.lt.s32.totalorder %s8896_s28, %s8891_s10 }
  0x3a   : > { %p8894_p7 = pnand %p8893_p11, %p8892_p6 }
  0x3b   : > { %p8899_p4 = por %p8898_p0, %p8897_p2 }
  0x3c   : > { %p8895_p8 = pneg %p8894_p7 }
  0x3e   : > { %p8900_p5 = pnand %p8899_p4, %p8895_p8 }
  0x40   : > { %8903 = shalt.err (!%p8900_p5)
}
  0x41   : > { %s8904_s23 = scalar_lea.vmem %s9135_s2, 2048  ;;  %s8993_s12 = smov [#allocation4]  }
  0x42   : > { %p8905_p9 = scmp.ne.s32.totalorder %s9135_s2, %s8904_s23  ;;  %s8909_s14 = sshll.u32 %s8993_s12, 4  ;;  %s8910_s14 = int_to_ptr.vmem [resolvable:$false] %s8909_s14 }
  0x43   : > { %s8911_s15 = scalar_lea.vmem %s8910_s14, 4096  ;;  %p8912_p12 = scmp.lt.s32.totalorder %s9135_s2, %s8910_s14 }
  0x44   : > { %p8907_p10 = pnand %p8905_p9, %p8893_p11  ;;  %p8913_p6 = scmp.lt.s32.totalorder %s8911_s15, %s8904_s23 }
  0x46   : > { %p8908_p1 = pneg %p8907_p10  ;;  %p8914_p7 = por %p8913_p6, %p8912_p12 }
  0x48   : > { %p8915_p13 = pnand %p8914_p7, %p8908_p1 }
  0x4a   : > { %8918 = shalt.err (!%p8915_p13)
}
  0x4b   : > { %s8994_s16 = smov 64   ;;  %s8995_s25 = smov 4  }
  0x4c   : > { %8683 = dma.hbm_to_vmem [thread:$0]  (!%p9106_p3), %s9133_s17, 2048, %s9135_s2, %s9137_s27, %s8994_s16, %s8994_s16, %s8995_s25  }
  0x4d   : > { %p11385_p11 = scmp.ne.s32.totalorder %s11380_s7, 0 }
  0x4e   : > { %s9161_s10 = sand.u32 (!%p11385_p11), 1, %s8979_s19   ;;  %p11386_p13 = scmp.ne.s32.totalorder (!%p11385_p11), %s11377_s29, 0 }
  0x4f   : > { %229 = sbr.rel (%p11385_p11) target bundleno = 940 (0x3ac), region = 40  ;;  %s8065_s13 = sshll.u32 (!%p11385_p11), %s9161_s10, 7 }
  0x50   : > { %s232_s26 = scalar_lea.sflag (!%p11385_p11), [#allocation5], %s9161_s10  ;;  %s9165_s28 = scalar_lea.vmem (!%p11385_p11), [#allocation4], %s8065_s13 }
  0x54   : > { %8962 = dma.done.wait (%p11386_p13), %s232_s26, 2048  }
  0x55   : > { %8964 = vsyncadd (%p11386_p13), %s232_s26, 4294965248  ;;  %p11387_p3 = scmp.eq.s32.totalorder %s9051_s22, 0 }
  0x57   : > { %8966 = dma.done.wait (%p11387_p3), [#allocation8], 4624   ;;  %p11388_p8 = pmov %p11387_p3 }
  0x58   : > { %vm461_vm0 = vcmask 257024   ;;  %vm464_vm1 = vcmask 253952   ;;  %v8996_v0 = vmov 0   ;;  %vm597_vm2 = vsmask.f32 256  ;;  %v8648_v7 = vld [vmem:[%s9165_s28 + $0x38] sm:$0xff]  }
  0x59   : > { %8968 = vsyncadd (%p11388_p8), [#allocation8], 4294962672  ;;  %1335 = vmatprep.mubr.bf16.mxu1 %v8996_v0  ;;  %487 = vst.msk [vmem:[#allocation2 + $0x60] sm:$0xf] %vm461_vm0, %v8996_v0  ;;  %1255 = vmatprep.mubr.bf16.mxu0 %v8996_v0  ;;  %v8735_v2 = vld [vmem:[#allocation9 + $0x14] ss:$8 sps:$4 sm:$0xff]   ;;  %v8608_v9 = vunpack.c.l.bf16 %v8648_v7  ;;  %v8609_v10 = vunpack.c.h.bf16 %v8648_v7 }
  0x5a   : > { %488 = vst.msk [vmem:[#allocation2 + $0x64] sm:$0xf] %vm461_vm0, %v8996_v0  ;;  %462 = vst.msk [vmem:[#allocation2] sm:$0xf] %vm461_vm0, %v8996_v0  ;;  %v8737_v3 = vld [vmem:[#allocation9 + $0x10] ss:$8 sps:$4 sm:$0xff]   ;;  %8657 = vmatprep.subr.bf16.mxu1 %v8735_v2  ;;  %1235 = vmatprep.subr.bf16.mxu0 %v8735_v2 }
  0x5b   : > { %463 = vst.msk [vmem:[#allocation2 + $0x4] sm:$0xf] %vm461_vm0, %v8996_v0  ;;  %466 = vst.msk [vmem:[#allocation2 + $0xc] sm:$0xf] %vm461_vm0, %v8996_v0  ;;  %v8738_v4 = vld [vmem:[#allocation9 + $0x4] ss:$8 sps:$4 sm:$0xff]   ;;  %8659 = vmatpush1.bf16.msra.mxu1 %v8737_v3  ;;  %1236 = vmatpush1.bf16.msra.mxu0 %v8737_v3 }
  0x5c   : > { %465 = vst.msk [vmem:[#allocation2 + $0x8] sm:$0x1] %vm464_vm1, %v8996_v0  ;;  %468 = vst.msk [vmem:[#allocation2 + $0x14] sm:$0x1] %vm464_vm1, %v8996_v0  ;;  %v8740_v5 = vld [vmem:[#allocation9] ss:$8 sps:$4 sm:$0xff]   ;;  %8658 = vmatprep.subr.bf16.mxu1 %v8738_v4  ;;  %1237 = vmatprep.subr.bf16.mxu0 %v8738_v4 }
  0x5d   : > { %467 = vst.msk [vmem:[#allocation2 + $0x10] sm:$0xf] %vm461_vm0, %v8996_v0  ;;  %469 = vst.msk [vmem:[#allocation2 + $0x18] sm:$0xf] %vm461_vm0, %v8996_v0  ;;  %v8743_v6 = vld [vmem:[#allocation9 + $0x34] ss:$8 sps:$4 sm:$0xff]  }
  0x5e   : > { %470 = vst.msk [vmem:[#allocation2 + $0x1c] sm:$0xf] %vm461_vm0, %v8996_v0  ;;  %472 = vst.msk [vmem:[#allocation2 + $0x24] sm:$0xf] %vm461_vm0, %v8996_v0  ;;  %v9295_v8 = vld [vmem:[%s11365_s1] ss:$0 sm:$0xff] }
  0x5f   : > { %471 = vst.msk [vmem:[#allocation2 + $0x20] sm:$0x1] %vm464_vm1, %v8996_v0  ;;  %474 = vst.msk [vmem:[#allocation2 + $0x2c] sm:$0x1] %vm464_vm1, %v8996_v0  ;;  %v9297_v11 = vld [vmem:[#allocation7] ss:$0 sm:$0xff]  ;;  %8660 = vmatpush1.bf16.msra.mxu1 %v8740_v5  ;;  %v357_v14 = vmul.f32 %v8608_v9, %v9295_v8  ;;  %v358_v15 = vmul.f32 %v8609_v10, %v9295_v8  ;;  %1238 = vmatpush1.bf16.msra.mxu0 %v8740_v5 }
  0x60   : > { %473 = vst.msk [vmem:[#allocation2 + $0x28] sm:$0xf] %vm461_vm0, %v8996_v0  ;;  %475 = vst.msk [vmem:[#allocation2 + $0x30] sm:$0xf] %vm461_vm0, %v8996_v0  ;;  %vm598_vm4 = vsmask.f32 4368  ;;  %2048 = vmatprep.subr.bf16.mxu1 %v8743_v6 }
  0x61   : > { %476 = vst.msk [vmem:[#allocation2 + $0x34] sm:$0xf] %vm461_vm0, %v8996_v0  ;;  %478 = vst.msk [vmem:[#allocation2 + $0x3c] sm:$0xf] %vm461_vm0, %v8996_v0  ;;  %v8649_v13 = vld [vmem:[%s9165_s28 + $0x40] sm:$0xff]   ;;  %vm1174_vm6 = vcmask 261120   ;;  %v395_v21 = vadd.f32 %v9297_v11, %v357_v14  ;;  %v396_v22 = vadd.f32 %v9297_v11, %v358_v15 }
  0x62   : > { %477 = vst.msk [vmem:[#allocation2 + $0x38] sm:$0x1] %vm464_vm1, %v8996_v0  ;;  %480 = vst.msk [vmem:[#allocation2 + $0x44] sm:$0x1] %vm464_vm1, %v8996_v0  ;;  %v8745_v12 = vld [vmem:[#allocation2] sm:$0xff]   ;;  %v8612_v16 = vunpack.c.l.bf16 %v8649_v13  ;;  %v8613_v17 = vunpack.c.h.bf16 %v8649_v13  ;;  %v8579_v20 = vld [vmem:[%s9165_s28] sm:$0xff]  }
  0x63   : > { %479 = vst.msk [vmem:[#allocation2 + $0x40] sm:$0xf] %vm461_vm0, %v8996_v0  ;;  %481 = vst.msk [vmem:[#allocation2 + $0x48] sm:$0xf] %vm461_vm0, %v8996_v0  ;;  %v8747_v18 = vld [vmem:[#allocation9 + $0x50] ss:$8 sps:$4 sm:$0xff]   ;;  %8123 = vmatmul.mubr.msk.bf16.vlgmr.msra.gmra.mxu0 %vm1174_vm6, %v8745_v12  ;;  %v8580_v26 = vunpack.c.l.bf16 %v8579_v20  ;;  %v8581_v27 = vunpack.c.h.bf16 %v8579_v20 }
  0x64   : > { %482 = vst.msk [vmem:[#allocation2 + $0x4c] sm:$0xf] %vm461_vm0, %v8996_v0  ;;  %484 = vst.msk [vmem:[#allocation2 + $0x54] sm:$0xf] %vm461_vm0, %v8996_v0  ;;  %vm922_vm5 = vsmask.f32 7938  ;;  %v359_v23 = vmul.f32 %v8612_v16, %v9295_v8  ;;  %v360_v24 = vmul.f32 %v8613_v17, %v9295_v8  ;;  %1265 = vmatprep.mubr.bf16.mxu0 %v8996_v0 }
  0x65   : > { %483 = vst.msk [vmem:[#allocation2 + $0x50] sm:$0x1] %vm464_vm1, %v8996_v0  ;;  %486 = vst.msk [vmem:[#allocation2 + $0x5c] sm:$0x1] %vm464_vm1, %v8996_v0  ;;  %v8749_v19 = vld [vmem:[#allocation9 + $0x54] ss:$8 sps:$4 sm:$0xff]   ;;  %v343_v34 = vmul.f32 %v8580_v26, %v9295_v8  ;;  %v344_v35 = vmul.f32 %v8581_v27, %v9295_v8 }
  0x66   : > { %485 = vst.msk [vmem:[#allocation2 + $0x58] sm:$0xf] %vm461_vm0, %v8996_v0  ;;  %490 = vst.msk [vmem:[#allocation2 + $0x6c] sm:$0xf] %vm461_vm0, %v8996_v0  ;;  %v8650_v25 = vld [vmem:[%s9165_s28 + $0x48] sm:$0xff]   ;;  %2765 = vmatprep.subr.bf16.mxu0 %v8749_v19  ;;  %v427_v30 = vmax.f32 %v395_v21, 0.0  ;;  %v397_v32 = vadd.f32 %v9297_v11, %v359_v23  ;;  %v398_v33 = vadd.f32 %v9297_v11, %v360_v24 }
  0x67   : > { %489 = vst.msk [vmem:[#allocation2 + $0x68] sm:$0x1] %vm464_vm1, %v8996_v0  ;;  %492 = vst.msk [vmem:[#allocation2 + $0x74] sm:$0x1] %vm464_vm1, %v8996_v0  ;;  %v8616_v28 = vunpack.c.l.bf16 %v8650_v25  ;;  %v8617_v29 = vunpack.c.h.bf16 %v8650_v25  ;;  %v428_v31 = vmax.f32 %v396_v22, 0.0  ;;  %2766 = vmatpush1.bf16.msra.mxu0 %v8747_v18  ;;  %v381_v42 = vadd.f32 %v9297_v11, %v343_v34  ;;  %v8642_v26 = vld [vmem:[%s9165_s28 + $0x8] sm:$0xff]  }
  0x68   : > { %491 = vst.msk [vmem:[#allocation2 + $0x70] sm:$0xf] %vm461_vm0, %v8996_v0  ;;  %493 = vst.msk [vmem:[#allocation2 + $0x78] sm:$0xf] %vm461_vm0, %v8996_v0  ;;  %v8527_v38 = vpack.c.bf16 %v427_v30, %v427_v30  ;;  %v429_v40 = vmax.f32 %v397_v32, 0.0  ;;  %v430_v41 = vmax.f32 %v398_v33, 0.0  ;;  %v382_v43 = vadd.f32 %v9297_v11, %v344_v35 }
  0x69   : > { %494 = vst.msk [vmem:[#allocation2 + $0x7c] sm:$0xf] %vm461_vm0, %v8996_v0  ;;  %496 = vst.msk [vmem:[#allocation2 + $0x84] sm:$0xf] %vm461_vm0, %v8996_v0  ;;  %v361_v36 = vmul.f32 %v8616_v28, %v9295_v8  ;;  %v362_v37 = vmul.f32 %v8617_v29, %v9295_v8  ;;  %v8528_v39 = vpack.c.bf16 %v428_v31, %v428_v31  ;;  %v413_v52 = vmax.f32 %v381_v42, 0.0  ;;  %v8651_v31 = vld [vmem:[%s9165_s28 + $0x50] sm:$0xff]  }
  0x6a   : > { %495 = vst.msk [vmem:[#allocation2 + $0x80] sm:$0x1] %vm464_vm1, %v8996_v0  ;;  %498 = vst.msk [vmem:[#allocation2 + $0x8c] sm:$0x1] %vm464_vm1, %v8996_v0  ;;  %v720_v46 = vshrl.u32 %v8527_v38, 16  ;;  %v723_v47 = vshll.u32 %v8527_v38, 16  ;;  %v8529_v50 = vpack.c.bf16 %v429_v40, %v429_v40  ;;  %v8530_v51 = vpack.c.bf16 %v430_v41, %v430_v41 }
  0x6b   : > { %497 = vst.msk [vmem:[#allocation2 + $0x88] sm:$0xf] %vm461_vm0, %v8996_v0  ;;  %499 = vst.msk [vmem:[#allocation2 + $0x90] sm:$0xf] %vm461_vm0, %v8996_v0  ;;  %v399_v44 = vadd.f32 %v9297_v11, %v361_v36  ;;  %v400_v45 = vadd.f32 %v9297_v11, %v362_v37  ;;  %v728_v48 = vshrl.u32 %v8528_v39, 16  ;;  %v731_v49 = vshll.u32 %v8528_v39, 16 }
  0x6c   : > { %500 = vst.msk [vmem:[#allocation2 + $0x94] sm:$0xf] %vm461_vm0, %v8996_v0  ;;  %502 = vst.msk [vmem:[#allocation2 + $0x9c] sm:$0xf] %vm461_vm0, %v8996_v0  ;;  %v414_v53 = vmax.f32 %v382_v43, 0.0  ;;  %v722_v57 = vrot.slane %v720_v46, 7  ;;  %v8513_v12 = vpack.c.bf16 %v413_v52, %v413_v52  ;;  %v8584_v39 = vunpack.c.l.bf16 %v8642_v26 }
  0x6d   : > { %501 = vst.msk [vmem:[#allocation2 + $0x98] sm:$0x1] %vm464_vm1, %v8996_v0  ;;  %504 = vst.msk [vmem:[#allocation2 + $0xa4] sm:$0x1] %vm464_vm1, %v8996_v0  ;;  %v8761_v54 = vld [vmem:[#allocation9 + $0x40] ss:$8 sps:$4 sm:$0xff]   ;;  %v8585_v40 = vunpack.c.h.bf16 %v8642_v26 }
  0x6e   : > { %503 = vst.msk [vmem:[#allocation2 + $0xa0] sm:$0xf] %vm461_vm0, %v8996_v0  ;;  %505 = vst.msk [vmem:[#allocation2 + $0xa8] sm:$0xf] %vm461_vm0, %v8996_v0  ;;  %v8763_v55 = vld [vmem:[#allocation9 + $0x44] ss:$8 sps:$4 sm:$0xff]   ;;  %v725_v5 = vor.u32 %v723_v47, %v722_v57  ;;  %v8514_v13 = vpack.c.bf16 %v414_v53, %v414_v53 }
  0x6f   : > { %506 = vst.msk [vmem:[#allocation2 + $0xac] sm:$0xf] %vm461_vm0, %v8996_v0  ;;  %508 = vst.msk [vmem:[#allocation2 + $0xb4] sm:$0xf] %vm461_vm0, %v8996_v0  ;;  %v9326_v58 = vrot.slane %v728_v48, 7  ;;  %v431_v59 = vmax.f32 %v399_v44, 0.0  ;;  %2767 = vmatprep.subr.bf16.mxu0 %v8763_v55 }
  0x70   : > { %507 = vst.msk [vmem:[#allocation2 + $0xb0] sm:$0x1] %vm464_vm1, %v8996_v0  ;;  %510 = vst.msk [vmem:[#allocation2 + $0xbc] sm:$0x1] %vm464_vm1, %v8996_v0  ;;  %v432_v60 = vmax.f32 %v400_v45, 0.0  ;;  %v737_v63 = vshrl.u32 %v8529_v50, 16  ;;  %2768 = vmatpush1.bf16.msra.mxu0 %v8761_v54  ;;  %v8620_v45 = vunpack.c.l.bf16 %v8651_v31 }
  0x71   : > { %509 = vst.msk [vmem:[#allocation2 + $0xb8] sm:$0xf] %vm461_vm0, %v8996_v0  ;;  %511 = vst.msk [vmem:[#allocation2 + $0xc0] sm:$0xf] %vm461_vm0, %v8996_v0  ;;  %v975_v62 = vld [vmem:[#allocation2 + $0x60] sm:$0xf]  ;;  %v733_v7 = vor.u32 %v731_v49, %v9326_v58  ;;  %v8531_v17 = vpack.c.bf16 %v431_v59, %v431_v59  ;;  %v346_v59 = vmul.f32 %v8585_v40, %v9295_v8 }
  0x72   : > { %512 = vst.msk [vmem:[#allocation2 + $0xc4] sm:$0xf] %vm461_vm0, %v8996_v0  ;;  %514 = vst.msk [vmem:[#allocation2 + $0xcc] sm:$0xf] %vm461_vm0, %v8996_v0  ;;  %v740_v2 = vshll.u32 %v8529_v50, 16  ;;  %v745_v3 = vshrl.u32 %v8530_v51, 16  ;;  %v8532_v18 = vpack.c.bf16 %v432_v60, %v432_v60  ;;  %v345_v50 = vmul.f32 %v8584_v39, %v9295_v8 }
  0x73   : > { %513 = vst.msk [vmem:[#allocation2 + $0xc8] sm:$0x1] %vm464_vm1, %v8996_v0  ;;  %516 = vst.msk [vmem:[#allocation2 + $0xd4] sm:$0x1] %vm464_vm1, %v8996_v0  ;;  %v748_v4 = vshll.u32 %v8530_v51, 16  ;;  %v726_v6 = vrot.slane %v722_v57, 4  ;;  %v8621_v60 = vunpack.c.h.bf16 %v8651_v31 }
  0x74   : > { %515 = vst.msk [vmem:[#allocation2 + $0xd0] sm:$0xf] %vm461_vm0, %v8996_v0  ;;  %vm9287_vm3 = vmand %vm464_vm1, %vm597_vm2  ;;  %v739_v9 = vrot.slane %v737_v63, 7  ;;  %v9335_v10 = vrot.slane %v745_v3, 7  ;;  %v982_v16 = vld [vmem:[#allocation2 + $0x6c] sm:$0xf]  ;;  %v384_v3 = vadd.f32 %v9297_v11, %v346_v59 }
  0x75   : > { %vm9322_vm7 = vmor %vm597_vm2, %vm598_vm4  ;;  %v601_v22 = vshrl.u32 %v8513_v12, 16  ;;  %v604_v23 = vshll.u32 %v8513_v12, 16  ;;  %v609_v24 = vshrl.u32 %v8514_v13, 16  ;;  %v612_v25 = vshll.u32 %v8514_v13, 16  ;;  %v8741_v35 = vld [vmem:[#allocation9 + $0x30] ss:$8 sps:$4 sm:$0xff]  }
  0x76   : > { %vm9330_vm8 = vmand %vm461_vm0, %vm922_vm5  ;;  %v734_v14 = vsel %vm9322_vm7, %v726_v6, %v733_v7  ;;  %v742_v19 = vor.u32 %v740_v2, %v739_v9  ;;  %v743_v20 = vrot.slane %v739_v9, 4  ;;  %v750_v21 = vor.u32 %v748_v4, %v9335_v10  ;;  %v924_v36 = vld [vmem:[#allocation2 + $0xc] sm:$0xf]  ;;  %v989_v44 = vld [vmem:[#allocation2 + $0x78] sm:$0xf]  ;;  %s8068_s8 = sshll.u32 %s9161_s10, 8 }
  0x77   : > { %v976_v15 = vsel %vm9330_vm8, %v725_v5, %v975_v62  ;;  %978 = vst.msk [vmem:[#allocation2 + $0x64] sm:$0xf] %vm461_vm0, %v734_v14  ;;  %v754_v29 = vshrl.u32 %v8531_v17, 16  ;;  %v757_v30 = vshll.u32 %v8531_v17, 16  ;;  %v603_v32 = vrot.slane %v601_v22, 7  ;;  %v8643_v51 = vld [vmem:[%s9165_s28 + $0x10] sm:$0xff]  }
  0x78   : > { %977 = vst [vmem:[#allocation2 + $0x60] sm:$0xf] %v976_v15  ;;  %v751_v27 = vsel %vm9322_vm7, %v743_v20, %v750_v21  ;;  %v983_v28 = vsel %vm9330_vm8, %v742_v19, %v982_v16  ;;  %v9350_v33 = vrot.slane %v609_v24, 7  ;;  %v762_v34 = vshrl.u32 %v8532_v18, 16  ;;  %v8757_v46 = vld [vmem:[#allocation9 + $0x24] ss:$8 sps:$4 sm:$0xff]  }
  0x79   : > { %984 = vst [vmem:[#allocation2 + $0x6c] sm:$0xf] %v983_v28  ;;  %985 = vst.msk [vmem:[#allocation2 + $0x70] sm:$0xf] %vm461_vm0, %v751_v27  ;;  %v756_v37 = vrot.slane %v754_v29, 7  ;;  %v765_v38 = vshll.u32 %v8532_v18, 16  ;;  %v606_v41 = vor.u32 %v604_v23, %v603_v32  ;;  %v383_v2 = vadd.f32 %v9297_v11, %v345_v50 }
  0x7a   : > { %v607_v42 = vrot.slane %v603_v32, 4  ;;  %v614_v43 = vor.u32 %v612_v25, %v9350_v33  ;;  %v9353_v49 = vrot.slane %v762_v34, 7  ;;  %v8652_v52 = vld [vmem:[%s9165_s28 + $0x58] sm:$0xff]   ;;  %v363_v4 = vmul.f32 %v8620_v45, %v9295_v8  ;;  %v8755_v7 = vld [vmem:[#allocation9 + $0x20] ss:$8 sps:$4 sm:$0xff]   ;;  %s11002_s9 = scalar_lea.vmem [#allocation10], %s8068_s8 }
  0x7b   : > { %v759_v47 = vor.u32 %v757_v30, %v756_v37  ;;  %v760_v48 = vrot.slane %v756_v37, 4  ;;  %v8774_v53 = vld [vmem:[#allocation9 + $0x94] ss:$8 sps:$4 sm:$0xff]   ;;  %v925_v57 = vsel %vm9330_vm8, %v606_v41, %v924_v36  ;;  %v364_v5 = vmul.f32 %v8621_v60, %v9295_v8  ;;  %v996_v59 = vld [vmem:[#allocation2 + $0x84] sm:$0xf]  ;;  %s8577_s23 = sshll.u32 %s9051_s22, 12 }
  0x7c   : > { %v615_v55 = vsel %vm9322_vm7, %v607_v42, %v614_v43  ;;  %926 = vst [vmem:[#allocation2 + $0xc] sm:$0xf] %v925_v57  ;;  %v767_v62 = vor.u32 %v765_v38, %v9353_v49  ;;  %4273 = vmatprep.subr.bf16.mxu0 %v8774_v53  ;;  %v8588_v6 = vunpack.c.l.bf16 %v8643_v51  ;;  %v415_v12 = vmax.f32 %v383_v2, 0.0  ;;  %v8771_v19 = vld [vmem:[#allocation9 + $0x74] ss:$8 sps:$4 sm:$0xff]   ;;  %s7964_s12 = sshll.u32 %s11002_s9, 4  ;;  %s11316_s16 = scalar_lea.hbm %s11369_s5, %s8577_s23  ;;  %s11318_s12 = int_to_ptr.vmem [resolvable:$true] %s7964_s12 }
  0x7d   : > { %927 = vst.msk [vmem:[#allocation2 + $0x10] sm:$0xf] %vm461_vm0, %v615_v55  ;;  %v990_v63 = vsel %vm9330_vm8, %v759_v47, %v989_v44  ;;  %v8589_v13 = vunpack.c.h.bf16 %v8643_v51  ;;  %v8624_v14 = vunpack.c.l.bf16 %v8652_v52  ;;  %v416_v15 = vmax.f32 %v384_v3, 0.0  ;;  %v933_v43 = vld [vmem:[#allocation2 + $0x18] sm:$0xf]  ;;  %s7951_s22 = scalar_lea.sflag [#allocation6], %s9161_s10 }
  0x7e   : > { %991 = vst [vmem:[#allocation2 + $0x78] sm:$0xf] %v990_v63  ;;  %v768_v9 = vsel %vm9322_vm7, %v760_v48, %v767_v62  ;;  %v401_v16 = vadd.f32 %v9297_v11, %v363_v4  ;;  %v402_v17 = vadd.f32 %v9297_v11, %v364_v5  ;;  %v347_v18 = vmul.f32 %v8588_v6, %v9295_v8  ;;  %s8919_s25 = scalar_lea.vmem %s11318_s12, 4096  ;;  %p11401_p0 = scmp.ne.s32.totalorder %s11378_s30, 0 }
  0x7f   : > { %v8744_v54 = vld [vmem:[#allocation2 + $0x60] sm:$0xff]   ;;  %992 = vst.msk [vmem:[#allocation2 + $0x7c] sm:$0xf] %vm461_vm0, %v768_v9  ;;  %v8515_v21 = vpack.c.bf16 %v415_v12, %v415_v12  ;;  %v348_v22 = vmul.f32 %v8589_v13, %v9295_v8  ;;  %v8625_v23 = vunpack.c.h.bf16 %v8652_v52  ;;  %v8516_v24 = vpack.c.bf16 %v416_v15, %v416_v15  ;;  %p8920_p2 = scmp.ne.s32.totalorder %s11318_s12, %s8919_s25  ;;  %s8997_s13 = smov [#allocation10]  }
  0x80   : > { %8131 = vmatmul.mubr.msk.bf16.vlgmr.msra.gmra.mxu1 %vm1174_vm6, %v8744_v54  ;;  %v8746_v20 = vld [vmem:[#allocation2 + $0x6c] sm:$0xff]   ;;  %v433_v25 = vmax.f32 %v401_v16, 0.0  ;;  %v434_v26 = vmax.f32 %v402_v17, 0.0  ;;  %v385_v27 = vadd.f32 %v9297_v11, %v347_v18  ;;  %v365_v31 = vmul.f32 %v8624_v14, %v9295_v8  ;;  %v8653_v14 = vld [vmem:[%s9165_s28 + $0x60] sm:$0xff]   ;;  %v940_v17 = vld [vmem:[#allocation2 + $0x24] sm:$0xf] }
  0x81   : > { %2049 = vmatpush1.bf16.msra.mxu1 %v8741_v35  ;;  %1345 = vmatprep.mubr.bf16.mxu1 %v8996_v0  ;;  %v618_v28 = vshrl.u32 %v8515_v21, 16  ;;  %v621_v29 = vshll.u32 %v8515_v21, 16  ;;  %v386_v30 = vadd.f32 %v9297_v11, %v348_v22  ;;  %v626_v34 = vshrl.u32 %v8516_v24, 16  ;;  %p8921_p4 = pnand %p8920_p2, %p11401_p0  ;;  %s8923_s26 = sshll.u32 %s8997_s13, 4  ;;  %s8924_s26 = int_to_ptr.vmem [resolvable:$false] %s8923_s26 }
  0x82   : > { %2050 = vmatprep.subr.bf16.mxu1 %v8757_v46  ;;  %v8533_v35 = vpack.c.bf16 %v433_v25, %v433_v25  ;;  %v8534_v36 = vpack.c.bf16 %v434_v26, %v434_v26  ;;  %v366_v37 = vmul.f32 %v8625_v23, %v9295_v8  ;;  %v629_v39 = vshll.u32 %v8516_v24, 16  ;;  %p8926_p9 = scmp.lt.s32.totalorder %s11318_s12, %s8924_s26 }
  0x83   : > { %v620_v38 = vrot.slane %v618_v28, 7  ;;  %v417_v40 = vmax.f32 %v385_v27, 0.0  ;;  %v418_v41 = vmax.f32 %v386_v30, 0.0  ;;  %v9386_v42 = vrot.slane %v626_v34, 7  ;;  %p8922_p5 = pneg %p8921_p4 }
  0x84   : > { %v8750_v32 = vld [vmem:[#allocation2 + $0xc] sm:$0xff]   ;;  %v771_v44 = vshrl.u32 %v8533_v35, 16  ;;  %v774_v45 = vshll.u32 %v8533_v35, 16  ;;  %v779_v46 = vshrl.u32 %v8534_v36, 16  ;;  %v782_v50 = vshll.u32 %v8534_v36, 16  ;;  %v8645_v36 = vld [vmem:[%s9165_s28 + $0x20] sm:$0xff]  }
  0x85   : > { %2051 = vmatpush1.bf16.msra.mxu1 %v8755_v7  ;;  %8124 = vmatmul.mubr.msk.bf16.gmra.mxu0 %vm1174_vm6, %v8750_v32  ;;  %v623_v47 = vor.u32 %v621_v29, %v620_v38  ;;  %v624_v48 = vrot.slane %v620_v38, 4  ;;  %v8517_v51 = vpack.c.bf16 %v417_v40, %v417_v40  ;;  %v631_v52 = vor.u32 %v629_v39, %v9386_v42  ;;  %v8644_v7 = vld [vmem:[%s9165_s28 + $0x18] sm:$0xff]  }
  0x86   : > { %3335 = vmatprep.subr.bf16.mxu1 %v8771_v19  ;;  %1275 = vmatprep.mubr.bf16.mxu0 %v8996_v0  ;;  %v773_v53 = vrot.slane %v771_v44, 7  ;;  %v9391_v54 = vrot.slane %v779_v46, 7  ;;  %v403_v55 = vadd.f32 %v9297_v11, %v365_v31  ;;  %v8518_v60 = vpack.c.bf16 %v418_v41, %v418_v41  ;;  %v8751_v2 = vld [vmem:[#allocation2 + $0x78] sm:$0xff]  }
  0x87   : > { %v934_v57 = vsel %vm9330_vm8, %v623_v47, %v933_v43  ;;  %v635_v62 = vshrl.u32 %v8517_v51, 16  ;;  %v638_v63 = vshll.u32 %v8517_v51, 16  ;;  %v632_v3 = vsel %vm9322_vm7, %v624_v48, %v631_v52  ;;  %v1003_v47 = vld [vmem:[#allocation2 + $0x90] sm:$0xf] }
  0x88   : > { %8132 = vmatmul.mubr.msk.bf16.gmra.mxu1 %vm1174_vm6, %v8746_v20  ;;  %935 = vst [vmem:[#allocation2 + $0x18] sm:$0xf] %v934_v57  ;;  %v776_v4 = vor.u32 %v774_v45, %v773_v53  ;;  %v777_v5 = vrot.slane %v773_v53, 4  ;;  %v784_v6 = vor.u32 %v782_v50, %v9391_v54  ;;  %936 = vst.msk [vmem:[#allocation2 + $0x1c] sm:$0xf] %vm461_vm0, %v632_v3  ;;  %v643_v12 = vshrl.u32 %v8518_v60, 16 }
  0x89   : > { %1355 = vmatprep.mubr.bf16.mxu1 %v8996_v0  ;;  %v637_v9 = vrot.slane %v635_v62, 7  ;;  %v646_v13 = vshll.u32 %v8518_v60, 16  ;;  %v404_v18 = vadd.f32 %v9297_v11, %v366_v37  ;;  %v435_v19 = vmax.f32 %v403_v55, 0.0 }
  0x8a   : > { %v785_v15 = vsel %vm9322_vm7, %v777_v5, %v784_v6  ;;  %v997_v16 = vsel %vm9330_vm8, %v776_v4, %v996_v59  ;;  %v9408_v22 = vrot.slane %v643_v12, 7  ;;  %v8592_v23 = vunpack.c.l.bf16 %v8644_v7 }
  0x8b   : > { %998 = vst [vmem:[#allocation2 + $0x84] sm:$0xf] %v997_v16  ;;  %999 = vst.msk [vmem:[#allocation2 + $0x88] sm:$0xf] %vm461_vm0, %v785_v15  ;;  %v640_v20 = vor.u32 %v638_v63, %v637_v9  ;;  %v641_v21 = vrot.slane %v637_v9, 4  ;;  %v436_v24 = vmax.f32 %v404_v18, 0.0  ;;  %v8535_v25 = vpack.c.bf16 %v435_v19, %v435_v19 }
  0x8c   : > { %v8593_v26 = vunpack.c.h.bf16 %v8644_v7  ;;  %v8628_v27 = vunpack.c.l.bf16 %v8653_v14  ;;  %v648_v28 = vor.u32 %v646_v13, %v9408_v22  ;;  %v349_v30 = vmul.f32 %v8592_v23, %v9295_v8  ;;  %v947_v23 = vld [vmem:[#allocation2 + $0x30] sm:$0xf] }
  0x8d   : > { %v941_v29 = vsel %vm9330_vm8, %v640_v20, %v940_v17  ;;  %v8536_v31 = vpack.c.bf16 %v436_v24, %v436_v24  ;;  %v788_v32 = vshrl.u32 %v8535_v25, 16  ;;  %v791_v34 = vshll.u32 %v8535_v25, 16 }
  0x8e   : > { %942 = vst [vmem:[#allocation2 + $0x24] sm:$0xf] %v941_v29  ;;  %v350_v35 = vmul.f32 %v8593_v26, %v9295_v8  ;;  %v649_v37 = vsel %vm9322_vm7, %v641_v21, %v648_v28  ;;  %v387_v38 = vadd.f32 %v9297_v11, %v349_v30  ;;  %v8629_v39 = vunpack.c.h.bf16 %v8653_v14  ;;  %v8654_v28 = vld [vmem:[%s9165_s28 + $0x68] sm:$0xff]  }
  0x8f   : > { %v367_v40 = vmul.f32 %v8628_v27, %v9295_v8  ;;  %v8752_v41 = vld [vmem:[#allocation2 + $0x18] sm:$0xff]   ;;  %943 = vst.msk [vmem:[#allocation2 + $0x28] sm:$0xf] %vm461_vm0, %v649_v37  ;;  %v790_v43 = vrot.slane %v788_v32, 7  ;;  %v796_v44 = vshrl.u32 %v8536_v31, 16  ;;  %v799_v45 = vshll.u32 %v8536_v31, 16 }
  0x90   : > { %8133 = vmatmul.mubr.msk.bf16.gmra.mxu1 %vm1174_vm6, %v8751_v2  ;;  %v388_v46 = vadd.f32 %v9297_v11, %v350_v35  ;;  %v419_v48 = vmax.f32 %v387_v38, 0.0  ;;  %v368_v50 = vmul.f32 %v8629_v39, %v9295_v8  ;;  %v8596_v52 = vunpack.c.l.bf16 %v8645_v36  ;;  %8125 = vmatmul.mubr.msk.bf16.gmra.mxu0 %vm1174_vm6, %v8752_v41 }
  0x91   : > { %1365 = vmatprep.mubr.bf16.mxu1 %v8996_v0  ;;  %v405_v51 = vadd.f32 %v9297_v11, %v367_v40  ;;  %v793_v55 = vor.u32 %v791_v34, %v790_v43  ;;  %v794_v57 = vrot.slane %v790_v43, 4  ;;  %v8597_v59 = vunpack.c.h.bf16 %v8645_v36  ;;  %1285 = vmatprep.mubr.bf16.mxu0 %v8996_v0  ;;  %v1010_v40 = vld [vmem:[#allocation2 + $0x9c] sm:$0xf] }
  0x92   : > { %v8753_v53 = vld [vmem:[#allocation2 + $0x84] sm:$0xff]   ;;  %v9428_v60 = vrot.slane %v796_v44, 7  ;;  %v420_v62 = vmax.f32 %v388_v46, 0.0  ;;  %v8519_v63 = vpack.c.bf16 %v419_v48, %v419_v48  ;;  %v406_v2 = vadd.f32 %v9297_v11, %v368_v50 }
  0x93   : > { %v1004_v3 = vsel %vm9330_vm8, %v793_v55, %v1003_v47  ;;  %v437_v4 = vmax.f32 %v405_v51, 0.0  ;;  %v351_v5 = vmul.f32 %v8596_v52, %v9295_v8  ;;  %v352_v6 = vmul.f32 %v8597_v59, %v9295_v8  ;;  %v8646_v48 = vld [vmem:[%s9165_s28 + $0x28] sm:$0xff]  }
  0x94   : > { %v801_v7 = vor.u32 %v799_v45, %v9428_v60  ;;  %1005 = vst [vmem:[#allocation2 + $0x90] sm:$0xf] %v1004_v3  ;;  %v8520_v9 = vpack.c.bf16 %v420_v62, %v420_v62  ;;  %v652_v12 = vshrl.u32 %v8519_v63, 16  ;;  %v655_v13 = vshll.u32 %v8519_v63, 16  ;;  %v954_v62 = vld [vmem:[#allocation2 + $0x3c] sm:$0xf] }
  0x95   : > { %v438_v14 = vmax.f32 %v406_v2, 0.0  ;;  %v8537_v15 = vpack.c.bf16 %v437_v4, %v437_v4  ;;  %v389_v16 = vadd.f32 %v9297_v11, %v351_v5  ;;  %v390_v27 = vadd.f32 %v9297_v11, %v352_v6 }
  0x96   : > { %v8754_v17 = vld [vmem:[#allocation2 + $0x24] sm:$0xff]   ;;  %v802_v18 = vsel %vm9322_vm7, %v794_v57, %v801_v7  ;;  %v654_v19 = vrot.slane %v652_v12, 7  ;;  %v660_v20 = vshrl.u32 %v8520_v9, 16  ;;  %v663_v21 = vshll.u32 %v8520_v9, 16 }
  0x97   : > { %1006 = vst.msk [vmem:[#allocation2 + $0x94] sm:$0xf] %vm461_vm0, %v802_v18  ;;  %v8538_v24 = vpack.c.bf16 %v438_v14, %v438_v14  ;;  %v805_v25 = vshrl.u32 %v8537_v15, 16  ;;  %v808_v26 = vshll.u32 %v8537_v15, 16  ;;  %v421_v32 = vmax.f32 %v389_v16, 0.0 }
  0x98   : > { %8134 = vmatmul.mubr.msk.bf16.gmra.mxu1 %vm1174_vm6, %v8753_v53  ;;  %v657_v29 = vor.u32 %v655_v13, %v654_v19  ;;  %v658_v30 = vrot.slane %v654_v19, 4  ;;  %v9444_v31 = vrot.slane %v660_v20, 7  ;;  %8126 = vmatmul.mubr.msk.bf16.gmra.mxu0 %vm1174_vm6, %v8754_v17  ;;  %v422_v37 = vmax.f32 %v390_v27, 0.0  ;;  %v8655_v13 = vld [vmem:[%s9165_s28 + $0x70] sm:$0xff]  }
  0x99   : > { %1375 = vmatprep.mubr.bf16.mxu1 %v8996_v0  ;;  %v807_v34 = vrot.slane %v805_v25, 7  ;;  %v813_v35 = vshrl.u32 %v8538_v24, 16  ;;  %v816_v36 = vshll.u32 %v8538_v24, 16  ;;  %1295 = vmatprep.mubr.bf16.mxu0 %v8996_v0  ;;  %v8521_v41 = vpack.c.bf16 %v421_v32, %v421_v32 }
  0x9a   : > { %v665_v38 = vor.u32 %v663_v21, %v9444_v31  ;;  %v948_v39 = vsel %vm9330_vm8, %v657_v29, %v947_v23  ;;  %v8632_v43 = vunpack.c.l.bf16 %v8654_v28  ;;  %v8522_v47 = vpack.c.bf16 %v422_v37, %v422_v37  ;;  %v8647_v21 = vld [vmem:[%s9165_s28 + $0x30] sm:$0xff]  }
  0x9b   : > { %949 = vst [vmem:[#allocation2 + $0x30] sm:$0xf] %v948_v39  ;;  %v810_v44 = vor.u32 %v808_v26, %v807_v34  ;;  %v811_v45 = vrot.slane %v807_v34, 4  ;;  %v9451_v46 = vrot.slane %v813_v35, 7  ;;  %v669_v51 = vshrl.u32 %v8521_v41, 16 }
  0x9c   : > { %v666_v50 = vsel %vm9322_vm7, %v658_v30, %v665_v38  ;;  %v672_v52 = vshll.u32 %v8521_v41, 16  ;;  %v8633_v53 = vunpack.c.h.bf16 %v8654_v28  ;;  %v677_v59 = vshrl.u32 %v8522_v47, 16 }
  0x9d   : > { %950 = vst.msk [vmem:[#allocation2 + $0x34] sm:$0xf] %vm461_vm0, %v666_v50  ;;  %v818_v55 = vor.u32 %v816_v36, %v9451_v46  ;;  %v1011_v57 = vsel %vm9330_vm8, %v810_v44, %v1010_v40  ;;  %v671_v2 = vrot.slane %v669_v51, 7  ;;  %v680_v3 = vshll.u32 %v8522_v47, 16 }
  0x9e   : > { %v8758_v63 = vld [vmem:[#allocation2 + $0x90] sm:$0xff]   ;;  %1012 = vst [vmem:[#allocation2 + $0x9c] sm:$0xf] %v1011_v57  ;;  %v369_v4 = vmul.f32 %v8632_v43, %v9295_v8  ;;  %v370_v5 = vmul.f32 %v8633_v53, %v9295_v8  ;;  %v9464_v7 = vrot.slane %v677_v59, 7  ;;  %v8600_v9 = vunpack.c.l.bf16 %v8646_v48  ;;  %v1017_v59 = vld [vmem:[#allocation2 + $0xa8] sm:$0xf] }
  0x9f   : > { %v819_v6 = vsel %vm9322_vm7, %v811_v45, %v818_v55  ;;  %v8601_v12 = vunpack.c.h.bf16 %v8646_v48  ;;  %v674_v14 = vor.u32 %v672_v52, %v671_v2  ;;  %v675_v15 = vrot.slane %v671_v2, 4 }
  0xa0   : > { %8135 = vmatmul.mubr.msk.bf16.gmra.mxu1 %vm1174_vm6, %v8758_v63  ;;  %1013 = vst.msk [vmem:[#allocation2 + $0xa0] sm:$0xf] %vm461_vm0, %v819_v6  ;;  %v407_v16 = vadd.f32 %v9297_v11, %v369_v4  ;;  %v408_v17 = vadd.f32 %v9297_v11, %v370_v5  ;;  %v682_v18 = vor.u32 %v680_v3, %v9464_v7  ;;  %v8636_v26 = vunpack.c.l.bf16 %v8655_v13 }
  0xa1   : > { %1385 = vmatprep.mubr.bf16.mxu1 %v8996_v0  ;;  %v353_v19 = vmul.f32 %v8600_v9, %v9295_v8  ;;  %v354_v20 = vmul.f32 %v8601_v12, %v9295_v8  ;;  %v955_v23 = vsel %vm9330_vm8, %v674_v14, %v954_v62  ;;  %v8637_v30 = vunpack.c.h.bf16 %v8655_v13 }
  0xa2   : > { %v439_v24 = vmax.f32 %v407_v16, 0.0  ;;  %v440_v25 = vmax.f32 %v408_v17, 0.0  ;;  %v683_v27 = vsel %vm9322_vm7, %v675_v15, %v682_v18  ;;  %956 = vst [vmem:[#allocation2 + $0x3c] sm:$0xf] %v955_v23  ;;  %v371_v36 = vmul.f32 %v8636_v26, %v9295_v8 }
  0xa3   : > { %v391_v28 = vadd.f32 %v9297_v11, %v353_v19  ;;  %v392_v29 = vadd.f32 %v9297_v11, %v354_v20  ;;  %957 = vst.msk [vmem:[#allocation2 + $0x40] sm:$0xf] %vm461_vm0, %v683_v27  ;;  %v8604_v37 = vunpack.c.l.bf16 %v8647_v21  ;;  %v372_v40 = vmul.f32 %v8637_v30, %v9295_v8  ;;  %v961_v20 = vld [vmem:[#allocation2 + $0x48] sm:$0xf] }
  0xa4   : > { %v8759_v32 = vld [vmem:[#allocation2 + $0x30] sm:$0xff]   ;;  %v8539_v34 = vpack.c.bf16 %v439_v24, %v439_v24  ;;  %v8540_v35 = vpack.c.bf16 %v440_v25, %v440_v25  ;;  %v8605_v41 = vunpack.c.h.bf16 %v8647_v21  ;;  %v409_v52 = vadd.f32 %v9297_v11, %v371_v36  ;;  %v1480_v24 = vld [vmem:[#allocation2] sm:$0xf] }
  0xa5   : > { %v423_v38 = vmax.f32 %v391_v28, 0.0  ;;  %v424_v39 = vmax.f32 %v392_v29, 0.0  ;;  %8127 = vmatmul.mubr.msk.bf16.gmra.mxu0 %vm1174_vm6, %v8759_v32  ;;  %v410_v53 = vadd.f32 %v9297_v11, %v372_v40  ;;  %v355_v62 = vmul.f32 %v8604_v37, %v9295_v8 }
  0xa6   : > { %v822_v43 = vshrl.u32 %v8539_v34, 16  ;;  %v825_v44 = vshll.u32 %v8539_v34, 16  ;;  %v830_v45 = vshrl.u32 %v8540_v35, 16  ;;  %v833_v47 = vshll.u32 %v8540_v35, 16  ;;  %1305 = vmatprep.mubr.bf16.mxu0 %v8996_v0  ;;  %v1481_v35 = vld [vmem:[#allocation2 + $0x4] sm:$0xf] }
  0xa7   : > { %v8760_v48 = vld [vmem:[#allocation2 + $0x9c] sm:$0xff]   ;;  %v8523_v50 = vpack.c.bf16 %v423_v38, %v423_v38  ;;  %v8524_v51 = vpack.c.bf16 %v424_v39, %v424_v39  ;;  %v356_v63 = vmul.f32 %v8605_v41, %v9295_v8  ;;  %v616_v6 = vrot.slane %v9350_v33, 4 }
  0xa8   : > { %v824_v55 = vrot.slane %v822_v43, 7  ;;  %v9489_v57 = vrot.slane %v830_v45, 7  ;;  %8136 = vmatmul.mubr.msk.bf16.gmra.mxu1 %vm1174_vm6, %v8760_v48  ;;  %v441_v17 = vmax.f32 %v409_v52, 0.0  ;;  %v393_v8 = vadd.f32 %v9297_v11, %v355_v62 }
  0xa9   : > { %v686_v2 = vshrl.u32 %v8523_v50, 16  ;;  %v689_v3 = vshll.u32 %v8523_v50, 16  ;;  %v694_v4 = vshrl.u32 %v8524_v51, 16  ;;  %v697_v5 = vshll.u32 %v8524_v51, 16  ;;  %1395 = vmatprep.mubr.bf16.mxu1 %v8996_v0 }
  0xaa   : > { %v827_v9 = vor.u32 %v825_v44, %v824_v55  ;;  %v828_v12 = vrot.slane %v824_v55, 4  ;;  %v835_v13 = vor.u32 %v833_v47, %v9489_v57  ;;  %v8764_v14 = vld [vmem:[#allocation2 + $0x3c] sm:$0xff]   ;;  %v442_v21 = vmax.f32 %v410_v53, 0.0  ;;  %v1024_v44 = vld [vmem:[#allocation2 + $0xb4] sm:$0xf] }
  0xab   : > { %v688_v15 = vrot.slane %v686_v2, 7  ;;  %v9497_v16 = vrot.slane %v694_v4, 7  ;;  %v394_v23 = vadd.f32 %v9297_v11, %v356_v63  ;;  %v633_v25 = vrot.slane %v9386_v42, 4  ;;  %v1482_v4 = vld [vmem:[#allocation2 + $0x8] sm:$0x1] }
  0xac   : > { %v836_v18 = vsel %vm9322_vm7, %v828_v12, %v835_v13  ;;  %v1018_v19 = vsel %vm9330_vm8, %v827_v9, %v1017_v59  ;;  %v8541_v29 = vpack.c.bf16 %v441_v17, %v441_v17  ;;  %v8542_v30 = vpack.c.bf16 %v442_v21, %v442_v21  ;;  %v930_v59 = vld [vmem:[#allocation2 + $0x14] sm:$0x1] }
  0xad   : > { %1019 = vst [vmem:[#allocation2 + $0xa8] sm:$0xf] %v1018_v19  ;;  %1020 = vst.msk [vmem:[#allocation2 + $0xac] sm:$0xf] %vm461_vm0, %v836_v18  ;;  %v691_v26 = vor.u32 %v689_v3, %v688_v15  ;;  %v692_v27 = vrot.slane %v688_v15, 4  ;;  %v699_v28 = vor.u32 %v697_v5, %v9497_v16  ;;  %8128 = vmatmul.mubr.msk.bf16.gmra.mxu0 %vm1174_vm6, %v8764_v14  ;;  %v425_v32 = vmax.f32 %v393_v8, 0.0 }
  0xae   : > { %v426_v34 = vmax.f32 %v394_v23, 0.0  ;;  %1315 = vmatprep.mubr.bf16.mxu0 %v8996_v0  ;;  %v1532_v37 = vshrl.u32 %v1480_v24, 16  ;;  %v1535_v38 = vshll.u32 %v1480_v24, 16  ;;  %v839_v39 = vshrl.u32 %v8541_v29, 16  ;;  %v968_v14 = vld [vmem:[#allocation2 + $0x54] sm:$0xf] }
  0xaf   : > { %v700_v11 = vsel %vm9322_vm7, %v692_v27, %v699_v28  ;;  %v962_v36 = vsel %vm9330_vm8, %v691_v26, %v961_v20  ;;  %v842_v40 = vshll.u32 %v8541_v29, 16  ;;  %v847_v41 = vshrl.u32 %v8542_v30, 16  ;;  %v9523_v19 = vld [vmem:[#allocation2] sm:$0xe]  ;;  %v2422_v26 = vld [vmem:[#allocation2 + $0x4] sm:$0xf] }
  0xb0   : > { %963 = vst [vmem:[#allocation2 + $0x48] sm:$0xf] %v962_v36  ;;  %964 = vst.msk [vmem:[#allocation2 + $0x4c] sm:$0xf] %vm461_vm0, %v700_v11  ;;  %v850_v43 = vshll.u32 %v8542_v30, 16  ;;  %v8525_v45 = vpack.c.bf16 %v425_v32, %v425_v32  ;;  %v8526_v47 = vpack.c.bf16 %v426_v34, %v426_v34  ;;  %v1534_v48 = vrot.slane %v1532_v37, 4 }
  0xb1   : > { %vm1528_vm9 = vsmask.f32 3328  ;;  %vm1529_vm10 = vsmask.f32 7440  ;;  %v1537_v50 = vrot.slane %v1535_v38, 5  ;;  %v841_v51 = vrot.slane %v839_v39, 7 }
  0xb2   : > { %v9515_v52 = vrot.slane %v847_v41, 7  ;;  %v1541_v53 = vshll.u32 %v1481_v35, 16  ;;  %v1545_v55 = vshrl.u32 %v1481_v35, 16  ;;  %vm2517_vm11 = vcmask 1042432   ;;  %v1483_v27 = vld [vmem:[#allocation2 + $0xc] sm:$0xf]  ;;  %vm9552_vm13 = vmor %vm1528_vm9, %vm1529_vm10 }
  0xb3   : > { %vm2518_vm12 = vcmask 1046532   ;;  %v703_v62 = vshrl.u32 %v8525_v45, 16  ;;  %v706_v63 = vshll.u32 %v8525_v45, 16  ;;  %v711_v2 = vshrl.u32 %v8526_v47, 16  ;;  %v2423_v32 = vld [vmem:[#allocation2 + $0x8] sm:$0x1] }
  0xb4   : > { %v714_v3 = vshll.u32 %v8526_v47, 16  ;;  %v8765_v5 = vld [vmem:[#allocation2 + $0xa8] sm:$0xff]   ;;  %v844_v9 = vor.u32 %v842_v40, %v841_v51  ;;  %v845_v12 = vrot.slane %v841_v51, 4  ;;  %v852_v13 = vor.u32 %v850_v43, %v9515_v52  ;;  %v1484_v38 = vld [vmem:[#allocation2 + $0x10] sm:$0xf]  ;;  %vm9558_vm14 = vmor %vm2517_vm11, %vm2518_vm12 }
  0xb5   : > { %v650_v15 = vrot.slane %v9408_v22, 4  ;;  %v705_v17 = vrot.slane %v703_v62, 7  ;;  %v9519_v8 = vrot.slane %v711_v2, 7  ;;  %v9521_v18 = vrot.slane %v1541_v53, 5  ;;  %8137 = vmatmul.mubr.msk.bf16.gmra.mxu1 %vm1174_vm6, %v8765_v5  ;;  %v937_v41 = vld [vmem:[#allocation2 + $0x20] sm:$0x1] }
  0xb6   : > { %v853_v20 = vsel %vm9322_vm7, %v845_v12, %v852_v13  ;;  %v1025_v21 = vsel %vm9330_vm8, %v844_v9, %v1024_v44  ;;  %v1538_v23 = vor.u32 %v1537_v50, %v1534_v48  ;;  %v1547_v24 = vrot.slane %v1545_v55, 4  ;;  %1405 = vmatprep.mubr.bf16.mxu1 %v8996_v0  ;;  %v1486_v45 = vld [vmem:[#allocation2 + $0x18] sm:$0xf] }
  0xb7   : > { %v8766_v22 = vld [vmem:[#allocation2 + $0x48] sm:$0xff]   ;;  %1026 = vst [vmem:[#allocation2 + $0xb4] sm:$0xf] %v1025_v21  ;;  %1027 = vst.msk [vmem:[#allocation2 + $0xb8] sm:$0xf] %vm461_vm0, %v853_v20  ;;  %v708_v28 = vor.u32 %v706_v63, %v705_v17  ;;  %v709_v29 = vrot.slane %v705_v17, 4  ;;  %v716_v30 = vor.u32 %v714_v3, %v9519_v8  ;;  %v931_v34 = vsel %vm9287_vm3, %v616_v6, %v930_v59 }
  0xb8   : > { %v667_v35 = vrot.slane %v9444_v31, 4  ;;  %v684_v11 = vrot.slane %v9464_v7, 4  ;;  %v1548_v36 = vor.u32 %v1547_v24, %v9521_v18  ;;  %v1551_v37 = vshll.u32 %v1482_v4, 16  ;;  %932 = vst [vmem:[#allocation2 + $0x14] sm:$0x1] %v931_v34  ;;  %8129 = vmatmul.mubr.msk.bf16.gmra.mxu0 %vm1174_vm6, %v8766_v22 }
  0xb9   : > { %v701_v39 = vrot.slane %v9497_v16, 4  ;;  %v717_v40 = vsel %vm9322_vm7, %v709_v29, %v716_v30  ;;  %v969_v33 = vsel %vm9330_vm8, %v708_v28, %v968_v14  ;;  %v2522_v6 = vrot.slane %v2422_v26, 5  ;;  %v944_v31 = vld [vmem:[#allocation2 + $0x2c] sm:$0x1]  ;;  %1325 = vmatprep.mubr.bf16.mxu0 %v8996_v0  ;;  %v951_v47 = vld [vmem:[#allocation2 + $0x38] sm:$0x1] }
  0xba   : > { %v718_v7 = vrot.slane %v9519_v8, 4  ;;  %970 = vst [vmem:[#allocation2 + $0x54] sm:$0xf] %v969_v33  ;;  %971 = vst.msk [vmem:[#allocation2 + $0x58] sm:$0xf] %vm461_vm0, %v717_v40  ;;  %v1539_v43 = vrot.slane %v1538_v23, 4  ;;  %v938_v17 = vsel %vm9287_vm3, %v633_v25, %v937_v41  ;;  %v952_v42 = vsel %vm9287_vm3, %v667_v35, %v951_v47 }
  0xbb   : > { %v8175_v16 = vrot.slane %v9523_v19, 9  ;;  %v1556_v44 = vshrl.u32 %v1483_v27, 16  ;;  %v1549_v48 = vrot.slane %v1548_v36, 4  ;;  %v1553_v50 = vrot.slane %v1551_v37, 5  ;;  %v958_v3 = vld [vmem:[#allocation2 + $0x44] sm:$0x1] }
  0xbc   : > { %v1559_v51 = vshll.u32 %v1483_v27, 16  ;;  %v1565_v53 = vshll.u32 %v1484_v38, 16  ;;  %v2524_v59 = vrot.slane %v2522_v6, 4  ;;  %v2525_v62 = vrot.slane %v2423_v32, 5  ;;  %v965_v4 = vld [vmem:[#allocation2 + $0x50] sm:$0x1] }
  0xbd   : > { %v1558_v63 = vrot.slane %v1556_v44, 4  ;;  %v1569_v2 = vshrl.u32 %v1484_v38, 16  ;;  %v945_v19 = vsel %vm9287_vm3, %v650_v15, %v944_v31  ;;  %v1544_v20 = vsel %vm9552_vm13, %v1539_v43, %v9521_v18  ;;  %v9573_v24 = vld [vmem:[#allocation2 + $0x10] sm:$0xf]  ;;  %939 = vst [vmem:[#allocation2 + $0x20] sm:$0x1] %v938_v17 }
  0xbe   : > { %v1561_v9 = vrot.slane %v1559_v51, 5  ;;  %v9562_v12 = vrot.slane %v1565_v53, 5  ;;  %v8767_v13 = vld [vmem:[#allocation2 + $0xb4] sm:$0xff]   ;;  %v1580_v26 = vshrl.u32 %v1486_v45, 16  ;;  %946 = vst [vmem:[#allocation2 + $0x2c] sm:$0x1] %v945_v19  ;;  %v2523_v25 = vsel %vm9558_vm14, %v8175_v16, %v2522_v6 }
  0xbf   : > { %v1571_v14 = vrot.slane %v1569_v2, 4  ;;  %v1485_v21 = vld [vmem:[#allocation2 + $0x14] sm:$0x1]  ;;  %8138 = vmatmul.mubr.msk.bf16.gmra.mxu1 %vm1174_vm6, %v8767_v13  ;;  %v1487_v22 = vld [vmem:[#allocation2 + $0x1c] sm:$0xf]  ;;  %v1583_v18 = vshll.u32 %v1486_v45, 16  ;;  %v1554_v29 = vsel %vm9552_vm13, %v1549_v48, %v1553_v50  ;;  %v2526_v30 = vsel %vm9558_vm14, %v2524_v59, %v2525_v62 }
  0xc0   : > { %v1562_v23 = vor.u32 %v1561_v9, %v1558_v63  ;;  %v1575_v27 = vshll.u32 %v1485_v21, 16  ;;  %953 = vst [vmem:[#allocation2 + $0x38] sm:$0x1] %v952_v42  ;;  %2068 = vmatprep.mubr.bf16.mxu1 %v8996_v0  ;;  %v959_v32 = vsel %vm9287_vm3, %v684_v11, %v958_v3  ;;  %v966_v34 = vsel %vm9287_vm3, %v701_v39, %v965_v4  ;;  %v972_v35 = vld [vmem:[#allocation2 + $0x5c] sm:$0x1] }
  0xc1   : > { %v1572_v15 = vor.u32 %v1571_v14, %v9562_v12  ;;  %v8768_v28 = vld [vmem:[#allocation2 + $0x54] sm:$0xff]   ;;  %v2424_v40 = vld [vmem:[#allocation2 + $0xc] sm:$0xe]  ;;  %v2529_v33 = vrot.slane %v9573_v24, 5  ;;  %960 = vst [vmem:[#allocation2 + $0x44] sm:$0x1] %v959_v32  ;;  %v8139_v44 = vcombine.low %v1544_v20, %v1554_v29  ;;  %v8191_v50 = vcombine.low %v2523_v25, %v2526_v30 }
  0xc2   : > { %v1563_v36 = vrot.slane %v1562_v23, 4  ;;  %v1577_v38 = vrot.slane %v1575_v27, 5  ;;  %967 = vst [vmem:[#allocation2 + $0x50] sm:$0x1] %v966_v34  ;;  %8130 = vmatmul.mubr.msk.bf16.gmra.mxu0 %vm1174_vm6, %v8768_v28  ;;  %v2426_v6 = vld [vmem:[#allocation2 + $0x14] sm:$0x1]  ;;  %v973_v63 = vsel %vm9287_vm3, %v718_v7, %v972_v35 }
  0xc3   : > { %v1573_v37 = vrot.slane %v1572_v15, 4  ;;  %v1582_v41 = vrot.slane %v1580_v26, 4  ;;  %v1585_v31 = vrot.slane %v1583_v18, 5  ;;  %v1589_v43 = vshll.u32 %v1487_v22, 16  ;;  %v8769_v11 = vld [vmem:[#allocation9 + $0x70] ss:$8 sps:$4 sm:$0xff]   ;;  %2785 = vmatprep.mubr.bf16.mxu0 %v8996_v0 }
  0xc4   : > { %v1593_v16 = vshrl.u32 %v1487_v22, 16  ;;  %v8176_v39 = vrot.slane %v2424_v40, 9  ;;  %v1489_v47 = vld [vmem:[#allocation2 + $0x24] sm:$0xf]  ;;  %v2532_v51 = vrot.slane %v2426_v6, 5  ;;  %v1568_v2 = vsel %vm9552_vm13, %v1563_v36, %v9562_v12 }
  0xc5   : > { %v9593_v45 = vrot.slane %v1589_v43, 5  ;;  %v8777_v48 = vld [vmem:[#allocation9 + $0x64] ss:$8 sps:$4 sm:$0xff]   ;;  %v1578_v3 = vsel %vm9552_vm13, %v1573_v37, %v1577_v38  ;;  %v8772_v4 = vld [vmem:[#allocation9 + $0x90] ss:$8 sps:$4 sm:$0xff]   ;;  %v2531_v9 = vrot.slane %v2529_v33, 4  ;;  %v1586_v13 = vor.u32 %v1585_v31, %v1582_v41 }
  0xc6   : > { %v1488_v53 = vld [vmem:[#allocation2 + $0x20] sm:$0x1]  ;;  %v1595_v59 = vrot.slane %v1593_v16, 4  ;;  %v1490_v62 = vld [vmem:[#allocation2 + $0x28] sm:$0xf]  ;;  %v1604_v19 = vshrl.u32 %v1489_v47, 16  ;;  %v2530_v24 = vsel %vm9558_vm14, %v8176_v39, %v2529_v33  ;;  %v8140_v42 = vcombine.low %v1568_v2, %v1578_v3 }
  0xc7   : > { %974 = vst [vmem:[#allocation2 + $0x5c] sm:$0x1] %v973_v63  ;;  %8159 = vmatmul.mubr.msk.bf16.vlgmr.msra.gmra.mxu1 %vm1174_vm6, %v8139_v44  ;;  %v1599_v17 = vshll.u32 %v1488_v53, 16  ;;  %v2428_v8 = vld [vmem:[#allocation2 + $0x1c] sm:$0xf]  ;;  %v1607_v20 = vshll.u32 %v1489_v47, 16  ;;  %v2533_v25 = vsel %vm9558_vm14, %v2531_v9, %v2532_v51 }
  0xc8   : > { %v1596_v14 = vor.u32 %v1595_v59, %v9593_v45  ;;  %3336 = vmatpush1.bf16.msra.mxu1 %v8769_v11  ;;  %2078 = vmatprep.mubr.bf16.mxu1 %v8996_v0  ;;  %v1613_v7 = vshll.u32 %v1490_v62, 16  ;;  %v1617_v12 = vshrl.u32 %v1490_v62, 16  ;;  %v8775_v21 = vld [vmem:[#allocation9 + $0x60] ss:$8 sps:$4 sm:$0xff]   ;;  %v8780_v23 = vld [vmem:[#allocation9 + $0x84] ss:$8 sps:$4 sm:$0xff]   ;;  %v8192_v38 = vcombine.low %v2530_v24, %v2533_v25 }
  0xc9   : > { %v2427_v26 = vld [vmem:[#allocation2 + $0x18] sm:$0xe]  ;;  %3337 = vmatprep.subr.bf16.mxu1 %v8777_v48  ;;  %v1587_v15 = vrot.slane %v1586_v13, 4  ;;  %v2429_v27 = vld [vmem:[#allocation2 + $0x20] sm:$0x1]  ;;  %v2536_v22 = vrot.slane %v2428_v8, 5 }
  0xca   : > { %8211 = vmatmul.mubr.msk.bf16.vlgmr.msra.gmra.mxu0 %vm1174_vm6, %v8191_v50  ;;  %v8778_v18 = vld [vmem:[#allocation9 + $0x80] ss:$8 sps:$4 sm:$0xff]   ;;  %v1597_v28 = vrot.slane %v1596_v14, 4  ;;  %v1601_v29 = vrot.slane %v1599_v17, 5  ;;  %v1491_v30 = vld [vmem:[#allocation2 + $0x2c] sm:$0x1] }
  0xcb   : > { %4274 = vmatpush1.bf16.msra.mxu0 %v8772_v4  ;;  %2795 = vmatprep.mubr.bf16.mxu0 %v8996_v0  ;;  %v1606_v32 = vrot.slane %v1604_v19, 4  ;;  %v1609_v34 = vrot.slane %v1607_v20, 5  ;;  %v9613_v35 = vrot.slane %v1613_v7, 5  ;;  %v1619_v36 = vrot.slane %v1617_v12, 4  ;;  %v1492_v37 = vld [vmem:[#allocation2 + $0x30] sm:$0xf] }
  0xcc   : > { %3338 = vmatpush1.bf16.msra.mxu1 %v8775_v21  ;;  %4275 = vmatprep.subr.bf16.mxu0 %v8780_v23  ;;  %v8177_v40 = vrot.slane %v2427_v26, 9  ;;  %v2431_v33 = vld [vmem:[#allocation2 + $0x28] sm:$0xf]  ;;  %v1493_v6 = vld [vmem:[#allocation2 + $0x34] sm:$0xf]  ;;  %v1592_v41 = vsel %vm9552_vm13, %v1587_v15, %v9593_v45  ;;  %v2538_v31 = vrot.slane %v2536_v22, 4  ;;  %v1602_v44 = vsel %vm9552_vm13, %v1597_v28, %v1601_v29 }
  0xcd   : > { %v2539_v43 = vrot.slane %v2429_v27, 5  ;;  %v1623_v16 = vshll.u32 %v1491_v30, 16  ;;  %v2430_v11 = vld [vmem:[#allocation2 + $0x24] sm:$0xe]  ;;  %v1610_v39 = vor.u32 %v1609_v34, %v1606_v32  ;;  %v2432_v47 = vld [vmem:[#allocation2 + $0x2c] sm:$0x1]  ;;  %v1620_v53 = vor.u32 %v1619_v36, %v9613_v35 }
  0xce   : > { %v1628_v48 = vshrl.u32 %v1492_v37, 16  ;;  %v1631_v50 = vshll.u32 %v1492_v37, 16  ;;  %v8783_v51 = vld [vmem:[#allocation9 + $0xb4] ss:$8 sps:$4 sm:$0xff]   ;;  %v2543_v45 = vrot.slane %v2431_v33, 5  ;;  %v1637_v59 = vshll.u32 %v1493_v6, 16 }
  0xcf   : > { %8160 = vmatmul.mubr.msk.bf16.gmra.mxu1 %vm1174_vm6, %v8140_v42  ;;  %4276 = vmatpush1.bf16.msra.mxu0 %v8778_v18  ;;  %v1641_v62 = vshrl.u32 %v1493_v6, 16  ;;  %v2537_v63 = vsel %vm9558_vm14, %v8177_v40, %v2536_v22  ;;  %v8788_v2 = vld [vmem:[#allocation9 + $0xd4] ss:$8 sps:$4 sm:$0xff]   ;;  %v8141_v3 = vcombine.low %v1592_v41, %v1602_v44  ;;  %v2540_v4 = vsel %vm9558_vm14, %v2538_v31, %v2539_v43  ;;  %v1495_v14 = vld [vmem:[#allocation2 + $0x3c] sm:$0xf] }
  0xd0   : > { %2088 = vmatprep.mubr.bf16.mxu1 %v8996_v0  ;;  %4987 = vmatprep.subr.bf16.mxu1 %v8783_v51  ;;  %v8178_v9 = vrot.slane %v2430_v11, 9  ;;  %v2546_v13 = vrot.slane %v2432_v47, 5  ;;  %v1496_v17 = vld [vmem:[#allocation2 + $0x40] sm:$0xf]  ;;  %v1611_v8 = vrot.slane %v1610_v39, 4  ;;  %v1625_v19 = vrot.slane %v1623_v16, 5 }
  0xd1   : > { %v1630_v20 = vrot.slane %v1628_v48, 4  ;;  %v1633_v7 = vrot.slane %v1631_v50, 5  ;;  %5558 = vmatprep.subr.bf16.mxu0 %v8788_v2  ;;  %v1621_v12 = vrot.slane %v1620_v53, 4  ;;  %v2545_v21 = vrot.slane %v2543_v45, 4  ;;  %v1494_v23 = vld [vmem:[#allocation2 + $0x38] sm:$0x1] }
  0xd2   : > { %8212 = vmatmul.mubr.msk.bf16.gmra.mxu0 %vm1174_vm6, %v8192_v38  ;;  %v9629_v24 = vrot.slane %v1637_v59, 5  ;;  %v1643_v26 = vrot.slane %v1641_v62, 4  ;;  %v2434_v42 = vld [vmem:[#allocation2 + $0x34] sm:$0xf]  ;;  %v1652_v25 = vshrl.u32 %v1495_v14, 16  ;;  %v1655_v15 = vshll.u32 %v1495_v14, 16 }
  0xd3   : > { %2805 = vmatprep.mubr.bf16.mxu0 %v8996_v0  ;;  %v1661_v27 = vshll.u32 %v1496_v17, 16  ;;  %v1665_v22 = vshrl.u32 %v1496_v17, 16  ;;  %v8193_v18 = vcombine.low %v2537_v63, %v2540_v4  ;;  %v1616_v28 = vsel %vm9552_vm13, %v1611_v8, %v9613_v35  ;;  %v2433_v34 = vld [vmem:[#allocation2 + $0x30] sm:$0xe]  ;;  %v1497_v33 = vld [vmem:[#allocation2 + $0x44] sm:$0x1] }
  0xd4   : > { %v2544_v29 = vsel %vm9558_vm14, %v8178_v9, %v2543_v45  ;;  %v1634_v30 = vor.u32 %v1633_v7, %v1630_v20  ;;  %v1647_v32 = vshll.u32 %v1494_v23, 16  ;;  %v1626_v36 = vsel %vm9552_vm13, %v1621_v12, %v1625_v19  ;;  %v2435_v43 = vld [vmem:[#allocation2 + $0x38] sm:$0x1]  ;;  %v1498_v16 = vld [vmem:[#allocation2 + $0x48] sm:$0xf] }
  0xd5   : > { %v2547_v37 = vsel %vm9558_vm14, %v2545_v21, %v2546_v13  ;;  %v1644_v38 = vor.u32 %v1643_v26, %v9629_v24  ;;  %v2550_v40 = vrot.slane %v2434_v42, 5  ;;  %v1654_v6 = vrot.slane %v1652_v25, 4  ;;  %v1499_v11 = vld [vmem:[#allocation2 + $0x4c] sm:$0xf]  ;;  %v9647_v50 = vld [vmem:[#allocation2 + $0x40] sm:$0xf] }
  0xd6   : > { %v1657_v35 = vrot.slane %v1655_v15, 5  ;;  %v9643_v41 = vrot.slane %v1661_v27, 5  ;;  %v1667_v31 = vrot.slane %v1665_v22, 4  ;;  %v8142_v44 = vcombine.low %v1616_v28, %v1626_v36  ;;  %v979_v20 = vld [vmem:[#allocation2 + $0x68] sm:$0x1] }
  0xd7   : > { %8161 = vmatmul.mubr.msk.bf16.gmra.mxu1 %vm1174_vm6, %v8141_v3  ;;  %v1635_v39 = vrot.slane %v1634_v30, 4  ;;  %v1649_v47 = vrot.slane %v1647_v32, 5  ;;  %v8179_v48 = vrot.slane %v2433_v34, 9  ;;  %v8194_v51 = vcombine.low %v2544_v29, %v2547_v37  ;;  %v2438_v23 = vld [vmem:[#allocation2 + $0x44] sm:$0x1] }
  0xd8   : > { %2098 = vmatprep.mubr.bf16.mxu1 %v8996_v0  ;;  %v1645_v53 = vrot.slane %v1644_v38, 4  ;;  %v1671_v45 = vshll.u32 %v1497_v33, 16  ;;  %v2552_v59 = vrot.slane %v2550_v40, 4  ;;  %v2553_v62 = vrot.slane %v2435_v43, 5  ;;  %v1500_v29 = vld [vmem:[#allocation2 + $0x50] sm:$0x1] }
  0xd9   : > { %v1658_v63 = vor.u32 %v1657_v35, %v1654_v6  ;;  %v1668_v2 = vor.u32 %v1667_v31, %v9643_v41  ;;  %v1676_v3 = vshrl.u32 %v1498_v16, 16  ;;  %v1679_v4 = vshll.u32 %v1498_v16, 16  ;;  %v1501_v30 = vld [vmem:[#allocation2 + $0x54] sm:$0xf]  ;;  %v1502_v34 = vld [vmem:[#allocation2 + $0x58] sm:$0xf] }
  0xda   : > { %8213 = vmatmul.mubr.msk.bf16.gmra.mxu0 %vm1174_vm6, %v8193_v18  ;;  %v1685_v9 = vshll.u32 %v1499_v11, 16  ;;  %v1689_v13 = vshrl.u32 %v1499_v11, 16  ;;  %v735_v14 = vrot.slane %v9326_v58, 4  ;;  %v752_v17 = vrot.slane %v9335_v10, 4  ;;  %v2436_v58 = vld [vmem:[#allocation2 + $0x3c] sm:$0xe] }
  0xdb   : > { %2815 = vmatprep.mubr.bf16.mxu0 %v8996_v0  ;;  %v769_v8 = vrot.slane %v9353_v49, 4  ;;  %v786_v19 = vrot.slane %v9391_v54, 4  ;;  %v1640_v7 = vsel %vm9552_vm13, %v1635_v39, %v9629_v24  ;;  %v1650_v12 = vsel %vm9552_vm13, %v1645_v53, %v1649_v47  ;;  %v986_v16 = vld [vmem:[#allocation2 + $0x74] sm:$0x1]  ;;  %v2440_v11 = vld [vmem:[#allocation2 + $0x4c] sm:$0xf] }
  0xdc   : > { %v1673_v21 = vrot.slane %v1671_v45, 5  ;;  %v2557_v10 = vrot.slane %v9647_v50, 5  ;;  %v2551_v26 = vsel %vm9558_vm14, %v8179_v48, %v2550_v40  ;;  %v2554_v42 = vsel %vm9558_vm14, %v2552_v59, %v2553_v62  ;;  %v1000_v50 = vld [vmem:[#allocation2 + $0x8c] sm:$0x1]  ;;  %v2441_v62 = vld [vmem:[#allocation2 + $0x50] sm:$0x1] }
  0xdd   : > { %v1659_v25 = vrot.slane %v1658_v63, 4  ;;  %v1669_v15 = vrot.slane %v1668_v2, 4  ;;  %v1678_v27 = vrot.slane %v1676_v3, 4  ;;  %v1681_v24 = vrot.slane %v1679_v4, 5  ;;  %v1007_v54 = vld [vmem:[#allocation2 + $0x98] sm:$0x1] }
  0xde   : > { %v9667_v22 = vrot.slane %v1685_v9, 5  ;;  %v1691_v18 = vrot.slane %v1689_v13, 4  ;;  %v8143_v28 = vcombine.low %v1640_v7, %v1650_v12  ;;  %v8195_v32 = vcombine.low %v2551_v26, %v2554_v42  ;;  %v1503_v13 = vld [vmem:[#allocation2 + $0x5c] sm:$0x1] }
  0xdf   : > { %8162 = vmatmul.mubr.msk.bf16.gmra.mxu1 %vm1174_vm6, %v8142_v44  ;;  %v980_v36 = vsel %vm9287_vm3, %v735_v14, %v979_v20  ;;  %v1664_v37 = vsel %vm9552_vm13, %v1659_v25, %v9643_v41  ;;  %v8180_v38 = vrot.slane %v2436_v58, 9  ;;  %v2559_v40 = vrot.slane %v2557_v10, 4  ;;  %v993_v41 = vld [vmem:[#allocation2 + $0x80] sm:$0x1] }
  0xe0   : > { %2108 = vmatprep.mubr.bf16.mxu1 %v8996_v0  ;;  %v2560_v33 = vrot.slane %v2438_v23, 5  ;;  %981 = vst [vmem:[#allocation2 + $0x68] sm:$0x1] %v980_v36  ;;  %v1674_v6 = vsel %vm9552_vm13, %v1669_v15, %v1673_v21  ;;  %v1682_v35 = vor.u32 %v1681_v24, %v1678_v27  ;;  %v1692_v31 = vor.u32 %v1691_v18, %v9667_v22  ;;  %v1504_v58 = vld [vmem:[#allocation2 + $0x60] sm:$0xf] }
  0xe1   : > { %v1695_v43 = vshll.u32 %v1500_v29, 16  ;;  %v1700_v44 = vshrl.u32 %v1501_v30, 16  ;;  %v1703_v39 = vshll.u32 %v1501_v30, 16  ;;  %v1709_v47 = vshll.u32 %v1502_v34, 16  ;;  %v1505_v23 = vld [vmem:[#allocation2 + $0x64] sm:$0xf] }
  0xe2   : > { %8214 = vmatmul.mubr.msk.bf16.gmra.mxu0 %vm1174_vm6, %v8194_v51  ;;  %v1713_v48 = vshrl.u32 %v1502_v34, 16  ;;  %v2439_v51 = vld [vmem:[#allocation2 + $0x48] sm:$0xe]  ;;  %v8144_v53 = vcombine.low %v1664_v37, %v1674_v6  ;;  %v2558_v45 = vsel %vm9558_vm14, %v8180_v38, %v2557_v10  ;;  %v2561_v59 = vsel %vm9558_vm14, %v2559_v40, %v2560_v33  ;;  %v2443_v24 = vld [vmem:[#allocation2 + $0x58] sm:$0xf] }
  0xe3   : > { %2825 = vmatprep.mubr.bf16.mxu0 %v8996_v0  ;;  %v987_v63 = vsel %vm9287_vm3, %v752_v17, %v986_v16  ;;  %v1683_v2 = vrot.slane %v1682_v35, 4  ;;  %v1693_v3 = vrot.slane %v1692_v31, 4  ;;  %v1697_v4 = vrot.slane %v1695_v43, 5  ;;  %v1014_v36 = vld [vmem:[#allocation2 + $0xa4] sm:$0x1] }
  0xe4   : > { %v2564_v9 = vrot.slane %v2440_v11, 5  ;;  %988 = vst [vmem:[#allocation2 + $0x74] sm:$0x1] %v987_v63  ;;  %v1702_v14 = vrot.slane %v1700_v44, 4  ;;  %v1705_v20 = vrot.slane %v1703_v39, 5  ;;  %v9688_v7 = vrot.slane %v1709_v47, 5 }
  0xe5   : > { %v1715_v12 = vrot.slane %v1713_v48, 4  ;;  %v803_v21 = vrot.slane %v9428_v60, 4  ;;  %v994_v17 = vsel %vm9287_vm3, %v769_v8, %v993_v41  ;;  %v1001_v10 = vsel %vm9287_vm3, %v786_v19, %v1000_v50  ;;  %v2442_v33 = vld [vmem:[#allocation2 + $0x54] sm:$0xe]  ;;  %v2444_v6 = vld [vmem:[#allocation2 + $0x5c] sm:$0x1] }
  0xe6   : > { %v820_v26 = vrot.slane %v9451_v46, 4  ;;  %v8196_v42 = vcombine.low %v2558_v45, %v2561_v59  ;;  %v8181_v25 = vrot.slane %v2439_v51, 9  ;;  %v2567_v15 = vrot.slane %v2441_v62, 5  ;;  %995 = vst [vmem:[#allocation2 + $0x80] sm:$0x1] %v994_v17 }
  0xe7   : > { %8163 = vmatmul.mubr.msk.bf16.gmra.mxu1 %vm1174_vm6, %v8143_v28  ;;  %1002 = vst [vmem:[#allocation2 + $0x8c] sm:$0x1] %v1001_v10  ;;  %v1688_v60 = vsel %vm9552_vm13, %v1683_v2, %v9667_v22  ;;  %v1698_v49 = vsel %vm9552_vm13, %v1693_v3, %v1697_v4  ;;  %v2566_v8 = vrot.slane %v2564_v9, 4  ;;  %v1719_v27 = vshll.u32 %v1503_v13, 16  ;;  %v1508_v22 = vld [vmem:[#allocation2 + $0x70] sm:$0xf] }
  0xe8   : > { %2118 = vmatprep.mubr.bf16.mxu1 %v8996_v0  ;;  %v1706_v19 = vor.u32 %v1705_v20, %v1702_v14  ;;  %v1716_v46 = vor.u32 %v1715_v12, %v9688_v7  ;;  %v1724_v18 = vshrl.u32 %v1504_v58, 16  ;;  %v1727_v28 = vshll.u32 %v1504_v58, 16  ;;  %v1506_v51 = vld [vmem:[#allocation2 + $0x68] sm:$0x1]  ;;  %v2446_v20 = vld [vmem:[#allocation2 + $0x64] sm:$0xf] }
  0xe9   : > { %v1733_v29 = vshll.u32 %v1505_v23, 16  ;;  %v1737_v30 = vshrl.u32 %v1505_v23, 16  ;;  %v1008_v34 = vsel %vm9287_vm3, %v803_v21, %v1007_v54  ;;  %v8145_v37 = vcombine.low %v1688_v60, %v1698_v49  ;;  %v2445_v12 = vld [vmem:[#allocation2 + $0x60] sm:$0xe]  ;;  %v2447_v54 = vld [vmem:[#allocation2 + $0x68] sm:$0x1] }
  0xea   : > { %8215 = vmatmul.mubr.msk.bf16.gmra.mxu0 %vm1174_vm6, %v8195_v32  ;;  %v1507_v32 = vld [vmem:[#allocation2 + $0x6c] sm:$0xf]  ;;  %v2565_v38 = vsel %vm9558_vm14, %v8181_v25, %v2564_v9  ;;  %v2568_v40 = vsel %vm9558_vm14, %v2566_v8, %v2567_v15  ;;  %v2571_v35 = vrot.slane %v2443_v24, 5  ;;  %1009 = vst [vmem:[#allocation2 + $0x98] sm:$0x1] %v1008_v34  ;;  %v1707_v31 = vrot.slane %v1706_v19, 4 }
  0xeb   : > { %2835 = vmatprep.mubr.bf16.mxu0 %v8996_v0  ;;  %v1717_v43 = vrot.slane %v1716_v46, 4  ;;  %v1721_v16 = vrot.slane %v1719_v27, 5  ;;  %v1726_v11 = vrot.slane %v1724_v18, 4  ;;  %v1729_v44 = vrot.slane %v1727_v28, 5  ;;  %v1509_v60 = vld [vmem:[#allocation2 + $0x74] sm:$0x1] }
  0xec   : > { %v9716_v39 = vrot.slane %v1733_v29, 5  ;;  %v1739_v47 = vrot.slane %v1737_v30, 4  ;;  %v1015_v48 = vsel %vm9287_vm3, %v820_v26, %v1014_v36  ;;  %v8197_v41 = vcombine.low %v2565_v38, %v2568_v40  ;;  %v1510_v26 = vld [vmem:[#allocation2 + $0x78] sm:$0xf]  ;;  %v2449_v29 = vld [vmem:[#allocation2 + $0x70] sm:$0xf] }
  0xed   : > { %v8182_v50 = vrot.slane %v2442_v33, 9  ;;  %v1751_v45 = vshll.u32 %v1507_v32, 16  ;;  %1016 = vst [vmem:[#allocation2 + $0xa4] sm:$0x1] %v1015_v48  ;;  %v2573_v59 = vrot.slane %v2571_v35, 4  ;;  %v2574_v62 = vrot.slane %v2444_v6, 5 }
  0xee   : > { %v1757_v63 = vshll.u32 %v1508_v22, 16  ;;  %v1761_v2 = vshrl.u32 %v1508_v22, 16  ;;  %v1712_v3 = vsel %vm9552_vm13, %v1707_v31, %v9688_v7  ;;  %v1722_v4 = vsel %vm9552_vm13, %v1717_v43, %v1721_v16  ;;  %v2448_v33 = vld [vmem:[#allocation2 + $0x6c] sm:$0xe]  ;;  %v2450_v31 = vld [vmem:[#allocation2 + $0x74] sm:$0x1] }
  0xef   : > { %8164 = vmatmul.mubr.msk.bf16.gmra.mxu1 %vm1174_vm6, %v8144_v53  ;;  %v1748_v53 = vshrl.u32 %v1507_v32, 16  ;;  %v1730_v9 = vor.u32 %v1729_v44, %v1726_v11  ;;  %v1740_v13 = vor.u32 %v1739_v47, %v9716_v39  ;;  %v1743_v14 = vshll.u32 %v1506_v51, 16  ;;  %v1512_v51 = vld [vmem:[#allocation2 + $0x80] sm:$0x1] }
  0xf0   : > { %2128 = vmatprep.mubr.bf16.mxu1 %v8996_v0  ;;  %v1753_v58 = vrot.slane %v1751_v45, 5  ;;  %v2572_v23 = vsel %vm9558_vm14, %v8182_v50, %v2571_v35  ;;  %v2575_v7 = vsel %vm9558_vm14, %v2573_v59, %v2574_v62  ;;  %v9733_v17 = vrot.slane %v1757_v63, 5  ;;  %v1514_v62 = vld [vmem:[#allocation2 + $0x88] sm:$0xf] }
  0xf1   : > { %v1750_v21 = vrot.slane %v1748_v53, 4  ;;  %v1763_v10 = vrot.slane %v1761_v2, 4  ;;  %v8146_v25 = vcombine.low %v1712_v3, %v1722_v4  ;;  %v2578_v15 = vrot.slane %v2446_v20, 5  ;;  %v1513_v53 = vld [vmem:[#allocation2 + $0x84] sm:$0xf] }
  0xf2   : > { %8216 = vmatmul.mubr.msk.bf16.gmra.mxu0 %vm1174_vm6, %v8196_v42  ;;  %v1511_v42 = vld [vmem:[#allocation2 + $0x7c] sm:$0xf]  ;;  %v1731_v49 = vrot.slane %v1730_v9, 4  ;;  %v1741_v8 = vrot.slane %v1740_v13, 4  ;;  %v1745_v27 = vrot.slane %v1743_v14, 5  ;;  %v8198_v19 = vcombine.low %v2572_v23, %v2575_v7 }
  0xf3   : > { %2845 = vmatprep.mubr.bf16.mxu0 %v8996_v0  ;;  %v8183_v46 = vrot.slane %v2445_v12, 9  ;;  %v1754_v24 = vor.u32 %v1753_v58, %v1750_v21  ;;  %v1764_v18 = vor.u32 %v1763_v10, %v9733_v17  ;;  %v1767_v28 = vshll.u32 %v1509_v60, 16  ;;  %v1021_v9 = vld [vmem:[#allocation2 + $0xb0] sm:$0x1]  ;;  %v2451_v10 = vld [vmem:[#allocation2 + $0x78] sm:$0xe] }
  0xf4   : > { %v1772_v30 = vshrl.u32 %v1510_v26, 16  ;;  %v1775_v32 = vshll.u32 %v1510_v26, 16  ;;  %v2580_v22 = vrot.slane %v2578_v15, 4  ;;  %v2581_v34 = vrot.slane %v2447_v54, 5  ;;  %v1517_v26 = vld [vmem:[#allocation2 + $0x94] sm:$0xf] }
  0xf5   : > { %v1781_v36 = vshll.u32 %v1511_v42, 16  ;;  %v1736_v38 = vsel %vm9552_vm13, %v1731_v49, %v9716_v39  ;;  %v1746_v40 = vsel %vm9552_vm13, %v1741_v8, %v1745_v27  ;;  %v2579_v6 = vsel %vm9558_vm14, %v8183_v46, %v2578_v15  ;;  %v2453_v49 = vld [vmem:[#allocation2 + $0x80] sm:$0x1]  ;;  %v1028_v27 = vld [vmem:[#allocation2 + $0xbc] sm:$0x1] }
  0xf6   : > { %v1755_v35 = vrot.slane %v1754_v24, 4  ;;  %v2585_v43 = vrot.slane %v2449_v29, 5  ;;  %v1765_v16 = vrot.slane %v1764_v18, 4  ;;  %v1769_v11 = vrot.slane %v1767_v28, 5  ;;  %v1515_v18 = vld [vmem:[#allocation2 + $0x8c] sm:$0x1] }
  0xf7   : > { %8165 = vmatmul.mubr.msk.bf16.gmra.mxu1 %vm1174_vm6, %v8145_v37  ;;  %v1785_v37 = vshrl.u32 %v1511_v42, 16  ;;  %v1774_v44 = vrot.slane %v1772_v30, 4  ;;  %v1777_v47 = vrot.slane %v1775_v32, 5  ;;  %v8147_v48 = vcombine.low %v1736_v38, %v1746_v40  ;;  %v2455_v32 = vld [vmem:[#allocation2 + $0x88] sm:$0xf] }
  0xf8   : > { %2138 = vmatprep.mubr.bf16.mxu1 %v8996_v0  ;;  %v2582_v39 = vsel %vm9558_vm14, %v2580_v22, %v2581_v34  ;;  %v837_v45 = vrot.slane %v9489_v57, 4  ;;  %v8184_v59 = vrot.slane %v2448_v33, 9  ;;  %v1760_v2 = vsel %vm9552_vm13, %v1755_v35, %v9733_v17  ;;  %v2452_v57 = vld [vmem:[#allocation2 + $0x7c] sm:$0xf]  ;;  %v1516_v17 = vld [vmem:[#allocation2 + $0x90] sm:$0xf] }
  0xf9   : > { %v1787_v50 = vrot.slane %v1785_v37, 4  ;;  %v8199_v63 = vcombine.low %v2579_v6, %v2582_v39  ;;  %v2587_v3 = vrot.slane %v2585_v43, 4  ;;  %v2588_v4 = vrot.slane %v2450_v31, 5  ;;  %v2456_v39 = vld [vmem:[#allocation2 + $0x8c] sm:$0x1] }
  0xfa   : > { %8217 = vmatmul.mubr.msk.bf16.gmra.mxu0 %vm1174_vm6, %v8197_v41  ;;  %v9750_v41 = vrot.slane %v1781_v36, 5  ;;  %v1770_v13 = vsel %vm9552_vm13, %v1765_v16, %v1769_v11  ;;  %v1778_v14 = vor.u32 %v1777_v47, %v1774_v44  ;;  %v1791_v12 = vshll.u32 %v1512_v51, 16  ;;  %v2454_v47 = vld [vmem:[#allocation2 + $0x84] sm:$0xe] }
  0xfb   : > { %2855 = vmatprep.mubr.bf16.mxu0 %v8996_v0  ;;  %v1796_v21 = vshrl.u32 %v1513_v53, 16  ;;  %v1799_v58 = vshll.u32 %v1513_v53, 16  ;;  %v1805_v23 = vshll.u32 %v1514_v62, 16  ;;  %v1809_v7 = vshrl.u32 %v1514_v62, 16  ;;  %v1518_v62 = vld [vmem:[#allocation2 + $0x98] sm:$0x1] }
  0xfc   : > { %v1788_v20 = vor.u32 %v1787_v50, %v9750_v41  ;;  %v1022_v42 = vsel %vm9287_vm3, %v837_v45, %v1021_v9  ;;  %v2586_v15 = vsel %vm9558_vm14, %v8184_v59, %v2585_v43  ;;  %v2589_v60 = vsel %vm9558_vm14, %v2587_v3, %v2588_v4  ;;  %v1519_v4 = vld [vmem:[#allocation2 + $0x9c] sm:$0xf]  ;;  %v1520_v9 = vld [vmem:[#allocation2 + $0xa0] sm:$0xf] }
  0xfd   : > { %v2592_v8 = vrot.slane %v2452_v57, 5  ;;  %1023 = vst [vmem:[#allocation2 + $0xb0] sm:$0x1] %v1022_v42  ;;  %v8148_v54 = vcombine.low %v1760_v2, %v1770_v13  ;;  %v1793_v24 = vrot.slane %v1791_v12, 5  ;;  %v1801_v28 = vrot.slane %v1799_v58, 5 }
  0xfe   : > { %v1789_v46 = vrot.slane %v1788_v20, 4  ;;  %v9770_v29 = vrot.slane %v1805_v23, 5  ;;  %v1811_v30 = vrot.slane %v1809_v7, 4  ;;  %v1820_v22 = vshrl.u32 %v1516_v17, 16  ;;  %v2458_v7 = vld [vmem:[#allocation2 + $0x94] sm:$0xf] }
  0xff   : > { %8166 = vmatmul.mubr.msk.bf16.gmra.mxu1 %vm1174_vm6, %v8146_v25  ;;  %v854_v25 = vrot.slane %v9515_v52, 4  ;;  %v1798_v52 = vrot.slane %v1796_v21, 4  ;;  %v1823_v34 = vshll.u32 %v1516_v17, 16  ;;  %v1829_v36 = vshll.u32 %v1517_v26, 16 }
 0x100   : > { %2148 = vmatprep.mubr.bf16.mxu1 %v8996_v0  ;;  %v1833_v37 = vshrl.u32 %v1517_v26, 16  ;;  %v8200_v38 = vcombine.low %v2586_v15, %v2589_v60  ;;  %v8185_v40 = vrot.slane %v2451_v10, 9  ;;  %v2594_v33 = vrot.slane %v2592_v8, 4 }
 0x101   : > { %v2595_v6 = vrot.slane %v2453_v49, 5  ;;  %v1815_v31 = vshll.u32 %v1515_v18, 16  ;;  %v1029_v43 = vsel %vm9287_vm3, %v854_v25, %v1028_v27  ;;  %v1794_v16 = vsel %vm9552_vm13, %v1789_v46, %v1793_v24  ;;  %v2459_v24 = vld [vmem:[#allocation2 + $0x98] sm:$0x1] }
 0x102   : > { %8218 = vmatmul.mubr.msk.bf16.gmra.mxu0 %vm1174_vm6, %v8198_v19  ;;  %v1779_v19 = vrot.slane %v1778_v14, 4  ;;  %v1802_v11 = vor.u32 %v1801_v28, %v1798_v52  ;;  %v1812_v44 = vor.u32 %v1811_v30, %v9770_v29  ;;  %1030 = vst [vmem:[#allocation2 + $0xbc] sm:$0x1] %v1029_v43  ;;  %v1822_v50 = vrot.slane %v1820_v22, 4 }
 0x103   : > { %2865 = vmatprep.mubr.bf16.mxu0 %v8996_v0  ;;  %v1825_v51 = vrot.slane %v1823_v34, 5  ;;  %v9782_v53 = vrot.slane %v1829_v36, 5  ;;  %v2593_v45 = vsel %vm9558_vm14, %v8185_v40, %v2592_v8  ;;  %v2596_v59 = vsel %vm9558_vm14, %v2594_v33, %v2595_v6  ;;  %v1522_v34 = vld [vmem:[#allocation2 + $0xa8] sm:$0xf]  ;;  %v1523_v36 = vld [vmem:[#allocation2 + $0xac] sm:$0xf] }
 0x104   : > { %v1784_v35 = vsel %vm9552_vm13, %v1779_v19, %v9750_v41  ;;  %v1835_v41 = vrot.slane %v1833_v37, 4  ;;  %v1817_v2 = vrot.slane %v1815_v31, 5  ;;  %v8186_v3 = vrot.slane %v2454_v47, 9  ;;  %v2457_v19 = vld [vmem:[#allocation2 + $0x90] sm:$0xe] }
 0x105   : > { %v1803_v13 = vrot.slane %v1802_v11, 4  ;;  %v1813_v14 = vrot.slane %v1812_v44, 4  ;;  %v2602_v12 = vrot.slane %v2456_v39, 5  ;;  %v8201_v57 = vcombine.low %v2593_v45, %v2596_v59  ;;  %v2460_v59 = vld [vmem:[#allocation2 + $0x9c] sm:$0xe] }
 0x106   : > { %v1826_v21 = vor.u32 %v1825_v51, %v1822_v50  ;;  %v1836_v58 = vor.u32 %v1835_v41, %v9782_v53  ;;  %v1839_v23 = vshll.u32 %v1518_v62, 16  ;;  %v1844_v17 = vshrl.u32 %v1519_v4, 16 }
 0x107   : > { %8167 = vmatmul.mubr.msk.bf16.gmra.mxu1 %vm1174_vm6, %v8147_v48  ;;  %v2599_v48 = vrot.slane %v2455_v32, 5  ;;  %v1847_v10 = vshll.u32 %v1519_v4, 16  ;;  %v1853_v26 = vshll.u32 %v1520_v9, 16  ;;  %v1857_v42 = vshrl.u32 %v1520_v9, 16  ;;  %v1521_v32 = vld [vmem:[#allocation2 + $0xa4] sm:$0x1] }
 0x108   : > { %2158 = vmatprep.mubr.bf16.mxu1 %v8996_v0  ;;  %v1808_v25 = vsel %vm9552_vm13, %v1803_v13, %v9770_v29  ;;  %v1818_v15 = vsel %vm9552_vm13, %v1813_v14, %v1817_v2  ;;  %v1827_v8 = vrot.slane %v1826_v21, 4  ;;  %v1837_v27 = vrot.slane %v1836_v58, 4  ;;  %v1525_v13 = vld [vmem:[#allocation2 + $0xb4] sm:$0xf] }
 0x109   : > { %v2601_v20 = vrot.slane %v2599_v48, 4  ;;  %v2600_v60 = vsel %vm9558_vm14, %v8186_v3, %v2599_v48  ;;  %v2606_v46 = vrot.slane %v2458_v7, 5  ;;  %v1846_v18 = vrot.slane %v1844_v17, 4 }
 0x10a   : > { %8219 = vmatmul.mubr.msk.bf16.gmra.mxu0 %vm1174_vm6, %v8199_v63  ;;  %v8149_v63 = vcombine.low %v1784_v35, %v1794_v16  ;;  %v1849_v52 = vrot.slane %v1847_v10, 5  ;;  %v9803_v28 = vrot.slane %v1853_v26, 5  ;;  %v1859_v29 = vrot.slane %v1857_v42, 4  ;;  %v2461_v16 = vld [vmem:[#allocation2 + $0xa0] sm:$0xf] }
 0x10b   : > { %2875 = vmatprep.mubr.bf16.mxu0 %v8996_v0  ;;  %v2603_v49 = vsel %vm9558_vm14, %v2601_v20, %v2602_v12  ;;  %v8150_v30 = vcombine.low %v1808_v25, %v1818_v15  ;;  %v8187_v22 = vrot.slane %v2457_v19, 9  ;;  %v2608_v40 = vrot.slane %v2606_v46, 4  ;;  %v1524_v20 = vld [vmem:[#allocation2 + $0xb0] sm:$0x1]  ;;  %v1526_v12 = vld [vmem:[#allocation2 + $0xb8] sm:$0xf] }
 0x10c   : > { %v8202_v37 = vcombine.low %v2600_v60, %v2603_v49  ;;  %v2609_v33 = vrot.slane %v2459_v24, 5  ;;  %v1850_v35 = vor.u32 %v1849_v52, %v1846_v18  ;;  %v1860_v31 = vor.u32 %v1859_v29, %v9803_v28  ;;  %v2464_v42 = vld [vmem:[#allocation2 + $0xac] sm:$0xf]  ;;  %v2463_v24 = vld [vmem:[#allocation2 + $0xa8] sm:$0xe] }
 0x10d   : > { %v1863_v43 = vshll.u32 %v1521_v32, 16  ;;  %v1868_v11 = vshrl.u32 %v1522_v34, 16  ;;  %v1871_v44 = vshll.u32 %v1522_v34, 16  ;;  %v1877_v47 = vshll.u32 %v1523_v36, 16 }
 0x10e   : > { %v1881_v48 = vshrl.u32 %v1523_v36, 16  ;;  %v2607_v50 = vsel %vm9558_vm14, %v8187_v22, %v2606_v46  ;;  %v2610_v51 = vsel %vm9558_vm14, %v2608_v40, %v2609_v33  ;;  %v1861_v41 = vrot.slane %v1860_v31, 4  ;;  %v1527_v33 = vld [vmem:[#allocation2 + $0xbc] sm:$0x1] }
 0x10f   : > { %8168 = vmatmul.mubr.msk.bf16.gmra.mxu1 %vm1174_vm6, %v8148_v54  ;;  %v1841_v54 = vrot.slane %v1839_v23, 5  ;;  %v1865_v45 = vrot.slane %v1863_v43, 5  ;;  %v2613_v62 = vrot.slane %v2461_v16, 5  ;;  %v1870_v2 = vrot.slane %v1868_v11, 4  ;;  %v2467_v16 = vld [vmem:[#allocation2 + $0xb8] sm:$0xf] }
 0x110   : > { %2168 = vmatprep.mubr.bf16.mxu1 %v8996_v0  ;;  %v1873_v3 = vrot.slane %v1871_v44, 5  ;;  %v9820_v4 = vrot.slane %v1877_v47, 5  ;;  %v1883_v9 = vrot.slane %v1881_v48, 4  ;;  %v8203_v14 = vcombine.low %v2607_v50, %v2610_v51  ;;  %v3708_v11 = vld [vmem:[#allocation2 + $0xc] sm:$0xf] }
 0x111   : > { %v1842_v6 = vsel %vm9552_vm13, %v1837_v27, %v1841_v54  ;;  %v8188_v58 = vrot.slane %v2460_v59, 9  ;;  %v2615_v23 = vrot.slane %v2613_v62, 4  ;;  %v1866_v17 = vsel %vm9552_vm13, %v1861_v41, %v1865_v45  ;;  %v3709_v50 = vld [vmem:[#allocation2 + $0x10] sm:$0xf]  ;;  %v2466_v41 = vld [vmem:[#allocation2 + $0xb4] sm:$0xe] }
 0x112   : > { %8220 = vmatmul.mubr.msk.bf16.gmra.mxu0 %vm1174_vm6, %v8200_v38  ;;  %v1832_v38 = vsel %vm9552_vm13, %v1827_v8, %v9782_v53  ;;  %v1851_v53 = vrot.slane %v1850_v35, 4  ;;  %v1874_v10 = vor.u32 %v1873_v3, %v1870_v2  ;;  %v1884_v26 = vor.u32 %v1883_v9, %v9820_v4  ;;  %v2468_v2 = vld [vmem:[#allocation2 + $0xbc] sm:$0x1] }
 0x113   : > { %2885 = vmatprep.mubr.bf16.mxu0 %v8996_v0  ;;  %v8151_v39 = vcombine.low %v1832_v38, %v1842_v6  ;;  %v1892_v25 = vshrl.u32 %v1525_v13, 16  ;;  %v1887_v60 = vshll.u32 %v1524_v20, 16  ;;  %v1895_v49 = vshll.u32 %v1525_v13, 16 }
 0x114   : > { %v1856_v21 = vsel %vm9552_vm13, %v1851_v53, %v9803_v28  ;;  %v1901_v8 = vshll.u32 %v1526_v12, 16  ;;  %v1905_v27 = vshrl.u32 %v1526_v12, 16  ;;  %v2614_v19 = vsel %vm9558_vm14, %v8188_v58, %v2613_v62 }
 0x115   : > { %v2620_v18 = vrot.slane %v2464_v42, 5  ;;  %v8152_v52 = vcombine.low %v1856_v21, %v1866_v17  ;;  %v1875_v28 = vrot.slane %v1874_v10, 4  ;;  %v1885_v29 = vrot.slane %v1884_v26, 4  ;;  %v3711_v42 = vld [vmem:[#allocation2 + $0x18] sm:$0xf] }
 0x116   : > { %v1894_v32 = vrot.slane %v1892_v25, 4  ;;  %v1889_v34 = vrot.slane %v1887_v60, 5  ;;  %v1897_v36 = vrot.slane %v1895_v49, 5  ;;  %v1907_v38 = vrot.slane %v1905_v27, 4  ;;  %v3712_v60 = vld [vmem:[#allocation2 + $0x1c] sm:$0xf] }
 0x117   : > { %8169 = vmatmul.mubr.msk.bf16.gmra.mxu1 %vm1174_vm6, %v8149_v63  ;;  %v2462_v63 = vld [vmem:[#allocation2 + $0xa4] sm:$0x1]  ;;  %v8189_v40 = vrot.slane %v2463_v24, 9  ;;  %v2622_v35 = vrot.slane %v2620_v18, 4  ;;  %v1880_v43 = vsel %vm9552_vm13, %v1875_v28, %v9820_v4  ;;  %v2627_v45 = vrot.slane %v2467_v16, 5 }
 0x118   : > { %2178 = vmatprep.mubr.bf16.mxu1 %v8996_v0  ;;  %v2616_v7 = vrot.slane %v2462_v63, 5  ;;  %v1890_v44 = vsel %vm9552_vm13, %v1885_v29, %v1889_v34  ;;  %v1898_v47 = vor.u32 %v1897_v36, %v1894_v32  ;;  %v3757_v59 = vshrl.u32 %v3708_v11, 16 }
 0x119   : > { %v2621_v51 = vsel %vm9558_vm14, %v8189_v40, %v2620_v18  ;;  %v3760_v62 = vshll.u32 %v3708_v11, 16  ;;  %v8153_v63 = vcombine.low %v1880_v43, %v1890_v44  ;;  %v3766_v3 = vshll.u32 %v3709_v50, 16  ;;  %v3714_v43 = vld [vmem:[#allocation2 + $0x24] sm:$0xf]  ;;  %v3715_v11 = vld [vmem:[#allocation2 + $0x28] sm:$0xf] }
 0x11a   : > { %8221 = vmatmul.mubr.msk.bf16.gmra.mxu0 %vm1174_vm6, %v8201_v57  ;;  %v2617_v46 = vsel %vm9558_vm14, %v2615_v23, %v2616_v7  ;;  %v3770_v4 = vshrl.u32 %v3709_v50, 16  ;;  %v1899_v9 = vrot.slane %v1898_v47, 4  ;;  %v8190_v12 = vrot.slane %v2466_v41, 9  ;;  %v3710_v23 = vld [vmem:[#allocation2 + $0x14] sm:$0x1]  ;;  %v8784_v41 = vld [vmem:[#allocation2 + $0xc] sm:$0xff]  }
 0x11b   : > { %2895 = vmatprep.mubr.bf16.mxu0 %v8996_v0  ;;  %v8204_v6 = vcombine.low %v2614_v19, %v2617_v46  ;;  %v2629_v21 = vrot.slane %v2627_v45, 4  ;;  %v2630_v58 = vrot.slane %v2468_v2, 5  ;;  %v3759_v7 = vrot.slane %v3757_v59, 4  ;;  %v8781_v2 = vld [vmem:[#allocation9 + $0xb0] ss:$8 sps:$4 sm:$0xff]  }
 0x11c   : > { %v3762_v17 = vrot.slane %v3760_v62, 5  ;;  %v9856_v10 = vrot.slane %v3766_v3, 5  ;;  %v3772_v26 = vrot.slane %v3770_v4, 4  ;;  %v2628_v49 = vsel %vm9558_vm14, %v8190_v12, %v2627_v45 }
 0x11d   : > { %v2631_v27 = vsel %vm9558_vm14, %v2629_v21, %v2630_v58  ;;  %v3781_v24 = vshrl.u32 %v3711_v42, 16  ;;  %v3784_v18 = vshll.u32 %v3711_v42, 16  ;;  %v3790_v29 = vshll.u32 %v3712_v60, 16 }
 0x11e   : > { %v3763_v46 = vor.u32 %v3762_v17, %v3759_v7  ;;  %v3773_v28 = vor.u32 %v3772_v26, %v9856_v10  ;;  %v3814_v62 = vshll.u32 %v3715_v11, 16  ;;  %v3718_v17 = vld [vmem:[#allocation2 + $0x34] sm:$0xf]  ;;  %v3716_v26 = vld [vmem:[#allocation2 + $0x2c] sm:$0x1]  ;;  %vm7915_vm15 = vcmask 1043456  }
 0x11f   : > { %8170 = vmatmul.mubr.msk.bf16.gmra.mxu1 %vm1174_vm6, %v8150_v30  ;;  %v2465_v30 = vld [vmem:[#allocation2 + $0xb0] sm:$0x1]  ;;  %v3786_v40 = vrot.slane %v3784_v18, 5  ;;  %v3842_v18 = vshrl.u32 %v3718_v17, 16 }
 0x120   : > { %2188 = vmatprep.mubr.bf16.mxu1 %v8996_v0  ;;  %v2623_v31 = vrot.slane %v2465_v30, 5  ;;  %v3794_v30 = vshrl.u32 %v3712_v60, 16  ;;  %v3764_v36 = vrot.slane %v3763_v46, 4  ;;  %v8802_v46 = vld [vmem:[#allocation9 + $0xc4] ss:$8 sps:$4 sm:$0xff]  }
 0x122   : > { %8222 = vmatmul.mubr.msk.bf16.gmra.mxu0 %vm1174_vm6, %v8202_v37  ;;  %v1903_v37 = vrot.slane %v1901_v8, 5  ;;  %v2624_v53 = vsel %vm9558_vm14, %v2622_v35, %v2623_v31  ;;  %v3776_v8 = vshll.u32 %v3710_v23, 16  ;;  %v9872_v35 = vrot.slane %v3790_v29, 5  ;;  %v8785_v29 = vld [vmem:[#allocation2 + $0x18] sm:$0xff]  }
 0x123   : > { %2905 = vmatprep.mubr.bf16.mxu0 %v8996_v0  ;;  %v9822_v57 = vpop.f32.mrf.mxu0  ;;  %v8205_v20 = vcombine.low %v2621_v51, %v2624_v53  ;;  %v3796_v31 = vrot.slane %v3794_v30, 4  ;;  %v3769_v47 = vsel %vm9552_vm13, %v3764_v36, %v9856_v10  ;;  %v3805_v51 = vshrl.u32 %v3714_v43, 16  ;;  %v8800_v36 = vld [vmem:[#allocation9 + $0xc0] ss:$8 sps:$4 sm:$0xff]  }
 0x124   : > { %v1908_v48 = vor.u32 %v1907_v38, %v1903_v37  ;;  %v1904_v25 = vsel %vm9552_vm13, %v1899_v9, %v1903_v37  ;;  %v3713_v37 = vld [vmem:[#allocation2 + $0x20] sm:$0x1]  ;;  %v3783_v38 = vrot.slane %v3781_v24, 4  ;;  %v3808_v53 = vshll.u32 %v3714_v43, 16  ;;  %v8786_v9 = vld [vmem:[#allocation9 + $0xd0] ss:$8 sps:$4 sm:$0xff]  }
 0x125   : > { %v1259_v15 = vpop.f32.mrf.mxu0  ;;  %v3800_v44 = vshll.u32 %v3713_v37, 16  ;;  %v3797_v59 = vor.u32 %v3796_v31, %v9872_v35  ;;  %v3807_v7 = vrot.slane %v3805_v51, 4  ;;  %v3838_v24 = vshll.u32 %v3718_v17, 16 }
 0x126   : > { %1417 = vst.msk [vmem:[#allocation3 + $0x8] sm:$0xff] %vm1174_vm6, %v1259_v15  ;;  %v1909_v13 = vrot.slane %v1908_v48, 4  ;;  %v3787_v50 = vor.u32 %v3786_v40, %v3783_v38  ;;  %v3810_v42 = vrot.slane %v3808_v53, 5 }
 0x127   : > { %8171 = vmatmul.mubr.msk.bf16.gmra.mxu1 %vm1174_vm6, %v8151_v39  ;;  %v9833_v54 = vpop.f32.mrf.mxu0  ;;  %v1911_v39 = vshll.u32 %v1527_v33, 16  ;;  %v3774_v33 = vrot.slane %v3773_v28, 4  ;;  %v3802_v58 = vrot.slane %v3800_v44, 5  ;;  %v3798_v10 = vrot.slane %v3797_v59, 4 }
 0x128   : > { %2198 = vmatprep.mubr.bf16.mxu1 %v8996_v0  ;;  %v3788_v21 = vrot.slane %v3787_v50, 4  ;;  %v8811_v50 = vld [vmem:[#allocation9 + $0xf4] ss:$8 sps:$4 sm:$0xff]  }
 0x129   : > { %v1263_v22 = vpop.f32.mrf.mxu0  ;;  %v3803_v30 = vsel %vm9552_vm13, %v3798_v10, %v3802_v58 }
 0x12a   : > { %8223 = vmatmul.mubr.msk.bf16.gmra.mxu0 %vm1174_vm6, %v8203_v14  ;;  %1419 = vst.msk [vmem:[#allocation3 + $0x18] sm:$0xff] %vm1174_vm6, %v1263_v22  ;;  %v1913_v14 = vrot.slane %v1911_v39, 5  ;;  %v8206_v22 = vcombine.low %v2628_v49, %v2631_v27 }
 0x12b   : > { %2915 = vmatprep.mubr.bf16.mxu0 %v8996_v0 }
 0x12c   : > { %v1914_v15 = vsel %vm9552_vm13, %v1909_v13, %v1913_v14  ;;  %v3717_v13 = vld [vmem:[#allocation2 + $0x30] sm:$0xf]  ;;  %v8797_v14 = vld [vmem:[#allocation9 + $0xa4] ss:$8 sps:$4 sm:$0xff]  }
 0x12d   : > { %v3832_v27 = vshll.u32 %v3717_v13, 16 }
 0x12f   : > { %8172 = vmatmul.mubr.msk.bf16.gmra.mxu1 %vm1174_vm6, %v8152_v52  ;;  %v8154_v52 = vcombine.low %v1904_v25, %v1914_v15  ;;  %v9891_v25 = vrot.slane %v3814_v62, 5  ;;  %v3834_v40 = vrot.slane %v3832_v27, 5 }
 0x130   : > { %2208 = vmatprep.mubr.bf16.mxu1 %v8996_v0 }
 0x132   : > { %8224 = vmatmul.mubr.msk.bf16.gmra.mxu0 %vm1174_vm6, %v8204_v6  ;;  %v3778_v6 = vrot.slane %v3776_v8, 5  ;;  %v3829_v8 = vshrl.u32 %v3717_v13, 16  ;;  %v8789_v13 = vld [vmem:[#allocation2 + $0x24] sm:$0xff]  }
 0x133   : > { %2925 = vmatprep.mubr.bf16.mxu0 %v8996_v0 }
 0x134   : > { %v3779_v45 = vsel %vm9552_vm13, %v3774_v33, %v3778_v6  ;;  %v3831_v38 = vrot.slane %v3829_v8, 4  ;;  %v9905_v33 = vrot.slane %v3838_v24, 5  ;;  %v3844_v6 = vrot.slane %v3842_v18, 4  ;;  %v8815_v24 = vld [vmem:[#allocation9 + $0x114] ss:$8 sps:$4 sm:$0xff]  }
 0x135   : > { %v3724_v18 = vld [vmem:[#allocation2 + $0x4c] sm:$0xf] }
 0x136   : > { %v3845_v62 = vor.u32 %v3844_v6, %v9905_v33 }
 0x137   : > { %8173 = vmatmul.mubr.msk.bf16.gmra.mxu1 %vm1174_vm6, %v8153_v63  ;;  %v3818_v63 = vshrl.u32 %v3715_v11, 16  ;;  %v3721_v11 = vld [vmem:[#allocation2 + $0x40] sm:$0xf] }
 0x138   : > { %2218 = vmatprep.mubr.bf16.mxu1 %v8996_v0 }
 0x139   : > { %v3820_v15 = vrot.slane %v3818_v63, 4 }
 0x13a   : > { %8225 = vmatmul.mubr.msk.bf16.gmra.mxu0 %vm1174_vm6, %v8205_v20  ;;  %v8263_v20 = vcombine.low %v3769_v47, %v3779_v45 }
 0x13b   : > { %2935 = vmatprep.mubr.bf16.mxu0 %v8996_v0 }
 0x13f   : > { %8174 = vmatmul.mubr.msk.bf16.gmra.mxu1 %vm1174_vm6, %v8154_v52  ;;  %v3793_v52 = vsel %vm9552_vm13, %v3788_v21, %v9872_v35  ;;  %v3720_v35 = vld [vmem:[#allocation2 + $0x3c] sm:$0xf] }
 0x140   : > { %v1337_v19 = vpop.f32.mrf.mxu1  ;;  %3355 = vmatprep.mubr.bf16.mxu1 %v8996_v0  ;;  %v8264_v31 = vcombine.low %v3793_v52, %v3803_v30  ;;  %v3853_v45 = vshrl.u32 %v3720_v35, 16  ;;  %v3856_v59 = vshll.u32 %v3720_v35, 16 }
 0x141   : > { %1448 = vst [vmem:[#allocation3 + $0x100] sm:$0xff] %v1337_v19  ;;  %v8795_v19 = vld [vmem:[#allocation9 + $0xa0] ss:$8 sps:$4 sm:$0xff]  }
 0x142   : > { %v1339_v32 = vpop.f32.mrf.mxu1  ;;  %8226 = vmatmul.mubr.msk.bf16.gmra.mxu0 %vm1174_vm6, %v8206_v22  ;;  %v3821_v22 = vor.u32 %v3820_v15, %v9891_v25  ;;  %v3855_v17 = vrot.slane %v3853_v45, 4  ;;  %v3858_v10 = vrot.slane %v3856_v59, 5  ;;  %v3722_v15 = vld [vmem:[#allocation2 + $0x44] sm:$0x1]  ;;  %v3725_v59 = vld [vmem:[#allocation2 + $0x50] sm:$0x1] }
 0x143   : > { %1449 = vst.msk [vmem:[#allocation3 + $0x108] sm:$0xff] %vm1174_vm6, %v1339_v32  ;;  %4293 = vmatprep.mubr.bf16.mxu0 %v8996_v0  ;;  %v3811_v32 = vor.u32 %v3810_v42, %v3807_v7 }
 0x144   : > { %v1341_v34 = vpop.f32.mrf.mxu1  ;;  %v3822_v47 = vrot.slane %v3821_v22, 4  ;;  %v3872_v22 = vshll.u32 %v3722_v15, 16 }
 0x145   : > { %1450 = vst [vmem:[#allocation3 + $0x110] sm:$0xff] %v1341_v34  ;;  %v9880_v39 = vpop.f32.mrf.mxu0  ;;  %v3824_v34 = vshll.u32 %v3716_v26, 16  ;;  %v3812_v44 = vrot.slane %v3811_v32, 4  ;;  %v3846_v26 = vrot.slane %v3845_v62, 4  ;;  %v3859_v32 = vor.u32 %v3858_v10, %v3855_v17  ;;  %v3727_v10 = vld [vmem:[#allocation2 + $0x58] sm:$0xf] }
 0x146   : > { %v1343_v16 = vpop.f32.mrf.mxu1  ;;  %v3896_v17 = vshll.u32 %v3725_v59, 16  ;;  %v3729_v59 = vld [vmem:[#allocation2 + $0x60] sm:$0xf] }
 0x147   : > { %1451 = vst.msk [vmem:[#allocation3 + $0x118] sm:$0xff] %vm1174_vm6, %v1343_v16  ;;  %v1269_v4 = vpop.f32.mrf.mxu0  ;;  %8247 = vmatmul.mubr.msk.bf16.vlgmr.msra.gmra.mxu1 %vm1174_vm6, %v8784_v41  ;;  %v3719_v16 = vld [vmem:[#allocation2 + $0x38] sm:$0x1]  ;;  %v3835_v41 = vor.u32 %v3834_v40, %v3831_v38 }
 0x148   : > { %v1347_v48 = vpop.f32.mrf.mxu1  ;;  %1421 = vst.msk [vmem:[#allocation3 + $0x28] sm:$0xff] %vm1174_vm6, %v1269_v4  ;;  %4988 = vmatpush1.bf16.msra.mxu1 %v8781_v2  ;;  %3365 = vmatprep.mubr.bf16.mxu1 %v8996_v0  ;;  %v3848_v63 = vshll.u32 %v3719_v16, 16  ;;  %v3862_v4 = vshll.u32 %v3721_v11, 16  ;;  %v8838_v16 = vld [vmem:[#allocation7] ss:$0 sm:$0xff] }
 0x149   : > { %1452 = vst [vmem:[#allocation3 + $0x120] sm:$0xff] %v1347_v48  ;;  %v9888_v23 = vpop.f32.mrf.mxu0  ;;  %4989 = vmatprep.subr.bf16.mxu1 %v8797_v14  ;;  %v3826_v48 = vrot.slane %v3824_v34, 5  ;;  %v3817_v14 = vsel %vm9552_vm13, %v3812_v44, %v9891_v25  ;;  %v3836_v7 = vrot.slane %v3835_v41, 4  ;;  %v8837_v34 = vld [vmem:[%s11365_s1] ss:$0 sm:$0xff]  ;;  %v8790_v44 = vld [vmem:[#allocation2 + $0x30] sm:$0xff]  }
 0x14a   : > { %v1349_v3 = vpop.f32.mrf.mxu1  ;;  %8283 = vmatmul.mubr.msk.bf16.vlgmr.msra.gmra.mxu0 %vm1174_vm6, %v8263_v20  ;;  %v3850_v42 = vrot.slane %v3848_v63, 5  ;;  %v9925_v8 = vrot.slane %v3862_v4, 5 }
 0x14b   : > { %1453 = vst.msk [vmem:[#allocation3 + $0x128] sm:$0xff] %vm1174_vm6, %v1349_v3  ;;  %v1273_v49 = vpop.f32.mrf.mxu0  ;;  %5559 = vmatpush1.bf16.msra.mxu0 %v8786_v9  ;;  %4303 = vmatprep.mubr.bf16.mxu0 %v8996_v0  ;;  %v3866_v9 = vshrl.u32 %v3721_v11, 16  ;;  %v3827_v20 = vsel %vm9552_vm13, %v3822_v47, %v3826_v48 }
 0x14c   : > { %v1351_v12 = vpop.f32.mrf.mxu1  ;;  %1423 = vst.msk [vmem:[#allocation3 + $0x38] sm:$0xff] %vm1174_vm6, %v1273_v49  ;;  %4990 = vmatpush1.bf16.msra.mxu1 %v8795_v19  ;;  %5560 = vmatprep.subr.bf16.mxu0 %v8802_v46  ;;  %v3723_v19 = vld [vmem:[#allocation2 + $0x48] sm:$0xf] }
 0x14d   : > { %1454 = vst [vmem:[#allocation3 + $0x130] sm:$0xff] %v1351_v12  ;;  %6496 = vmatprep.subr.bf16.mxu1 %v8811_v50  ;;  %v8656_v12 = vld [vmem:[%s9165_s28 + $0x78] sm:$0xff]   ;;  %v3868_v27 = vrot.slane %v3866_v9, 4  ;;  %v3877_v38 = vshrl.u32 %v3723_v19, 16  ;;  %v3880_v40 = vshll.u32 %v3723_v19, 16  ;;  %v3860_v50 = vrot.slane %v3859_v32, 4 }
 0x14e   : > { %v1353_v60 = vpop.f32.mrf.mxu1  ;;  %v8640_v46 = vunpack.c.l.bf16 %v8656_v12  ;;  %v8641_v52 = vunpack.c.h.bf16 %v8656_v12  ;;  %s8925_s28 = scalar_lea.vmem %s8924_s26, 8192 }
 0x14f   : > { %1455 = vst.msk [vmem:[#allocation3 + $0x138] sm:$0xff] %vm1174_vm6, %v1353_v60  ;;  %8248 = vmatmul.mubr.msk.bf16.gmra.mxu1 %vm1174_vm6, %v8785_v29  ;;  %5561 = vmatpush1.bf16.msra.mxu0 %v8800_v36  ;;  %v8265_v60 = vcombine.low %v3817_v14, %v3827_v20  ;;  %v3841_v29 = vsel %vm9552_vm13, %v3836_v7, %v9905_v33  ;;  %v3879_v62 = vrot.slane %v3877_v38, 4  ;;  %v3882_v63 = vrot.slane %v3880_v40, 5  ;;  %v3726_v14 = vld [vmem:[#allocation2 + $0x54] sm:$0xf]  ;;  %p8927_p10 = scmp.lt.s32.totalorder %s8925_s28, %s8919_s25 }
 0x150   : > { %v1357_v28 = vpop.f32.mrf.mxu1  ;;  %3375 = vmatprep.mubr.bf16.mxu1 %v8996_v0  ;;  %v9909_v51 = vpop.f32.mrf.mxu0  ;;  %v373_v36 = vmul.f32 %v8837_v34, %v8640_v46  ;;  %7210 = vmatprep.subr.bf16.mxu0 %v8815_v24  ;;  %v374_v6 = vmul.f32 %v8837_v34, %v8641_v52  ;;  %v3869_v35 = vor.u32 %v3868_v27, %v9925_v8  ;;  %v3904_v24 = vshll.u32 %v3726_v14, 16  ;;  %v1035_v38 = vld [vmem:[#allocation2 + $0xc8] sm:$0x1] }
 0x151   : > { %1456 = vst [vmem:[#allocation3 + $0x140] sm:$0xff] %v1357_v28  ;;  %v3865_v7 = vsel %vm9552_vm13, %v3860_v50, %v9925_v8  ;;  %v3898_v34 = vrot.slane %v3896_v17, 5  ;;  %p8928_p1 = por %p8927_p10, %p8926_p9 }
 0x152   : > { %v1359_v37 = vpop.f32.mrf.mxu1  ;;  %8284 = vmatmul.mubr.msk.bf16.gmra.mxu0 %vm1174_vm6, %v8264_v31  ;;  %v1279_v2 = vpop.f32.mrf.mxu0  ;;  %v3886_v31 = vshll.u32 %v3724_v18, 16  ;;  %v411_v11 = vadd.f32 %v8838_v16, %v373_v36  ;;  %v412_v47 = vadd.f32 %v8838_v16, %v374_v6  ;;  %v3870_v4 = vrot.slane %v3869_v35, 4 }
 0x153   : > { %1457 = vst.msk [vmem:[#allocation3 + $0x148] sm:$0xff] %vm1174_vm6, %v1359_v37  ;;  %4313 = vmatprep.mubr.bf16.mxu0 %v8996_v0  ;;  %1425 = vst.msk [vmem:[#allocation3 + $0x48] sm:$0xff] %vm1174_vm6, %v1279_v2  ;;  %v3851_v37 = vsel %vm9552_vm13, %v3846_v26, %v3850_v42  ;;  %p8929_p12 = pnand %p8928_p1, %p8922_p5 }
 0x154   : > { %v1361_v43 = vpop.f32.mrf.mxu1  ;;  %v9922_v21 = vpop.f32.mrf.mxu0  ;;  %v443_v41 = vmax.f32 %v411_v11, 0.0  ;;  %v8266_v45 = vcombine.low %v3841_v29, %v3851_v37  ;;  %v444_v2 = vmax.f32 %v412_v47, 0.0  ;;  %v9947_v9 = vrot.slane %v3886_v31, 5  ;;  %v3728_v11 = vld [vmem:[#allocation2 + $0x5c] sm:$0x1] }
 0x155   : > { %1458 = vst [vmem:[#allocation3 + $0x150] sm:$0xff] %v1361_v43  ;;  %v3890_v43 = vshrl.u32 %v3724_v18, 16  ;;  %v8791_v18 = vld [vmem:[#allocation2 + $0x3c] sm:$0xff]   ;;  %v3910_v29 = vshll.u32 %v3727_v10, 16  ;;  %v3906_v47 = vrot.slane %v3904_v24, 5 }
 0x156   : > { %v1363_v53 = vpop.f32.mrf.mxu1  ;;  %v1283_v25 = vpop.f32.mrf.mxu0  ;;  %v8543_v20 = vpack.c.bf16 %v443_v41, %v443_v41 }
 0x157   : > { %1459 = vst.msk [vmem:[#allocation3 + $0x158] sm:$0xff] %vm1174_vm6, %v1363_v53  ;;  %8249 = vmatmul.mubr.msk.bf16.gmra.mxu1 %vm1174_vm6, %v8789_v13  ;;  %1427 = vst.msk [vmem:[#allocation3 + $0x58] sm:$0xff] %vm1174_vm6, %v1283_v25  ;;  %v3874_v53 = vrot.slane %v3872_v22, 5  ;;  %v3892_v13 = vrot.slane %v3890_v43, 4  ;;  %v3901_v25 = vshrl.u32 %v3726_v14, 16  ;;  %v9967_v41 = vrot.slane %v3910_v29, 5 }
 0x158   : > { %v1367_v3 = vpop.f32.mrf.mxu1  ;;  %3385 = vmatprep.mubr.bf16.mxu1 %v8996_v0  ;;  %v9930_v28 = vpop.f32.mrf.mxu0  ;;  %v856_v26 = vshrl.u32 %v8543_v20, 16  ;;  %v859_v42 = vshll.u32 %v8543_v20, 16  ;;  %v1031_v22 = vld [vmem:[#allocation2 + $0xc0] sm:$0xf]  ;;  %v3925_v14 = vshrl.u32 %v3729_v59, 16  ;;  %v3928_v20 = vshll.u32 %v3729_v59, 16 }
 0x159   : > { %1460 = vst [vmem:[#allocation3 + $0x160] sm:$0xff] %v1367_v3  ;;  %v3875_v19 = vsel %vm9552_vm13, %v3870_v4, %v3874_v53  ;;  %v3893_v46 = vor.u32 %v3892_v13, %v9947_v9  ;;  %v3920_v4 = vshll.u32 %v3728_v11, 16  ;;  %v3735_v59 = vld [vmem:[#allocation2 + $0x78] sm:$0xf] }
 0x15a   : > { %v1369_v58 = vpop.f32.mrf.mxu1  ;;  %8285 = vmatmul.mubr.msk.bf16.gmra.mxu0 %vm1174_vm6, %v8265_v60  ;;  %v1289_v33 = vpop.f32.mrf.mxu0  ;;  %v3883_v60 = vor.u32 %v3882_v63, %v3879_v62  ;;  %v858_v8 = vrot.slane %v856_v26, 7  ;;  %v8267_v6 = vcombine.low %v3865_v7, %v3875_v19  ;;  %v3927_v24 = vrot.slane %v3925_v14, 4 }
 0x15b   : > { %1461 = vst.msk [vmem:[#allocation3 + $0x168] sm:$0xff] %vm1174_vm6, %v1369_v58  ;;  %4323 = vmatprep.mubr.bf16.mxu0 %v8996_v0  ;;  %1429 = vst.msk [vmem:[#allocation3 + $0x68] sm:$0xff] %vm1174_vm6, %v1289_v33  ;;  %v8544_v58 = vpack.c.bf16 %v444_v2, %v444_v2  ;;  %v3894_v16 = vrot.slane %v3893_v46, 4  ;;  %v3730_v2 = vld [vmem:[#allocation2 + $0x64] sm:$0xf]  ;;  %v3973_v14 = vshrl.u32 %v3735_v59, 16 }
 0x15c   : > { %v1371_v49 = vpop.f32.mrf.mxu1  ;;  %v9945_v48 = vpop.f32.mrf.mxu0  ;;  %v861_v36 = vor.u32 %v859_v42, %v858_v8  ;;  %v862_v37 = vrot.slane %v858_v8, 4  ;;  %v3884_v35 = vrot.slane %v3883_v60, 4  ;;  %v3938_v26 = vshrl.u32 %v3730_v2, 16  ;;  %v3731_v60 = vld [vmem:[#allocation2 + $0x68] sm:$0x1] }
 0x15d   : > { %1462 = vst [vmem:[#allocation3 + $0x170] sm:$0xff] %v1371_v49  ;;  %v864_v49 = vshrl.u32 %v8544_v58, 16  ;;  %v867_v27 = vshll.u32 %v8544_v58, 16  ;;  %v3899_v7 = vsel %vm9552_vm13, %v3894_v16, %v3898_v34 }
 0x15e   : > { %v1373_v30 = vpop.f32.mrf.mxu1  ;;  %v1293_v3 = vpop.f32.mrf.mxu0  ;;  %v1032_v50 = vsel %vm9330_vm8, %v861_v36, %v1031_v22  ;;  %v3889_v1 = vsel %vm9552_vm13, %v3884_v35, %v9947_v9  ;;  %v3944_v36 = vshll.u32 %v3731_v60, 16 }
 0x15f   : > { %1463 = vst.msk [vmem:[#allocation3 + $0x178] sm:$0xff] %vm1174_vm6, %v1373_v30  ;;  %8250 = vmatmul.mubr.msk.bf16.gmra.mxu1 %vm1174_vm6, %v8790_v44  ;;  %1431 = vst.msk [vmem:[#allocation3 + $0x78] sm:$0xff] %vm1174_vm6, %v1293_v3  ;;  %v3914_v30 = vshrl.u32 %v3727_v10, 16  ;;  %v866_v32 = vrot.slane %v864_v49, 7  ;;  %v3903_v44 = vrot.slane %v3901_v25, 4  ;;  %v3934_v10 = vshll.u32 %v3730_v2, 16 }
 0x160   : > { %v1377_v12 = vpop.f32.mrf.mxu1  ;;  %3395 = vmatprep.mubr.bf16.mxu1 %v8996_v0  ;;  %1033 = vst [vmem:[#allocation2 + $0xc0] sm:$0xf] %v1032_v50  ;;  %v3732_v25 = vld [vmem:[#allocation2 + $0x6c] sm:$0xf]  ;;  %v3733_v49 = vld [vmem:[#allocation2 + $0x70] sm:$0xf] }
 0x161   : > { %1464 = vst [vmem:[#allocation3 + $0x180] sm:$0xff] %v1377_v12  ;;  %v869_v31 = vor.u32 %v867_v27, %v866_v32  ;;  %v871_v43 = vrot.slane %v866_v32, 4  ;;  %v3907_v13 = vor.u32 %v3906_v47, %v3903_v44  ;;  %v8792_v12 = vld [vmem:[#allocation2 + $0x48] sm:$0xff]   ;;  %v8268_v27 = vcombine.low %v3889_v1, %v3899_v7  ;;  %v3734_v2 = vld [vmem:[#allocation2 + $0x74] sm:$0x1] }
 0x162   : > { %v1379_v15 = vpop.f32.mrf.mxu1  ;;  %8286 = vmatmul.mubr.msk.bf16.gmra.mxu0 %vm1174_vm6, %v8266_v45  ;;  %v3916_v45 = vrot.slane %v3914_v30, 4  ;;  %v3936_v29 = vrot.slane %v3934_v10, 5  ;;  %v3940_v30 = vrot.slane %v3938_v26, 4  ;;  %v3949_v22 = vshrl.u32 %v3732_v25, 16  ;;  %v8794_v10 = vld [vmem:[#allocation2 + $0x60] sm:$0xff]  }
 0x163   : > { %1465 = vst.msk [vmem:[#allocation3 + $0x188] sm:$0xff] %vm1174_vm6, %v1379_v15  ;;  %4333 = vmatprep.mubr.bf16.mxu0 %v8996_v0  ;;  %v870_v62 = vsel %vm9322_vm7, %v862_v37, %v869_v31  ;;  %v1036_v63 = vsel %vm9287_vm3, %v871_v43, %v1035_v38  ;;  %v3922_v15 = vrot.slane %v3920_v4, 5  ;;  %v3908_v46 = vrot.slane %v3907_v13, 4 }
 0x164   : > { %v1381_v52 = vpop.f32.mrf.mxu1  ;;  %1034 = vst.msk [vmem:[#allocation2 + $0xc4] sm:$0xf] %vm461_vm0, %v870_v62  ;;  %1037 = vst [vmem:[#allocation2 + $0xc8] sm:$0x1] %v1036_v63  ;;  %v3917_v17 = vor.u32 %v3916_v45, %v9967_v41  ;;  %v3952_v34 = vshll.u32 %v3732_v25, 16  ;;  %v3958_v37 = vshll.u32 %v3733_v49, 16  ;;  %v3941_v16 = vor.u32 %v3940_v30, %v3936_v29 }
 0x165   : > { %1466 = vst [vmem:[#allocation3 + $0x190] sm:$0xff] %v1381_v52  ;;  %v9961_v40 = vpop.f32.mrf.mxu0  ;;  %v3930_v52 = vrot.slane %v3928_v20, 5  ;;  %v3962_v38 = vshrl.u32 %v3733_v49, 16  ;;  %v3913_v35 = vsel %vm9552_vm13, %v3908_v46, %v9967_v41  ;;  %v3951_v44 = vrot.slane %v3949_v22, 4 }
 0x166   : > { %v1383_v33 = vpop.f32.mrf.mxu1  ;;  %v3954_v47 = vrot.slane %v3952_v34, 5  ;;  %v3942_v63 = vrot.slane %v3941_v16, 4  ;;  %v3976_v20 = vshll.u32 %v3735_v59, 16  ;;  %v3968_v7 = vshll.u32 %v3734_v2, 16  ;;  %v3739_v34 = vld [vmem:[#allocation2 + $0x88] sm:$0xf] }
 0x167   : > { %1467 = vst.msk [vmem:[#allocation3 + $0x198] sm:$0xff] %vm1174_vm6, %v1383_v33  ;;  %8251 = vmatmul.mubr.msk.bf16.gmra.mxu1 %vm1174_vm6, %v8791_v18  ;;  %v1299_v53 = vpop.f32.mrf.mxu0  ;;  %v3918_v18 = vrot.slane %v3917_v17, 4  ;;  %v3931_v43 = vor.u32 %v3930_v52, %v3927_v24  ;;  %v3964_v45 = vrot.slane %v3962_v38, 4  ;;  %v3738_v52 = vld [vmem:[#allocation2 + $0x84] sm:$0xf]  ;;  %v4006_v16 = vshll.u32 %v3739_v34, 16 }
 0x168   : > { %1433 = vst.msk [vmem:[#allocation3 + $0x88] sm:$0xff] %vm1174_vm6, %v1299_v53  ;;  %3405 = vmatprep.mubr.bf16.mxu1 %v8996_v0  ;;  %v1387_v61 = vpop.f32.mrf.mxu1  ;;  %v10004_v53 = vrot.slane %v3958_v37, 5  ;;  %v3955_v13 = vor.u32 %v3954_v47, %v3951_v44  ;;  %v8798_v47 = vld [vmem:[#allocation2 + $0x6c] sm:$0xff]   ;;  %vm7916_vm0 = vcmask 261124  }
 0x169   : > { %v9976_v3 = vpop.f32.mrf.mxu0  ;;  %1468 = vst [vmem:[#allocation3 + $0x1a0] sm:$0xff] %v1387_v61  ;;  %v3923_v31 = vsel %vm9552_vm13, %v3918_v18, %v3922_v15  ;;  %v3932_v41 = vrot.slane %v3931_v43, 4  ;;  %v3946_v61 = vrot.slane %v3944_v36, 5  ;;  %v3970_v18 = vrot.slane %v3968_v7, 5  ;;  %v3737_v36 = vld [vmem:[#allocation2 + $0x80] sm:$0x1]  ;;  %vm10994_vm1 = vmor %vm7916_vm0, %vm7915_vm15 }
 0x16a   : > { %8287 = vmatmul.mubr.msk.bf16.gmra.mxu0 %vm1174_vm6, %v8267_v6  ;;  %v1389_v56 = vpop.f32.mrf.mxu1  ;;  %v8793_v6 = vld [vmem:[#allocation2 + $0x54] sm:$0xff]   ;;  %v8269_v50 = vcombine.low %v3913_v35, %v3923_v31  ;;  %v3956_v49 = vrot.slane %v3955_v13, 4  ;;  %v4000_v43 = vshll.u32 %v3738_v52, 16 }
 0x16b   : > { %v1303_v58 = vpop.f32.mrf.mxu0  ;;  %1469 = vst.msk [vmem:[#allocation3 + $0x1a8] sm:$0xff] %vm1174_vm6, %v1389_v56  ;;  %4343 = vmatprep.mubr.bf16.mxu0 %v8996_v0  ;;  %v3736_v56 = vld [vmem:[#allocation2 + $0x7c] sm:$0xf]  ;;  %v3937_v26 = vsel %vm9552_vm13, %v3932_v41, %v3936_v29 }
 0x16c   : > { %1435 = vst.msk [vmem:[#allocation3 + $0x98] sm:$0xff] %vm1174_vm6, %v1303_v58  ;;  %v1391_v42 = vpop.f32.mrf.mxu1  ;;  %v3965_v58 = vor.u32 %v3964_v45, %v10004_v53  ;;  %v3982_v15 = vshll.u32 %v3736_v56, 16  ;;  %v3986_v60 = vshrl.u32 %v3736_v56, 16  ;;  %v3961_v38 = vsel %vm9552_vm13, %v3956_v49, %v10004_v53 }
 0x16d   : > { %v9988_v9 = vpop.f32.mrf.mxu0  ;;  %1470 = vst [vmem:[#allocation3 + $0x1b0] sm:$0xff] %v1391_v42  ;;  %v3947_v42 = vsel %vm9552_vm13, %v3942_v63, %v3946_v61  ;;  %v3992_v53 = vshll.u32 %v3737_v36, 16  ;;  %v3740_v63 = vld [vmem:[#allocation2 + $0x8c] sm:$0x1]  ;;  %v4002_v56 = vrot.slane %v4000_v43, 5 }
 0x16e   : > { %v1393_v19 = vpop.f32.mrf.mxu1  ;;  %v8270_v24 = vcombine.low %v3937_v26, %v3947_v42  ;;  %v10024_v29 = vrot.slane %v3982_v15, 5  ;;  %v3988_v22 = vrot.slane %v3986_v60, 4  ;;  %v2230_v42 = vld [vmem:[#allocation3 + $0x8] sm:$0xff]  ;;  %v4016_v15 = vshll.u32 %v3740_v63, 16 }
 0x16f   : > { %8252 = vmatmul.mubr.msk.bf16.gmra.mxu1 %vm1174_vm6, %v8792_v12  ;;  %v1309_v8 = vpop.f32.mrf.mxu0  ;;  %1471 = vst.msk [vmem:[#allocation3 + $0x1b8] sm:$0xff] %vm1174_vm6, %v1393_v19  ;;  %v3978_v19 = vrot.slane %v3976_v20, 5 }
 0x170   : > { %1437 = vst.msk [vmem:[#allocation3 + $0xa8] sm:$0xff] %vm1174_vm6, %v1309_v8  ;;  %3415 = vmatprep.mubr.bf16.mxu1 %v8996_v0  ;;  %v3966_v8 = vrot.slane %v3965_v58, 4  ;;  %v3994_v58 = vrot.slane %v3992_v53, 5 }
 0x171   : > { %v9994_v32 = vpop.f32.mrf.mxu0 }
 0x172   : > { %8288 = vmatmul.mubr.msk.bf16.gmra.mxu0 %vm1174_vm6, %v8268_v27  ;;  %v3975_v27 = vrot.slane %v3973_v14, 4  ;;  %v3971_v31 = vsel %vm9552_vm13, %v3966_v8, %v3970_v18  ;;  %v3741_v14 = vld [vmem:[#allocation2 + $0x90] sm:$0xf] }
 0x173   : > { %v1313_v33 = vpop.f32.mrf.mxu0  ;;  %4353 = vmatprep.mubr.bf16.mxu0 %v8996_v0  ;;  %v4021_v60 = vshrl.u32 %v3741_v14, 16  ;;  %v4024_v49 = vshll.u32 %v3741_v14, 16 }
 0x174   : > { %1439 = vst.msk [vmem:[#allocation3 + $0xb8] sm:$0xff] %vm1174_vm6, %v1313_v33  ;;  %v3997_v33 = vshrl.u32 %v3738_v52, 16  ;;  %v8799_v52 = vld [vmem:[#allocation2 + $0x78] sm:$0xff]  }
 0x175   : > { %v1397_v11 = vpop.f32.mrf.mxu1 }
 0x176   : > { %1472 = vst [vmem:[#allocation3 + $0x1c0] sm:$0xff] %v1397_v11  ;;  %v4010_v11 = vshrl.u32 %v3739_v34, 16  ;;  %v3999_v2 = vrot.slane %v3997_v33, 4  ;;  %v4026_v33 = vrot.slane %v4024_v49, 5 }
 0x177   : > { %8253 = vmatmul.mubr.msk.bf16.gmra.mxu1 %vm1174_vm6, %v8793_v6  ;;  %v1399_v62 = vpop.f32.mrf.mxu1  ;;  %v3979_v6 = vor.u32 %v3978_v19, %v3975_v27 }
 0x178   : > { %1473 = vst.msk [vmem:[#allocation3 + $0x1c8] sm:$0xff] %vm1174_vm6, %v1399_v62  ;;  %v10008_v4 = vpop.f32.mrf.mxu0  ;;  %3425 = vmatprep.mubr.bf16.mxu1 %v8996_v0  ;;  %v8271_v62 = vcombine.low %v3961_v38, %v3971_v31  ;;  %v4012_v13 = vrot.slane %v4010_v11, 4  ;;  %v2232_v38 = vld [vmem:[#allocation3 + $0x18] sm:$0xff] }
 0x179   : > { %v1401_v1 = vpop.f32.mrf.mxu1  ;;  %v3980_v41 = vrot.slane %v3979_v6, 4  ;;  %v4023_v6 = vrot.slane %v4021_v60, 4 }
 0x17a   : > { %1474 = vst [vmem:[#allocation3 + $0x1d0] sm:$0xff] %v1401_v1  ;;  %8289 = vmatmul.mubr.msk.bf16.gmra.mxu0 %vm1174_vm6, %v8269_v50  ;;  %v1319_v12 = vpop.f32.mrf.mxu0  ;;  %v3989_v50 = vor.u32 %v3988_v22, %v10024_v29  ;;  %v10042_v1 = vrot.slane %v4006_v16, 5 }
 0x17b   : > { %1441 = vst.msk [vmem:[#allocation3 + $0xc8] sm:$0xff] %vm1174_vm6, %v1319_v12  ;;  %v1403_v17 = vpop.f32.mrf.mxu1  ;;  %4363 = vmatprep.mubr.bf16.mxu0 %v8996_v0  ;;  %v4027_v14 = vor.u32 %v4026_v33, %v4023_v6 }
 0x17c   : > { %1475 = vst.msk [vmem:[#allocation3 + $0x1d8] sm:$0xff] %vm1174_vm6, %v1403_v17  ;;  %v10020_v25 = vpop.f32.mrf.mxu0  ;;  %v3990_v12 = vrot.slane %v3989_v50, 4  ;;  %v3744_v50 = vld [vmem:[#allocation2 + $0x9c] sm:$0xf] }
 0x17e   : > { %v1323_v46 = vpop.f32.mrf.mxu0 }
 0x17f   : > { %v1407_v30 = vpop.f32.mrf.mxu1  ;;  %8254 = vmatmul.mubr.msk.bf16.gmra.mxu1 %vm1174_vm6, %v8794_v10  ;;  %1443 = vst.msk [vmem:[#allocation3 + $0xd8] sm:$0xff] %vm1174_vm6, %v1323_v46  ;;  %v3742_v10 = vld [vmem:[#allocation2 + $0x94] sm:$0xf]  ;;  %v3985_v46 = vsel %vm9552_vm13, %v3980_v41, %v10024_v29  ;;  %v3745_v41 = vld [vmem:[#allocation2 + $0xa0] sm:$0xf] }
 0x180   : > { %1476 = vst [vmem:[#allocation3 + $0x1e0] sm:$0xff] %v1407_v30  ;;  %3435 = vmatprep.mubr.bf16.mxu1 %v8996_v0  ;;  %v3995_v30 = vsel %vm9552_vm13, %v3990_v12, %v3994_v58  ;;  %v4030_v22 = vshll.u32 %v3742_v10, 16  ;;  %v4034_v34 = vshrl.u32 %v3742_v10, 16  ;;  %v4048_v12 = vshll.u32 %v3744_v50, 16 }
 0x181   : > { %v1409_v37 = vpop.f32.mrf.mxu1  ;;  %v8272_v16 = vcombine.low %v3985_v46, %v3995_v30  ;;  %v4054_v10 = vshll.u32 %v3745_v41, 16 }
 0x182   : > { %1477 = vst.msk [vmem:[#allocation3 + $0x1e8] sm:$0xff] %vm1174_vm6, %v1409_v37  ;;  %v10031_v35 = vpop.f32.mrf.mxu0  ;;  %8290 = vmatmul.mubr.msk.bf16.gmra.mxu0 %vm1174_vm6, %v8270_v24  ;;  %v4013_v24 = vor.u32 %v4012_v13, %v10042_v1  ;;  %v2234_v13 = vld [vmem:[#allocation3 + $0x28] sm:$0xff]  ;;  %v4050_v30 = vrot.slane %v4048_v12, 5 }
 0x183   : > { %v1411_v44 = vpop.f32.mrf.mxu1  ;;  %4373 = vmatprep.mubr.bf16.mxu0 %v8996_v0 }
 0x184   : > { %1478 = vst [vmem:[#allocation3 + $0x1f0] sm:$0xff] %v1411_v44  ;;  %v1329_v45 = vpop.f32.mrf.mxu0  ;;  %v4018_v44 = vrot.slane %v4016_v15, 5 }
 0x185   : > { %1445 = vst.msk [vmem:[#allocation3 + $0xe8] sm:$0xff] %vm1174_vm6, %v1329_v45  ;;  %v1413_v59 = vpop.f32.mrf.mxu1 }
 0x186   : > { %1479 = vst.msk [vmem:[#allocation3 + $0x1f8] sm:$0xff] %vm1174_vm6, %v1413_v59  ;;  %v10040_v61 = vpop.f32.mrf.mxu0  ;;  %v4014_v59 = vrot.slane %v4013_v24, 4 }
 0x187   : > { %v2070_v20 = vpop.f32.mrf.mxu1  ;;  %8255 = vmatmul.mubr.msk.bf16.gmra.mxu1 %vm1174_vm6, %v8798_v47  ;;  %v3743_v47 = vld [vmem:[#allocation2 + $0x98] sm:$0x1] }
 0x188   : > { %v2293_v7 = vadd.f32 %v2070_v20, %v9822_v57  ;;  %v1333_v17 = vpop.f32.mrf.mxu0  ;;  %3445 = vmatprep.mubr.bf16.mxu1 %v8996_v0  ;;  %v4003_v57 = vor.u32 %v4002_v56, %v3999_v2  ;;  %v4045_v20 = vshrl.u32 %v3744_v50, 16 }
 0x189   : > { %1447 = vst.msk [vmem:[#allocation3 + $0xf8] sm:$0xff] %vm1174_vm6, %v1333_v17  ;;  %v2072_v26 = vpop.f32.mrf.mxu1  ;;  %v4040_v17 = vshll.u32 %v3743_v47, 16 }
 0x18a   : > { %v2294_v27 = vadd.f32 %v2230_v42, %v2072_v26  ;;  %v2787_v19 = vpop.f32.mrf.mxu0  ;;  %8291 = vmatmul.mubr.msk.bf16.gmra.mxu0 %vm1174_vm6, %v8271_v62  ;;  %v4004_v11 = vrot.slane %v4003_v57, 4  ;;  %v10059_v62 = vrot.slane %v4030_v22, 5  ;;  %v4058_v26 = vshrl.u32 %v3745_v41, 16  ;;  %v3747_v22 = vld [vmem:[#allocation2 + $0xa8] sm:$0xf] }
 0x18b   : > { %v2074_v8 = vpop.f32.mrf.mxu1  ;;  %v3010_v18 = vadd.f32 %v2787_v19, %v2293_v7  ;;  %4383 = vmatprep.mubr.bf16.mxu0 %v8996_v0  ;;  %v4072_v41 = vshll.u32 %v3747_v22, 16 }
 0x18c   : > { %2358 = vst.msk [vmem:[#allocation3 + $0x8] sm:$0xff] %vm1174_vm6, %v2294_v27  ;;  %v2295_v36 = vadd.f32 %v2074_v8, %v9833_v54  ;;  %v2789_v37 = vpop.f32.mrf.mxu0  ;;  %v4036_v54 = vrot.slane %v4034_v34, 4  ;;  %v4009_v49 = vsel %vm9552_vm13, %v4004_v11, %v10042_v1  ;;  %v4019_v27 = vsel %vm9552_vm13, %v4014_v59, %v4018_v44  ;;  %v3746_v11 = vld [vmem:[#allocation2 + $0xa4] sm:$0x1] }
 0x18d   : > { %3074 = vst [vmem:[#allocation3] sm:$0xff] %v3010_v18  ;;  %v2076_v29 = vpop.f32.mrf.mxu1  ;;  %v2236_v18 = vld [vmem:[#allocation3 + $0x38] sm:$0xff]  ;;  %v2238_v59 = vld [vmem:[#allocation3 + $0x48] sm:$0xff] }
 0x18e   : > { %v2296_v31 = vadd.f32 %v2232_v38, %v2076_v29  ;;  %v2791_v43 = vpop.f32.mrf.mxu0  ;;  %v4037_v19 = vor.u32 %v4036_v54, %v10059_v62  ;;  %v10075_v29 = vrot.slane %v4054_v10, 5  ;;  %v4060_v38 = vrot.slane %v4058_v26, 4 }
 0x18f   : > { %v2080_v53 = vpop.f32.mrf.mxu1  ;;  %v3012_v45 = vadd.f32 %v2791_v43, %v2295_v36  ;;  %8256 = vmatmul.mubr.msk.bf16.gmra.mxu1 %vm1174_vm6, %v8799_v52  ;;  %v4047_v52 = vrot.slane %v4045_v20, 4  ;;  %v8273_v36 = vcombine.low %v4009_v49, %v4019_v27  ;;  %v3750_v49 = vld [vmem:[#allocation2 + $0xb4] sm:$0xf] }
 0x190   : > { %2360 = vst.msk [vmem:[#allocation3 + $0x18] sm:$0xff] %vm1174_vm6, %v2296_v31  ;;  %v2297_v63 = vadd.f32 %v2080_v53, %v9880_v39  ;;  %v2793_v2 = vpop.f32.mrf.mxu0  ;;  %3455 = vmatprep.mubr.bf16.mxu1 %v8996_v0  ;;  %v8803_v39 = vld [vmem:[#allocation2 + $0x84] sm:$0xff]   ;;  %v4038_v43 = vrot.slane %v4037_v19, 4  ;;  %v4069_v53 = vshrl.u32 %v3747_v22, 16  ;;  %v2240_v19 = vld [vmem:[#allocation3 + $0x58] sm:$0xff] }
 0x191   : > { %3076 = vst [vmem:[#allocation3 + $0x10] sm:$0xff] %v3012_v45  ;;  %v2082_v56 = vpop.f32.mrf.mxu1  ;;  %v4051_v54 = vor.u32 %v4050_v30, %v4047_v52 }
 0x192   : > { %v2298_v58 = vadd.f32 %v2234_v13, %v2082_v56  ;;  %v2797_v7 = vpop.f32.mrf.mxu0  ;;  %8292 = vmatmul.mubr.msk.bf16.gmra.mxu0 %vm1174_vm6, %v8272_v16  ;;  %v4042_v16 = vrot.slane %v4040_v17, 5 }
 0x193   : > { %v2947_v42 = vld [vmem:[#allocation3 + $0x8] sm:$0xff]  ;;  %v2084_v15 = vpop.f32.mrf.mxu1  ;;  %v3014_v60 = vadd.f32 %v2797_v7, %v2297_v63  ;;  %4393 = vmatprep.mubr.bf16.mxu0 %v8996_v0  ;;  %v8804_v7 = vld [vmem:[#allocation2 + $0x90] sm:$0xff]  }
 0x194   : > { %v3011_v46 = vadd.f32 %v2947_v42, %v2789_v37  ;;  %2362 = vst.msk [vmem:[#allocation3 + $0x28] sm:$0xff] %vm1174_vm6, %v2298_v58  ;;  %v2299_v57 = vadd.f32 %v2084_v15, %v9888_v23  ;;  %v2799_v24 = vpop.f32.mrf.mxu0  ;;  %v3748_v37 = vld [vmem:[#allocation2 + $0xac] sm:$0xf]  ;;  %v4028_v23 = vrot.slane %v4027_v14, 4  ;;  %v4043_v10 = vsel %vm9552_vm13, %v4038_v43, %v4042_v16  ;;  %v2242_v43 = vld [vmem:[#allocation3 + $0x68] sm:$0xff] }
 0x195   : > { %3078 = vst [vmem:[#allocation3 + $0x20] sm:$0xff] %v3014_v60  ;;  %v2086_v8 = vpop.f32.mrf.mxu1  ;;  %v4078_v63 = vshll.u32 %v3748_v37, 16  ;;  %v4082_v56 = vshrl.u32 %v3748_v37, 16  ;;  %v3749_v60 = vld [vmem:[#allocation2 + $0xb0] sm:$0x1] }
 0x196   : > { %3075 = vst.msk [vmem:[#allocation3 + $0x8] sm:$0xff] %vm1174_vm6, %v3011_v46  ;;  %v2300_v1 = vadd.f32 %v2236_v18, %v2086_v8  ;;  %v2801_v34 = vpop.f32.mrf.mxu0  ;;  %v4033_v17 = vsel %vm9552_vm13, %v4028_v23, %v10059_v62  ;;  %v4052_v46 = vrot.slane %v4051_v54, 4 }
 0x197   : > { %v2949_v6 = vld [vmem:[#allocation3 + $0x18] sm:$0xff]  ;;  %v2090_v33 = vpop.f32.mrf.mxu1  ;;  %v3016_v31 = vadd.f32 %v2801_v34, %v2299_v57  ;;  %8257 = vmatmul.mubr.msk.bf16.gmra.mxu1 %vm1174_vm6, %v8803_v39  ;;  %v4071_v39 = vrot.slane %v4069_v53, 4  ;;  %v4074_v57 = vrot.slane %v4072_v41, 5  ;;  %v10092_v8 = vrot.slane %v4078_v63, 5 }
 0x198   : > { %v3013_v44 = vadd.f32 %v2949_v6, %v2793_v2  ;;  %2364 = vst.msk [vmem:[#allocation3 + $0x38] sm:$0xff] %vm1174_vm6, %v2300_v1  ;;  %v2301_v47 = vadd.f32 %v2090_v33, %v9909_v51  ;;  %v2803_v50 = vpop.f32.mrf.mxu0  ;;  %3465 = vmatprep.mubr.bf16.mxu1 %v8996_v0  ;;  %v4061_v2 = vor.u32 %v4060_v38, %v10075_v29  ;;  %v4064_v51 = vshll.u32 %v3746_v11, 16 }
 0x199   : > { %3080 = vst [vmem:[#allocation3 + $0x30] sm:$0xff] %v3016_v31  ;;  %v2092_v45 = vpop.f32.mrf.mxu1  ;;  %v4084_v62 = vrot.slane %v4082_v56, 4  ;;  %v8274_v52 = vcombine.low %v4033_v17, %v4043_v10  ;;  %v4088_v33 = vshll.u32 %v3749_v60, 16  ;;  %v4093_v31 = vshrl.u32 %v3750_v49, 16  ;;  %v8805_v56 = vld [vmem:[#allocation2 + $0x9c] sm:$0xff]  }
 0x19a   : > { %3077 = vst.msk [vmem:[#allocation3 + $0x18] sm:$0xff] %vm1174_vm6, %v3013_v44  ;;  %v2302_v13 = vadd.f32 %v2238_v59, %v2092_v45  ;;  %v2807_v14 = vpop.f32.mrf.mxu0  ;;  %8293 = vmatmul.mubr.msk.bf16.gmra.mxu0 %vm1174_vm6, %v8273_v36  ;;  %v4062_v30 = vrot.slane %v4061_v2, 4  ;;  %v4066_v22 = vrot.slane %v4064_v51, 5  ;;  %v3751_v36 = vld [vmem:[#allocation2 + $0xb8] sm:$0xf]  ;;  %v4057_v16 = vsel %vm9552_vm13, %v4052_v46, %v10075_v29 }
 0x19b   : > { %v2951_v20 = vld [vmem:[#allocation3 + $0x28] sm:$0xff]  ;;  %v2094_v12 = vpop.f32.mrf.mxu1  ;;  %v3018_v58 = vadd.f32 %v2807_v14, %v2301_v47  ;;  %4403 = vmatprep.mubr.bf16.mxu0 %v8996_v0  ;;  %v4075_v11 = vor.u32 %v4074_v57, %v4071_v39  ;;  %v4085_v44 = vor.u32 %v4084_v62, %v10092_v8  ;;  %v4096_v47 = vshll.u32 %v3750_v49, 16  ;;  %v3752_v60 = vld [vmem:[#allocation2 + $0xbc] sm:$0x1] }
 0x19c   : > { %v3015_v26 = vadd.f32 %v2951_v20, %v2799_v24  ;;  %2366 = vst.msk [vmem:[#allocation3 + $0x48] sm:$0xff] %vm1174_vm6, %v2302_v13  ;;  %v2303_v42 = vadd.f32 %v2094_v12, %v9922_v21  ;;  %v2809_v15 = vpop.f32.mrf.mxu0  ;;  %v4067_v53 = vsel %vm9552_vm13, %v4062_v30, %v4066_v22  ;;  %v4102_v45 = vshll.u32 %v3751_v36, 16  ;;  %v2244_v20 = vld [vmem:[#allocation3 + $0x78] sm:$0xff] }
 0x19d   : > { %3082 = vst [vmem:[#allocation3 + $0x40] sm:$0xff] %v3018_v58  ;;  %v2096_v27 = vpop.f32.mrf.mxu1  ;;  %v4106_v59 = vshrl.u32 %v3751_v36, 16  ;;  %v4090_v2 = vrot.slane %v4088_v33, 5  ;;  %v8275_v12 = vcombine.low %v4057_v16, %v4067_v53  ;;  %v4076_v58 = vrot.slane %v4075_v11, 4 }
 0x19e   : > { %3079 = vst.msk [vmem:[#allocation3 + $0x28] sm:$0xff] %vm1174_vm6, %v3015_v26  ;;  %v2304_v18 = vadd.f32 %v2240_v19, %v2096_v27  ;;  %v2811_v24 = vpop.f32.mrf.mxu0  ;;  %v4098_v17 = vrot.slane %v4096_v47, 5  ;;  %v3753_v19 = vld [vmem:[#allocation2 + $0xc0] sm:$0xf] }
 0x19f   : > { %v2953_v21 = vld [vmem:[#allocation3 + $0x38] sm:$0xff]  ;;  %v2100_v1 = vpop.f32.mrf.mxu1  ;;  %v3020_v34 = vadd.f32 %v2811_v24, %v2303_v42  ;;  %8258 = vmatmul.mubr.msk.bf16.gmra.mxu1 %vm1174_vm6, %v8804_v7  ;;  %v4095_v7 = vrot.slane %v4093_v31, 4  ;;  %v4086_v42 = vrot.slane %v4085_v44, 4  ;;  %v4108_v39 = vrot.slane %v4106_v59, 4  ;;  %v8806_v31 = vld [vmem:[#allocation2 + $0xa8] sm:$0xff]  }
 0x1a0   : > { %v3017_v38 = vadd.f32 %v2953_v21, %v2803_v50  ;;  %2368 = vst.msk [vmem:[#allocation3 + $0x58] sm:$0xff] %vm1174_vm6, %v2304_v18  ;;  %v2305_v37 = vadd.f32 %v2100_v1, %v9930_v28  ;;  %v2813_v6 = vpop.f32.mrf.mxu0  ;;  %3475 = vmatprep.mubr.bf16.mxu1 %v8996_v0  ;;  %v3754_v18 = vld [vmem:[#allocation2 + $0xc4] sm:$0xf]  ;;  %v4081_v30 = vsel %vm9552_vm13, %v4076_v58, %v10092_v8  ;;  %v4112_v21 = vshll.u32 %v3752_v60, 16  ;;  %v3755_v58 = vld [vmem:[#allocation2 + $0xc8] sm:$0x1] }
 0x1a1   : > { %3084 = vst [vmem:[#allocation3 + $0x50] sm:$0xff] %v3020_v34  ;;  %v2102_v23 = vpop.f32.mrf.mxu1  ;;  %v4099_v22 = vor.u32 %v4098_v17, %v4095_v7  ;;  %v4120_v8 = vshll.u32 %v3753_v19, 16  ;;  %v2250_v17 = vld [vmem:[#allocation3 + $0xa8] sm:$0xff] }
 0x1a2   : > { %3081 = vst.msk [vmem:[#allocation3 + $0x38] sm:$0xff] %vm1174_vm6, %v3017_v38  ;;  %v2306_v50 = vadd.f32 %v2242_v43, %v2102_v23  ;;  %v2817_v28 = vpop.f32.mrf.mxu0  ;;  %8294 = vmatmul.mubr.msk.bf16.gmra.mxu0 %vm1174_vm6, %v8274_v52  ;;  %v2246_v52 = vld [vmem:[#allocation3 + $0x88] sm:$0xff]  ;;  %v4117_v38 = vshrl.u32 %v3753_v19, 16  ;;  %v4126_v23 = vshll.u32 %v3754_v18, 16  ;;  %v4130_v43 = vshrl.u32 %v3754_v18, 16 }
 0x1a3   : > { %v2955_v54 = vld [vmem:[#allocation3 + $0x48] sm:$0xff]  ;;  %v2104_v41 = vpop.f32.mrf.mxu1  ;;  %v3022_v63 = vadd.f32 %v2817_v28, %v2305_v37  ;;  %4413 = vmatprep.mubr.bf16.mxu0 %v8996_v0  ;;  %v4114_v53 = vrot.slane %v4112_v21, 5 }
 0x1a4   : > { %v3019_v29 = vadd.f32 %v2955_v54, %v2809_v15  ;;  %2370 = vst.msk [vmem:[#allocation3 + $0x68] sm:$0xff] %vm1174_vm6, %v2306_v50  ;;  %v2307_v13 = vadd.f32 %v2104_v41, %v9945_v48  ;;  %v2819_v14 = vpop.f32.mrf.mxu0  ;;  %v10111_v15 = vrot.slane %v4102_v45, 5  ;;  %v2248_v50 = vld [vmem:[#allocation3 + $0x98] sm:$0xff]  ;;  %v4100_v54 = vrot.slane %v4099_v22, 4 }
 0x1a5   : > { %3086 = vst [vmem:[#allocation3 + $0x60] sm:$0xff] %v3022_v63  ;;  %v2106_v51 = vpop.f32.mrf.mxu1  ;;  %v4119_v63 = vrot.slane %v4117_v38, 4 }
 0x1a6   : > { %3083 = vst.msk [vmem:[#allocation3 + $0x48] sm:$0xff] %vm1174_vm6, %v3019_v29  ;;  %v2308_v10 = vadd.f32 %v2244_v20, %v2106_v51  ;;  %v2821_v26 = vpop.f32.mrf.mxu0  ;;  %v4109_v36 = vor.u32 %v4108_v39, %v10111_v15 }
 0x1a7   : > { %v2957_v49 = vld [vmem:[#allocation3 + $0x58] sm:$0xff]  ;;  %v2110_v48 = vpop.f32.mrf.mxu1  ;;  %v3024_v27 = vadd.f32 %v2821_v26, %v2307_v13  ;;  %8259 = vmatmul.mubr.msk.bf16.gmra.mxu1 %vm1174_vm6, %v8805_v56 }
 0x1a8   : > { %v3021_v46 = vadd.f32 %v2957_v49, %v2813_v6  ;;  %2372 = vst.msk [vmem:[#allocation3 + $0x78] sm:$0xff] %vm1174_vm6, %v2308_v10  ;;  %v2309_v57 = vadd.f32 %v2110_v48, %v9961_v40  ;;  %v2823_v62 = vpop.f32.mrf.mxu0  ;;  %3485 = vmatprep.mubr.bf16.mxu1 %v8996_v0  ;;  %v4091_v40 = vsel %vm9552_vm13, %v4086_v42, %v4090_v2  ;;  %v4110_v41 = vrot.slane %v4109_v36, 4  ;;  %v8807_v48 = vld [vmem:[#allocation2 + $0xb4] sm:$0xff]  }
 0x1a9   : > { %3088 = vst [vmem:[#allocation3 + $0x70] sm:$0xff] %v3024_v27  ;;  %v2112_v24 = vpop.f32.mrf.mxu1  ;;  %v8276_v28 = vcombine.low %v4081_v30, %v4091_v40  ;;  %v4132_v2 = vrot.slane %v4130_v43, 4  ;;  %v4105_v42 = vsel %vm9552_vm13, %v4100_v54, %v10111_v15  ;;  %v2254_v43 = vld [vmem:[#allocation3 + $0xc8] sm:$0xff] }
 0x1aa   : > { %3085 = vst.msk [vmem:[#allocation3 + $0x58] sm:$0xff] %vm1174_vm6, %v3021_v46  ;;  %v2310_v1 = vadd.f32 %v2246_v52, %v2112_v24  ;;  %v2827_v34 = vpop.f32.mrf.mxu0  ;;  %8295 = vmatmul.mubr.msk.bf16.gmra.mxu0 %vm1174_vm6, %v8275_v12  ;;  %v4136_v46 = vshll.u32 %v3755_v58, 16  ;;  %v2252_v24 = vld [vmem:[#allocation3 + $0xb8] sm:$0xff] }
 0x1ab   : > { %v2959_v37 = vld [vmem:[#allocation3 + $0x68] sm:$0xff]  ;;  %v2114_v6 = vpop.f32.mrf.mxu1  ;;  %v3026_v33 = vadd.f32 %v2827_v34, %v2309_v57  ;;  %4423 = vmatprep.mubr.bf16.mxu0 %v8996_v0  ;;  %v4647_v52 = vld [vmem:[#allocation2 + $0x10] sm:$0xf] }
 0x1ac   : > { %v3023_v16 = vadd.f32 %v2959_v37, %v2819_v14  ;;  %2374 = vst.msk [vmem:[#allocation3 + $0x88] sm:$0xff] %vm1174_vm6, %v2310_v1  ;;  %v2311_v11 = vadd.f32 %v2114_v6, %v9976_v3  ;;  %v2829_v44 = vpop.f32.mrf.mxu0  ;;  %v4122_v14 = vrot.slane %v4120_v8, 5  ;;  %v10130_v3 = vrot.slane %v4126_v23, 5 }
 0x1ad   : > { %3090 = vst [vmem:[#allocation3 + $0x80] sm:$0xff] %v3026_v33  ;;  %v2116_v47 = vpop.f32.mrf.mxu1  ;;  %v4138_v37 = vrot.slane %v4136_v46, 5  ;;  %v4744_v8 = vrot.slane %v4647_v52, 5 }
 0x1ae   : > { %3087 = vst.msk [vmem:[#allocation3 + $0x68] sm:$0xff] %vm1174_vm6, %v3023_v16  ;;  %v2312_v45 = vadd.f32 %v2248_v50, %v2116_v47  ;;  %v2831_v59 = vpop.f32.mrf.mxu0  ;;  %v4123_v27 = vor.u32 %v4122_v14, %v4119_v63  ;;  %v4133_v19 = vor.u32 %v4132_v2, %v10130_v3  ;;  %v4648_v16 = vld [vmem:[#allocation2 + $0x14] sm:$0x1] }
 0x1af   : > { %v2961_v56 = vld [vmem:[#allocation3 + $0x78] sm:$0xff]  ;;  %v2120_v29 = vpop.f32.mrf.mxu1  ;;  %v3028_v13 = vadd.f32 %v2831_v59, %v2311_v11  ;;  %8260 = vmatmul.mubr.msk.bf16.gmra.mxu1 %vm1174_vm6, %v8806_v31  ;;  %v4646_v31 = vld [vmem:[#allocation2 + $0xc] sm:$0xe] }
 0x1b0   : > { %v3025_v51 = vadd.f32 %v2961_v56, %v2823_v62  ;;  %2376 = vst.msk [vmem:[#allocation3 + $0x98] sm:$0xff] %vm1174_vm6, %v2312_v45  ;;  %v2313_v20 = vadd.f32 %v2120_v29, %v9988_v9  ;;  %v2833_v12 = vpop.f32.mrf.mxu0  ;;  %3495 = vmatprep.mubr.bf16.mxu1 %v8996_v0  ;;  %v4115_v9 = vsel %vm9552_vm13, %v4110_v41, %v4114_v53  ;;  %v4124_v36 = vrot.slane %v4123_v27, 4  ;;  %v8808_v53 = vld [vmem:[#allocation2 + $0xc0] sm:$0xff]   ;;  %v2256_v2 = vld [vmem:[#allocation3 + $0xd8] sm:$0xff] }
 0x1b1   : > { %3092 = vst [vmem:[#allocation3 + $0x90] sm:$0xff] %v3028_v13  ;;  %v2122_v7 = vpop.f32.mrf.mxu1  ;;  %v8277_v21 = vcombine.low %v4105_v42, %v4115_v9  ;;  %v4134_v38 = vrot.slane %v4133_v19, 4  ;;  %v8299_v59 = vrot.slane %v4646_v31, 9  ;;  %v4746_v56 = vrot.slane %v4744_v8, 4  ;;  %v4650_v13 = vld [vmem:[#allocation2 + $0x1c] sm:$0xf] }
 0x1b2   : > { %3089 = vst.msk [vmem:[#allocation3 + $0x78] sm:$0xff] %vm1174_vm6, %v3025_v51  ;;  %v2314_v10 = vadd.f32 %v2250_v17, %v2122_v7  ;;  %v2837_v26 = vpop.f32.mrf.mxu0  ;;  %8296 = vmatmul.mubr.msk.bf16.gmra.mxu0 %vm1174_vm6, %v8276_v28  ;;  %v4747_v29 = vrot.slane %v4648_v16, 5  ;;  %v4751_v17 = vrot.slane %v4650_v13, 5 }
 0x1b3   : > { %v2963_v60 = vld [vmem:[#allocation3 + $0x88] sm:$0xff]  ;;  %v2124_v39 = vpop.f32.mrf.mxu1  ;;  %v3030_v49 = vadd.f32 %v2837_v26, %v2313_v20  ;;  %4433 = vmatprep.mubr.bf16.mxu0 %v8996_v0  ;;  %v4139_v45 = vsel %vm9552_vm13, %v4134_v38, %v4138_v37  ;;  %v4745_v42 = vsel %vm9558_vm14, %v8299_v59, %v4744_v8  ;;  %v2261_v37 = vld [vmem:[#allocation3 + $0x100] sm:$0xff]  ;;  %v4654_v59 = vld [vmem:[#allocation2 + $0x2c] sm:$0x1] }
 0x1b4   : > { %v3027_v57 = vadd.f32 %v2963_v60, %v2829_v44  ;;  %2378 = vst.msk [vmem:[#allocation3 + $0xa8] sm:$0xff] %vm1174_vm6, %v2314_v10  ;;  %v2315_v62 = vadd.f32 %v2124_v39, %v9994_v32  ;;  %v2839_v18 = vpop.f32.mrf.mxu0  ;;  %v4748_v9 = vsel %vm9558_vm14, %v4746_v56, %v4747_v29  ;;  %v4649_v60 = vld [vmem:[#allocation2 + $0x18] sm:$0xe]  ;;  %v2263_v29 = vld [vmem:[#allocation3 + $0x110] sm:$0xff] }
 0x1b5   : > { %3094 = vst [vmem:[#allocation3 + $0xa0] sm:$0xff] %v3030_v49  ;;  %v2126_v15 = vpop.f32.mrf.mxu1  ;;  %v2258_v49 = vld [vmem:[#allocation3 + $0xe8] sm:$0xff] }
 0x1b6   : > { %3091 = vst.msk [vmem:[#allocation3 + $0x88] sm:$0xff] %vm1174_vm6, %v3027_v57  ;;  %v2316_v30 = vadd.f32 %v2252_v24, %v2126_v15  ;;  %v2841_v22 = vpop.f32.mrf.mxu0 }
 0x1b7   : > { %v2965_v1 = vld [vmem:[#allocation3 + $0x98] sm:$0xff]  ;;  %v2130_v34 = vpop.f32.mrf.mxu1  ;;  %v3032_v40 = vadd.f32 %v2841_v22, %v2315_v62  ;;  %8261 = vmatmul.mubr.msk.bf16.gmra.mxu1 %vm1174_vm6, %v8807_v48  ;;  %v4651_v48 = vld [vmem:[#allocation2 + $0x20] sm:$0x1]  ;;  %v8315_v62 = vcombine.low %v4745_v42, %v4748_v9  ;;  %v4753_v22 = vrot.slane %v4751_v17, 4  ;;  %v8816_v9 = vld [vmem:[#allocation2 + $0x24] sm:$0xff]  }
 0x1b8   : > { %v3029_v6 = vadd.f32 %v2965_v1, %v2833_v12  ;;  %2380 = vst.msk [vmem:[#allocation3 + $0xb8] sm:$0xff] %vm1174_vm6, %v2316_v30  ;;  %v2317_v32 = vadd.f32 %v2130_v34, %v10008_v4  ;;  %v2843_v33 = vpop.f32.mrf.mxu0  ;;  %3505 = vmatprep.mubr.bf16.mxu1 %v8996_v0  ;;  %v4129_v4 = vsel %vm9552_vm13, %v4124_v36, %v10130_v3  ;;  %v8809_v30 = vld [vmem:[#allocation9 + $0xf0] ss:$8 sps:$4 sm:$0xff]   ;;  %v8825_v36 = vld [vmem:[#allocation9 + $0xe4] ss:$8 sps:$4 sm:$0xff]  }
 0x1b9   : > { %3096 = vst [vmem:[#allocation3 + $0xb0] sm:$0xff] %v3032_v40  ;;  %v2132_v23 = vpop.f32.mrf.mxu1  ;;  %v8278_v20 = vcombine.low %v4129_v4, %v4139_v45  ;;  %v2260_v34 = vld [vmem:[#allocation3 + $0xf8] sm:$0xff]  ;;  %v10175_v40 = vld [vmem:[#allocation2 + $0x28] sm:$0xf]  ;;  %v2262_v45 = vld [vmem:[#allocation3 + $0x108] sm:$0xff] }
 0x1ba   : > { %3093 = vst.msk [vmem:[#allocation3 + $0x98] sm:$0xff] %vm1174_vm6, %v3029_v6  ;;  %v2318_v11 = vadd.f32 %v2254_v43, %v2132_v23  ;;  %v2847_v44 = vpop.f32.mrf.mxu0  ;;  %8297 = vmatmul.mubr.msk.bf16.gmra.mxu0 %vm1174_vm6, %v8277_v21  ;;  %v4754_v21 = vrot.slane %v4651_v48, 5  ;;  %v8813_v23 = vld [vmem:[#allocation9 + $0x110] ss:$8 sps:$4 sm:$0xff]   ;;  %v4652_v43 = vld [vmem:[#allocation2 + $0x24] sm:$0xe] }
 0x1bb   : > { %v2967_v47 = vld [vmem:[#allocation3 + $0xa8] sm:$0xff]  ;;  %v2134_v50 = vpop.f32.mrf.mxu1  ;;  %v3034_v28 = vadd.f32 %v2847_v44, %v2317_v32  ;;  %4443 = vmatprep.mubr.bf16.mxu0 %v8996_v0  ;;  %v8812_v32 = vld [vmem:[#allocation2 + $0x18] sm:$0xff]  }
 0x1bc   : > { %v3031_v54 = vadd.f32 %v2967_v47, %v2839_v18  ;;  %2382 = vst.msk [vmem:[#allocation3 + $0xc8] sm:$0xff] %vm1174_vm6, %v2318_v11  ;;  %v2319_v41 = vadd.f32 %v2134_v50, %v10020_v25  ;;  %v2849_v63 = vpop.f32.mrf.mxu0  ;;  %v8300_v18 = vrot.slane %v4649_v60, 9  ;;  %v4755_v47 = vsel %vm9558_vm14, %v4753_v22, %v4754_v21 }
 0x1bd   : > { %3098 = vst [vmem:[#allocation3 + $0xc0] sm:$0xff] %v3034_v28  ;;  %v2136_v14 = vpop.f32.mrf.mxu1  ;;  %v4758_v50 = vrot.slane %v10175_v40, 5  ;;  %v8823_v28 = vld [vmem:[#allocation9 + $0xe0] ss:$8 sps:$4 sm:$0xff]  }
 0x1be   : > { %3095 = vst.msk [vmem:[#allocation3 + $0xa8] sm:$0xff] %vm1174_vm6, %v3031_v54  ;;  %v2320_v51 = vadd.f32 %v2256_v2, %v2136_v14  ;;  %v2851_v3 = vpop.f32.mrf.mxu0  ;;  %v8301_v2 = vrot.slane %v4652_v43, 9 }
 0x1bf   : > { %v2969_v12 = vld [vmem:[#allocation3 + $0xb8] sm:$0xff]  ;;  %v2140_v58 = vpop.f32.mrf.mxu1  ;;  %v3036_v7 = vadd.f32 %v2851_v3, %v2319_v41  ;;  %8262 = vmatmul.mubr.msk.bf16.gmra.mxu1 %vm1174_vm6, %v8808_v53  ;;  %v8829_v53 = vld [vmem:[#allocation9 + $0x104] ss:$8 sps:$4 sm:$0xff]  }
 0x1c0   : > { %v3033_v10 = vadd.f32 %v2969_v12, %v2843_v33  ;;  %2384 = vst.msk [vmem:[#allocation3 + $0xd8] sm:$0xff] %vm1174_vm6, %v2320_v51  ;;  %v2321_v25 = vadd.f32 %v2140_v58, %v10031_v35  ;;  %v2853_v26 = vpop.f32.mrf.mxu0  ;;  %5007 = vmatprep.mubr.bf16.mxu1 %v8996_v0  ;;  %v8827_v51 = vld [vmem:[#allocation9 + $0x100] ss:$8 sps:$4 sm:$0xff]   ;;  %v4760_v58 = vrot.slane %v4758_v50, 4 }
 0x1c1   : > { %3100 = vst [vmem:[#allocation3 + $0xd0] sm:$0xff] %v3036_v7  ;;  %v2142_v39 = vpop.f32.mrf.mxu1  ;;  %v4761_v7 = vrot.slane %v4654_v59, 5 }
 0x1c2   : > { %3097 = vst.msk [vmem:[#allocation3 + $0xb8] sm:$0xff] %vm1174_vm6, %v3033_v10  ;;  %v2322_v27 = vadd.f32 %v2258_v49, %v2142_v39  ;;  %v2857_v19 = vpop.f32.mrf.mxu0  ;;  %8298 = vmatmul.mubr.msk.bf16.gmra.mxu0 %vm1174_vm6, %v8278_v20  ;;  %v2264_v10 = vld [vmem:[#allocation3 + $0x118] sm:$0xff]  ;;  %v2265_v49 = vld [vmem:[#allocation3 + $0x120] sm:$0xff] }
 0x1c3   : > { %v2971_v35 = vld [vmem:[#allocation3 + $0xc8] sm:$0xff]  ;;  %v2144_v46 = vpop.f32.mrf.mxu1  ;;  %v3038_v57 = vadd.f32 %v2857_v19, %v2321_v25  ;;  %5578 = vmatprep.mubr.bf16.mxu0 %v8996_v0  ;;  %v10190_v25 = vld [vmem:[#allocation2 + $0x34] sm:$0xf] }
 0x1c4   : > { %v3035_v15 = vadd.f32 %v2971_v35, %v2849_v63  ;;  %2386 = vst.msk [vmem:[#allocation3 + $0xe8] sm:$0xff] %vm1174_vm6, %v2322_v27  ;;  %v2323_v24 = vadd.f32 %v2144_v46, %v10040_v61  ;;  %v2859_v52 = vpop.f32.mrf.mxu0  ;;  %v4752_v61 = vsel %vm9558_vm14, %v8300_v18, %v4751_v17  ;;  %v4759_v27 = vsel %vm9558_vm14, %v8301_v2, %v4758_v50  ;;  %v2269_v50 = vld [vmem:[#allocation3 + $0x140] sm:$0xff] }
 0x1c5   : > { %3102 = vst [vmem:[#allocation3 + $0xe0] sm:$0xff] %v3038_v57  ;;  %v2146_v1 = vpop.f32.mrf.mxu1  ;;  %v8316_v14 = vcombine.low %v4752_v61, %v4755_v47  ;;  %v4762_v57 = vsel %vm9558_vm14, %v4760_v58, %v4761_v7  ;;  %v4765_v18 = vrot.slane %v10190_v25, 5 }
 0x1c6   : > { %3099 = vst.msk [vmem:[#allocation3 + $0xc8] sm:$0xff] %vm1174_vm6, %v3035_v15  ;;  %v2324_v38 = vadd.f32 %v2260_v34, %v2146_v1  ;;  %v2861_v6 = vpop.f32.mrf.mxu0  ;;  %v2267_v34 = vld [vmem:[#allocation3 + $0x130] sm:$0xff] }
 0x1c7   : > { %v2973_v33 = vld [vmem:[#allocation3 + $0xd8] sm:$0xff]  ;;  %v2150_v31 = vpop.f32.mrf.mxu1  ;;  %v3040_v8 = vadd.f32 %v2861_v6, %v2323_v24  ;;  %8335 = vmatmul.mubr.msk.bf16.vlgmr.msra.gmra.mxu1 %vm1174_vm6, %v8315_v62  ;;  %v2266_v24 = vld [vmem:[#allocation3 + $0x128] sm:$0xff] }
 0x1c8   : > { %v3037_v16 = vadd.f32 %v2973_v33, %v2853_v26  ;;  %2388 = vst.msk [vmem:[#allocation3 + $0xf8] sm:$0xff] %vm1174_vm6, %v2324_v38  ;;  %v2325_v11 = vadd.f32 %v2261_v37, %v2150_v31  ;;  %6497 = vmatpush1.bf16.msra.mxu1 %v8809_v30  ;;  %v2863_v44 = vpop.f32.mrf.mxu0  ;;  %5017 = vmatprep.mubr.bf16.mxu1 %v8996_v0  ;;  %v4655_v62 = vld [vmem:[#allocation2 + $0x30] sm:$0xe]  ;;  %v4767_v33 = vrot.slane %v4765_v18, 4 }
 0x1c9   : > { %3104 = vst [vmem:[#allocation3 + $0xf0] sm:$0xff] %v3040_v8  ;;  %v2152_v4 = vpop.f32.mrf.mxu1  ;;  %6498 = vmatprep.subr.bf16.mxu1 %v8825_v36  ;;  %v8317_v36 = vcombine.low %v4759_v27, %v4762_v57  ;;  %v8302_v38 = vrot.slane %v4655_v62, 9  ;;  %v4659_v8 = vld [vmem:[#allocation2 + $0x40] sm:$0xf] }
 0x1ca   : > { %3101 = vst.msk [vmem:[#allocation3 + $0xd8] sm:$0xff] %vm1174_vm6, %v3037_v16  ;;  %v2326_v54 = vadd.f32 %v2262_v45, %v2152_v4  ;;  %v2867_v41 = vpop.f32.mrf.mxu0  ;;  %8371 = vmatmul.mubr.msk.bf16.vlgmr.msra.gmra.mxu0 %vm1174_vm6, %v8812_v32  ;;  %v4772_v4 = vrot.slane %v4659_v8, 5  ;;  %v8818_v27 = vld [vmem:[#allocation2 + $0x3c] sm:$0xff]  }
 0x1cb   : > { %v2975_v63 = vld [vmem:[#allocation3 + $0xe8] sm:$0xff]  ;;  %v2154_v56 = vpop.f32.mrf.mxu1  ;;  %v3042_v13 = vadd.f32 %v2867_v41, %v2325_v11  ;;  %7211 = vmatpush1.bf16.msra.mxu0 %v8813_v23  ;;  %5588 = vmatprep.mubr.bf16.mxu0 %v8996_v0  ;;  %v2268_v23 = vld [vmem:[#allocation3 + $0x138] sm:$0xff]  ;;  %v4766_v41 = vsel %vm9558_vm14, %v8302_v38, %v4765_v18 }
 0x1cc   : > { %v3039_v3 = vadd.f32 %v2975_v63, %v2859_v52  ;;  %2390 = vst.msk [vmem:[#allocation3 + $0x108] sm:$0xff] %vm1174_vm6, %v2326_v54  ;;  %v2327_v20 = vadd.f32 %v2263_v29, %v2154_v56  ;;  %v2869_v12 = vpop.f32.mrf.mxu0  ;;  %6499 = vmatpush1.bf16.msra.mxu1 %v8823_v28  ;;  %7212 = vmatprep.subr.bf16.mxu0 %v8829_v53  ;;  %v4657_v52 = vld [vmem:[#allocation2 + $0x38] sm:$0x1]  ;;  %v8817_v11 = vld [vmem:[#allocation2 + $0x30] sm:$0xff]   ;;  %v4658_v53 = vld [vmem:[#allocation2 + $0x3c] sm:$0xe] }
 0x1cd   : > { %3106 = vst [vmem:[#allocation3 + $0x100] sm:$0xff] %v3042_v13  ;;  %v2156_v17 = vpop.f32.mrf.mxu1  ;;  %v4768_v31 = vrot.slane %v4657_v52, 5  ;;  %v4660_v56 = vld [vmem:[#allocation2 + $0x44] sm:$0x1] }
 0x1ce   : > { %3103 = vst.msk [vmem:[#allocation3 + $0xe8] sm:$0xff] %vm1174_vm6, %v3039_v3  ;;  %v2328_v26 = vadd.f32 %v2264_v10, %v2156_v17  ;;  %v2871_v42 = vpop.f32.mrf.mxu0  ;;  %v2270_v13 = vld [vmem:[#allocation3 + $0x148] sm:$0xff]  ;;  %v4774_v17 = vrot.slane %v4772_v4, 4  ;;  %v4775_v10 = vrot.slane %v4660_v56, 5 }
 0x1cf   : > { %v2977_v60 = vld [vmem:[#allocation3 + $0xf8] sm:$0xff]  ;;  %v2160_v39 = vpop.f32.mrf.mxu1  ;;  %v3044_v48 = vadd.f32 %v2871_v42, %v2327_v20  ;;  %8336 = vmatmul.mubr.msk.bf16.gmra.mxu1 %vm1174_vm6, %v8316_v14  ;;  %7213 = vmatpush1.bf16.msra.mxu0 %v8827_v51  ;;  %v4769_v63 = vsel %vm9558_vm14, %v4767_v33, %v4768_v31  ;;  %v8303_v51 = vrot.slane %v4658_v53, 9  ;;  %v8819_v53 = vld [vmem:[#allocation2 + $0x48] sm:$0xff]  }
 0x1d0   : > { %v3041_v19 = vadd.f32 %v2977_v60, %v2863_v44  ;;  %2392 = vst.msk [vmem:[#allocation3 + $0x118] sm:$0xff] %vm1174_vm6, %v2328_v26  ;;  %v2329_v35 = vadd.f32 %v2265_v49, %v2160_v39  ;;  %v2873_v46 = vpop.f32.mrf.mxu0  ;;  %5027 = vmatprep.mubr.bf16.mxu1 %v8996_v0  ;;  %v8318_v7 = vcombine.low %v4766_v41, %v4769_v63  ;;  %v2272_v39 = vld [vmem:[#allocation3 + $0x158] sm:$0xff] }
 0x1d1   : > { %3108 = vst [vmem:[#allocation3 + $0x110] sm:$0xff] %v3044_v48  ;;  %v2162_v15 = vpop.f32.mrf.mxu1  ;;  %v4773_v62 = vsel %vm9558_vm14, %v8303_v51, %v4772_v4  ;;  %v4776_v18 = vsel %vm9558_vm14, %v4774_v17, %v4775_v10  ;;  %v4666_v51 = vld [vmem:[#allocation2 + $0x5c] sm:$0x1] }
 0x1d2   : > { %3105 = vst.msk [vmem:[#allocation3 + $0xf8] sm:$0xff] %vm1174_vm6, %v3041_v19  ;;  %v2330_v30 = vadd.f32 %v2266_v24, %v2162_v15  ;;  %v2877_v22 = vpop.f32.mrf.mxu0  ;;  %8372 = vmatmul.mubr.msk.bf16.gmra.mxu0 %vm1174_vm6, %v8816_v9  ;;  %v4662_v9 = vld [vmem:[#allocation2 + $0x4c] sm:$0xf]  ;;  %v8319_v38 = vcombine.low %v4773_v62, %v4776_v18  ;;  %v8820_v62 = vld [vmem:[#allocation2 + $0x54] sm:$0xff]  }
 0x1d3   : > { %v2979_v21 = vld [vmem:[#allocation3 + $0x108] sm:$0xff]  ;;  %v2164_v1 = vpop.f32.mrf.mxu1  ;;  %v3046_v40 = vadd.f32 %v2877_v22, %v2329_v35  ;;  %5598 = vmatprep.mubr.bf16.mxu0 %v8996_v0  ;;  %v4779_v15 = vrot.slane %v4662_v9, 5  ;;  %v4661_v22 = vld [vmem:[#allocation2 + $0x48] sm:$0xe] }
 0x1d4   : > { %v3043_v37 = vadd.f32 %v2979_v21, %v2869_v12  ;;  %2394 = vst.msk [vmem:[#allocation3 + $0x128] sm:$0xff] %vm1174_vm6, %v2330_v30  ;;  %v2331_v6 = vadd.f32 %v2267_v34, %v2164_v1  ;;  %v2879_v32 = vpop.f32.mrf.mxu0  ;;  %v2271_v12 = vld [vmem:[#allocation3 + $0x150] sm:$0xff]  ;;  %v4663_v21 = vld [vmem:[#allocation2 + $0x50] sm:$0x1]  ;;  %v2274_v34 = vld [vmem:[#allocation3 + $0x168] sm:$0xff]  ;;  %v8304_v31 = vrot.slane %v4661_v22, 9 }
 0x1d5   : > { %3110 = vst [vmem:[#allocation3 + $0x120] sm:$0xff] %v3046_v40  ;;  %v2166_v61 = vpop.f32.mrf.mxu1  ;;  %v4781_v8 = vrot.slane %v4779_v15, 4 }
 0x1d6   : > { %3107 = vst.msk [vmem:[#allocation3 + $0x108] sm:$0xff] %vm1174_vm6, %v3043_v37  ;;  %v2332_v43 = vadd.f32 %v2268_v23, %v2166_v61  ;;  %v2881_v16 = vpop.f32.mrf.mxu0  ;;  %v4782_v61 = vrot.slane %v4663_v21, 5  ;;  %v4780_v41 = vsel %vm9558_vm14, %v8304_v31, %v4779_v15 }
 0x1d7   : > { %v2981_v44 = vld [vmem:[#allocation3 + $0x118] sm:$0xff]  ;;  %v2170_v47 = vpop.f32.mrf.mxu1  ;;  %v3048_v28 = vadd.f32 %v2881_v16, %v2331_v6  ;;  %8337 = vmatmul.mubr.msk.bf16.gmra.mxu1 %vm1174_vm6, %v8317_v36 }
 0x1d8   : > { %v3045_v45 = vadd.f32 %v2981_v44, %v2873_v46  ;;  %2396 = vst.msk [vmem:[#allocation3 + $0x138] sm:$0xff] %vm1174_vm6, %v2332_v43  ;;  %v2333_v59 = vadd.f32 %v2269_v50, %v2170_v47  ;;  %v2883_v54 = vpop.f32.mrf.mxu0  ;;  %5037 = vmatprep.mubr.bf16.mxu1 %v8996_v0  ;;  %v2273_v46 = vld [vmem:[#allocation3 + $0x160] sm:$0xff]  ;;  %v2276_v47 = vld [vmem:[#allocation3 + $0x178] sm:$0xff]  ;;  %v4783_v63 = vsel %vm9558_vm14, %v4781_v8, %v4782_v61 }
 0x1d9   : > { %3112 = vst [vmem:[#allocation3 + $0x130] sm:$0xff] %v3048_v28  ;;  %v2172_v29 = vpop.f32.mrf.mxu1 }
 0x1da   : > { %3109 = vst.msk [vmem:[#allocation3 + $0x118] sm:$0xff] %vm1174_vm6, %v3045_v45  ;;  %v2334_v14 = vadd.f32 %v2270_v13, %v2172_v29  ;;  %v2887_v2 = vpop.f32.mrf.mxu0  ;;  %8373 = vmatmul.mubr.msk.bf16.gmra.mxu0 %vm1174_vm6, %v8817_v11  ;;  %v4665_v11 = vld [vmem:[#allocation2 + $0x58] sm:$0xf] }
 0x1db   : > { %v2983_v3 = vld [vmem:[#allocation3 + $0x128] sm:$0xff]  ;;  %v2174_v20 = vpop.f32.mrf.mxu1  ;;  %v3050_v58 = vadd.f32 %v2887_v2, %v2333_v59  ;;  %5608 = vmatprep.mubr.bf16.mxu0 %v8996_v0  ;;  %v2277_v59 = vld [vmem:[#allocation3 + $0x180] sm:$0xff]  ;;  %v4786_v56 = vrot.slane %v4665_v11, 5  ;;  %v4664_v2 = vld [vmem:[#allocation2 + $0x54] sm:$0xe] }
 0x1dc   : > { %v3047_v25 = vadd.f32 %v2983_v3, %v2879_v32  ;;  %2398 = vst.msk [vmem:[#allocation3 + $0x148] sm:$0xff] %vm1174_vm6, %v2334_v14  ;;  %v2335_v26 = vadd.f32 %v2271_v12, %v2174_v20  ;;  %v2889_v42 = vpop.f32.mrf.mxu0  ;;  %v2275_v32 = vld [vmem:[#allocation3 + $0x170] sm:$0xff]  ;;  %v2278_v20 = vld [vmem:[#allocation3 + $0x188] sm:$0xff] }
 0x1dd   : > { %3114 = vst [vmem:[#allocation3 + $0x140] sm:$0xff] %v3050_v58  ;;  %v2176_v60 = vpop.f32.mrf.mxu1  ;;  %v4788_v9 = vrot.slane %v4786_v56, 4 }
 0x1de   : > { %3111 = vst.msk [vmem:[#allocation3 + $0x128] sm:$0xff] %vm1174_vm6, %v3047_v25  ;;  %v2336_v49 = vadd.f32 %v2272_v39, %v2176_v60  ;;  %v2891_v48 = vpop.f32.mrf.mxu0  ;;  %v2279_v25 = vld [vmem:[#allocation3 + $0x190] sm:$0xff]  ;;  %v4789_v60 = vrot.slane %v4666_v51, 5 }
 0x1df   : > { %v2985_v19 = vld [vmem:[#allocation3 + $0x138] sm:$0xff]  ;;  %v2180_v35 = vpop.f32.mrf.mxu1  ;;  %v3052_v57 = vadd.f32 %v2891_v48, %v2335_v26  ;;  %8338 = vmatmul.mubr.msk.bf16.gmra.mxu1 %vm1174_vm6, %v8318_v7  ;;  %v8320_v7 = vcombine.low %v4780_v41, %v4783_v63  ;;  %v8821_v41 = vld [vmem:[#allocation2 + $0x60] sm:$0xff]  }
 0x1e0   : > { %v3049_v24 = vadd.f32 %v2985_v19, %v2883_v54  ;;  %2400 = vst.msk [vmem:[#allocation3 + $0x158] sm:$0xff] %vm1174_vm6, %v2336_v49  ;;  %v2337_v52 = vadd.f32 %v2273_v46, %v2180_v35  ;;  %v2893_v30 = vpop.f32.mrf.mxu0  ;;  %5047 = vmatprep.mubr.bf16.mxu1 %v8996_v0  ;;  %v2280_v35 = vld [vmem:[#allocation3 + $0x198] sm:$0xff]  ;;  %v4790_v22 = vsel %vm9558_vm14, %v4788_v9, %v4789_v60 }
 0x1e1   : > { %3116 = vst [vmem:[#allocation3 + $0x150] sm:$0xff] %v3052_v57  ;;  %v2182_v1 = vpop.f32.mrf.mxu1 }
 0x1e2   : > { %3113 = vst.msk [vmem:[#allocation3 + $0x138] sm:$0xff] %vm1174_vm6, %v3049_v24  ;;  %v2338_v40 = vadd.f32 %v2274_v34, %v2182_v1  ;;  %v2897_v36 = vpop.f32.mrf.mxu0  ;;  %8374 = vmatmul.mubr.msk.bf16.gmra.mxu0 %vm1174_vm6, %v8818_v27  ;;  %v4668_v27 = vld [vmem:[#allocation2 + $0x64] sm:$0xf]  ;;  %v2281_v24 = vld [vmem:[#allocation3 + $0x1a0] sm:$0xff] }
 0x1e3   : > { %v2987_v37 = vld [vmem:[#allocation3 + $0x148] sm:$0xff]  ;;  %v2184_v6 = vpop.f32.mrf.mxu1  ;;  %v3054_v33 = vadd.f32 %v2897_v36, %v2337_v52  ;;  %5618 = vmatprep.mubr.bf16.mxu0 %v8996_v0  ;;  %v4793_v21 = vrot.slane %v4668_v27, 5 }
 0x1e4   : > { %v3051_v23 = vadd.f32 %v2987_v37, %v2889_v42  ;;  %2402 = vst.msk [vmem:[#allocation3 + $0x168] sm:$0xff] %vm1174_vm6, %v2338_v40  ;;  %v2339_v43 = vadd.f32 %v2275_v32, %v2184_v6  ;;  %v2899_v16 = vpop.f32.mrf.mxu0  ;;  %v8305_v42 = vrot.slane %v4664_v2, 9  ;;  %v4667_v36 = vld [vmem:[#allocation2 + $0x60] sm:$0xe] }
 0x1e5   : > { %3118 = vst [vmem:[#allocation3 + $0x160] sm:$0xff] %v3054_v33  ;;  %v2186_v44 = vpop.f32.mrf.mxu1  ;;  %v2282_v6 = vld [vmem:[#allocation3 + $0x1a8] sm:$0xff]  ;;  %v4795_v11 = vrot.slane %v4793_v21, 4 }
 0x1e6   : > { %3115 = vst.msk [vmem:[#allocation3 + $0x148] sm:$0xff] %vm1174_vm6, %v3051_v23  ;;  %v2340_v50 = vadd.f32 %v2276_v47, %v2186_v44  ;;  %v2901_v28 = vpop.f32.mrf.mxu0  ;;  %v2283_v23 = vld [vmem:[#allocation3 + $0x1b0] sm:$0xff] }
 0x1e7   : > { %v2989_v4 = vld [vmem:[#allocation3 + $0x158] sm:$0xff]  ;;  %v2190_v45 = vpop.f32.mrf.mxu1  ;;  %v3056_v54 = vadd.f32 %v2901_v28, %v2339_v43  ;;  %8339 = vmatmul.mubr.msk.bf16.gmra.mxu1 %vm1174_vm6, %v8319_v38  ;;  %v4669_v38 = vld [vmem:[#allocation2 + $0x68] sm:$0x1] }
 0x1e8   : > { %v3053_v29 = vadd.f32 %v2989_v4, %v2893_v30  ;;  %2404 = vst.msk [vmem:[#allocation3 + $0x178] sm:$0xff] %vm1174_vm6, %v2340_v50  ;;  %v2341_v13 = vadd.f32 %v2277_v59, %v2190_v45  ;;  %v2903_v14 = vpop.f32.mrf.mxu0  ;;  %5057 = vmatprep.mubr.bf16.mxu1 %v8996_v0  ;;  %v4787_v30 = vsel %vm9558_vm14, %v8305_v42, %v4786_v56  ;;  %v4796_v44 = vrot.slane %v4669_v38, 5  ;;  %v2284_v45 = vld [vmem:[#allocation3 + $0x1b8] sm:$0xff] }
 0x1e9   : > { %3120 = vst [vmem:[#allocation3 + $0x170] sm:$0xff] %v3056_v54  ;;  %v2192_v3 = vpop.f32.mrf.mxu1  ;;  %v8321_v31 = vcombine.low %v4787_v30, %v4790_v22  ;;  %v8822_v30 = vld [vmem:[#allocation2 + $0x6c] sm:$0xff]  }
 0x1ea   : > { %3117 = vst.msk [vmem:[#allocation3 + $0x158] sm:$0xff] %vm1174_vm6, %v3053_v29  ;;  %v2342_v12 = vadd.f32 %v2278_v20, %v2192_v3  ;;  %v2907_v58 = vpop.f32.mrf.mxu0  ;;  %8375 = vmatmul.mubr.msk.bf16.gmra.mxu0 %vm1174_vm6, %v8819_v53  ;;  %v4671_v53 = vld [vmem:[#allocation2 + $0x70] sm:$0xf]  ;;  %v2285_v29 = vld [vmem:[#allocation3 + $0x1c0] sm:$0xff]  ;;  %v4797_v2 = vsel %vm9558_vm14, %v4795_v11, %v4796_v44 }
 0x1eb   : > { %v2991_v17 = vld [vmem:[#allocation3 + $0x168] sm:$0xff]  ;;  %v2194_v10 = vpop.f32.mrf.mxu1  ;;  %v3058_v26 = vadd.f32 %v2907_v58, %v2341_v13  ;;  %5628 = vmatprep.mubr.bf16.mxu0 %v8996_v0  ;;  %v4800_v51 = vrot.slane %v4671_v53, 5  ;;  %v4670_v58 = vld [vmem:[#allocation2 + $0x6c] sm:$0xe] }
 0x1ec   : > { %v3055_v39 = vadd.f32 %v2991_v17, %v2899_v16  ;;  %2406 = vst.msk [vmem:[#allocation3 + $0x188] sm:$0xff] %vm1174_vm6, %v2342_v12  ;;  %v2343_v49 = vadd.f32 %v2279_v25, %v2194_v10  ;;  %v2909_v48 = vpop.f32.mrf.mxu0  ;;  %v8306_v16 = vrot.slane %v4667_v36, 9  ;;  %v2286_v10 = vld [vmem:[#allocation3 + $0x1c8] sm:$0xff] }
 0x1ed   : > { %3122 = vst [vmem:[#allocation3 + $0x180] sm:$0xff] %v3058_v26  ;;  %v2196_v19 = vpop.f32.mrf.mxu1  ;;  %v4802_v27 = vrot.slane %v4800_v51, 4 }
 0x1ee   : > { %3119 = vst.msk [vmem:[#allocation3 + $0x168] sm:$0xff] %vm1174_vm6, %v3055_v39  ;;  %v2344_v46 = vadd.f32 %v2280_v35, %v2196_v19  ;;  %v2911_v57 = vpop.f32.mrf.mxu0  ;;  %v2287_v39 = vld [vmem:[#allocation3 + $0x1d0] sm:$0xff] }
 0x1ef   : > { %v2993_v18 = vld [vmem:[#allocation3 + $0x178] sm:$0xff]  ;;  %v2200_v15 = vpop.f32.mrf.mxu1  ;;  %v3060_v52 = vadd.f32 %v2911_v57, %v2343_v49  ;;  %8340 = vmatmul.mubr.msk.bf16.gmra.mxu1 %vm1174_vm6, %v8320_v7 }
 0x1f0   : > { %v3057_v1 = vadd.f32 %v2993_v18, %v2903_v14  ;;  %2408 = vst.msk [vmem:[#allocation3 + $0x198] sm:$0xff] %vm1174_vm6, %v2344_v46  ;;  %v2345_v34 = vadd.f32 %v2281_v24, %v2200_v15  ;;  %v2913_v40 = vpop.f32.mrf.mxu0  ;;  %5067 = vmatprep.mubr.bf16.mxu1 %v8996_v0  ;;  %v4794_v14 = vsel %vm9558_vm14, %v8306_v16, %v4793_v21  ;;  %v4672_v7 = vld [vmem:[#allocation2 + $0x74] sm:$0x1] }
 0x1f1   : > { %3124 = vst [vmem:[#allocation3 + $0x190] sm:$0xff] %v3060_v52  ;;  %v2202_v37 = vpop.f32.mrf.mxu1  ;;  %v8322_v42 = vcombine.low %v4794_v14, %v4797_v2  ;;  %v4803_v19 = vrot.slane %v4672_v7, 5  ;;  %v2288_v15 = vld [vmem:[#allocation3 + $0x1d8] sm:$0xff]  ;;  %v8826_v14 = vld [vmem:[#allocation2 + $0x78] sm:$0xff]  }
 0x1f2   : > { %3121 = vst.msk [vmem:[#allocation3 + $0x178] sm:$0xff] %vm1174_vm6, %v3057_v1  ;;  %v2346_v32 = vadd.f32 %v2282_v6, %v2202_v37  ;;  %v2917_v33 = vpop.f32.mrf.mxu0  ;;  %8376 = vmatmul.mubr.msk.bf16.gmra.mxu0 %vm1174_vm6, %v8820_v62  ;;  %v4674_v62 = vld [vmem:[#allocation2 + $0x7c] sm:$0xf] }
 0x1f3   : > { %v2995_v8 = vld [vmem:[#allocation3 + $0x188] sm:$0xff]  ;;  %v2204_v61 = vpop.f32.mrf.mxu1  ;;  %v3062_v43 = vadd.f32 %v2917_v33, %v2345_v34  ;;  %5638 = vmatprep.mubr.bf16.mxu0 %v8996_v0  ;;  %v2289_v1 = vld [vmem:[#allocation3 + $0x1e0] sm:$0xff]  ;;  %v4804_v36 = vsel %vm9558_vm14, %v4802_v27, %v4803_v19  ;;  %v4807_v38 = vrot.slane %v4674_v62, 5 }
 0x1f4   : > { %v3059_v47 = vadd.f32 %v2995_v8, %v2909_v48  ;;  %2410 = vst.msk [vmem:[#allocation3 + $0x1a8] sm:$0xff] %vm1174_vm6, %v2346_v32  ;;  %v2347_v50 = vadd.f32 %v2283_v23, %v2204_v61  ;;  %v2919_v28 = vpop.f32.mrf.mxu0  ;;  %v8307_v48 = vrot.slane %v4670_v58, 9  ;;  %v4673_v33 = vld [vmem:[#allocation2 + $0x78] sm:$0xe]  ;;  %v2290_v61 = vld [vmem:[#allocation3 + $0x1e8] sm:$0xff] }
 0x1f5   : > { %3126 = vst [vmem:[#allocation3 + $0x1a0] sm:$0xff] %v3062_v43  ;;  %v2206_v4 = vpop.f32.mrf.mxu1  ;;  %v4809_v53 = vrot.slane %v4807_v38, 4 }
 0x1f6   : > { %3123 = vst.msk [vmem:[#allocation3 + $0x188] sm:$0xff] %vm1174_vm6, %v3059_v47  ;;  %v2348_v59 = vadd.f32 %v2284_v45, %v2206_v4  ;;  %v2921_v54 = vpop.f32.mrf.mxu0  ;;  %v2291_v47 = vld [vmem:[#allocation3 + $0x1f0] sm:$0xff] }
 0x1f7   : > { %v2997_v63 = vld [vmem:[#allocation3 + $0x198] sm:$0xff]  ;;  %v2210_v56 = vpop.f32.mrf.mxu1  ;;  %v3064_v13 = vadd.f32 %v2921_v54, %v2347_v50  ;;  %8341 = vmatmul.mubr.msk.bf16.gmra.mxu1 %vm1174_vm6, %v8321_v31  ;;  %v4675_v31 = vld [vmem:[#allocation2 + $0x80] sm:$0x1] }
 0x1f8   : > { %v3061_v3 = vadd.f32 %v2997_v63, %v2913_v40  ;;  %2412 = vst.msk [vmem:[#allocation3 + $0x1b8] sm:$0xff] %vm1174_vm6, %v2348_v59  ;;  %v2349_v20 = vadd.f32 %v2285_v29, %v2210_v56  ;;  %v2923_v12 = vpop.f32.mrf.mxu0  ;;  %5077 = vmatprep.mubr.bf16.mxu1 %v8996_v0  ;;  %v4801_v40 = vsel %vm9558_vm14, %v8307_v48, %v4800_v51  ;;  %v4810_v4 = vrot.slane %v4675_v31, 5  ;;  %v2292_v56 = vld [vmem:[#allocation3 + $0x1f8] sm:$0xff] }
 0x1f9   : > { %3128 = vst [vmem:[#allocation3 + $0x1b0] sm:$0xff] %v3064_v13  ;;  %v2212_v17 = vpop.f32.mrf.mxu1  ;;  %v8323_v16 = vcombine.low %v4801_v40, %v4804_v36  ;;  %v8830_v40 = vld [vmem:[#allocation2 + $0x84] sm:$0xff]  }
 0x1fa   : > { %3125 = vst.msk [vmem:[#allocation3 + $0x198] sm:$0xff] %vm1174_vm6, %v3061_v3  ;;  %v2350_v25 = vadd.f32 %v2286_v10, %v2212_v17  ;;  %v2927_v26 = vpop.f32.mrf.mxu0  ;;  %8377 = vmatmul.mubr.msk.bf16.gmra.mxu0 %vm1174_vm6, %v8821_v41  ;;  %v4677_v41 = vld [vmem:[#allocation2 + $0x88] sm:$0xf]  ;;  %v4811_v58 = vsel %vm9558_vm14, %v4809_v53, %v4810_v4 }
 0x1fb   : > { %v2999_v9 = vld [vmem:[#allocation3 + $0x1a8] sm:$0xff]  ;;  %v2214_v60 = vpop.f32.mrf.mxu1  ;;  %v3066_v49 = vadd.f32 %v2927_v26, %v2349_v20  ;;  %5648 = vmatprep.mubr.bf16.mxu0 %v8996_v0  ;;  %v3516_v20 = vld [vmem:[#allocation3] sm:$0xff]  ;;  %v4814_v7 = vrot.slane %v4677_v41, 5 }
 0x1fc   : > { %v3063_v35 = vadd.f32 %v2999_v9, %v2919_v28  ;;  %2414 = vst.msk [vmem:[#allocation3 + $0x1c8] sm:$0xff] %vm1174_vm6, %v2350_v25  ;;  %v2351_v46 = vadd.f32 %v2287_v39, %v2214_v60  ;;  %v2929_v57 = vpop.f32.mrf.mxu0  ;;  %v8308_v28 = vrot.slane %v4673_v33, 9  ;;  %v4676_v26 = vld [vmem:[#allocation2 + $0x84] sm:$0xe] }
 0x1fd   : > { %3130 = vst [vmem:[#allocation3 + $0x1c0] sm:$0xff] %v3066_v49  ;;  %v2216_v18 = vpop.f32.mrf.mxu1  ;;  %v3517_v60 = vld [vmem:[#allocation3 + $0x8] sm:$0xff]  ;;  %v4816_v62 = vrot.slane %v4814_v7, 4 }
 0x1fe   : > { %3127 = vst.msk [vmem:[#allocation3 + $0x1a8] sm:$0xff] %vm1174_vm6, %v3063_v35  ;;  %v2352_v24 = vadd.f32 %v2288_v15, %v2216_v18  ;;  %v2931_v52 = vpop.f32.mrf.mxu0  ;;  %v3518_v35 = vld [vmem:[#allocation3 + $0x10] sm:$0xff] }
 0x1ff   : > { %v3001_v22 = vld [vmem:[#allocation3 + $0x1b8] sm:$0xff]  ;;  %v2220_v21 = vpop.f32.mrf.mxu1  ;;  %v3068_v34 = vadd.f32 %v2931_v52, %v2351_v46  ;;  %8342 = vmatmul.mubr.msk.bf16.gmra.mxu1 %vm1174_vm6, %v8322_v42  ;;  %v4678_v42 = vld [vmem:[#allocation2 + $0x8c] sm:$0x1] }
 0x200   : > { %v3065_v37 = vadd.f32 %v3001_v22, %v2923_v12  ;;  %2416 = vst.msk [vmem:[#allocation3 + $0x1d8] sm:$0xff] %vm1174_vm6, %v2352_v24  ;;  %v2353_v6 = vadd.f32 %v2289_v1, %v2220_v21  ;;  %v2933_v32 = vpop.f32.mrf.mxu0  ;;  %5087 = vmatprep.mubr.bf16.mxu1 %v8996_v0  ;;  %v4808_v12 = vsel %vm9558_vm14, %v8308_v28, %v4807_v38  ;;  %v4817_v18 = vrot.slane %v4678_v42, 5  ;;  %v3519_v21 = vld [vmem:[#allocation3 + $0x18] sm:$0xff] }
 0x201   : > { %3132 = vst [vmem:[#allocation3 + $0x1d0] sm:$0xff] %v3068_v34  ;;  %v2222_v8 = vpop.f32.mrf.mxu1  ;;  %v8324_v48 = vcombine.low %v4808_v12, %v4811_v58  ;;  %v8831_v12 = vld [vmem:[#allocation2 + $0x90] sm:$0xff]  }
 0x202   : > { %3129 = vst.msk [vmem:[#allocation3 + $0x1b8] sm:$0xff] %vm1174_vm6, %v3065_v37  ;;  %v2354_v23 = vadd.f32 %v2290_v61, %v2222_v8  ;;  %v2937_v43 = vpop.f32.mrf.mxu0  ;;  %8378 = vmatmul.mubr.msk.bf16.gmra.mxu0 %vm1174_vm6, %v8822_v30  ;;  %v4680_v30 = vld [vmem:[#allocation2 + $0x94] sm:$0xf]  ;;  %v3520_v37 = vld [vmem:[#allocation3 + $0x20] sm:$0xff]  ;;  %v4818_v33 = vsel %vm9558_vm14, %v4816_v62, %v4817_v18 }
 0x203   : > { %v3003_v11 = vld [vmem:[#allocation3 + $0x1c8] sm:$0xff]  ;;  %v2224_v44 = vpop.f32.mrf.mxu1  ;;  %v3070_v50 = vadd.f32 %v2937_v43, %v2353_v6  ;;  %5658 = vmatprep.mubr.bf16.mxu0 %v8996_v0  ;;  %v4821_v31 = vrot.slane %v4680_v30, 5  ;;  %v4679_v43 = vld [vmem:[#allocation2 + $0x90] sm:$0xe] }
 0x204   : > { %v3067_v45 = vadd.f32 %v3003_v11, %v2929_v57  ;;  %2418 = vst.msk [vmem:[#allocation3 + $0x1e8] sm:$0xff] %vm1174_vm6, %v2354_v23  ;;  %v2355_v59 = vadd.f32 %v2291_v47, %v2224_v44  ;;  %v2939_v54 = vpop.f32.mrf.mxu0  ;;  %v8309_v57 = vrot.slane %v4676_v26, 9  ;;  %v3521_v44 = vld [vmem:[#allocation3 + $0x28] sm:$0xff] }
 0x205   : > { %3134 = vst [vmem:[#allocation3 + $0x1e0] sm:$0xff] %v3070_v50  ;;  %v2226_v63 = vpop.f32.mrf.mxu1  ;;  %v4823_v41 = vrot.slane %v4821_v31, 4 }
 0x206   : > { %3131 = vst.msk [vmem:[#allocation3 + $0x1c8] sm:$0xff] %vm1174_vm6, %v3067_v45  ;;  %v2356_v29 = vadd.f32 %v2292_v56, %v2226_v63  ;;  %v2941_v13 = vpop.f32.mrf.mxu0  ;;  %v3522_v45 = vld [vmem:[#allocation3 + $0x30] sm:$0xff] }
 0x207   : > { %v3005_v2 = vld [vmem:[#allocation3 + $0x1d8] sm:$0xff]  ;;  %v3072_v51 = vadd.f32 %v2941_v13, %v2355_v59  ;;  %v3357_v3 = vpop.f32.mrf.mxu1  ;;  %8343 = vmatmul.mubr.msk.bf16.gmra.mxu1 %vm1174_vm6, %v8323_v16  ;;  %v4681_v16 = vld [vmem:[#allocation2 + $0x98] sm:$0x1] }
 0x208   : > { %v3069_v17 = vadd.f32 %v3005_v2, %v2933_v32  ;;  %2420 = vst.msk [vmem:[#allocation3 + $0x1f8] sm:$0xff] %vm1174_vm6, %v2356_v29  ;;  %v3580_v10 = vadd.f32 %v3516_v20, %v3357_v3  ;;  %v2943_v25 = vpop.f32.mrf.mxu0  ;;  %5097 = vmatprep.mubr.bf16.mxu1 %v8996_v0  ;;  %v4815_v32 = vsel %vm9558_vm14, %v8309_v57, %v4814_v7  ;;  %v4824_v63 = vrot.slane %v4681_v16, 5 }
 0x209   : > { %3136 = vst [vmem:[#allocation3 + $0x1f0] sm:$0xff] %v3072_v51  ;;  %v3359_v9 = vpop.f32.mrf.mxu1  ;;  %v8325_v28 = vcombine.low %v4815_v32, %v4818_v33  ;;  %v3523_v51 = vld [vmem:[#allocation3 + $0x38] sm:$0xff]  ;;  %v8832_v32 = vld [vmem:[#allocation2 + $0x9c] sm:$0xff]  }
 0x20a   : > { %3133 = vst.msk [vmem:[#allocation3 + $0x1d8] sm:$0xff] %vm1174_vm6, %v3069_v17  ;;  %v3581_v39 = vadd.f32 %v3517_v60, %v3359_v9  ;;  %v4295_v49 = vpop.f32.mrf.mxu0  ;;  %8379 = vmatmul.mubr.msk.bf16.gmra.mxu0 %vm1174_vm6, %v8826_v14  ;;  %v4683_v14 = vld [vmem:[#allocation2 + $0xa0] sm:$0xf]  ;;  %v3524_v17 = vld [vmem:[#allocation3 + $0x40] sm:$0xff]  ;;  %v4825_v26 = vsel %vm9558_vm14, %v4823_v41, %v4824_v63 }
 0x20b   : > { %v3007_v27 = vld [vmem:[#allocation3 + $0x1e8] sm:$0xff]  ;;  %v3361_v19 = vpop.f32.mrf.mxu1  ;;  %v4518_v46 = vadd.f32 %v4295_v49, %v3580_v10  ;;  %5668 = vmatprep.mubr.bf16.mxu0 %v8996_v0  ;;  %v4828_v42 = vrot.slane %v4683_v14, 5  ;;  %v4682_v49 = vld [vmem:[#allocation2 + $0x9c] sm:$0xe] }
 0x20c   : > { %v3071_v15 = vadd.f32 %v3007_v27, %v2939_v54  ;;  %3645 = vst.msk [vmem:[#allocation3 + $0x8] sm:$0xff] %vm1174_vm6, %v3581_v39  ;;  %v3582_v24 = vadd.f32 %v3518_v35, %v3361_v19  ;;  %v4297_v52 = vpop.f32.mrf.mxu0  ;;  %v8310_v54 = vrot.slane %v4679_v43, 9  ;;  %v3525_v19 = vld [vmem:[#allocation3 + $0x48] sm:$0xff] }
 0x20d   : > { %4582 = vst [vmem:[#allocation3] sm:$0xff] %v4518_v46  ;;  %v3363_v22 = vpop.f32.mrf.mxu1  ;;  %v4830_v30 = vrot.slane %v4828_v42, 4 }
 0x20e   : > { %3135 = vst.msk [vmem:[#allocation3 + $0x1e8] sm:$0xff] %vm1174_vm6, %v3071_v15  ;;  %v3583_v1 = vadd.f32 %v3519_v21, %v3363_v22  ;;  %v4299_v34 = vpop.f32.mrf.mxu0  ;;  %v3526_v15 = vld [vmem:[#allocation3 + $0x50] sm:$0xff] }
 0x20f   : > { %v3009_v36 = vld [vmem:[#allocation3 + $0x1f8] sm:$0xff]  ;;  %v3367_v38 = vpop.f32.mrf.mxu1  ;;  %v4520_v6 = vadd.f32 %v4299_v34, %v3582_v24  ;;  %8344 = vmatmul.mubr.msk.bf16.gmra.mxu1 %vm1174_vm6, %v8324_v48  ;;  %v4684_v48 = vld [vmem:[#allocation2 + $0xa4] sm:$0x1] }
 0x210   : > { %v3073_v8 = vadd.f32 %v3009_v36, %v2943_v25  ;;  %3647 = vst.msk [vmem:[#allocation3 + $0x18] sm:$0xff] %vm1174_vm6, %v3583_v1  ;;  %v3584_v61 = vadd.f32 %v3520_v37, %v3367_v38  ;;  %v4301_v23 = vpop.f32.mrf.mxu0  ;;  %5107 = vmatprep.mubr.bf16.mxu1 %v8996_v0  ;;  %v4822_v25 = vsel %vm9558_vm14, %v8310_v54, %v4821_v31  ;;  %v4831_v22 = vrot.slane %v4684_v48, 5  ;;  %v3527_v38 = vld [vmem:[#allocation3 + $0x58] sm:$0xff]  ;;  %v5931_v48 = vld [vmem:[#allocation2 + $0x18] sm:$0xf] }
 0x211   : > { %4584 = vst [vmem:[#allocation3 + $0x10] sm:$0xff] %v4520_v6  ;;  %v3369_v11 = vpop.f32.mrf.mxu1  ;;  %v8326_v57 = vcombine.low %v4822_v25, %v4825_v26  ;;  %v8833_v25 = vld [vmem:[#allocation2 + $0xa8] sm:$0xff]  }
 0x212   : > { %3137 = vst.msk [vmem:[#allocation3 + $0x1f8] sm:$0xff] %vm1174_vm6, %v3073_v8  ;;  %v3585_v47 = vadd.f32 %v3521_v44, %v3369_v11  ;;  %v4305_v50 = vpop.f32.mrf.mxu0  ;;  %8380 = vmatmul.mubr.msk.bf16.gmra.mxu0 %vm1174_vm6, %v8830_v40  ;;  %v4686_v40 = vld [vmem:[#allocation2 + $0xac] sm:$0xf]  ;;  %v3528_v8 = vld [vmem:[#allocation3 + $0x60] sm:$0xff]  ;;  %v4832_v43 = vsel %vm9558_vm14, %v4830_v30, %v4831_v22 }
 0x213   : > { %v4455_v53 = vld [vmem:[#allocation3 + $0x8] sm:$0xff]  ;;  %v3371_v4 = vpop.f32.mrf.mxu1  ;;  %v4522_v59 = vadd.f32 %v4305_v50, %v3584_v61  ;;  %5678 = vmatprep.mubr.bf16.mxu0 %v8996_v0  ;;  %v4835_v16 = vrot.slane %v4686_v40, 5  ;;  %v4685_v50 = vld [vmem:[#allocation2 + $0xa8] sm:$0xe] }
 0x214   : > { %v4519_v56 = vadd.f32 %v4455_v53, %v4297_v52  ;;  %3649 = vst.msk [vmem:[#allocation3 + $0x28] sm:$0xff] %vm1174_vm6, %v3585_v47  ;;  %v3586_v29 = vadd.f32 %v3522_v45, %v3371_v4  ;;  %v4307_v13 = vpop.f32.mrf.mxu0  ;;  %v8311_v52 = vrot.slane %v4682_v49, 9  ;;  %v3529_v4 = vld [vmem:[#allocation3 + $0x68] sm:$0xff] }
 0x215   : > { %4586 = vst [vmem:[#allocation3 + $0x20] sm:$0xff] %v4522_v59  ;;  %v3373_v2 = vpop.f32.mrf.mxu1  ;;  %v4837_v14 = vrot.slane %v4835_v16, 4 }
 0x216   : > { %4583 = vst.msk [vmem:[#allocation3 + $0x8] sm:$0xff] %vm1174_vm6, %v4519_v56  ;;  %v3587_v3 = vadd.f32 %v3523_v51, %v3373_v2  ;;  %v4309_v20 = vpop.f32.mrf.mxu0  ;;  %v3530_v56 = vld [vmem:[#allocation3 + $0x70] sm:$0xff] }
 0x217   : > { %v4457_v58 = vld [vmem:[#allocation3 + $0x18] sm:$0xff]  ;;  %v3377_v7 = vpop.f32.mrf.mxu1  ;;  %v4524_v10 = vadd.f32 %v4309_v20, %v3586_v29  ;;  %8345 = vmatmul.mubr.msk.bf16.gmra.mxu1 %vm1174_vm6, %v8325_v28 }
 0x218   : > { %v4521_v9 = vadd.f32 %v4457_v58, %v4301_v23  ;;  %3651 = vst.msk [vmem:[#allocation3 + $0x38] sm:$0xff] %vm1174_vm6, %v3587_v3  ;;  %v3588_v60 = vadd.f32 %v3524_v17, %v3377_v7  ;;  %v4311_v39 = vpop.f32.mrf.mxu0  ;;  %5117 = vmatprep.mubr.bf16.mxu1 %v8996_v0  ;;  %v4829_v23 = vsel %vm9558_vm14, %v8311_v52, %v4828_v42  ;;  %v4687_v28 = vld [vmem:[#allocation2 + $0xb0] sm:$0x1]  ;;  %v10325_v7 = vld [vmem:[#allocation2 + $0xb8] sm:$0xf] }
 0x219   : > { %4588 = vst [vmem:[#allocation3 + $0x30] sm:$0xff] %v4524_v10  ;;  %v3379_v27 = vpop.f32.mrf.mxu1  ;;  %v8327_v54 = vcombine.low %v4829_v23, %v4832_v43  ;;  %v4838_v2 = vrot.slane %v4687_v28, 5  ;;  %v3531_v58 = vld [vmem:[#allocation3 + $0x78] sm:$0xff] }
 0x21a   : > { %4585 = vst.msk [vmem:[#allocation3 + $0x18] sm:$0xff] %vm1174_vm6, %v4521_v9  ;;  %v3589_v35 = vadd.f32 %v3525_v19, %v3379_v27  ;;  %v4315_v46 = vpop.f32.mrf.mxu0  ;;  %8381 = vmatmul.mubr.msk.bf16.gmra.mxu0 %vm1174_vm6, %v8831_v12  ;;  %v3532_v9 = vld [vmem:[#allocation3 + $0x80] sm:$0xff] }
 0x21b   : > { %v4459_v62 = vld [vmem:[#allocation3 + $0x28] sm:$0xff]  ;;  %v3381_v18 = vpop.f32.mrf.mxu1  ;;  %v4526_v24 = vadd.f32 %v4315_v46, %v3588_v60  ;;  %5688 = vmatprep.mubr.bf16.mxu0 %v8996_v0  ;;  %v4839_v49 = vsel %vm9558_vm14, %v4837_v14, %v4838_v2  ;;  %v4688_v46 = vld [vmem:[#allocation2 + $0xb4] sm:$0xe] }
 0x21c   : > { %v4523_v21 = vadd.f32 %v4459_v62, %v4307_v13  ;;  %3653 = vst.msk [vmem:[#allocation3 + $0x48] sm:$0xff] %vm1174_vm6, %v3589_v35  ;;  %v3590_v1 = vadd.f32 %v3526_v15, %v3381_v18  ;;  %v4317_v34 = vpop.f32.mrf.mxu0  ;;  %v8312_v13 = vrot.slane %v4685_v50, 9  ;;  %v5932_v62 = vld [vmem:[#allocation2 + $0x1c] sm:$0xf]  ;;  %v3533_v15 = vld [vmem:[#allocation3 + $0x88] sm:$0xff] }
 0x21d   : > { %4590 = vst [vmem:[#allocation3 + $0x40] sm:$0xff] %v4526_v24  ;;  %v3383_v36 = vpop.f32.mrf.mxu1  ;;  %v4690_v24 = vld [vmem:[#allocation2 + $0xbc] sm:$0x1] }
 0x21e   : > { %4587 = vst.msk [vmem:[#allocation3 + $0x28] sm:$0xff] %vm1174_vm6, %v4523_v21  ;;  %v3591_v37 = vadd.f32 %v3527_v38, %v3383_v36  ;;  %v4319_v6 = vpop.f32.mrf.mxu0  ;;  %v10338_v21 = vld [vmem:[#allocation2 + $0xc4] sm:$0xf]  ;;  %v3534_v38 = vld [vmem:[#allocation3 + $0x90] sm:$0xff]  ;;  %v4845_v43 = vrot.slane %v4690_v24, 5 }
 0x21f   : > { %v4461_v33 = vld [vmem:[#allocation3 + $0x38] sm:$0xff]  ;;  %v3387_v31 = vpop.f32.mrf.mxu1  ;;  %v4528_v61 = vadd.f32 %v4319_v6, %v3590_v1  ;;  %8346 = vmatmul.mubr.msk.bf16.gmra.mxu1 %vm1174_vm6, %v8326_v57  ;;  %v4842_v57 = vrot.slane %v10325_v7, 5  ;;  %v5980_v1 = vshrl.u32 %v5931_v48, 16  ;;  %v8313_v6 = vrot.slane %v4688_v46, 9 }
 0x220   : > { %v4525_v11 = vadd.f32 %v4461_v33, %v4311_v39  ;;  %3655 = vst.msk [vmem:[#allocation3 + $0x58] sm:$0xff] %vm1174_vm6, %v3591_v37  ;;  %v3592_v44 = vadd.f32 %v3528_v8, %v3387_v31  ;;  %v4321_v47 = vpop.f32.mrf.mxu0  ;;  %5127 = vmatprep.mubr.bf16.mxu1 %v8996_v0  ;;  %v4836_v39 = vsel %vm9558_vm14, %v8312_v13, %v4835_v16  ;;  %v5993_v33 = vshrl.u32 %v5932_v62, 16 }
 0x221   : > { %4592 = vst [vmem:[#allocation3 + $0x50] sm:$0xff] %v4528_v61  ;;  %v3389_v53 = vpop.f32.mrf.mxu1  ;;  %v8328_v22 = vcombine.low %v4836_v39, %v4839_v49  ;;  %v4844_v23 = vrot.slane %v4842_v57, 4 }
 0x222   : > { %4589 = vst.msk [vmem:[#allocation3 + $0x38] sm:$0xff] %vm1174_vm6, %v4525_v11  ;;  %v3593_v45 = vadd.f32 %v3529_v4, %v3389_v53  ;;  %v4325_v59 = vpop.f32.mrf.mxu0  ;;  %8382 = vmatmul.mubr.msk.bf16.gmra.mxu0 %vm1174_vm6, %v8832_v32  ;;  %v5989_v32 = vshll.u32 %v5932_v62, 16  ;;  %v3535_v11 = vld [vmem:[#allocation3 + $0x98] sm:$0xff]  ;;  %v4691_v53 = vld [vmem:[#allocation2 + $0xc0] sm:$0xe]  ;;  %v5995_v14 = vrot.slane %v5993_v33, 4 }
 0x223   : > { %v4463_v41 = vld [vmem:[#allocation3 + $0x48] sm:$0xff]  ;;  %v3391_v63 = vpop.f32.mrf.mxu1  ;;  %v4530_v29 = vadd.f32 %v4325_v59, %v3592_v44  ;;  %5698 = vmatprep.mubr.bf16.mxu0 %v8996_v0  ;;  %v8834_v44 = vld [vmem:[#allocation2 + $0xb4] sm:$0xff]   ;;  %v4693_v4 = vld [vmem:[#allocation2 + $0xc8] sm:$0x1] }
 0x224   : > { %v4527_v51 = vadd.f32 %v4463_v41, %v4317_v34  ;;  %3657 = vst.msk [vmem:[#allocation3 + $0x68] sm:$0xff] %vm1174_vm6, %v3593_v45  ;;  %v3594_v3 = vadd.f32 %v3530_v56, %v3391_v63  ;;  %v4327_v20 = vpop.f32.mrf.mxu0  ;;  %v5983_v34 = vshll.u32 %v5931_v48, 16  ;;  %v5982_v45 = vrot.slane %v5980_v1, 4  ;;  %v3536_v63 = vld [vmem:[#allocation3 + $0xa0] sm:$0xff]  ;;  %v5935_v48 = vld [vmem:[#allocation2 + $0x28] sm:$0xf] }
 0x225   : > { %4594 = vst [vmem:[#allocation3 + $0x60] sm:$0xff] %v4530_v29  ;;  %v3393_v12 = vpop.f32.mrf.mxu1  ;;  %v5933_v29 = vld [vmem:[#allocation2 + $0x20] sm:$0x1]  ;;  %v10345_v13 = vrot.slane %v5989_v32, 5 }
 0x226   : > { %4591 = vst.msk [vmem:[#allocation3 + $0x48] sm:$0xff] %vm1174_vm6, %v4527_v51  ;;  %v3595_v17 = vadd.f32 %v3531_v58, %v3393_v12  ;;  %v4329_v10 = vpop.f32.mrf.mxu0  ;;  %v5985_v59 = vrot.slane %v5983_v34, 5  ;;  %v4846_v12 = vsel %vm9558_vm14, %v4844_v23, %v4845_v43  ;;  %v10353_v58 = vld [vmem:[#allocation2 + $0x1c] sm:$0xf]  ;;  %v5999_v49 = vshll.u32 %v5933_v29, 16  ;;  %v3539_v34 = vld [vmem:[#allocation3 + $0xb8] sm:$0xff] }
 0x227   : > { %v4465_v26 = vld [vmem:[#allocation3 + $0x58] sm:$0xff]  ;;  %v3397_v42 = vpop.f32.mrf.mxu1  ;;  %v4532_v60 = vadd.f32 %v4329_v10, %v3594_v3  ;;  %8347 = vmatmul.mubr.msk.bf16.gmra.mxu1 %vm1174_vm6, %v8327_v54  ;;  %v8314_v10 = vrot.slane %v4691_v53, 9  ;;  %v5996_v62 = vor.u32 %v5995_v14, %v10345_v13  ;;  %v8835_v33 = vld [vmem:[#allocation2 + $0xc0] sm:$0xff]   ;;  %v5936_v29 = vld [vmem:[#allocation2 + $0x2c] sm:$0x1] }
 0x228   : > { %v4529_v27 = vadd.f32 %v4465_v26, %v4321_v47  ;;  %3659 = vst.msk [vmem:[#allocation3 + $0x78] sm:$0xff] %vm1174_vm6, %v3595_v17  ;;  %v3596_v19 = vadd.f32 %v3532_v9, %v3397_v42  ;;  %v4331_v35 = vpop.f32.mrf.mxu0  ;;  %5137 = vmatprep.mubr.bf16.mxu1 %v8996_v0  ;;  %v4849_v47 = vrot.slane %v10338_v21, 5  ;;  %v3537_v17 = vld [vmem:[#allocation3 + $0xa8] sm:$0xff]  ;;  %v5986_v39 = vor.u32 %v5985_v59, %v5982_v45 }
 0x229   : > { %4596 = vst [vmem:[#allocation3 + $0x70] sm:$0xff] %v4532_v60  ;;  %v3399_v18 = vpop.f32.mrf.mxu1  ;;  %v5934_v26 = vld [vmem:[#allocation2 + $0x24] sm:$0xf]  ;;  %v4852_v60 = vrot.slane %v4693_v4, 5  ;;  %v6871_v23 = vld [vmem:[#allocation2 + $0x20] sm:$0x1] }
 0x22a   : > { %4593 = vst.msk [vmem:[#allocation3 + $0x58] sm:$0xff] %vm1174_vm6, %v4529_v27  ;;  %v3597_v52 = vadd.f32 %v3533_v15, %v3399_v18  ;;  %v4335_v30 = vpop.f32.mrf.mxu0  ;;  %8383 = vmatmul.mubr.msk.bf16.gmra.mxu0 %vm1174_vm6, %v8833_v25  ;;  %v4851_v25 = vrot.slane %v4849_v47, 4  ;;  %v6967_v18 = vrot.slane %v10353_v58, 5  ;;  %v6007_v21 = vshll.u32 %v5934_v26, 16 }
 0x22b   : > { %v4467_v40 = vld [vmem:[#allocation3 + $0x68] sm:$0xff]  ;;  %v3401_v36 = vpop.f32.mrf.mxu1  ;;  %v4534_v37 = vadd.f32 %v4335_v30, %v3596_v19  ;;  %5708 = vmatprep.mubr.bf16.mxu0 %v8996_v0  ;;  %v10361_v30 = vld [vmem:[#allocation2 + $0x18] sm:$0xe] }
 0x22c   : > { %v4531_v31 = vadd.f32 %v4467_v40, %v4327_v20  ;;  %3661 = vst.msk [vmem:[#allocation3 + $0x88] sm:$0xff] %vm1174_vm6, %v3597_v52  ;;  %v3598_v8 = vadd.f32 %v3534_v38, %v3401_v36  ;;  %v4337_v61 = vpop.f32.mrf.mxu0  ;;  %v4843_v20 = vsel %vm9558_vm14, %v8313_v6, %v4842_v57  ;;  %v10365_v40 = vsel %vm9558_vm14, %v8314_v10, %v4849_v47  ;;  %v3540_v6 = vld [vmem:[#allocation3 + $0xc0] sm:$0xff] }
 0x22d   : > { %4598 = vst [vmem:[#allocation3 + $0x80] sm:$0xff] %v4534_v37  ;;  %v3403_v16 = vpop.f32.mrf.mxu1  ;;  %v8329_v57 = vcombine.low %v4843_v20, %v4846_v12  ;;  %v6013_v36 = vshll.u32 %v5935_v48, 16  ;;  %v6017_v38 = vshrl.u32 %v5935_v48, 16  ;;  %v8423_v47 = vrot.slane %v10361_v30, 9  ;;  %v10386_v20 = vld [vmem:[#allocation2 + $0x28] sm:$0xf] }
 0x22e   : > { %4595 = vst.msk [vmem:[#allocation3 + $0x68] sm:$0xff] %vm1174_vm6, %v4531_v31  ;;  %v3599_v50 = vadd.f32 %v3535_v11, %v3403_v16  ;;  %v4339_v28 = vpop.f32.mrf.mxu0  ;;  %v10370_v31 = vsel %vm9558_vm14, %v4851_v25, %v4852_v60  ;;  %v3542_v25 = vld [vmem:[#allocation3 + $0xd0] sm:$0xff] }
 0x22f   : > { %v4469_v54 = vld [vmem:[#allocation3 + $0x78] sm:$0xff]  ;;  %v3407_v41 = vpop.f32.mrf.mxu1  ;;  %v4536_v56 = vadd.f32 %v4339_v28, %v3598_v8  ;;  %8348 = vmatmul.mubr.msk.bf16.gmra.mxu1 %vm1174_vm6, %v8328_v22  ;;  %v6004_v22 = vshrl.u32 %v5934_v26, 16  ;;  %v10372_v8 = vrot.slane %v5986_v39, 4  ;;  %v10382_v14 = vrot.slane %v6013_v36, 5 }
 0x230   : > { %v4533_v2 = vadd.f32 %v4469_v54, %v4331_v35  ;;  %3663 = vst.msk [vmem:[#allocation3 + $0x98] sm:$0xff] %vm1174_vm6, %v3599_v50  ;;  %v3600_v51 = vadd.f32 %v3536_v63, %v3407_v41  ;;  %v4341_v3 = vpop.f32.mrf.mxu0  ;;  %5147 = vmatprep.mubr.bf16.mxu1 %v8996_v0  ;;  %v3538_v35 = vld [vmem:[#allocation3 + $0xb0] sm:$0xff]  ;;  %v6969_v50 = vrot.slane %v6967_v18, 4  ;;  %v5937_v28 = vld [vmem:[#allocation2 + $0x30] sm:$0xf]  ;;  %v6009_v54 = vrot.slane %v6007_v21, 5 }
 0x231   : > { %4600 = vst [vmem:[#allocation3 + $0x90] sm:$0xff] %v4536_v56  ;;  %v3409_v7 = vpop.f32.mrf.mxu1  ;;  %v6006_v59 = vrot.slane %v6004_v22, 4  ;;  %v3541_v63 = vld [vmem:[#allocation3 + $0xc8] sm:$0xff]  ;;  %v6970_v56 = vrot.slane %v6871_v23, 5  ;;  %v6028_v12 = vshrl.u32 %v5937_v28, 16  ;;  %v8836_v21 = vld [vmem:[#allocation2 + $0xcc] sm:$0xff]  }
 0x232   : > { %4597 = vst.msk [vmem:[#allocation3 + $0x78] sm:$0xff] %vm1174_vm6, %v4533_v2  ;;  %v3601_v42 = vadd.f32 %v3537_v17, %v3409_v7  ;;  %v4345_v9 = vpop.f32.mrf.mxu0  ;;  %8384 = vmatmul.mubr.msk.bf16.gmra.mxu0 %vm1174_vm6, %v8834_v44  ;;  %v5997_v44 = vrot.slane %v5996_v62, 4  ;;  %v6019_v2 = vrot.slane %v6017_v38, 4  ;;  %v6031_v7 = vshll.u32 %v5937_v28, 16  ;;  %v5938_v39 = vld [vmem:[#allocation2 + $0x34] sm:$0xf] }
 0x233   : > { %v4471_v27 = vld [vmem:[#allocation3 + $0x88] sm:$0xff]  ;;  %v3411_v19 = vpop.f32.mrf.mxu1  ;;  %v4538_v46 = vadd.f32 %v4345_v9, %v3600_v51  ;;  %5718 = vmatprep.mubr.bf16.mxu0 %v8996_v0  ;;  %v5992_v9 = vsel %vm9552_vm13, %v10372_v8, %v10345_v13  ;;  %v10403_v13 = vsel %vm9558_vm14, %v8423_v47, %v6967_v18  ;;  %v10407_v62 = vsel %vm9558_vm14, %v6969_v50, %v6970_v56  ;;  %v3544_v38 = vld [vmem:[#allocation3 + $0xe0] sm:$0xff] }
 0x234   : > { %v4535_v15 = vadd.f32 %v4471_v27, %v4337_v61  ;;  %3665 = vst.msk [vmem:[#allocation3 + $0xa8] sm:$0xff] %vm1174_vm6, %v3601_v42  ;;  %v3602_v24 = vadd.f32 %v3538_v35, %v3411_v19  ;;  %v4347_v52 = vpop.f32.mrf.mxu0  ;;  %v10374_v61 = vrot.slane %v5999_v49, 5  ;;  %v8330_v42 = vcombine.low %v10365_v40, %v10370_v31  ;;  %v5941_v56 = vld [vmem:[#allocation2 + $0x40] sm:$0xf] }
 0x235   : > { %4602 = vst [vmem:[#allocation3 + $0xa0] sm:$0xff] %v4538_v46  ;;  %v3413_v1 = vpop.f32.mrf.mxu1  ;;  %v6010_v19 = vor.u32 %v6009_v54, %v6006_v59  ;;  %v6023_v35 = vshll.u32 %v5936_v29, 16  ;;  %v6030_v58 = vrot.slane %v6028_v12, 4  ;;  %v6037_v40 = vshll.u32 %v5938_v39, 16 }
 0x236   : > { %4599 = vst.msk [vmem:[#allocation3 + $0x88] sm:$0xff] %vm1174_vm6, %v4535_v15  ;;  %v3603_v37 = vadd.f32 %v3539_v34, %v3413_v1  ;;  %v4349_v32 = vpop.f32.mrf.mxu0  ;;  %v6002_v60 = vsel %vm9552_vm13, %v5997_v44, %v10374_v61  ;;  %v6020_v15 = vor.u32 %v6019_v2, %v10382_v14  ;;  %v6874_v1 = vld [vmem:[#allocation2 + $0x2c] sm:$0x1]  ;;  %v6033_v34 = vrot.slane %v6031_v7, 5 }
 0x237   : > { %v4473_v43 = vld [vmem:[#allocation3 + $0x98] sm:$0xff]  ;;  %v3417_v16 = vpop.f32.mrf.mxu1  ;;  %v4540_v11 = vadd.f32 %v4349_v32, %v3602_v24  ;;  %8349 = vmatmul.mubr.msk.bf16.gmra.mxu1 %vm1174_vm6, %v8329_v57  ;;  %v6872_v24 = vld [vmem:[#allocation2 + $0x24] sm:$0xe]  ;;  %v6041_v32 = vshrl.u32 %v5938_v39, 16  ;;  %v10415_v61 = vrot.slane %v6010_v19, 4  ;;  %v10417_v23 = vrot.slane %v6023_v35, 5 }
 0x238   : > { %v4537_v53 = vadd.f32 %v4473_v43, %v4341_v3  ;;  %3667 = vst.msk [vmem:[#allocation3 + $0xb8] sm:$0xff] %vm1174_vm6, %v3603_v37  ;;  %v3604_v4 = vadd.f32 %v3540_v6, %v3417_v16  ;;  %v4351_v45 = vpop.f32.mrf.mxu0  ;;  %5157 = vmatprep.mubr.bf16.mxu1 %v8996_v0  ;;  %v3543_v57 = vld [vmem:[#allocation3 + $0xd8] sm:$0xff]  ;;  %v8387_v6 = vcombine.low %v5992_v9, %v6002_v60  ;;  %v5940_v43 = vld [vmem:[#allocation2 + $0x3c] sm:$0xf]  ;;  %v6021_v47 = vrot.slane %v6020_v15, 4 }
 0x239   : > { %4604 = vst [vmem:[#allocation3 + $0xb0] sm:$0xff] %v4540_v11  ;;  %v3419_v41 = vpop.f32.mrf.mxu1  ;;  %v3545_v11 = vld [vmem:[#allocation3 + $0xe8] sm:$0xff]  ;;  %v8439_v44 = vcombine.low %v10403_v13, %v10407_v62  ;;  %v8424_v50 = vrot.slane %v6872_v24, 9  ;;  %v6977_v28 = vrot.slane %v6874_v1, 5  ;;  %v6052_v12 = vshrl.u32 %v5940_v43, 16  ;;  %v3547_v60 = vld [vmem:[#allocation3 + $0xf8] sm:$0xff] }
 0x23a   : > { %4601 = vst.msk [vmem:[#allocation3 + $0x98] sm:$0xff] %vm1174_vm6, %v4537_v53  ;;  %v3605_v51 = vadd.f32 %v3541_v63, %v3419_v41  ;;  %v4355_v3 = vpop.f32.mrf.mxu0  ;;  %8385 = vmatmul.mubr.msk.bf16.gmra.mxu0 %vm1174_vm6, %v8835_v33  ;;  %v5939_v53 = vld [vmem:[#allocation2 + $0x38] sm:$0x1]  ;;  %v6034_v41 = vor.u32 %v6033_v34, %v6030_v58  ;;  %v10423_v63 = vrot.slane %v6037_v40, 5  ;;  %v6055_v7 = vshll.u32 %v5940_v43, 16 }
 0x23b   : > { %v4475_v17 = vld [vmem:[#allocation3 + $0xa8] sm:$0xff]  ;;  %v3421_v10 = vpop.f32.mrf.mxu1  ;;  %v4542_v26 = vadd.f32 %v4355_v3, %v3604_v4  ;;  %5728 = vmatprep.mubr.bf16.mxu0 %v8996_v0  ;;  %v10426_v3 = vrot.slane %v6041_v32, 4  ;;  %v6026_v39 = vsel %vm9552_vm13, %v6021_v47, %v10417_v23  ;;  %v6877_v1 = vld [vmem:[#allocation2 + $0x38] sm:$0x1]  ;;  %v6054_v58 = vrot.slane %v6052_v12, 4  ;;  %v3551_v12 = vld [vmem:[#allocation3 + $0x118] sm:$0xff] }
 0x23c   : > { %v4539_v49 = vadd.f32 %v4475_v17, %v4347_v52  ;;  %3669 = vst.msk [vmem:[#allocation3 + $0xc8] sm:$0xff] %vm1174_vm6, %v3605_v51  ;;  %v3606_v48 = vadd.f32 %v3542_v25, %v3421_v10  ;;  %v4357_v27 = vpop.f32.mrf.mxu0  ;;  %v6974_v52 = vrot.slane %v10386_v20, 5  ;;  %v10428_v20 = vld [vmem:[#allocation2 + $0x34] sm:$0xf]  ;;  %v6057_v34 = vrot.slane %v6055_v7, 5  ;;  %v3549_v32 = vld [vmem:[#allocation3 + $0x108] sm:$0xff] }
 0x23d   : > { %4606 = vst [vmem:[#allocation3 + $0xc0] sm:$0xff] %v4542_v26  ;;  %v3423_v46 = vpop.f32.mrf.mxu1  ;;  %v6016_v26 = vsel %vm9552_vm13, %v10415_v61, %v10382_v14  ;;  %v6981_v15 = vrot.slane %v10428_v20, 5  ;;  %v5943_v23 = vld [vmem:[#allocation2 + $0x48] sm:$0xf]  ;;  %v6984_v47 = vrot.slane %v6877_v1, 5 }
 0x23e   : > { %4603 = vst.msk [vmem:[#allocation3 + $0xa8] sm:$0xff] %vm1174_vm6, %v4539_v49  ;;  %v3607_v30 = vadd.f32 %v3543_v57, %v3423_v46  ;;  %v4359_v22 = vpop.f32.mrf.mxu0  ;;  %v6976_v54 = vrot.slane %v6974_v52, 4  ;;  %v10440_v49 = vsel %vm9558_vm14, %v8424_v50, %v6974_v52  ;;  %v10447_v46 = vrot.slane %v6034_v41, 4  ;;  %v6875_v57 = vld [vmem:[#allocation2 + $0x30] sm:$0xe] }
 0x23f   : > { %v4477_v18 = vld [vmem:[#allocation3 + $0xb8] sm:$0xff]  ;;  %v3427_v36 = vpop.f32.mrf.mxu1  ;;  %v4544_v37 = vadd.f32 %v4359_v22, %v3606_v48  ;;  %8350 = vmatmul.mubr.msk.bf16.gmra.mxu1 %vm1174_vm6, %v8330_v42  ;;  %v6047_v42 = vshll.u32 %v5939_v53, 16  ;;  %v6061_v48 = vshll.u32 %v5941_v56, 16  ;;  %v3548_v22 = vld [vmem:[#allocation3 + $0x100] sm:$0xff]  ;;  %v5942_v50 = vld [vmem:[#allocation2 + $0x44] sm:$0x1] }
 0x240   : > { %v4541_v33 = vadd.f32 %v4477_v18, %v4351_v45  ;;  %3671 = vst.msk [vmem:[#allocation3 + $0xd8] sm:$0xff] %vm1174_vm6, %v3607_v30  ;;  %v3608_v31 = vadd.f32 %v3544_v38, %v3427_v36  ;;  %v4361_v8 = vpop.f32.mrf.mxu0  ;;  %6516 = vmatprep.mubr.bf16.mxu1 %v8996_v0  ;;  %v3546_v45 = vld [vmem:[#allocation3 + $0xf0] sm:$0xff]  ;;  %v10445_v14 = vsel %vm9558_vm14, %v6976_v54, %v6977_v28  ;;  %v10466_v28 = vld [vmem:[#allocation2 + $0x40] sm:$0xf] }
 0x241   : > { %4608 = vst [vmem:[#allocation3 + $0xd0] sm:$0xff] %v4544_v37  ;;  %v3429_v16 = vpop.f32.mrf.mxu1  ;;  %v10455_v38 = vrot.slane %v6047_v42, 5  ;;  %v6040_v13 = vsel %vm9552_vm13, %v10447_v46, %v10423_v63  ;;  %v5944_v54 = vld [vmem:[#allocation2 + $0x4c] sm:$0xf] }
 0x242   : > { %4605 = vst.msk [vmem:[#allocation3 + $0xb8] sm:$0xff] %vm1174_vm6, %v4541_v33  ;;  %v3609_v4 = vadd.f32 %v3545_v11, %v3429_v16  ;;  %v4365_v59 = vpop.f32.mrf.mxu0  ;;  %8386 = vmatmul.mubr.msk.bf16.gmra.mxu0 %vm1174_vm6, %v8836_v21  ;;  %v6044_v21 = vor.u32 %v10426_v3, %v10423_v63  ;;  %v8388_v33 = vcombine.low %v6016_v26, %v6026_v39  ;;  %v6983_v11 = vrot.slane %v6981_v15, 4 }
 0x243   : > { %v4479_v29 = vld [vmem:[#allocation3 + $0xc8] sm:$0xff]  ;;  %v3431_v2 = vpop.f32.mrf.mxu1  ;;  %v4546_v51 = vadd.f32 %v4365_v59, %v3608_v31  ;;  %7230 = vmatprep.mubr.bf16.mxu0 %v8996_v0  ;;  %v10457_v31 = vrot.slane %v6061_v48, 5  ;;  %v8440_v16 = vcombine.low %v10440_v49, %v10445_v14  ;;  %v6079_v3 = vshll.u32 %v5943_v23, 16 }
 0x244   : > { %v4543_v17 = vadd.f32 %v4479_v29, %v4357_v27  ;;  %3673 = vst.msk [vmem:[#allocation3 + $0xe8] sm:$0xff] %vm1174_vm6, %v3609_v4  ;;  %v3610_v10 = vadd.f32 %v3546_v45, %v3431_v2  ;;  %v4367_v25 = vpop.f32.mrf.mxu0  ;;  %v6065_v27 = vshrl.u32 %v5941_v56, 16  ;;  %v3550_v45 = vld [vmem:[#allocation3 + $0x110] sm:$0xff]  ;;  %v6045_v62 = vrot.slane %v6044_v21, 4  ;;  %v6878_v2 = vld [vmem:[#allocation2 + $0x3c] sm:$0xe] }
 0x245   : > { %4610 = vst [vmem:[#allocation3 + $0xe0] sm:$0xff] %v4546_v51  ;;  %v3433_v9 = vpop.f32.mrf.mxu1  ;;  %v6076_v51 = vshrl.u32 %v5943_v23, 16  ;;  %v10483_v42 = vsel %vm9558_vm14, %v6983_v11, %v6984_v47  ;;  %v6089_v39 = vshrl.u32 %v5944_v54, 16  ;;  %v8426_v46 = vrot.slane %v6878_v2, 9  ;;  %v3553_v21 = vld [vmem:[#allocation3 + $0x128] sm:$0xff]  ;;  %v3554_v23 = vld [vmem:[#allocation3 + $0x130] sm:$0xff] }
 0x246   : > { %4607 = vst.msk [vmem:[#allocation3 + $0xc8] sm:$0xff] %vm1174_vm6, %v4543_v17  ;;  %v3611_v19 = vadd.f32 %v3547_v60, %v3433_v9  ;;  %v4369_v35 = vpop.f32.mrf.mxu0  ;;  %v6067_v61 = vrot.slane %v6065_v27, 4  ;;  %v6071_v17 = vshll.u32 %v5942_v50, 16  ;;  %v6880_v9 = vld [vmem:[#allocation2 + $0x44] sm:$0x1]  ;;  %v6085_v60 = vshll.u32 %v5944_v54, 16 }
 0x247   : > { %v4481_v24 = vld [vmem:[#allocation3 + $0xd8] sm:$0xff]  ;;  %v3437_v30 = vpop.f32.mrf.mxu1  ;;  %v4548_v52 = vadd.f32 %v4369_v35, %v3610_v10  ;;  %8407 = vmatmul.mubr.msk.bf16.vlgmr.msra.gmra.mxu1 %vm1174_vm6, %v8387_v6  ;;  %v8425_v6 = vrot.slane %v6875_v57, 9  ;;  %v6988_v10 = vrot.slane %v10466_v28, 5  ;;  %v3552_v27 = vld [vmem:[#allocation3 + $0x120] sm:$0xff]  ;;  %v6050_v35 = vsel %vm9552_vm13, %v6045_v62, %v10455_v38 }
 0x248   : > { %v4545_v40 = vadd.f32 %v4481_v24, %v4361_v8  ;;  %3675 = vst.msk [vmem:[#allocation3 + $0xf8] sm:$0xff] %vm1174_vm6, %v3611_v19  ;;  %v3612_v18 = vadd.f32 %v3548_v22, %v3437_v30  ;;  %v4371_v36 = vpop.f32.mrf.mxu0  ;;  %6526 = vmatprep.mubr.bf16.mxu1 %v8996_v0  ;;  %v6068_v63 = vor.u32 %v6067_v61, %v10457_v31  ;;  %v6078_v30 = vrot.slane %v6076_v51, 4 }
 0x249   : > { %4612 = vst [vmem:[#allocation3 + $0xf0] sm:$0xff] %v4548_v52  ;;  %v3439_v37 = vpop.f32.mrf.mxu1  ;;  %v10476_v7 = vsel %vm9558_vm14, %v8425_v6, %v6981_v15  ;;  %v6081_v22 = vrot.slane %v6079_v3, 5  ;;  %v10499_v38 = vrot.slane %v6085_v60, 5  ;;  %v10508_v47 = vsel %vm9558_vm14, %v8426_v46, %v6988_v10 }
 0x24a   : > { %4609 = vst.msk [vmem:[#allocation3 + $0xd8] sm:$0xff] %vm1174_vm6, %v4545_v40  ;;  %v3613_v8 = vadd.f32 %v3549_v32, %v3439_v37  ;;  %v4375_v43 = vpop.f32.mrf.mxu0  ;;  %8459 = vmatmul.mubr.msk.bf16.vlgmr.msra.gmra.mxu0 %vm1174_vm6, %v8439_v44  ;;  %v6058_v44 = vor.u32 %v6057_v34, %v6054_v58  ;;  %v10493_v1 = vrot.slane %v6068_v63, 4  ;;  %v10495_v58 = vrot.slane %v6071_v17, 5  ;;  %v10501_v32 = vld [vmem:[#allocation2 + $0x4c] sm:$0xf]  ;;  %v3556_v17 = vld [vmem:[#allocation3 + $0x140] sm:$0xff] }
 0x24b   : > { %v4483_v53 = vld [vmem:[#allocation3 + $0xe8] sm:$0xff]  ;;  %v3441_v4 = vpop.f32.mrf.mxu1  ;;  %v4550_v59 = vadd.f32 %v4375_v43, %v3612_v18  ;;  %7240 = vmatprep.mubr.bf16.mxu0 %v8996_v0  ;;  %v6990_v34 = vrot.slane %v6988_v10, 4  ;;  %v6991_v40 = vrot.slane %v6880_v9, 5  ;;  %v6091_v37 = vrot.slane %v6089_v39, 4 }
 0x24c   : > { %v4547_v41 = vadd.f32 %v4483_v53, %v4367_v25  ;;  %3677 = vst.msk [vmem:[#allocation3 + $0x108] sm:$0xff] %vm1174_vm6, %v3613_v8  ;;  %v3614_v56 = vadd.f32 %v3550_v45, %v3441_v4  ;;  %v4377_v29 = vpop.f32.mrf.mxu0  ;;  %v10489_v14 = vrot.slane %v6058_v44, 4  ;;  %v8389_v43 = vcombine.low %v6040_v13, %v6050_v35  ;;  %v5947_v13 = vld [vmem:[#allocation2 + $0x58] sm:$0xf]  ;;  %v3555_v44 = vld [vmem:[#allocation3 + $0x138] sm:$0xff] }
 0x24d   : > { %4614 = vst [vmem:[#allocation3 + $0x100] sm:$0xff] %v4550_v59  ;;  %v3443_v20 = vpop.f32.mrf.mxu1  ;;  %v8441_v11 = vcombine.low %v10476_v7, %v10483_v42  ;;  %v6082_v45 = vor.u32 %v6081_v22, %v6078_v30  ;;  %v6881_v59 = vld [vmem:[#allocation2 + $0x48] sm:$0xe]  ;;  %v10517_v54 = vsel %vm9558_vm14, %v6990_v34, %v6991_v40  ;;  %v6074_v3 = vsel %vm9552_vm13, %v10493_v1, %v10495_v58  ;;  %v5948_v1 = vld [vmem:[#allocation2 + $0x5c] sm:$0x1] }
 0x24e   : > { %4611 = vst.msk [vmem:[#allocation3 + $0xe8] sm:$0xff] %vm1174_vm6, %v4547_v41  ;;  %v3615_v25 = vadd.f32 %v3551_v12, %v3443_v20  ;;  %v4379_v26 = vpop.f32.mrf.mxu0  ;;  %v6064_v4 = vsel %vm9552_vm13, %v10489_v14, %v10457_v31  ;;  %v10519_v41 = vld [vmem:[#allocation2 + $0x50] sm:$0x1]  ;;  %v6092_v20 = vor.u32 %v6091_v37, %v10499_v38  ;;  %v6113_v42 = vshrl.u32 %v5947_v13, 16  ;;  %v10538_v58 = vld [vmem:[#allocation2 + $0x58] sm:$0xf] }
 0x24f   : > { %v4485_v49 = vld [vmem:[#allocation3 + $0xf8] sm:$0xff]  ;;  %v3447_v48 = vpop.f32.mrf.mxu1  ;;  %v4552_v19 = vadd.f32 %v4379_v26, %v3614_v56  ;;  %8408 = vmatmul.mubr.msk.bf16.gmra.mxu1 %vm1174_vm6, %v8388_v33  ;;  %v6995_v56 = vrot.slane %v10501_v32, 5  ;;  %v6109_v26 = vshll.u32 %v5947_v13, 16  ;;  %v8442_v35 = vcombine.low %v10508_v47, %v10517_v54 }
 0x250   : > { %v4549_v57 = vadd.f32 %v4485_v49, %v4371_v36  ;;  %3679 = vst.msk [vmem:[#allocation3 + $0x118] sm:$0xff] %vm1174_vm6, %v3615_v25  ;;  %v3616_v15 = vadd.f32 %v3552_v27, %v3447_v48  ;;  %v4381_v24 = vpop.f32.mrf.mxu0  ;;  %6536 = vmatprep.mubr.bf16.mxu1 %v8996_v0  ;;  %v5946_v33 = vld [vmem:[#allocation2 + $0x54] sm:$0xf]  ;;  %v8427_v25 = vrot.slane %v6881_v59, 9  ;;  %v10531_v49 = vrot.slane %v6082_v45, 4 }
 0x251   : > { %4616 = vst [vmem:[#allocation3 + $0x110] sm:$0xff] %v4552_v19  ;;  %v3449_v52 = vpop.f32.mrf.mxu1  ;;  %v6103_v2 = vshll.u32 %v5946_v33, 16  ;;  %v6998_v48 = vrot.slane %v10519_v41, 5  ;;  %v3557_v19 = vld [vmem:[#allocation3 + $0x148] sm:$0xff]  ;;  %v6997_v14 = vrot.slane %v6995_v56, 4  ;;  %v8390_v22 = vcombine.low %v6064_v4, %v6074_v3 }
 0x252   : > { %4613 = vst.msk [vmem:[#allocation3 + $0xf8] sm:$0xff] %vm1174_vm6, %v4549_v57  ;;  %v3617_v18 = vadd.f32 %v3553_v21, %v3449_v52  ;;  %v4385_v36 = vpop.f32.mrf.mxu0  ;;  %8460 = vmatmul.mubr.msk.bf16.gmra.mxu0 %vm1174_vm6, %v8440_v16  ;;  %v5945_v16 = vld [vmem:[#allocation2 + $0x50] sm:$0x1]  ;;  %v6093_v52 = vrot.slane %v6092_v20, 4  ;;  %v10543_v37 = vsel %vm9558_vm14, %v8427_v25, %v6995_v56  ;;  %v10545_v32 = vrot.slane %v6109_v26, 5 }
 0x253   : > { %v4487_v6 = vld [vmem:[#allocation3 + $0x108] sm:$0xff]  ;;  %v3451_v61 = vpop.f32.mrf.mxu1  ;;  %v4554_v8 = vadd.f32 %v4385_v36, %v3616_v15  ;;  %7250 = vmatprep.mubr.bf16.mxu0 %v8996_v0  ;;  %v6095_v12 = vshll.u32 %v5945_v16, 16  ;;  %v6105_v57 = vrot.slane %v6103_v2, 5  ;;  %v6088_v4 = vsel %vm9552_vm13, %v10531_v49, %v10499_v38  ;;  %v6886_v41 = vld [vmem:[#allocation2 + $0x5c] sm:$0x1] }
 0x254   : > { %v4551_v50 = vadd.f32 %v4487_v6, %v4377_v29  ;;  %3681 = vst.msk [vmem:[#allocation3 + $0x128] sm:$0xff] %vm1174_vm6, %v3617_v18  ;;  %v3618_v28 = vadd.f32 %v3554_v23, %v3451_v61  ;;  %v4387_v53 = vpop.f32.mrf.mxu0  ;;  %v6100_v29 = vshrl.u32 %v5946_v33, 16  ;;  %v5949_v15 = vld [vmem:[#allocation2 + $0x60] sm:$0xf]  ;;  %v3558_v18 = vld [vmem:[#allocation3 + $0x150] sm:$0xff]  ;;  %v6115_v33 = vrot.slane %v6113_v42, 4 }
 0x255   : > { %4618 = vst [vmem:[#allocation3 + $0x120] sm:$0xff] %v4554_v8  ;;  %v3453_v62 = vpop.f32.mrf.mxu1  ;;  %v6097_v21 = vrot.slane %v6095_v12, 5  ;;  %v10547_v6 = vld [vmem:[#allocation2 + $0x54] sm:$0xe]  ;;  %v6127_v16 = vshll.u32 %v5949_v15, 16  ;;  %v10556_v45 = vsel %vm9558_vm14, %v6997_v14, %v6998_v48  ;;  %v6119_v59 = vshll.u32 %v5948_v1, 16 }
 0x256   : > { %4615 = vst.msk [vmem:[#allocation3 + $0x108] sm:$0xff] %vm1174_vm6, %v4551_v50  ;;  %v3619_v51 = vadd.f32 %v3555_v44, %v3453_v62  ;;  %v4389_v31 = vpop.f32.mrf.mxu0  ;;  %v6102_v46 = vrot.slane %v6100_v29, 4  ;;  %v8428_v56 = vrot.slane %v10547_v6, 9  ;;  %v7002_v29 = vrot.slane %v10538_v58, 5  ;;  %v3561_v42 = vld [vmem:[#allocation3 + $0x168] sm:$0xff] }
 0x257   : > { %v4489_v7 = vld [vmem:[#allocation3 + $0x118] sm:$0xff]  ;;  %v3457_v63 = vpop.f32.mrf.mxu1  ;;  %v4556_v10 = vadd.f32 %v4389_v31, %v3618_v28  ;;  %8409 = vmatmul.mubr.msk.bf16.gmra.mxu1 %vm1174_vm6, %v8389_v43  ;;  %v5950_v43 = vld [vmem:[#allocation2 + $0x64] sm:$0xf]  ;;  %v6098_v44 = vsel %vm9552_vm13, %v6093_v52, %v6097_v21  ;;  %v6116_v3 = vor.u32 %v6115_v33, %v10545_v32  ;;  %v6129_v25 = vrot.slane %v6127_v16, 5  ;;  %v6887_v6 = vld [vmem:[#allocation2 + $0x60] sm:$0xe] }
 0x258   : > { %v4553_v9 = vadd.f32 %v4489_v7, %v4381_v24  ;;  %3683 = vst.msk [vmem:[#allocation3 + $0x138] sm:$0xff] %vm1174_vm6, %v3619_v51  ;;  %v3620_v60 = vadd.f32 %v3556_v17, %v3457_v63  ;;  %v4391_v39 = vpop.f32.mrf.mxu0  ;;  %6546 = vmatprep.mubr.bf16.mxu1 %v8996_v0  ;;  %v3559_v28 = vld [vmem:[#allocation3 + $0x158] sm:$0xff]  ;;  %v3560_v51 = vld [vmem:[#allocation3 + $0x160] sm:$0xff]  ;;  %v6133_v20 = vshll.u32 %v5950_v43, 16  ;;  %v6137_v12 = vshrl.u32 %v5950_v43, 16 }
 0x259   : > { %4620 = vst [vmem:[#allocation3 + $0x130] sm:$0xff] %v4556_v10  ;;  %v3459_v27 = vpop.f32.mrf.mxu1  ;;  %v7005_v49 = vrot.slane %v6886_v41, 5  ;;  %v8443_v14 = vcombine.low %v10543_v37, %v10556_v45  ;;  %v6117_v52 = vrot.slane %v6116_v3, 4  ;;  %v5953_v47 = vld [vmem:[#allocation2 + $0x70] sm:$0xf] }
 0x25a   : > { %4617 = vst.msk [vmem:[#allocation3 + $0x118] sm:$0xff] %vm1174_vm6, %v4553_v9  ;;  %v3621_v24 = vadd.f32 %v3557_v19, %v3459_v27  ;;  %v4395_v30 = vpop.f32.mrf.mxu0  ;;  %8461 = vmatmul.mubr.msk.bf16.gmra.mxu0 %vm1174_vm6, %v8441_v11  ;;  %v6124_v11 = vshrl.u32 %v5949_v15, 16  ;;  %v8391_v19 = vcombine.low %v6088_v4, %v6098_v44  ;;  %v5952_v15 = vld [vmem:[#allocation2 + $0x6c] sm:$0xf]  ;;  %v10581_v21 = vrot.slane %v6133_v20, 5  ;;  %v3563_v37 = vld [vmem:[#allocation3 + $0x178] sm:$0xff] }
 0x25b   : > { %v4491_v34 = vld [vmem:[#allocation3 + $0x128] sm:$0xff]  ;;  %v3461_v40 = vpop.f32.mrf.mxu1  ;;  %v4558_v36 = vadd.f32 %v4395_v30, %v3620_v60  ;;  %7260 = vmatprep.mubr.bf16.mxu0 %v8996_v0  ;;  %v10569_v60 = vrot.slane %v6119_v59, 5  ;;  %v6139_v1 = vrot.slane %v6137_v12, 4  ;;  %v6161_v4 = vshrl.u32 %v5953_v47, 16 }
 0x25c   : > { %v4555_v61 = vadd.f32 %v4491_v34, %v4387_v53  ;;  %3685 = vst.msk [vmem:[#allocation3 + $0x148] sm:$0xff] %vm1174_vm6, %v3621_v24  ;;  %v3622_v23 = vadd.f32 %v3558_v18, %v3461_v40  ;;  %v4397_v8 = vpop.f32.mrf.mxu0  ;;  %v6106_v53 = vor.u32 %v6105_v57, %v6102_v46  ;;  %v6126_v10 = vrot.slane %v6124_v11, 4  ;;  %v10578_v57 = vld [vmem:[#allocation2 + $0x64] sm:$0xf]  ;;  %v5951_v40 = vld [vmem:[#allocation2 + $0x68] sm:$0x1] }
 0x25d   : > { %4622 = vst [vmem:[#allocation3 + $0x140] sm:$0xff] %v4558_v36  ;;  %v3463_v50 = vpop.f32.mrf.mxu1  ;;  %v7004_v46 = vrot.slane %v7002_v29, 4  ;;  %v10586_v34 = vsel %vm9558_vm14, %v8428_v56, %v7002_v29  ;;  %v6143_v44 = vshll.u32 %v5951_v40, 16 }
 0x25e   : > { %4619 = vst.msk [vmem:[#allocation3 + $0x128] sm:$0xff] %vm1174_vm6, %v4555_v61  ;;  %v3623_v13 = vadd.f32 %v3559_v28, %v3463_v50  ;;  %v4399_v62 = vpop.f32.mrf.mxu0  ;;  %v10567_v9 = vrot.slane %v6106_v53, 4  ;;  %v6130_v18 = vor.u32 %v6129_v25, %v6126_v10  ;;  %v7009_v61 = vrot.slane %v10578_v57, 5  ;;  %v10598_v50 = vld [vmem:[#allocation2 + $0x68] sm:$0x1] }
 0x25f   : > { %v4493_v2 = vld [vmem:[#allocation3 + $0x138] sm:$0xff]  ;;  %v3467_v38 = vpop.f32.mrf.mxu1  ;;  %v4560_v31 = vadd.f32 %v4399_v62, %v3622_v23  ;;  %8410 = vmatmul.mubr.msk.bf16.gmra.mxu1 %vm1174_vm6, %v8390_v22  ;;  %v6148_v23 = vshrl.u32 %v5952_v15, 16  ;;  %v10596_v16 = vsel %vm9558_vm14, %v7004_v46, %v7005_v49  ;;  %v6157_v28 = vshll.u32 %v5953_v47, 16 }
 0x260   : > { %v4557_v7 = vadd.f32 %v4493_v2, %v4391_v39  ;;  %3687 = vst.msk [vmem:[#allocation3 + $0x158] sm:$0xff] %vm1174_vm6, %v3623_v13  ;;  %v3624_v63 = vadd.f32 %v3560_v51, %v3467_v38  ;;  %v4401_v17 = vpop.f32.mrf.mxu0  ;;  %6556 = vmatprep.mubr.bf16.mxu1 %v8996_v0  ;;  %v3562_v39 = vld [vmem:[#allocation3 + $0x170] sm:$0xff]  ;;  %v6112_v33 = vsel %vm9552_vm13, %v10567_v9, %v10545_v32  ;;  %v3564_v32 = vld [vmem:[#allocation3 + $0x180] sm:$0xff]  ;;  %v10607_v2 = vrot.slane %v6130_v18, 4  ;;  %v5954_v57 = vld [vmem:[#allocation2 + $0x74] sm:$0x1] }
 0x261   : > { %4624 = vst [vmem:[#allocation3 + $0x150] sm:$0xff] %v4560_v31  ;;  %v3469_v26 = vpop.f32.mrf.mxu1  ;;  %v6122_v13 = vsel %vm9552_vm13, %v6117_v52, %v10569_v60  ;;  %v6140_v62 = vor.u32 %v6139_v1, %v10581_v21  ;;  %v8429_v38 = vrot.slane %v6887_v6, 9  ;;  %v3565_v31 = vld [vmem:[#allocation3 + $0x188] sm:$0xff]  ;;  %v7011_v3 = vrot.slane %v7009_v61, 4  ;;  %v5955_v9 = vld [vmem:[#allocation2 + $0x78] sm:$0xf] }
 0x262   : > { %4621 = vst.msk [vmem:[#allocation3 + $0x138] sm:$0xff] %vm1174_vm6, %v4557_v7  ;;  %v3625_v48 = vadd.f32 %v3561_v42, %v3469_v26  ;;  %v4405_v27 = vpop.f32.mrf.mxu0  ;;  %8462 = vmatmul.mubr.msk.bf16.gmra.mxu0 %vm1174_vm6, %v8442_v35  ;;  %v7012_v20 = vrot.slane %v10598_v50, 5  ;;  %v6150_v12 = vrot.slane %v6148_v23, 4  ;;  %v8444_v10 = vcombine.low %v10586_v34, %v10596_v16  ;;  %v10616_v42 = vld [vmem:[#allocation2 + $0x70] sm:$0xf] }
 0x263   : > { %v4495_v24 = vld [vmem:[#allocation3 + $0x148] sm:$0xff]  ;;  %v3471_v30 = vpop.f32.mrf.mxu1  ;;  %v4562_v22 = vadd.f32 %v4405_v27, %v3624_v63  ;;  %7270 = vmatprep.mubr.bf16.mxu0 %v8996_v0  ;;  %v10614_v25 = vrot.slane %v6157_v28, 5  ;;  %v6163_v26 = vrot.slane %v6161_v4, 4  ;;  %v8392_v27 = vcombine.low %v6112_v33, %v6122_v13  ;;  %v6890_v52 = vld [vmem:[#allocation2 + $0x6c] sm:$0xe] }
 0x264   : > { %v4559_v54 = vadd.f32 %v4495_v24, %v4397_v8  ;;  %3689 = vst.msk [vmem:[#allocation3 + $0x168] sm:$0xff] %vm1174_vm6, %v3625_v48  ;;  %v3626_v35 = vadd.f32 %v3562_v39, %v3471_v30  ;;  %v4407_v58 = vpop.f32.mrf.mxu0  ;;  %v6151_v8 = vshll.u32 %v5952_v15, 16  ;;  %v3566_v48 = vld [vmem:[#allocation3 + $0x190] sm:$0xff]  ;;  %v6145_v46 = vrot.slane %v6143_v44, 5  ;;  %v5956_v1 = vld [vmem:[#allocation2 + $0x7c] sm:$0xf] }
 0x265   : > { %4626 = vst [vmem:[#allocation3 + $0x160] sm:$0xff] %v4562_v22  ;;  %v3473_v36 = vpop.f32.mrf.mxu1  ;;  %v6136_v30 = vsel %vm9552_vm13, %v10607_v2, %v10581_v21  ;;  %v10626_v22 = vsel %vm9558_vm14, %v8429_v38, %v7009_v61  ;;  %v7016_v34 = vrot.slane %v10616_v42, 5  ;;  %v6172_v40 = vshrl.u32 %v5955_v9, 16  ;;  %v3569_v13 = vld [vmem:[#allocation3 + $0x1a8] sm:$0xff] }
 0x266   : > { %4623 = vst.msk [vmem:[#allocation3 + $0x148] sm:$0xff] %vm1174_vm6, %v4559_v54  ;;  %v3627_v43 = vadd.f32 %v3563_v37, %v3473_v36  ;;  %v4409_v11 = vpop.f32.mrf.mxu0  ;;  %v6153_v7 = vrot.slane %v6151_v8, 5  ;;  %v3567_v54 = vld [vmem:[#allocation3 + $0x198] sm:$0xff]  ;;  %v6175_v18 = vshll.u32 %v5955_v9, 16  ;;  %v10632_v21 = vsel %vm9558_vm14, %v7011_v3, %v7012_v20  ;;  %v3568_v8 = vld [vmem:[#allocation3 + $0x1a0] sm:$0xff] }
 0x267   : > { %v4497_v45 = vld [vmem:[#allocation3 + $0x158] sm:$0xff]  ;;  %v3477_v53 = vpop.f32.mrf.mxu1  ;;  %v4564_v59 = vadd.f32 %v4409_v11, %v3626_v35  ;;  %8411 = vmatmul.mubr.msk.bf16.gmra.mxu1 %vm1174_vm6, %v8391_v19  ;;  %v6141_v19 = vrot.slane %v6140_v62, 4  ;;  %v6164_v33 = vor.u32 %v6163_v26, %v10614_v25  ;;  %v6167_v6 = vshll.u32 %v5954_v57, 16  ;;  %v5958_v42 = vld [vmem:[#allocation2 + $0x84] sm:$0xf] }
 0x268   : > { %v4561_v41 = vadd.f32 %v4497_v45, %v4401_v17  ;;  %3691 = vst.msk [vmem:[#allocation3 + $0x178] sm:$0xff] %vm1174_vm6, %v3627_v43  ;;  %v3628_v56 = vadd.f32 %v3564_v32, %v3477_v53  ;;  %v4411_v29 = vpop.f32.mrf.mxu0  ;;  %6566 = vmatprep.mubr.bf16.mxu1 %v8996_v0  ;;  %v6154_v35 = vor.u32 %v6153_v7, %v6150_v12  ;;  %v6181_v16 = vshll.u32 %v5956_v1, 16  ;;  %v3570_v12 = vld [vmem:[#allocation3 + $0x1b0] sm:$0xff] }
 0x269   : > { %4628 = vst [vmem:[#allocation3 + $0x170] sm:$0xff] %v4564_v59  ;;  %v3479_v51 = vpop.f32.mrf.mxu1  ;;  %v6146_v11 = vsel %vm9552_vm13, %v6141_v19, %v6145_v46  ;;  %v6185_v50 = vshrl.u32 %v5956_v1, 16  ;;  %v8430_v53 = vrot.slane %v6890_v52, 9  ;;  %v7018_v44 = vrot.slane %v7016_v34, 4  ;;  %v3571_v46 = vld [vmem:[#allocation3 + $0x1b8] sm:$0xff] }
 0x26a   : > { %4625 = vst.msk [vmem:[#allocation3 + $0x158] sm:$0xff] %vm1174_vm6, %v4561_v41  ;;  %v3629_v63 = vadd.f32 %v3565_v31, %v3479_v51  ;;  %v4415_v17 = vpop.f32.mrf.mxu0  ;;  %8463 = vmatmul.mubr.msk.bf16.gmra.mxu0 %vm1174_vm6, %v8443_v14  ;;  %v10640_v62 = vrot.slane %v6154_v35, 4  ;;  %v6174_v41 = vrot.slane %v6172_v40, 4  ;;  %v6165_v38 = vrot.slane %v6164_v33, 4  ;;  %v10644_v31 = vld [vmem:[#allocation2 + $0x7c] sm:$0xf] }
 0x26b   : > { %v4499_v60 = vld [vmem:[#allocation3 + $0x168] sm:$0xff]  ;;  %v3481_v49 = vpop.f32.mrf.mxu1  ;;  %v4566_v39 = vadd.f32 %v4415_v17, %v3628_v56  ;;  %7280 = vmatprep.mubr.bf16.mxu0 %v8996_v0  ;;  %v6177_v56 = vrot.slane %v6175_v18, 5  ;;  %v6169_v51 = vrot.slane %v6167_v6, 5  ;;  %v10647_v17 = vrot.slane %v6181_v16, 5 }
 0x26c   : > { %v4563_v14 = vadd.f32 %v4499_v60, %v4407_v58  ;;  %3693 = vst.msk [vmem:[#allocation3 + $0x188] sm:$0xff] %vm1174_vm6, %v3629_v63  ;;  %v3630_v15 = vadd.f32 %v3566_v48, %v3481_v49  ;;  %v4417_v24 = vpop.f32.mrf.mxu0  ;;  %v6892_v58 = vld [vmem:[#allocation2 + $0x74] sm:$0x1]  ;;  %v8393_v63 = vcombine.low %v6136_v30, %v6146_v11  ;;  %v6187_v26 = vrot.slane %v6185_v50, 4  ;;  %v5959_v30 = vld [vmem:[#allocation2 + $0x88] sm:$0xf] }
 0x26d   : > { %4630 = vst [vmem:[#allocation3 + $0x180] sm:$0xff] %v4566_v39  ;;  %v3483_v47 = vpop.f32.mrf.mxu1  ;;  %v7019_v32 = vrot.slane %v6892_v58, 5  ;;  %v8445_v49 = vcombine.low %v10626_v22, %v10632_v21  ;;  %v10654_v48 = vsel %vm9558_vm14, %v8430_v53, %v7016_v34  ;;  %v5957_v39 = vld [vmem:[#allocation2 + $0x80] sm:$0x1]  ;;  %v6160_v57 = vsel %vm9552_vm13, %v10640_v62, %v10614_v25  ;;  %v3572_v34 = vld [vmem:[#allocation3 + $0x1c0] sm:$0xff] }
 0x26e   : > { %4627 = vst.msk [vmem:[#allocation3 + $0x168] sm:$0xff] %vm1174_vm6, %v4563_v14  ;;  %v3631_v36 = vadd.f32 %v3567_v54, %v3483_v47  ;;  %v4419_v37 = vpop.f32.mrf.mxu0  ;;  %v6170_v1 = vsel %vm9552_vm13, %v6165_v38, %v6169_v51  ;;  %v10668_v47 = vld [vmem:[#allocation2 + $0x80] sm:$0x1]  ;;  %v6196_v54 = vshrl.u32 %v5958_v42, 16  ;;  %v6199_v35 = vshll.u32 %v5958_v42, 16 }
 0x26f   : > { %v4501_v61 = vld [vmem:[#allocation3 + $0x178] sm:$0xff]  ;;  %v3487_v23 = vpop.f32.mrf.mxu1  ;;  %v4568_v43 = vadd.f32 %v4419_v37, %v3630_v15  ;;  %8412 = vmatmul.mubr.msk.bf16.gmra.mxu1 %vm1174_vm6, %v8392_v27  ;;  %v6893_v27 = vld [vmem:[#allocation2 + $0x78] sm:$0xe]  ;;  %v10662_v14 = vsel %vm9558_vm14, %v7018_v44, %v7019_v32  ;;  %v6178_v15 = vor.u32 %v6177_v56, %v6174_v41  ;;  %v6188_v18 = vor.u32 %v6187_v26, %v10647_v17  ;;  %v3574_v56 = vld [vmem:[#allocation3 + $0x1d0] sm:$0xff] }
 0x270   : > { %v4565_v28 = vadd.f32 %v4501_v61, %v4411_v29  ;;  %3695 = vst.msk [vmem:[#allocation3 + $0x198] sm:$0xff] %vm1174_vm6, %v3631_v36  ;;  %v3632_v4 = vadd.f32 %v3568_v8, %v3487_v23  ;;  %v4421_v45 = vpop.f32.mrf.mxu0  ;;  %6576 = vmatprep.mubr.bf16.mxu1 %v8996_v0  ;;  %v6191_v36 = vshll.u32 %v5957_v39, 16  ;;  %v8431_v37 = vrot.slane %v6893_v27, 9  ;;  %v5962_v62 = vld [vmem:[#allocation2 + $0x94] sm:$0xf] }
 0x271   : > { %4632 = vst [vmem:[#allocation3 + $0x190] sm:$0xff] %v4568_v43  ;;  %v3489_v59 = vpop.f32.mrf.mxu1  ;;  %v6205_v61 = vshll.u32 %v5959_v30, 16  ;;  %v6209_v23 = vshrl.u32 %v5959_v30, 16  ;;  %v3573_v43 = vld [vmem:[#allocation3 + $0x1c8] sm:$0xff]  ;;  %v8446_v11 = vcombine.low %v10654_v48, %v10662_v14  ;;  %v10676_v16 = vrot.slane %v6178_v15, 4 }
 0x272   : > { %4629 = vst.msk [vmem:[#allocation3 + $0x178] sm:$0xff] %vm1174_vm6, %v4565_v28  ;;  %v3633_v2 = vadd.f32 %v3569_v13, %v3489_v59  ;;  %v4425_v29 = vpop.f32.mrf.mxu0  ;;  %8464 = vmatmul.mubr.msk.bf16.gmra.mxu0 %vm1174_vm6, %v8444_v10  ;;  %v7026_v28 = vrot.slane %v10668_v47, 5  ;;  %v8394_v53 = vcombine.low %v6160_v57, %v6170_v1  ;;  %v6198_v32 = vrot.slane %v6196_v54, 4  ;;  %v5961_v13 = vld [vmem:[#allocation2 + $0x90] sm:$0xf] }
 0x273   : > { %v4503_v3 = vld [vmem:[#allocation3 + $0x188] sm:$0xff]  ;;  %v3491_v20 = vpop.f32.mrf.mxu1  ;;  %v4570_v7 = vadd.f32 %v4425_v29, %v3632_v4  ;;  %7290 = vmatprep.mubr.bf16.mxu0 %v8996_v0  ;;  %v6201_v59 = vrot.slane %v6199_v35, 5  ;;  %v6189_v29 = vrot.slane %v6188_v18, 4  ;;  %v6193_v38 = vrot.slane %v6191_v36, 5  ;;  %v10693_v42 = vld [vmem:[#allocation2 + $0x88] sm:$0xf] }
 0x274   : > { %v4567_v9 = vadd.f32 %v4503_v3, %v4417_v24  ;;  %3697 = vst.msk [vmem:[#allocation3 + $0x1a8] sm:$0xff] %vm1174_vm6, %v3633_v2  ;;  %v3634_v60 = vadd.f32 %v3570_v12, %v3491_v20  ;;  %v4427_v10 = vpop.f32.mrf.mxu0  ;;  %v7023_v24 = vrot.slane %v10644_v31, 5  ;;  %v10686_v31 = vld [vmem:[#allocation2 + $0x8c] sm:$0x1]  ;;  %v10691_v26 = vld [vmem:[#allocation2 + $0x84] sm:$0xe]  ;;  %v6184_v57 = vsel %vm9552_vm13, %v10676_v16, %v10647_v17 }
 0x275   : > { %4634 = vst [vmem:[#allocation3 + $0x1a0] sm:$0xff] %v4570_v7  ;;  %v3493_v19 = vpop.f32.mrf.mxu1  ;;  %v10689_v7 = vrot.slane %v6205_v61, 5  ;;  %v6223_v39 = vshll.u32 %v5961_v13, 16  ;;  %v6229_v27 = vshll.u32 %v5962_v62, 16  ;;  %v6194_v47 = vsel %vm9552_vm13, %v6189_v29, %v6193_v38  ;;  %v3579_v29 = vld [vmem:[#allocation3 + $0x1f8] sm:$0xff] }
 0x276   : > { %4631 = vst.msk [vmem:[#allocation3 + $0x188] sm:$0xff] %vm1174_vm6, %v4567_v9  ;;  %v3635_v22 = vadd.f32 %v3571_v46, %v3493_v19  ;;  %v4429_v52 = vpop.f32.mrf.mxu0  ;;  %v7025_v50 = vrot.slane %v7023_v24, 4  ;;  %v10684_v51 = vsel %vm9558_vm14, %v8431_v37, %v7023_v24  ;;  %v6233_v19 = vshrl.u32 %v5962_v62, 16  ;;  %v3577_v37 = vld [vmem:[#allocation3 + $0x1e8] sm:$0xff]  ;;  %v5964_v62 = vld [vmem:[#allocation2 + $0x9c] sm:$0xf] }
 0x277   : > { %v4505_v25 = vld [vmem:[#allocation3 + $0x198] sm:$0xff]  ;;  %v3497_v58 = vpop.f32.mrf.mxu1  ;;  %v4572_v40 = vadd.f32 %v4429_v52, %v3634_v60  ;;  %8413 = vmatmul.mubr.msk.bf16.gmra.mxu1 %vm1174_vm6, %v8393_v63  ;;  %v6211_v63 = vrot.slane %v6209_v23, 4  ;;  %v6202_v24 = vor.u32 %v6201_v59, %v6198_v32  ;;  %v3576_v52 = vld [vmem:[#allocation3 + $0x1e0] sm:$0xff]  ;;  %v6215_v54 = vshll.u32 %v10686_v31, 16 }
 0x278   : > { %v4569_v21 = vadd.f32 %v4505_v25, %v4421_v45  ;;  %3699 = vst.msk [vmem:[#allocation3 + $0x1b8] sm:$0xff] %vm1174_vm6, %v3635_v22  ;;  %v3636_v33 = vadd.f32 %v3572_v34, %v3497_v58  ;;  %v4431_v6 = vpop.f32.mrf.mxu0  ;;  %6586 = vmatprep.mubr.bf16.mxu1 %v8996_v0  ;;  %v3575_v60 = vld [vmem:[#allocation3 + $0x1d8] sm:$0xff]  ;;  %v10702_v15 = vsel %vm9558_vm14, %v7025_v50, %v7026_v28  ;;  %v7030_v35 = vrot.slane %v10693_v42, 5  ;;  %v5963_v50 = vld [vmem:[#allocation2 + $0x98] sm:$0x1] }
 0x279   : > { %4636 = vst [vmem:[#allocation3 + $0x1b0] sm:$0xff] %v4572_v40  ;;  %v3499_v8 = vpop.f32.mrf.mxu1  ;;  %v6212_v34 = vor.u32 %v6211_v63, %v10689_v7  ;;  %v6898_v40 = vld [vmem:[#allocation2 + $0x8c] sm:$0x1]  ;;  %v8432_v18 = vrot.slane %v10691_v26, 9  ;;  %v10713_v61 = vrot.slane %v6229_v27, 5  ;;  %v6235_v23 = vrot.slane %v6233_v19, 4 }
 0x27a   : > { %4633 = vst.msk [vmem:[#allocation3 + $0x198] sm:$0xff] %vm1174_vm6, %v4569_v21  ;;  %v3637_v4 = vadd.f32 %v3573_v43, %v3499_v8  ;;  %v4435_v45 = vpop.f32.mrf.mxu0  ;;  %8465 = vmatmul.mubr.msk.bf16.gmra.mxu0 %vm1174_vm6, %v8445_v49  ;;  %v6220_v49 = vshrl.u32 %v5961_v13, 16  ;;  %v8447_v43 = vcombine.low %v10684_v51, %v10702_v15  ;;  %v10722_v16 = vrot.slane %v6202_v24, 4  ;;  %v6900_v42 = vld [vmem:[#allocation2 + $0x94] sm:$0xf]  ;;  %v5168_v19 = vld [vmem:[#allocation3] sm:$0xff] }
 0x27b   : > { %v4507_v44 = vld [vmem:[#allocation3 + $0x1a8] sm:$0xff]  ;;  %v3501_v41 = vpop.f32.mrf.mxu1  ;;  %v4574_v2 = vadd.f32 %v4435_v45, %v3636_v33  ;;  %7300 = vmatprep.mubr.bf16.mxu0 %v8996_v0  ;;  %v6225_v33 = vrot.slane %v6223_v39, 5  ;;  %v3578_v45 = vld [vmem:[#allocation3 + $0x1f0] sm:$0xff]  ;;  %v8395_v32 = vcombine.low %v6184_v57, %v6194_v47  ;;  %v7032_v59 = vrot.slane %v7030_v35, 4 }
 0x27c   : > { %v4571_v3 = vadd.f32 %v4507_v44, %v4427_v10  ;;  %3701 = vst.msk [vmem:[#allocation3 + $0x1c8] sm:$0xff] %vm1174_vm6, %v3637_v4  ;;  %v3638_v20 = vadd.f32 %v3574_v56, %v3501_v41  ;;  %v4437_v12 = vpop.f32.mrf.mxu0  ;;  %v6222_v21 = vrot.slane %v6220_v49, 4  ;;  %v7033_v13 = vrot.slane %v6898_v40, 5  ;;  %v5965_v56 = vld [vmem:[#allocation2 + $0xa0] sm:$0xf] }
 0x27d   : > { %4638 = vst [vmem:[#allocation3 + $0x1c0] sm:$0xff] %v4574_v2  ;;  %v3503_v9 = vpop.f32.mrf.mxu1  ;;  %v6217_v41 = vrot.slane %v6215_v54, 5  ;;  %v10728_v38 = vsel %vm9558_vm14, %v8432_v18, %v7030_v35  ;;  %v6236_v31 = vor.u32 %v6235_v23, %v10713_v61  ;;  %v6208_v26 = vsel %vm9552_vm13, %v10722_v16, %v10689_v7  ;;  %v5169_v47 = vld [vmem:[#allocation3 + $0x8] sm:$0xff] }
 0x27e   : > { %4635 = vst.msk [vmem:[#allocation3 + $0x1a8] sm:$0xff] %vm1174_vm6, %v4571_v3  ;;  %v3639_v10 = vadd.f32 %v3575_v60, %v3503_v9  ;;  %v4439_v46 = vpop.f32.mrf.mxu0  ;;  %v6226_v51 = vor.u32 %v6225_v33, %v6222_v21  ;;  %v6239_v3 = vshll.u32 %v5963_v50, 16  ;;  %v6244_v9 = vshrl.u32 %v5964_v62, 16  ;;  %v10749_v40 = vld [vmem:[#allocation2 + $0xa4] sm:$0x1]  ;;  %v5170_v33 = vld [vmem:[#allocation3 + $0x10] sm:$0xff] }
 0x27f   : > { %v4509_v30 = vld [vmem:[#allocation3 + $0x1b8] sm:$0xff]  ;;  %v3507_v22 = vpop.f32.mrf.mxu1  ;;  %v4576_v1 = vadd.f32 %v4439_v46, %v3638_v20  ;;  %8414 = vmatmul.mubr.msk.bf16.gmra.mxu1 %vm1174_vm6, %v8394_v53  ;;  %v6247_v60 = vshll.u32 %v5964_v62, 16  ;;  %v6253_v46 = vshll.u32 %v5965_v56, 16  ;;  %v6257_v57 = vshrl.u32 %v5965_v56, 16  ;;  %v10754_v50 = vld [vmem:[#allocation2 + $0xa0] sm:$0xf] }
 0x280   : > { %v4573_v25 = vadd.f32 %v4509_v30, %v4431_v6  ;;  %3703 = vst.msk [vmem:[#allocation3 + $0x1d8] sm:$0xff] %vm1174_vm6, %v3639_v10  ;;  %v3640_v17 = vadd.f32 %v3576_v52, %v3507_v22  ;;  %v4441_v58 = vpop.f32.mrf.mxu0  ;;  %6596 = vmatprep.mubr.bf16.mxu1 %v8996_v0  ;;  %v6899_v20 = vld [vmem:[#allocation2 + $0x90] sm:$0xe]  ;;  %v10739_v10 = vsel %vm9558_vm14, %v7032_v59, %v7033_v13  ;;  %v10745_v22 = vld [vmem:[#allocation2 + $0x98] sm:$0x1]  ;;  %v6227_v54 = vrot.slane %v6226_v51, 4 }
 0x281   : > { %4640 = vst [vmem:[#allocation3 + $0x1d0] sm:$0xff] %v4576_v1  ;;  %v3509_v36 = vpop.f32.mrf.mxu1  ;;  %v8433_v52 = vrot.slane %v6899_v20, 9  ;;  %v6237_v35 = vrot.slane %v6236_v31, 4  ;;  %v6246_v18 = vrot.slane %v6244_v9, 4  ;;  %v6259_v16 = vrot.slane %v6257_v57, 4  ;;  %v5171_v13 = vld [vmem:[#allocation3 + $0x18] sm:$0xff] }
 0x282   : > { %4637 = vst.msk [vmem:[#allocation3 + $0x1b8] sm:$0xff] %vm1174_vm6, %v4573_v25  ;;  %v3641_v6 = vadd.f32 %v3577_v37, %v3509_v36  ;;  %v4445_v8 = vpop.f32.mrf.mxu0  ;;  %8466 = vmatmul.mubr.msk.bf16.gmra.mxu0 %vm1174_vm6, %v8446_v11  ;;  %v6213_v11 = vrot.slane %v6212_v34, 4  ;;  %v6241_v25 = vrot.slane %v6239_v3, 5  ;;  %v6249_v36 = vrot.slane %v6247_v60, 5  ;;  %v10771_v51 = vld [vmem:[#allocation2 + $0xa4] sm:$0x1] }
 0x283   : > { %v4511_v28 = vld [vmem:[#allocation3 + $0x1c8] sm:$0xff]  ;;  %v3511_v4 = vpop.f32.mrf.mxu1  ;;  %v4578_v53 = vadd.f32 %v4445_v8, %v3640_v17  ;;  %7310 = vmatprep.mubr.bf16.mxu0 %v8996_v0  ;;  %v7037_v17 = vrot.slane %v6900_v42, 5  ;;  %v10752_v8 = vrot.slane %v6253_v46, 5  ;;  %v6232_v62 = vsel %vm9552_vm13, %v6227_v54, %v10713_v61  ;;  %v5172_v20 = vld [vmem:[#allocation3 + $0x20] sm:$0xff]  ;;  %v5970_v54 = vld [vmem:[#allocation2 + $0xb4] sm:$0xf] }
 0x284   : > { %v4575_v44 = vadd.f32 %v4511_v28, %v4437_v12  ;;  %3705 = vst.msk [vmem:[#allocation3 + $0x1e8] sm:$0xff] %vm1174_vm6, %v3641_v6  ;;  %v3642_v48 = vadd.f32 %v3578_v45, %v3511_v4  ;;  %v4447_v14 = vpop.f32.mrf.mxu0  ;;  %v6218_v30 = vsel %vm9552_vm13, %v6213_v11, %v6217_v41  ;;  %v8448_v45 = vcombine.low %v10728_v38, %v10739_v10  ;;  %v5968_v11 = vld [vmem:[#allocation2 + $0xac] sm:$0xf]  ;;  %v6902_v38 = vld [vmem:[#allocation2 + $0x9c] sm:$0xe]  ;;  %v5173_v10 = vld [vmem:[#allocation3 + $0x28] sm:$0xff] }
 0x285   : > { %4642 = vst [vmem:[#allocation3 + $0x1e0] sm:$0xff] %v4578_v53  ;;  %v3513_v2 = vpop.f32.mrf.mxu1  ;;  %v8396_v6 = vcombine.low %v6208_v26, %v6218_v30  ;;  %v7040_v53 = vrot.slane %v10745_v22, 5  ;;  %v7044_v61 = vrot.slane %v10754_v50, 5  ;;  %v5174_v30 = vld [vmem:[#allocation3 + $0x30] sm:$0xff] }
 0x286   : > { %4639 = vst.msk [vmem:[#allocation3 + $0x1c8] sm:$0xff] %vm1174_vm6, %v4575_v44  ;;  %v3643_v12 = vadd.f32 %v3579_v29, %v3513_v2  ;;  %v4449_v63 = vpop.f32.mrf.mxu0  ;;  %v6242_v44 = vsel %vm9552_vm13, %v6237_v35, %v6241_v25  ;;  %v6250_v2 = vor.u32 %v6249_v36, %v6246_v18  ;;  %v6263_v29 = vshll.u32 %v10749_v40, 16  ;;  %v5971_v18 = vld [vmem:[#allocation2 + $0xb8] sm:$0xf] }
 0x287   : > { %v4513_v49 = vld [vmem:[#allocation3 + $0x1d8] sm:$0xff]  ;;  %v4580_v39 = vadd.f32 %v4449_v63, %v3642_v48  ;;  %v5009_v27 = vpop.f32.mrf.mxu1  ;;  %8415 = vmatmul.mubr.msk.bf16.gmra.mxu1 %vm1174_vm6, %v8395_v32  ;;  %v5967_v32 = vld [vmem:[#allocation2 + $0xa8] sm:$0xf]  ;;  %v10767_v48 = vsel %vm9558_vm14, %v8433_v52, %v7037_v17  ;;  %v6260_v63 = vor.u32 %v6259_v16, %v10752_v8  ;;  %v8397_v46 = vcombine.low %v6232_v62, %v6242_v44 }
 0x288   : > { %v4577_v15 = vadd.f32 %v4513_v49, %v4441_v58  ;;  %3707 = vst.msk [vmem:[#allocation3 + $0x1f8] sm:$0xff] %vm1174_vm6, %v3643_v12  ;;  %v5232_v24 = vadd.f32 %v5168_v19, %v5009_v27  ;;  %v4451_v7 = vpop.f32.mrf.mxu0  ;;  %6606 = vmatprep.mubr.bf16.mxu1 %v8996_v0  ;;  %v6268_v26 = vshrl.u32 %v5967_v32, 16  ;;  %v6271_v42 = vshll.u32 %v5967_v32, 16  ;;  %v5175_v16 = vld [vmem:[#allocation3 + $0x38] sm:$0xff] }
 0x289   : > { %4644 = vst [vmem:[#allocation3 + $0x1f0] sm:$0xff] %v4580_v39  ;;  %v5011_v1 = vpop.f32.mrf.mxu1  ;;  %v6277_v39 = vshll.u32 %v5968_v11, 16  ;;  %v6281_v27 = vshrl.u32 %v5968_v11, 16  ;;  %v10785_v52 = vrot.slane %v6250_v2, 4  ;;  %v6301_v62 = vshll.u32 %v5971_v18, 16  ;;  %v5176_v11 = vld [vmem:[#allocation3 + $0x40] sm:$0xff] }
 0x28a   : > { %4641 = vst.msk [vmem:[#allocation3 + $0x1d8] sm:$0xff] %vm1174_vm6, %v4577_v15  ;;  %v5233_v58 = vadd.f32 %v5169_v47, %v5011_v1  ;;  %v5580_v34 = vpop.f32.mrf.mxu0  ;;  %8467 = vmatmul.mubr.msk.bf16.gmra.mxu0 %vm1174_vm6, %v8447_v43  ;;  %v8434_v15 = vrot.slane %v6902_v38, 9  ;;  %v10787_v1 = vrot.slane %v6263_v29, 5  ;;  %v7046_v47 = vrot.slane %v7044_v61, 4 }
 0x28b   : > { %v4515_v37 = vld [vmem:[#allocation3 + $0x1e8] sm:$0xff]  ;;  %v5013_v21 = vpop.f32.mrf.mxu1  ;;  %v5803_v23 = vadd.f32 %v5580_v34, %v5232_v24  ;;  %7320 = vmatprep.mubr.bf16.mxu0 %v8996_v0  ;;  %v7047_v24 = vrot.slane %v10771_v51, 5  ;;  %v6270_v34 = vrot.slane %v6268_v26, 4  ;;  %v6273_v40 = vrot.slane %v6271_v42, 5 }
 0x28c   : > { %v4579_v28 = vadd.f32 %v4515_v37, %v4447_v14  ;;  %5297 = vst.msk [vmem:[#allocation3 + $0x8] sm:$0xff] %vm1174_vm6, %v5233_v58  ;;  %v5234_v43 = vadd.f32 %v5170_v33, %v5013_v21  ;;  %v5582_v4 = vpop.f32.mrf.mxu0  ;;  %v7039_v14 = vrot.slane %v7037_v17, 4  ;;  %v6261_v58 = vrot.slane %v6260_v63, 4 }
 0x28d   : > { %5867 = vst [vmem:[#allocation3] sm:$0xff] %v5803_v23  ;;  %v5015_v59 = vpop.f32.mrf.mxu1  ;;  %v10791_v33 = vrot.slane %v6277_v39, 5  ;;  %v6283_v23 = vrot.slane %v6281_v27, 4  ;;  %v6305_v44 = vshrl.u32 %v5971_v18, 16  ;;  %v10812_v2 = vsel %vm9558_vm14, %v7046_v47, %v7047_v24  ;;  %v6907_v39 = vld [vmem:[#allocation2 + $0xb0] sm:$0x1] }
 0x28e   : > { %4643 = vst.msk [vmem:[#allocation3 + $0x1e8] sm:$0xff] %vm1174_vm6, %v4579_v28  ;;  %v5235_v41 = vadd.f32 %v5171_v13, %v5015_v59  ;;  %v5584_v56 = vpop.f32.mrf.mxu0  ;;  %v10780_v57 = vsel %vm9558_vm14, %v7039_v14, %v7040_v53  ;;  %v10797_v28 = vsel %vm9558_vm14, %v8434_v15, %v7044_v61  ;;  %v6256_v59 = vsel %vm9552_vm13, %v10785_v52, %v10752_v8  ;;  %v10804_v13 = vld [vmem:[#allocation2 + $0xac] sm:$0xf]  ;;  %v5972_v27 = vld [vmem:[#allocation2 + $0xbc] sm:$0x1] }
 0x28f   : > { %v4517_v31 = vld [vmem:[#allocation3 + $0x1f8] sm:$0xff]  ;;  %v5019_v3 = vpop.f32.mrf.mxu1  ;;  %v5805_v12 = vadd.f32 %v5584_v56, %v5234_v43  ;;  %8416 = vmatmul.mubr.msk.bf16.gmra.mxu1 %vm1174_vm6, %v8396_v6  ;;  %v8449_v50 = vcombine.low %v10767_v48, %v10780_v57  ;;  %v6266_v56 = vsel %vm9552_vm13, %v6261_v58, %v10787_v1  ;;  %v6274_v29 = vor.u32 %v6273_v40, %v6270_v34  ;;  %v5178_v15 = vld [vmem:[#allocation3 + $0x50] sm:$0xff]  ;;  %v5973_v52 = vld [vmem:[#allocation2 + $0xc0] sm:$0xf] }
 0x290   : > { %v4581_v9 = vadd.f32 %v4517_v31, %v4451_v7  ;;  %5299 = vst.msk [vmem:[#allocation3 + $0x18] sm:$0xff] %vm1174_vm6, %v5235_v41  ;;  %v5236_v60 = vadd.f32 %v5172_v20, %v5019_v3  ;;  %v5586_v49 = vpop.f32.mrf.mxu0  ;;  %6616 = vmatprep.mubr.bf16.mxu1 %v8996_v0  ;;  %v5969_v43 = vld [vmem:[#allocation2 + $0xb0] sm:$0x1]  ;;  %v6284_v61 = vor.u32 %v6283_v23, %v10791_v33  ;;  %v6905_v3 = vld [vmem:[#allocation2 + $0xa8] sm:$0xe]  ;;  %v7051_v63 = vrot.slane %v10804_v13, 5 }
 0x291   : > { %5869 = vst [vmem:[#allocation3 + $0x10] sm:$0xff] %v5805_v12  ;;  %v5021_v19 = vpop.f32.mrf.mxu1  ;;  %v6287_v31 = vshll.u32 %v5969_v43, 16  ;;  %v5177_v12 = vld [vmem:[#allocation3 + $0x48] sm:$0xff]  ;;  %v5179_v34 = vld [vmem:[#allocation3 + $0x58] sm:$0xff]  ;;  %v7054_v18 = vrot.slane %v6907_v39, 5 }
 0x292   : > { %4645 = vst.msk [vmem:[#allocation3 + $0x1f8] sm:$0xff] %vm1174_vm6, %v4581_v9  ;;  %v5237_v7 = vadd.f32 %v5173_v10, %v5021_v19  ;;  %v5590_v22 = vpop.f32.mrf.mxu0  ;;  %8468 = vmatmul.mubr.msk.bf16.gmra.mxu0 %vm1174_vm6, %v8448_v45  ;;  %v6292_v45 = vshrl.u32 %v5970_v54, 16  ;;  %v10822_v19 = vrot.slane %v6301_v62, 5  ;;  %v6307_v10 = vrot.slane %v6305_v44, 4  ;;  %v5975_v39 = vld [vmem:[#allocation2 + $0xc8] sm:$0x1] }
 0x293   : > { %v5740_v35 = vld [vmem:[#allocation3 + $0x8] sm:$0xff]  ;;  %v5023_v25 = vpop.f32.mrf.mxu1  ;;  %v5807_v17 = vadd.f32 %v5590_v22, %v5236_v60  ;;  %7330 = vmatprep.mubr.bf16.mxu0 %v8996_v0  ;;  %v8435_v22 = vrot.slane %v6905_v3, 9  ;;  %v7053_v40 = vrot.slane %v7051_v63, 4  ;;  %v6910_v3 = vld [vmem:[#allocation2 + $0xbc] sm:$0x1] }
 0x294   : > { %v5804_v36 = vadd.f32 %v5740_v35, %v5582_v4  ;;  %5301 = vst.msk [vmem:[#allocation3 + $0x28] sm:$0xff] %vm1174_vm6, %v5237_v7  ;;  %v5238_v37 = vadd.f32 %v5174_v30, %v5023_v25  ;;  %v5592_v21 = vpop.f32.mrf.mxu0  ;;  %v6295_v4 = vshll.u32 %v5970_v54, 16  ;;  %v6294_v26 = vrot.slane %v6292_v45, 4 }
 0x295   : > { %5871 = vst [vmem:[#allocation3 + $0x20] sm:$0xff] %v5807_v17  ;;  %v5025_v6 = vpop.f32.mrf.mxu1  ;;  %v8398_v7 = vcombine.low %v6256_v59, %v6266_v56  ;;  %v6275_v30 = vrot.slane %v6274_v29, 4  ;;  %v6285_v35 = vrot.slane %v6284_v61, 4  ;;  %v6289_v25 = vrot.slane %v6287_v31, 5  ;;  %v5974_v17 = vld [vmem:[#allocation2 + $0xc4] sm:$0xf] }
 0x296   : > { %5868 = vst.msk [vmem:[#allocation3 + $0x8] sm:$0xff] %vm1174_vm6, %v5804_v36  ;;  %v5239_v53 = vadd.f32 %v5175_v16, %v5025_v6  ;;  %v5594_v32 = vpop.f32.mrf.mxu0  ;;  %v6297_v42 = vrot.slane %v6295_v4, 5  ;;  %v10828_v16 = vld [vmem:[#allocation2 + $0xb8] sm:$0xf]  ;;  %v6325_v59 = vshll.u32 %v5974_v17, 16  ;;  %v6329_v13 = vshrl.u32 %v5974_v17, 16 }
 0x297   : > { %v5742_v48 = vld [vmem:[#allocation3 + $0x18] sm:$0xff]  ;;  %v5029_v14 = vpop.f32.mrf.mxu1  ;;  %v5809_v41 = vadd.f32 %v5594_v32, %v5238_v37  ;;  %8417 = vmatmul.mubr.msk.bf16.gmra.mxu1 %vm1174_vm6, %v8397_v46  ;;  %v6311_v37 = vshll.u32 %v5972_v27, 16  ;;  %v5180_v4 = vld [vmem:[#allocation3 + $0x60] sm:$0xff]  ;;  %v10833_v32 = vsel %vm9558_vm14, %v8435_v22, %v7051_v63  ;;  %v5181_v56 = vld [vmem:[#allocation3 + $0x68] sm:$0xff] }
 0x298   : > { %v5806_v8 = vadd.f32 %v5742_v48, %v5586_v49  ;;  %5303 = vst.msk [vmem:[#allocation3 + $0x38] sm:$0xff] %vm1174_vm6, %v5239_v53  ;;  %v5240_v38 = vadd.f32 %v5176_v11, %v5029_v14  ;;  %v5596_v51 = vpop.f32.mrf.mxu0  ;;  %6626 = vmatprep.mubr.bf16.mxu1 %v8996_v0  ;;  %v8450_v49 = vcombine.low %v10797_v28, %v10812_v2  ;;  %v6319_v28 = vshll.u32 %v5973_v52, 16 }
 0x299   : > { %5873 = vst [vmem:[#allocation3 + $0x30] sm:$0xff] %v5809_v41  ;;  %v5031_v20 = vpop.f32.mrf.mxu1  ;;  %v6298_v36 = vor.u32 %v6297_v42, %v6294_v26  ;;  %v6280_v14 = vsel %vm9552_vm13, %v6275_v30, %v10791_v33  ;;  %v6290_v11 = vsel %vm9552_vm13, %v6285_v35, %v6289_v25  ;;  %v10844_v2 = vsel %vm9558_vm14, %v7053_v40, %v7054_v18  ;;  %v5182_v42 = vld [vmem:[#allocation3 + $0x70] sm:$0xff]  ;;  %v5183_v30 = vld [vmem:[#allocation3 + $0x78] sm:$0xff] }
 0x29a   : > { %5870 = vst.msk [vmem:[#allocation3 + $0x18] sm:$0xff] %vm1174_vm6, %v5806_v8  ;;  %v5241_v9 = vadd.f32 %v5177_v12, %v5031_v20  ;;  %v5600_v60 = vpop.f32.mrf.mxu0  ;;  %8469 = vmatmul.mubr.msk.bf16.gmra.mxu0 %vm1174_vm6, %v8449_v50  ;;  %v6316_v50 = vshrl.u32 %v5973_v52, 16  ;;  %v6313_v8 = vrot.slane %v6311_v37, 5  ;;  %v6321_v12 = vrot.slane %v6319_v28, 5  ;;  %v5977_v35 = vld [vmem:[#allocation2 + $0xd0] sm:$0xf] }
 0x29b   : > { %v5744_v46 = vld [vmem:[#allocation3 + $0x28] sm:$0xff]  ;;  %v5033_v57 = vpop.f32.mrf.mxu1  ;;  %v5811_v24 = vadd.f32 %v5600_v60, %v5240_v38  ;;  %7340 = vmatprep.mubr.bf16.mxu0 %v8996_v0  ;;  %v6299_v29 = vrot.slane %v6298_v36, 4  ;;  %v6908_v38 = vld [vmem:[#allocation2 + $0xb4] sm:$0xe]  ;;  %v8399_v60 = vcombine.low %v6280_v14, %v6290_v11  ;;  %v10850_v27 = vrot.slane %v6325_v59, 5  ;;  %v5184_v36 = vld [vmem:[#allocation3 + $0x80] sm:$0xff] }
 0x29c   : > { %v5808_v1 = vadd.f32 %v5744_v46, %v5592_v21  ;;  %5305 = vst.msk [vmem:[#allocation3 + $0x48] sm:$0xff] %vm1174_vm6, %v5241_v9  ;;  %v5242_v47 = vadd.f32 %v5178_v15, %v5033_v57  ;;  %v5602_v54 = vpop.f32.mrf.mxu0  ;;  %v6308_v21 = vor.u32 %v6307_v10, %v10822_v19  ;;  %v6318_v20 = vrot.slane %v6316_v50, 4 }
 0x29d   : > { %5875 = vst [vmem:[#allocation3 + $0x40] sm:$0xff] %v5811_v24  ;;  %v5035_v58 = vpop.f32.mrf.mxu1  ;;  %v6331_v10 = vrot.slane %v6329_v13, 4  ;;  %v8451_v15 = vcombine.low %v10833_v32, %v10844_v2  ;;  %v5976_v24 = vld [vmem:[#allocation2 + $0xcc] sm:$0xf]  ;;  %v6304_v22 = vsel %vm9552_vm13, %v6299_v29, %v10822_v19  ;;  %v8436_v52 = vrot.slane %v6908_v38, 9 }
 0x29e   : > { %5872 = vst.msk [vmem:[#allocation3 + $0x28] sm:$0xff] %vm1174_vm6, %v5808_v1  ;;  %v5243_v23 = vadd.f32 %v5179_v34, %v5035_v58  ;;  %v5604_v6 = vpop.f32.mrf.mxu0  ;;  %v6309_v33 = vrot.slane %v6308_v21, 4  ;;  %v6322_v58 = vor.u32 %v6321_v12, %v6318_v20  ;;  %v6335_v34 = vshll.u32 %v5975_v39, 16 }
 0x29f   : > { %v5746_v43 = vld [vmem:[#allocation3 + $0x38] sm:$0xff]  ;;  %v5039_v45 = vpop.f32.mrf.mxu1  ;;  %v5813_v53 = vadd.f32 %v5604_v6, %v5242_v47  ;;  %8418 = vmatmul.mubr.msk.bf16.gmra.mxu1 %vm1174_vm6, %v8398_v7  ;;  %v7061_v47 = vrot.slane %v6910_v3, 5  ;;  %v6332_v19 = vor.u32 %v6331_v10, %v10850_v27  ;;  %v6340_v6 = vshrl.u32 %v5976_v24, 16 }
 0x2a0   : > { %v5810_v62 = vadd.f32 %v5746_v43, %v5596_v51  ;;  %5307 = vst.msk [vmem:[#allocation3 + $0x58] sm:$0xff] %vm1174_vm6, %v5243_v23  ;;  %v5244_v44 = vadd.f32 %v5180_v4, %v5039_v45  ;;  %v5606_v48 = vpop.f32.mrf.mxu0  ;;  %6636 = vmatprep.mubr.bf16.mxu1 %v8996_v0  ;;  %v7058_v51 = vrot.slane %v10828_v16, 5  ;;  %v6314_v17 = vsel %vm9552_vm13, %v6309_v33, %v6313_v8  ;;  %v10863_v23 = vld [vmem:[#allocation2 + $0xc4] sm:$0xf]  ;;  %v5186_v8 = vld [vmem:[#allocation3 + $0x90] sm:$0xff] }
 0x2a1   : > { %5877 = vst [vmem:[#allocation3 + $0x50] sm:$0xff] %v5813_v53  ;;  %v5041_v41 = vpop.f32.mrf.mxu1  ;;  %v6343_v21 = vshll.u32 %v5976_v24, 16  ;;  %v6349_v43 = vshll.u32 %v5977_v35, 16  ;;  %v6353_v45 = vshrl.u32 %v5977_v35, 16  ;;  %v5185_v53 = vld [vmem:[#allocation3 + $0x88] sm:$0xff]  ;;  %v8400_v32 = vcombine.low %v6304_v22, %v6314_v17 }
 0x2a2   : > { %5874 = vst.msk [vmem:[#allocation3 + $0x38] sm:$0xff] %vm1174_vm6, %v5810_v62  ;;  %v5245_v61 = vadd.f32 %v5181_v56, %v5041_v41  ;;  %v5610_v31 = vpop.f32.mrf.mxu0  ;;  %8470 = vmatmul.mubr.msk.bf16.gmra.mxu0 %vm1174_vm6, %v8450_v49  ;;  %v7060_v1 = vrot.slane %v7058_v51, 4  ;;  %v7059_v59 = vsel %vm9558_vm14, %v8436_v52, %v7058_v51  ;;  %v6911_v62 = vld [vmem:[#allocation2 + $0xc0] sm:$0xe]  ;;  %v6323_v14 = vrot.slane %v6322_v58, 4 }
 0x2a3   : > { %v5748_v63 = vld [vmem:[#allocation3 + $0x48] sm:$0xff]  ;;  %v5043_v26 = vpop.f32.mrf.mxu1  ;;  %v5815_v9 = vadd.f32 %v5610_v31, %v5244_v44  ;;  %7350 = vmatprep.mubr.bf16.mxu0 %v8996_v0  ;;  %v6337_v11 = vrot.slane %v6335_v34, 5  ;;  %v6913_v41 = vld [vmem:[#allocation2 + $0xc8] sm:$0x1]  ;;  %v7065_v56 = vrot.slane %v10863_v23, 5  ;;  %v6333_v51 = vrot.slane %v6332_v19, 4 }
 0x2a4   : > { %v5812_v46 = vadd.f32 %v5748_v63, %v5602_v54  ;;  %5309 = vst.msk [vmem:[#allocation3 + $0x68] sm:$0xff] %vm1174_vm6, %v5245_v61  ;;  %v5246_v57 = vadd.f32 %v5182_v42, %v5043_v26  ;;  %v5612_v49 = vpop.f32.mrf.mxu0  ;;  %v7062_v13 = vsel %vm9558_vm14, %v7060_v1, %v7061_v47  ;;  %v6342_v61 = vrot.slane %v6340_v6, 4  ;;  %v5187_v42 = vld [vmem:[#allocation3 + $0x98] sm:$0xff]  ;;  %v5190_v6 = vld [vmem:[#allocation3 + $0xb0] sm:$0xff] }
 0x2a5   : > { %5879 = vst [vmem:[#allocation3 + $0x60] sm:$0xff] %v5815_v9  ;;  %v5045_v7 = vpop.f32.mrf.mxu1  ;;  %v6345_v31 = vrot.slane %v6343_v21, 5  ;;  %v10876_v12 = vrot.slane %v6349_v43, 5  ;;  %v6355_v63 = vrot.slane %v6353_v45, 4  ;;  %v8452_v9 = vcombine.low %v7059_v59, %v7062_v13  ;;  %v10888_v58 = vld [vmem:[#allocation2 + $0xd0] sm:$0xf] }
 0x2a6   : > { %5876 = vst.msk [vmem:[#allocation3 + $0x48] sm:$0xff] %vm1174_vm6, %v5812_v46  ;;  %v5247_v54 = vadd.f32 %v5183_v30, %v5045_v7  ;;  %v5614_v25 = vpop.f32.mrf.mxu0  ;;  %v8437_v46 = vrot.slane %v6911_v62, 9  ;;  %v5188_v7 = vld [vmem:[#allocation3 + $0xa0] sm:$0xff]  ;;  %v6328_v22 = vsel %vm9552_vm13, %v6323_v14, %v10850_v27  ;;  %v6338_v52 = vsel %vm9552_vm13, %v6333_v51, %v6337_v11  ;;  %v6914_v59 = vld [vmem:[#allocation2 + $0xcc] sm:$0xe] }
 0x2a7   : > { %v5750_v40 = vld [vmem:[#allocation3 + $0x58] sm:$0xff]  ;;  %v5049_v18 = vpop.f32.mrf.mxu1  ;;  %v5817_v37 = vadd.f32 %v5614_v25, %v5246_v57  ;;  %8419 = vmatmul.mubr.msk.bf16.gmra.mxu1 %vm1174_vm6, %v8399_v60  ;;  %v7067_v57 = vrot.slane %v7065_v56, 4  ;;  %v6346_v1 = vor.u32 %v6345_v31, %v6342_v61  ;;  %v6356_v25 = vor.u32 %v6355_v63, %v10876_v12 }
 0x2a8   : > { %v5814_v16 = vadd.f32 %v5750_v40, %v5606_v48  ;;  %5311 = vst.msk [vmem:[#allocation3 + $0x78] sm:$0xff] %vm1174_vm6, %v5247_v54  ;;  %v5248_v50 = vadd.f32 %v5184_v36, %v5049_v18  ;;  %v5616_v28 = vpop.f32.mrf.mxu0  ;;  %6646 = vmatprep.mubr.bf16.mxu1 %v8996_v0  ;;  %v5978_v60 = vld [vmem:[#allocation2 + $0xd4] sm:$0x1]  ;;  %v5189_v40 = vld [vmem:[#allocation3 + $0xa8] sm:$0xff]  ;;  %v7066_v36 = vsel %vm9558_vm14, %v8437_v46, %v7065_v56 }
 0x2a9   : > { %5881 = vst [vmem:[#allocation3 + $0x70] sm:$0xff] %v5817_v37  ;;  %v5051_v4 = vpop.f32.mrf.mxu1  ;;  %v6359_v17 = vshll.u32 %v5978_v60, 16  ;;  %v6916_v13 = vld [vmem:[#allocation2 + $0xd4] sm:$0x1] }
 0x2aa   : > { %5878 = vst.msk [vmem:[#allocation3 + $0x58] sm:$0xff] %vm1174_vm6, %v5814_v16  ;;  %v5249_v44 = vadd.f32 %v5185_v53, %v5051_v4  ;;  %v5620_v48 = vpop.f32.mrf.mxu0  ;;  %8471 = vmatmul.mubr.msk.bf16.gmra.mxu0 %vm1174_vm6, %v8451_v15  ;;  %v7068_v15 = vrot.slane %v6913_v41, 5  ;;  %v8401_v16 = vcombine.low %v6328_v22, %v6338_v52  ;;  %v6357_v53 = vrot.slane %v6356_v25, 4 }
 0x2ab   : > { %v5752_v2 = vld [vmem:[#allocation3 + $0x68] sm:$0xff]  ;;  %v5053_v29 = vpop.f32.mrf.mxu1  ;;  %v5819_v38 = vadd.f32 %v5620_v48, %v5248_v50  ;;  %7360 = vmatprep.mubr.bf16.mxu0 %v8996_v0  ;;  %v6347_v50 = vrot.slane %v6346_v1, 4  ;;  %v7075_v51 = vrot.slane %v6916_v13, 5 }
 0x2ac   : > { %v5816_v33 = vadd.f32 %v5752_v2, %v5612_v49  ;;  %5313 = vst.msk [vmem:[#allocation3 + $0x88] sm:$0xff] %vm1174_vm6, %v5249_v44  ;;  %v5250_v3 = vadd.f32 %v5186_v8, %v5053_v29  ;;  %v5622_v20 = vpop.f32.mrf.mxu0  ;;  %v7069_v37 = vsel %vm9558_vm14, %v7067_v57, %v7068_v15  ;;  %v5191_v44 = vld [vmem:[#allocation3 + $0xb8] sm:$0xff]  ;;  %v5192_v2 = vld [vmem:[#allocation3 + $0xc0] sm:$0xff]  ;;  %v8438_v8 = vrot.slane %v6914_v59, 9 }
 0x2ad   : > { %5883 = vst [vmem:[#allocation3 + $0x80] sm:$0xff] %v5819_v38  ;;  %v5055_v26 = vpop.f32.mrf.mxu1  ;;  %v8453_v11 = vcombine.low %v7066_v36, %v7069_v37  ;;  %v5198_v37 = vld [vmem:[#allocation3 + $0xf0] sm:$0xff] }
 0x2ae   : > { %5880 = vst.msk [vmem:[#allocation3 + $0x68] sm:$0xff] %vm1174_vm6, %v5816_v33  ;;  %v5251_v39 = vadd.f32 %v5187_v42, %v5055_v26  ;;  %v5624_v10 = vpop.f32.mrf.mxu0  ;;  %v5193_v26 = vld [vmem:[#allocation3 + $0xc8] sm:$0xff] }
 0x2af   : > { %v5754_v49 = vld [vmem:[#allocation3 + $0x78] sm:$0xff]  ;;  %v5059_v24 = vpop.f32.mrf.mxu1  ;;  %v5821_v30 = vadd.f32 %v5624_v10, %v5250_v3  ;;  %8420 = vmatmul.mubr.msk.bf16.gmra.mxu1 %vm1174_vm6, %v8400_v32  ;;  %v6361_v32 = vrot.slane %v6359_v17, 5  ;;  %v6352_v3 = vsel %vm9552_vm13, %v6347_v50, %v10876_v12  ;;  %v5194_v10 = vld [vmem:[#allocation3 + $0xd0] sm:$0xff] }
 0x2b0   : > { %v5818_v47 = vadd.f32 %v5754_v49, %v5616_v28  ;;  %5315 = vst.msk [vmem:[#allocation3 + $0x98] sm:$0xff] %vm1174_vm6, %v5251_v39  ;;  %v5252_v35 = vadd.f32 %v5188_v7, %v5059_v24  ;;  %v5626_v54 = vpop.f32.mrf.mxu0  ;;  %6656 = vmatprep.mubr.bf16.mxu1 %v8996_v0  ;;  %v7072_v28 = vrot.slane %v10888_v58, 5  ;;  %v5199_v50 = vld [vmem:[#allocation3 + $0xf8] sm:$0xff] }
 0x2b1   : > { %5885 = vst [vmem:[#allocation3 + $0x90] sm:$0xff] %v5821_v30  ;;  %v5061_v34 = vpop.f32.mrf.mxu1  ;;  %v5195_v30 = vld [vmem:[#allocation3 + $0xd8] sm:$0xff] }
 0x2b2   : > { %5882 = vst.msk [vmem:[#allocation3 + $0x78] sm:$0xff] %vm1174_vm6, %v5818_v47  ;;  %v5253_v27 = vadd.f32 %v5189_v40, %v5061_v34  ;;  %v5630_v18 = vpop.f32.mrf.mxu0  ;;  %8472 = vmatmul.mubr.msk.bf16.gmra.mxu0 %vm1174_vm6, %v8452_v9  ;;  %v7074_v38 = vrot.slane %v7072_v28, 4  ;;  %v7073_v55 = vsel %vm9558_vm14, %v8438_v8, %v7072_v28  ;;  %v5197_v34 = vld [vmem:[#allocation3 + $0xe8] sm:$0xff] }
 0x2b3   : > { %v5756_v19 = vld [vmem:[#allocation3 + $0x88] sm:$0xff]  ;;  %v5063_v23 = vpop.f32.mrf.mxu1  ;;  %v5823_v21 = vadd.f32 %v5630_v18, %v5252_v35  ;;  %7370 = vmatprep.mubr.bf16.mxu0 %v8996_v0  ;;  %v5196_v35 = vld [vmem:[#allocation3 + $0xe0] sm:$0xff] }
 0x2b4   : > { %v5820_v43 = vadd.f32 %v5756_v19, %v5622_v20  ;;  %5317 = vst.msk [vmem:[#allocation3 + $0xa8] sm:$0xff] %vm1174_vm6, %v5253_v27  ;;  %v5254_v45 = vadd.f32 %v5190_v6, %v5063_v23  ;;  %v5632_v4 = vpop.f32.mrf.mxu0  ;;  %v6362_v20 = vsel %vm9552_vm13, %v6357_v53, %v6361_v32  ;;  %v7076_v12 = vsel %vm9558_vm14, %v7074_v38, %v7075_v51  ;;  %v5200_v53 = vld [vmem:[#allocation3 + $0x100] sm:$0xff] }
 0x2b5   : > { %5887 = vst [vmem:[#allocation3 + $0xa0] sm:$0xff] %v5823_v21  ;;  %v5065_v62 = vpop.f32.mrf.mxu1  ;;  %v8402_v57 = vcombine.low %v6352_v3, %v6362_v20  ;;  %v8454_v1 = vcombine.low %v7073_v55, %v7076_v12 }
 0x2b6   : > { %5884 = vst.msk [vmem:[#allocation3 + $0x88] sm:$0xff] %vm1174_vm6, %v5820_v43  ;;  %v5255_v48 = vadd.f32 %v5191_v44, %v5065_v62  ;;  %v5634_v14 = vpop.f32.mrf.mxu0 }
 0x2b7   : > { %v5758_v41 = vld [vmem:[#allocation3 + $0x98] sm:$0xff]  ;;  %v5069_v56 = vpop.f32.mrf.mxu1  ;;  %v5825_v29 = vadd.f32 %v5634_v14, %v5254_v45  ;;  %8421 = vmatmul.mubr.msk.bf16.gmra.mxu1 %vm1174_vm6, %v8401_v16 }
 0x2b8   : > { %v5822_v61 = vadd.f32 %v5758_v41, %v5626_v54  ;;  %5319 = vst.msk [vmem:[#allocation3 + $0xb8] sm:$0xff] %vm1174_vm6, %v5255_v48  ;;  %v5256_v31 = vadd.f32 %v5192_v2, %v5069_v56  ;;  %v5636_v33 = vpop.f32.mrf.mxu0  ;;  %6666 = vmatprep.mubr.bf16.mxu1 %v8996_v0  ;;  %v5201_v48 = vld [vmem:[#allocation3 + $0x108] sm:$0xff]  ;;  %v5202_v2 = vld [vmem:[#allocation3 + $0x110] sm:$0xff] }
 0x2b9   : > { %5889 = vst [vmem:[#allocation3 + $0xb0] sm:$0xff] %v5825_v29  ;;  %v5071_v63 = vpop.f32.mrf.mxu1 }
 0x2ba   : > { %5886 = vst.msk [vmem:[#allocation3 + $0x98] sm:$0xff] %vm1174_vm6, %v5822_v61  ;;  %v5257_v42 = vadd.f32 %v5193_v26, %v5071_v63  ;;  %v5640_v9 = vpop.f32.mrf.mxu0  ;;  %8473 = vmatmul.mubr.msk.bf16.gmra.mxu0 %vm1174_vm6, %v8453_v11  ;;  %v5204_v26 = vld [vmem:[#allocation3 + $0x120] sm:$0xff] }
 0x2bb   : > { %v5760_v60 = vld [vmem:[#allocation3 + $0xa8] sm:$0xff]  ;;  %v5073_v39 = vpop.f32.mrf.mxu1  ;;  %v5827_v46 = vadd.f32 %v5640_v9, %v5256_v31  ;;  %7380 = vmatprep.mubr.bf16.mxu0 %v8996_v0  ;;  %v5203_v31 = vld [vmem:[#allocation3 + $0x118] sm:$0xff] }
 0x2bc   : > { %v5824_v15 = vadd.f32 %v5760_v60, %v5632_v4  ;;  %5321 = vst.msk [vmem:[#allocation3 + $0xc8] sm:$0xff] %vm1174_vm6, %v5257_v42  ;;  %v5258_v49 = vadd.f32 %v5194_v10, %v5073_v39  ;;  %v5642_v24 = vpop.f32.mrf.mxu0 }
 0x2bd   : > { %5891 = vst [vmem:[#allocation3 + $0xc0] sm:$0xff] %v5827_v46  ;;  %v5075_v7 = vpop.f32.mrf.mxu1  ;;  %v5205_v46 = vld [vmem:[#allocation3 + $0x128] sm:$0xff] }
 0x2be   : > { %5888 = vst.msk [vmem:[#allocation3 + $0xa8] sm:$0xff] %vm1174_vm6, %v5824_v15  ;;  %v5259_v22 = vadd.f32 %v5195_v30, %v5075_v7  ;;  %v5644_v52 = vpop.f32.mrf.mxu0 }
 0x2bf   : > { %v5762_v0 = vld [vmem:[#allocation3 + $0xb8] sm:$0xff]  ;;  %v5079_v47 = vpop.f32.mrf.mxu1  ;;  %v5829_v54 = vadd.f32 %v5644_v52, %v5258_v49  ;;  %8422 = vmatmul.mubr.msk.bf16.gmra.mxu1 %vm1174_vm6, %v8402_v57  ;;  %v5206_v49 = vld [vmem:[#allocation3 + $0x130] sm:$0xff] }
 0x2c0   : > { %v5826_v5 = vadd.f32 %v5762_v0, %v5636_v33  ;;  %5323 = vst.msk [vmem:[#allocation3 + $0xd8] sm:$0xff] %vm1174_vm6, %v5259_v22  ;;  %v5260_v25 = vadd.f32 %v5196_v35, %v5079_v47  ;;  %v5646_v17 = vpop.f32.mrf.mxu0 }
 0x2c1   : > { %5893 = vst [vmem:[#allocation3 + $0xd0] sm:$0xff] %v5829_v54  ;;  %v5081_v58 = vpop.f32.mrf.mxu1 }
 0x2c2   : > { %5890 = vst.msk [vmem:[#allocation3 + $0xb8] sm:$0xff] %vm1174_vm6, %v5826_v5  ;;  %v5261_v40 = vadd.f32 %v5197_v34, %v5081_v58  ;;  %v5650_v27 = vpop.f32.mrf.mxu0  ;;  %8474 = vmatmul.mubr.msk.bf16.gmra.mxu0 %vm1174_vm6, %v8454_v1  ;;  %v5207_v1 = vld [vmem:[#allocation3 + $0x138] sm:$0xff]  ;;  %v5208_v5 = vld [vmem:[#allocation3 + $0x140] sm:$0xff] }
 0x2c3   : > { %v5764_v18 = vld [vmem:[#allocation3 + $0xc8] sm:$0xff]  ;;  %v5083_v36 = vpop.f32.mrf.mxu1  ;;  %v5831_v19 = vadd.f32 %v5650_v27, %v5260_v25 }
 0x2c4   : > { %v5828_v23 = vadd.f32 %v5764_v18, %v5642_v24  ;;  %5325 = vst.msk [vmem:[#allocation3 + $0xe8] sm:$0xff] %vm1174_vm6, %v5261_v40  ;;  %v5262_v6 = vadd.f32 %v5198_v37, %v5083_v36  ;;  %v5652_v21 = vpop.f32.mrf.mxu0  ;;  %v5209_v27 = vld [vmem:[#allocation3 + $0x148] sm:$0xff] }
 0x2c5   : > { %5895 = vst [vmem:[#allocation3 + $0xe0] sm:$0xff] %v5831_v19  ;;  %v5085_v16 = vpop.f32.mrf.mxu1 }
 0x2c6   : > { %5892 = vst.msk [vmem:[#allocation3 + $0xc8] sm:$0xff] %vm1174_vm6, %v5828_v23  ;;  %v5263_v28 = vadd.f32 %v5199_v50, %v5085_v16  ;;  %v5654_v43 = vpop.f32.mrf.mxu0  ;;  %v5210_v23 = vld [vmem:[#allocation3 + $0x150] sm:$0xff] }
 0x2c7   : > { %v5766_v45 = vld [vmem:[#allocation3 + $0xd8] sm:$0xff]  ;;  %v5089_v4 = vpop.f32.mrf.mxu1  ;;  %v5833_v32 = vadd.f32 %v5654_v43, %v5262_v6 }
 0x2c8   : > { %v5830_v59 = vadd.f32 %v5766_v45, %v5646_v17  ;;  %5327 = vst.msk [vmem:[#allocation3 + $0xf8] sm:$0xff] %vm1174_vm6, %v5263_v28  ;;  %v5264_v13 = vadd.f32 %v5200_v53, %v5089_v4  ;;  %v5656_v62 = vpop.f32.mrf.mxu0  ;;  %v5211_v43 = vld [vmem:[#allocation3 + $0x158] sm:$0xff] }
 0x2c9   : > { %5897 = vst [vmem:[#allocation3 + $0xf0] sm:$0xff] %v5833_v32  ;;  %v5091_v44 = vpop.f32.mrf.mxu1 }
 0x2ca   : > { %5894 = vst.msk [vmem:[#allocation3 + $0xd8] sm:$0xff] %vm1174_vm6, %v5830_v59  ;;  %v5265_v14 = vadd.f32 %v5201_v48, %v5091_v44  ;;  %v5660_v11 = vpop.f32.mrf.mxu0  ;;  %v5212_v59 = vld [vmem:[#allocation3 + $0x160] sm:$0xff] }
 0x2cb   : > { %v5768_v41 = vld [vmem:[#allocation3 + $0xe8] sm:$0xff]  ;;  %v5093_v56 = vpop.f32.mrf.mxu1  ;;  %v5835_v29 = vadd.f32 %v5660_v11, %v5264_v13 }
 0x2cc   : > { %v5832_v8 = vadd.f32 %v5768_v41, %v5652_v21  ;;  %5329 = vst.msk [vmem:[#allocation3 + $0x108] sm:$0xff] %vm1174_vm6, %v5265_v14  ;;  %v5266_v38 = vadd.f32 %v5202_v2, %v5093_v56  ;;  %v5662_v51 = vpop.f32.mrf.mxu0  ;;  %v5213_v11 = vld [vmem:[#allocation3 + $0x168] sm:$0xff] }
 0x2cd   : > { %5899 = vst [vmem:[#allocation3 + $0x100] sm:$0xff] %v5835_v29  ;;  %v5095_v61 = vpop.f32.mrf.mxu1 }
 0x2ce   : > { %5896 = vst.msk [vmem:[#allocation3 + $0xe8] sm:$0xff] %vm1174_vm6, %v5832_v8  ;;  %v5267_v33 = vadd.f32 %v5203_v31, %v5095_v61  ;;  %v5664_v3 = vpop.f32.mrf.mxu0  ;;  %v5214_v8 = vld [vmem:[#allocation3 + $0x170] sm:$0xff] }
 0x2cf   : > { %v5770_v20 = vld [vmem:[#allocation3 + $0xf8] sm:$0xff]  ;;  %v5099_v63 = vpop.f32.mrf.mxu1  ;;  %v5837_v42 = vadd.f32 %v5664_v3, %v5266_v38 }
 0x2d0   : > { %v5834_v9 = vadd.f32 %v5770_v20, %v5656_v62  ;;  %5331 = vst.msk [vmem:[#allocation3 + $0x118] sm:$0xff] %vm1174_vm6, %v5267_v33  ;;  %v5268_v60 = vadd.f32 %v5204_v26, %v5099_v63  ;;  %v5666_v39 = vpop.f32.mrf.mxu0  ;;  %v5215_v3 = vld [vmem:[#allocation3 + $0x178] sm:$0xff] }
 0x2d1   : > { %5901 = vst [vmem:[#allocation3 + $0x110] sm:$0xff] %v5837_v42  ;;  %v5101_v10 = vpop.f32.mrf.mxu1 }
 0x2d2   : > { %5898 = vst.msk [vmem:[#allocation3 + $0xf8] sm:$0xff] %vm1174_vm6, %v5834_v9  ;;  %v5269_v57 = vadd.f32 %v5205_v46, %v5101_v10  ;;  %v5670_v55 = vpop.f32.mrf.mxu0  ;;  %v5216_v9 = vld [vmem:[#allocation3 + $0x180] sm:$0xff] }
 0x2d3   : > { %v5772_v12 = vld [vmem:[#allocation3 + $0x108] sm:$0xff]  ;;  %v5103_v15 = vpop.f32.mrf.mxu1  ;;  %v5839_v24 = vadd.f32 %v5670_v55, %v5268_v60 }
 0x2d4   : > { %v5836_v7 = vadd.f32 %v5772_v12, %v5662_v51  ;;  %5333 = vst.msk [vmem:[#allocation3 + $0x128] sm:$0xff] %vm1174_vm6, %v5269_v57  ;;  %v5270_v30 = vadd.f32 %v5206_v49, %v5103_v15  ;;  %v5672_v22 = vpop.f32.mrf.mxu0  ;;  %v5217_v55 = vld [vmem:[#allocation3 + $0x188] sm:$0xff] }
 0x2d5   : > { %5903 = vst [vmem:[#allocation3 + $0x120] sm:$0xff] %v5839_v24  ;;  %v5105_v52 = vpop.f32.mrf.mxu1 }
 0x2d6   : > { %5900 = vst.msk [vmem:[#allocation3 + $0x108] sm:$0xff] %vm1174_vm6, %v5836_v7  ;;  %v5271_v0 = vadd.f32 %v5207_v1, %v5105_v52  ;;  %v5674_v47 = vpop.f32.mrf.mxu0  ;;  %v5218_v7 = vld [vmem:[#allocation3 + $0x190] sm:$0xff] }
 0x2d7   : > { %v5774_v35 = vld [vmem:[#allocation3 + $0x118] sm:$0xff]  ;;  %v5109_v54 = vpop.f32.mrf.mxu1  ;;  %v5841_v25 = vadd.f32 %v5674_v47, %v5270_v30 }
 0x2d8   : > { %v5838_v17 = vadd.f32 %v5774_v35, %v5666_v39  ;;  %5335 = vst.msk [vmem:[#allocation3 + $0x138] sm:$0xff] %vm1174_vm6, %v5271_v0  ;;  %v5272_v58 = vadd.f32 %v5208_v5, %v5109_v54  ;;  %v5676_v34 = vpop.f32.mrf.mxu0  ;;  %v5219_v47 = vld [vmem:[#allocation3 + $0x198] sm:$0xff] }
 0x2d9   : > { %5905 = vst [vmem:[#allocation3 + $0x130] sm:$0xff] %v5841_v25  ;;  %v5111_v40 = vpop.f32.mrf.mxu1 }
 0x2da   : > { %5902 = vst.msk [vmem:[#allocation3 + $0x118] sm:$0xff] %vm1174_vm6, %v5838_v17  ;;  %v5273_v18 = vadd.f32 %v5209_v27, %v5111_v40  ;;  %v5680_v36 = vpop.f32.mrf.mxu0  ;;  %v5220_v17 = vld [vmem:[#allocation3 + $0x1a0] sm:$0xff] }
 0x2db   : > { %v5776_v37 = vld [vmem:[#allocation3 + $0x128] sm:$0xff]  ;;  %v5113_v19 = vpop.f32.mrf.mxu1  ;;  %v5843_v6 = vadd.f32 %v5680_v36, %v5272_v58 }
 0x2dc   : > { %v5840_v21 = vadd.f32 %v5776_v37, %v5672_v22  ;;  %5337 = vst.msk [vmem:[#allocation3 + $0x148] sm:$0xff] %vm1174_vm6, %v5273_v18  ;;  %v5274_v16 = vadd.f32 %v5210_v23, %v5113_v19  ;;  %v5682_v50 = vpop.f32.mrf.mxu0  ;;  %v5221_v36 = vld [vmem:[#allocation3 + $0x1a8] sm:$0xff] }
 0x2dd   : > { %5907 = vst [vmem:[#allocation3 + $0x140] sm:$0xff] %v5843_v6  ;;  %v5115_v28 = vpop.f32.mrf.mxu1 }
 0x2de   : > { %5904 = vst.msk [vmem:[#allocation3 + $0x128] sm:$0xff] %vm1174_vm6, %v5840_v21  ;;  %v5275_v45 = vadd.f32 %v5211_v43, %v5115_v28  ;;  %v5684_v4 = vpop.f32.mrf.mxu0  ;;  %v5222_v21 = vld [vmem:[#allocation3 + $0x1b0] sm:$0xff] }
 0x2df   : > { %v5778_v53 = vld [vmem:[#allocation3 + $0x138] sm:$0xff]  ;;  %v5119_v32 = vpop.f32.mrf.mxu1  ;;  %v5845_v13 = vadd.f32 %v5684_v4, %v5274_v16 }
 0x2e0   : > { %v5842_v62 = vadd.f32 %v5778_v53, %v5676_v34  ;;  %5339 = vst.msk [vmem:[#allocation3 + $0x158] sm:$0xff] %vm1174_vm6, %v5275_v45  ;;  %v5276_v44 = vadd.f32 %v5212_v59, %v5119_v32  ;;  %v5686_v48 = vpop.f32.mrf.mxu0  ;;  %v5223_v4 = vld [vmem:[#allocation3 + $0x1b8] sm:$0xff] }
 0x2e1   : > { %5909 = vst [vmem:[#allocation3 + $0x150] sm:$0xff] %v5845_v13  ;;  %v5121_v14 = vpop.f32.mrf.mxu1 }
 0x2e2   : > { %5906 = vst.msk [vmem:[#allocation3 + $0x138] sm:$0xff] %vm1174_vm6, %v5842_v62  ;;  %v5277_v41 = vadd.f32 %v5213_v11, %v5121_v14  ;;  %v5690_v56 = vpop.f32.mrf.mxu0  ;;  %v5224_v62 = vld [vmem:[#allocation3 + $0x1c0] sm:$0xff] }
 0x2e3   : > { %v5780_v2 = vld [vmem:[#allocation3 + $0x148] sm:$0xff]  ;;  %v5123_v29 = vpop.f32.mrf.mxu1  ;;  %v5847_v38 = vadd.f32 %v5690_v56, %v5276_v44 }
 0x2e4   : > { %v5844_v51 = vadd.f32 %v5780_v2, %v5682_v50  ;;  %5341 = vst.msk [vmem:[#allocation3 + $0x168] sm:$0xff] %vm1174_vm6, %v5277_v41  ;;  %v5278_v61 = vadd.f32 %v5214_v8, %v5123_v29  ;;  %v5692_v31 = vpop.f32.mrf.mxu0  ;;  %v5225_v56 = vld [vmem:[#allocation3 + $0x1c8] sm:$0xff] }
 0x2e5   : > { %5911 = vst [vmem:[#allocation3 + $0x160] sm:$0xff] %v5847_v38  ;;  %v5125_v33 = vpop.f32.mrf.mxu1 }
 0x2e6   : > { %5908 = vst.msk [vmem:[#allocation3 + $0x148] sm:$0xff] %vm1174_vm6, %v5844_v51  ;;  %v5279_v20 = vadd.f32 %v5215_v3, %v5125_v33  ;;  %v5694_v63 = vpop.f32.mrf.mxu0  ;;  %v5226_v51 = vld [vmem:[#allocation3 + $0x1d0] sm:$0xff] }
 0x2e7   : > { %v5782_v26 = vld [vmem:[#allocation3 + $0x158] sm:$0xff]  ;;  %v5129_v42 = vpop.f32.mrf.mxu1  ;;  %v5849_v60 = vadd.f32 %v5694_v63, %v5278_v61 }
 0x2e8   : > { %v5846_v39 = vadd.f32 %v5782_v26, %v5686_v48  ;;  %5343 = vst.msk [vmem:[#allocation3 + $0x178] sm:$0xff] %vm1174_vm6, %v5279_v20  ;;  %v5280_v10 = vadd.f32 %v5216_v9, %v5129_v42  ;;  %v5696_v46 = vpop.f32.mrf.mxu0  ;;  %v5227_v63 = vld [vmem:[#allocation3 + $0x1d8] sm:$0xff] }
 0x2e9   : > { %5913 = vst [vmem:[#allocation3 + $0x170] sm:$0xff] %v5849_v60  ;;  %v5131_v57 = vpop.f32.mrf.mxu1 }
 0x2ea   : > { %5910 = vst.msk [vmem:[#allocation3 + $0x158] sm:$0xff] %vm1174_vm6, %v5846_v39  ;;  %v5281_v12 = vadd.f32 %v5217_v55, %v5131_v57  ;;  %v5700_v15 = vpop.f32.mrf.mxu0  ;;  %v5228_v39 = vld [vmem:[#allocation3 + $0x1e0] sm:$0xff] }
 0x2eb   : > { %v5784_v49 = vld [vmem:[#allocation3 + $0x168] sm:$0xff]  ;;  %v5133_v24 = vpop.f32.mrf.mxu1  ;;  %v5851_v30 = vadd.f32 %v5700_v15, %v5280_v10 }
 0x2ec   : > { %v5848_v22 = vadd.f32 %v5784_v49, %v5692_v31  ;;  %5345 = vst.msk [vmem:[#allocation3 + $0x188] sm:$0xff] %vm1174_vm6, %v5281_v12  ;;  %v5282_v52 = vadd.f32 %v5218_v7, %v5133_v24  ;;  %v5702_v1 = vpop.f32.mrf.mxu0  ;;  %v5229_v15 = vld [vmem:[#allocation3 + $0x1e8] sm:$0xff] }
 0x2ed   : > { %5915 = vst [vmem:[#allocation3 + $0x180] sm:$0xff] %v5851_v30  ;;  %v5135_v0 = vpop.f32.mrf.mxu1 }
 0x2ee   : > { %5912 = vst.msk [vmem:[#allocation3 + $0x168] sm:$0xff] %vm1174_vm6, %v5848_v22  ;;  %v5283_v35 = vadd.f32 %v5219_v47, %v5135_v0  ;;  %v5704_v54 = vpop.f32.mrf.mxu0  ;;  %v5230_v22 = vld [vmem:[#allocation3 + $0x1f0] sm:$0xff] }
 0x2ef   : > { %v5786_v5 = vld [vmem:[#allocation3 + $0x178] sm:$0xff]  ;;  %v5139_v25 = vpop.f32.mrf.mxu1  ;;  %v5853_v58 = vadd.f32 %v5704_v54, %v5282_v52 }
 0x2f0   : > { %v5850_v34 = vadd.f32 %v5786_v5, %v5696_v46  ;;  %5347 = vst.msk [vmem:[#allocation3 + $0x198] sm:$0xff] %vm1174_vm6, %v5283_v35  ;;  %v5284_v40 = vadd.f32 %v5220_v17, %v5139_v25  ;;  %v5706_v27 = vpop.f32.mrf.mxu0  ;;  %v5231_v54 = vld [vmem:[#allocation3 + $0x1f8] sm:$0xff] }
 0x2f1   : > { %5917 = vst [vmem:[#allocation3 + $0x190] sm:$0xff] %v5853_v58  ;;  %v5141_v18 = vpop.f32.mrf.mxu1 }
 0x2f2   : > { %5914 = vst.msk [vmem:[#allocation3 + $0x178] sm:$0xff] %vm1174_vm6, %v5850_v34  ;;  %v5285_v37 = vadd.f32 %v5221_v36, %v5141_v18  ;;  %v5710_v19 = vpop.f32.mrf.mxu0 }
 0x2f3   : > { %v5788_v23 = vld [vmem:[#allocation3 + $0x188] sm:$0xff]  ;;  %v5143_v6 = vpop.f32.mrf.mxu1  ;;  %v5855_v16 = vadd.f32 %v5710_v19, %v5284_v40  ;;  %v6677_v40 = vld [vmem:[#allocation3] sm:$0xff] }
 0x2f4   : > { %v5852_v50 = vadd.f32 %v5788_v23, %v5702_v1  ;;  %5349 = vst.msk [vmem:[#allocation3 + $0x1a8] sm:$0xff] %vm1174_vm6, %v5285_v37  ;;  %v5286_v28 = vadd.f32 %v5222_v21, %v5143_v6  ;;  %v5712_v43 = vpop.f32.mrf.mxu0  ;;  %v6678_v19 = vld [vmem:[#allocation3 + $0x8] sm:$0xff] }
 0x2f5   : > { %5919 = vst [vmem:[#allocation3 + $0x1a0] sm:$0xff] %v5855_v16  ;;  %v5145_v45 = vpop.f32.mrf.mxu1 }
 0x2f6   : > { %5916 = vst.msk [vmem:[#allocation3 + $0x188] sm:$0xff] %vm1174_vm6, %v5852_v50  ;;  %v5287_v53 = vadd.f32 %v5223_v4, %v5145_v45  ;;  %v5714_v32 = vpop.f32.mrf.mxu0  ;;  %v6679_v50 = vld [vmem:[#allocation3 + $0x10] sm:$0xff] }
 0x2f7   : > { %v5790_v59 = vld [vmem:[#allocation3 + $0x198] sm:$0xff]  ;;  %v5149_v13 = vpop.f32.mrf.mxu1  ;;  %v5857_v44 = vadd.f32 %v5714_v32, %v5286_v28 }
 0x2f8   : > { %v5854_v48 = vadd.f32 %v5790_v59, %v5706_v27  ;;  %5351 = vst.msk [vmem:[#allocation3 + $0x1b8] sm:$0xff] %vm1174_vm6, %v5287_v53  ;;  %v5288_v14 = vadd.f32 %v5224_v62, %v5149_v13  ;;  %v5716_v11 = vpop.f32.mrf.mxu0  ;;  %v6680_v32 = vld [vmem:[#allocation3 + $0x18] sm:$0xff]  ;;  %v7649_v59 = vlaneseq }
 0x2f9   : > { %5921 = vst [vmem:[#allocation3 + $0x1b0] sm:$0xff] %v5857_v44  ;;  %v5151_v41 = vpop.f32.mrf.mxu1 }
 0x2fa   : > { %5918 = vst.msk [vmem:[#allocation3 + $0x198] sm:$0xff] %vm1174_vm6, %v5854_v48  ;;  %v5289_v2 = vadd.f32 %v5225_v56, %v5151_v41  ;;  %v5720_v29 = vpop.f32.mrf.mxu0 }
 0x2fb   : > { %v5792_v8 = vld [vmem:[#allocation3 + $0x1a8] sm:$0xff]  ;;  %v5153_v38 = vpop.f32.mrf.mxu1  ;;  %v5859_v61 = vadd.f32 %v5720_v29, %v5288_v14  ;;  %v6681_v14 = vld [vmem:[#allocation3 + $0x20] sm:$0xff] }
 0x2fc   : > { %v5856_v31 = vadd.f32 %v5792_v8, %v5712_v43  ;;  %5353 = vst.msk [vmem:[#allocation3 + $0x1c8] sm:$0xff] %vm1174_vm6, %v5289_v2  ;;  %v5290_v33 = vadd.f32 %v5226_v51, %v5153_v38  ;;  %v5722_v3 = vpop.f32.mrf.mxu0  ;;  %v6682_v8 = vld [vmem:[#allocation3 + $0x28] sm:$0xff]  ;;  %v7650_v38 = vshrl.u32 %v7649_v59, 7 }
 0x2fd   : > { %5923 = vst [vmem:[#allocation3 + $0x1c0] sm:$0xff] %v5859_v61  ;;  %v5155_v20 = vpop.f32.mrf.mxu1 }
 0x2fe   : > { %5920 = vst.msk [vmem:[#allocation3 + $0x1a8] sm:$0xff] %vm1174_vm6, %v5856_v31  ;;  %v5291_v26 = vadd.f32 %v5227_v63, %v5155_v20  ;;  %v5724_v42 = vpop.f32.mrf.mxu0 }
 0x2ff   : > { %v5794_v9 = vld [vmem:[#allocation3 + $0x1b8] sm:$0xff]  ;;  %v5159_v60 = vpop.f32.mrf.mxu1  ;;  %v5861_v10 = vadd.f32 %v5724_v42, %v5290_v33 }
 0x300   : > { %v5858_v46 = vadd.f32 %v5794_v9, %v5716_v11  ;;  %5355 = vst.msk [vmem:[#allocation3 + $0x1d8] sm:$0xff] %vm1174_vm6, %v5291_v26  ;;  %v5292_v57 = vadd.f32 %v5228_v39, %v5159_v60  ;;  %v5726_v55 = vpop.f32.mrf.mxu0  ;;  %v6684_v60 = vld [vmem:[#allocation3 + $0x38] sm:$0xff]  ;;  %v7651_v39 = vsub.s32 0, %v7650_v38 }
 0x301   : > { %5925 = vst [vmem:[#allocation3 + $0x1d0] sm:$0xff] %v5861_v10  ;;  %v5161_v12 = vpop.f32.mrf.mxu1  ;;  %v7655_v10 = vsub.s32 1, %v7650_v38 }
 0x302   : > { %5922 = vst.msk [vmem:[#allocation3 + $0x1b8] sm:$0xff] %vm1174_vm6, %v5858_v46  ;;  %v5293_v49 = vadd.f32 %v5229_v15, %v5161_v12  ;;  %v5730_v24 = vpop.f32.mrf.mxu0 }
 0x303   : > { %v5796_v7 = vld [vmem:[#allocation3 + $0x1c8] sm:$0xff]  ;;  %v5163_v30 = vpop.f32.mrf.mxu1  ;;  %v5863_v52 = vadd.f32 %v5730_v24, %v5292_v57 }
 0x304   : > { %v5860_v1 = vadd.f32 %v5796_v7, %v5722_v3  ;;  %5357 = vst.msk [vmem:[#allocation3 + $0x1e8] sm:$0xff] %vm1174_vm6, %v5293_v49  ;;  %v5294_v0 = vadd.f32 %v5230_v22, %v5163_v30  ;;  %v5732_v47 = vpop.f32.mrf.mxu0  ;;  %v6683_v3 = vld [vmem:[#allocation3 + $0x30] sm:$0xff]  ;;  %v6685_v49 = vld [vmem:[#allocation3 + $0x40] sm:$0xff] }
 0x305   : > { %5927 = vst [vmem:[#allocation3 + $0x1e0] sm:$0xff] %v5863_v52  ;;  %v5165_v35 = vpop.f32.mrf.mxu1 }
 0x306   : > { %5924 = vst.msk [vmem:[#allocation3 + $0x1c8] sm:$0xff] %vm1174_vm6, %v5860_v1  ;;  %v5295_v5 = vadd.f32 %v5231_v54, %v5165_v35  ;;  %v5734_v25 = vpop.f32.mrf.mxu0  ;;  %v6686_v1 = vld [vmem:[#allocation3 + $0x48] sm:$0xff] }
 0x307   : > { %v5798_v17 = vld [vmem:[#allocation3 + $0x1d8] sm:$0xff]  ;;  %v5865_v58 = vadd.f32 %v5734_v25, %v5294_v0  ;;  %v6518_v34 = vpop.f32.mrf.mxu1 }
 0x308   : > { %v5862_v27 = vadd.f32 %v5798_v17, %v5726_v55  ;;  %5359 = vst.msk [vmem:[#allocation3 + $0x1f8] sm:$0xff] %vm1174_vm6, %v5295_v5  ;;  %v6741_v18 = vadd.f32 %v6677_v40, %v6518_v34  ;;  %v5736_v36 = vpop.f32.mrf.mxu0  ;;  %v7647_v55 = vld [vmem:[%s11368_s4] sm:$0x3]  ;;  %v6687_v17 = vld [vmem:[#allocation3 + $0x50] sm:$0xff] }
 0x309   : > { %5929 = vst [vmem:[#allocation3 + $0x1f0] sm:$0xff] %v5865_v58  ;;  %v6520_v37 = vpop.f32.mrf.mxu1  ;;  %v10979_v0 = vrot.slane %v7647_v55, %v7651_v39 }
 0x30a   : > { %5926 = vst.msk [vmem:[#allocation3 + $0x1d8] sm:$0xff] %vm1174_vm6, %v5862_v27  ;;  %v6742_v23 = vadd.f32 %v6678_v19, %v6520_v37  ;;  %v7232_v6 = vpop.f32.mrf.mxu0  ;;  %v6688_v37 = vld [vmem:[#allocation3 + $0x58] sm:$0xff] }
 0x30b   : > { %v5800_v21 = vld [vmem:[#allocation3 + $0x1e8] sm:$0xff]  ;;  %v6522_v16 = vpop.f32.mrf.mxu1  ;;  %v10957_v28 = vadd.f32 %v7232_v6, %v6741_v18 }
 0x30c   : > { %v5864_v43 = vadd.f32 %v5800_v21, %v5732_v47  ;;  %6806 = vst.msk [vmem:[#allocation3 + $0x8] sm:$0xff] %vm1174_vm6, %v6742_v23  ;;  %v6743_v45 = vadd.f32 %v6679_v50, %v6522_v16  ;;  %v7234_v4 = vpop.f32.mrf.mxu0  ;;  %v10981_v47 = vrot.slane %v7647_v55, %v7655_v10 }
 0x30d   : > { %7519 = vst [vmem:[#allocation3] sm:$0xff] %v10957_v28  ;;  %v6524_v53 = vpop.f32.mrf.mxu1  ;;  %v7659_v19 = vadd.f32 %v10979_v0, %v10957_v28 }
 0x30e   : > { %5928 = vst.msk [vmem:[#allocation3 + $0x1e8] sm:$0xff] %vm1174_vm6, %v5864_v43  ;;  %v6744_v13 = vadd.f32 %v6680_v32, %v6524_v53  ;;  %v7236_v62 = vpop.f32.mrf.mxu0 }
 0x30f   : > { %v5802_v44 = vld [vmem:[#allocation3 + $0x1f8] sm:$0xff]  ;;  %v6528_v48 = vpop.f32.mrf.mxu1  ;;  %v10962_v11 = vadd.f32 %v7236_v62, %v6743_v45  ;;  %v6689_v45 = vld [vmem:[#allocation3 + $0x60] sm:$0xff] }
 0x310   : > { %v5866_v41 = vadd.f32 %v5802_v44, %v5736_v36  ;;  %6808 = vst.msk [vmem:[#allocation3 + $0x18] sm:$0xff] %vm1174_vm6, %v6744_v13  ;;  %v6745_v56 = vadd.f32 %v6681_v14, %v6528_v48  ;;  %v7238_v2 = vpop.f32.mrf.mxu0  ;;  %v6690_v44 = vld [vmem:[#allocation3 + $0x68] sm:$0xff] }
 0x311   : > { %7521 = vst [vmem:[#allocation3 + $0x10] sm:$0xff] %v10962_v11  ;;  %v6530_v29 = vpop.f32.mrf.mxu1  ;;  %v7661_v48 = vadd.f32 %v10979_v0, %v10962_v11 }
 0x312   : > { %5930 = vst.msk [vmem:[#allocation3 + $0x1f8] sm:$0xff] %vm1174_vm6, %v5866_v41  ;;  %v6746_v51 = vadd.f32 %v6682_v8, %v6530_v29  ;;  %v7242_v61 = vpop.f32.mrf.mxu0  ;;  %v6691_v8 = vld [vmem:[#allocation3 + $0x70] sm:$0xff] }
 0x313   : > { %v7392_v31 = vld [vmem:[#allocation3 + $0x8] sm:$0xff]  ;;  %v6532_v33 = vpop.f32.mrf.mxu1  ;;  %v10967_v20 = vadd.f32 %v7242_v61, %v6745_v56 }
 0x314   : > { %v7456_v63 = vadd.f32 %v7392_v31, %v7234_v4  ;;  %6810 = vst.msk [vmem:[#allocation3 + $0x28] sm:$0xff] %vm1174_vm6, %v6746_v51  ;;  %v6747_v26 = vadd.f32 %v6683_v3, %v6532_v33  ;;  %v7244_v42 = vpop.f32.mrf.mxu0 }
 0x315   : > { %7523 = vst [vmem:[#allocation3 + $0x20] sm:$0xff] %v10967_v20  ;;  %v6534_v9 = vpop.f32.mrf.mxu1 }
 0x316   : > { %7520 = vst.msk [vmem:[#allocation3 + $0x8] sm:$0xff] %vm1174_vm6, %v7456_v63  ;;  %v6748_v46 = vadd.f32 %v6684_v60, %v6534_v9  ;;  %v7246_v57 = vpop.f32.mrf.mxu0  ;;  %v6692_v63 = vld [vmem:[#allocation3 + $0x78] sm:$0xff] }
 0x317   : > { %v7394_v12 = vld [vmem:[#allocation3 + $0x18] sm:$0xff]  ;;  %v6538_v15 = vpop.f32.mrf.mxu1  ;;  %v10975_v24 = vadd.f32 %v7246_v57, %v6747_v26  ;;  %v7663_v26 = vadd.f32 %v10979_v0, %v10967_v20 }
 0x318   : > { %v7458_v7 = vadd.f32 %v7394_v12, %v7238_v2  ;;  %6812 = vst.msk [vmem:[#allocation3 + $0x38] sm:$0xff] %vm1174_vm6, %v6748_v46  ;;  %v6749_v30 = vadd.f32 %v6685_v49, %v6538_v15  ;;  %v7248_v22 = vpop.f32.mrf.mxu0  ;;  %v6693_v46 = vld [vmem:[#allocation3 + $0x80] sm:$0xff] }
 0x319   : > { %7525 = vst [vmem:[#allocation3 + $0x30] sm:$0xff] %v10975_v24  ;;  %v6540_v52 = vpop.f32.mrf.mxu1 }
 0x31a   : > { %7522 = vst.msk [vmem:[#allocation3 + $0x18] sm:$0xff] %vm1174_vm6, %v7458_v7  ;;  %v6750_v35 = vadd.f32 %v6686_v1, %v6540_v52  ;;  %v7252_v54 = vpop.f32.mrf.mxu0 }
 0x31b   : > { %v7396_v5 = vld [vmem:[#allocation3 + $0x28] sm:$0xff]  ;;  %v6542_v25 = vpop.f32.mrf.mxu1  ;;  %v10984_v58 = vadd.f32 %v7252_v54, %v6749_v30 }
 0x31c   : > { %v7460_v34 = vadd.f32 %v7396_v5, %v7244_v42  ;;  %6814 = vst.msk [vmem:[#allocation3 + $0x48] sm:$0xff] %vm1174_vm6, %v6750_v35  ;;  %v6751_v40 = vadd.f32 %v6687_v17, %v6542_v25  ;;  %v7254_v27 = vpop.f32.mrf.mxu0  ;;  %v6694_v30 = vld [vmem:[#allocation3 + $0x88] sm:$0xff]  ;;  %v6695_v25 = vld [vmem:[#allocation3 + $0x90] sm:$0xff] }
 0x31d   : > { %v7584_v18 = vld [vmem:[#allocation3 + $0x8] sm:$0xff]  ;;  %7527 = vst [vmem:[#allocation3 + $0x40] sm:$0xff] %v10984_v58  ;;  %v6544_v36 = vpop.f32.mrf.mxu1 }
 0x31e   : > { %v7660_v23 = vadd.f32 %v10981_v47, %v7584_v18  ;;  %7524 = vst.msk [vmem:[#allocation3 + $0x28] sm:$0xff] %vm1174_vm6, %v7460_v34  ;;  %v6752_v6 = vadd.f32 %v6688_v37, %v6544_v36  ;;  %v7256_v21 = vpop.f32.mrf.mxu0  ;;  %v6696_v37 = vld [vmem:[#allocation3 + $0x98] sm:$0xff] }
 0x31f   : > { %v7398_v50 = vld [vmem:[#allocation3 + $0x38] sm:$0xff]  ;;  %v6548_v43 = vpop.f32.mrf.mxu1  ;;  %v10998_v4 = vadd.f32 %v7256_v21, %v6751_v40 }
 0x320   : > { %v8545_v53 = vpack.c.bf16 %v7660_v23, %v7659_v19  ;;  %v7462_v32 = vadd.f32 %v7398_v50, %v7248_v22  ;;  %6816 = vst.msk [vmem:[#allocation3 + $0x58] sm:$0xff] %vm1174_vm6, %v6752_v6  ;;  %v6753_v28 = vadd.f32 %v6689_v45, %v6548_v43  ;;  %v7258_v59 = vpop.f32.mrf.mxu0  ;;  %v7665_v22 = vadd.f32 %v10979_v0, %v10975_v24  ;;  %v6697_v45 = vld [vmem:[#allocation3 + $0xa0] sm:$0xff] }
 0x321   : > { %v7586_v13 = vld [vmem:[#allocation3 + $0x18] sm:$0xff]  ;;  %7529 = vst [vmem:[#allocation3 + $0x50] sm:$0xff] %v10998_v4  ;;  %v6550_v62 = vpop.f32.mrf.mxu1  ;;  %v7667_v19 = vadd.f32 %v10979_v0, %v10984_v58 }
 0x322   : > { %7918 = vst.msk [vmem:[%s11002_s9] sm:$0xff] %vm10994_vm1, %v8545_v53  ;;  %v7662_v14 = vadd.f32 %v10981_v47, %v7586_v13  ;;  %v6754_v41 = vadd.f32 %v6690_v44, %v6550_v62  ;;  %v7262_v56 = vpop.f32.mrf.mxu0  ;;  %v6698_v44 = vld [vmem:[#allocation3 + $0xa8] sm:$0xff] }
 0x323   : > { %7526 = vst.msk [vmem:[#allocation3 + $0x38] sm:$0xff] %vm1174_vm6, %v7462_v32  ;;  %v7400_v2 = vld [vmem:[#allocation3 + $0x48] sm:$0xff]  ;;  %v6552_v29 = vpop.f32.mrf.mxu1  ;;  %v11011_v38 = vadd.f32 %v7262_v56, %v6753_v28 }
 0x324   : > { %v8546_v51 = vpack.c.bf16 %v7662_v14, %v7661_v48  ;;  %v7464_v61 = vadd.f32 %v7400_v2, %v7254_v27  ;;  %6818 = vst.msk [vmem:[#allocation3 + $0x68] sm:$0xff] %vm1174_vm6, %v6754_v41  ;;  %v6755_v31 = vadd.f32 %v6691_v8, %v6552_v29  ;;  %v7264_v33 = vpop.f32.mrf.mxu0  ;;  %v7669_v48 = vadd.f32 %v10979_v0, %v10998_v4  ;;  %v6699_v8 = vld [vmem:[#allocation3 + $0xb0] sm:$0xff] }
 0x325   : > { %v7588_v3 = vld [vmem:[#allocation3 + $0x28] sm:$0xff]  ;;  %7531 = vst [vmem:[#allocation3 + $0x60] sm:$0xff] %v11011_v38  ;;  %v6554_v11 = vpop.f32.mrf.mxu1 }
 0x326   : > { %7919 = vst.msk [vmem:[%s11002_s9 + $0x8] sm:$0xff] %vm10994_vm1, %v8546_v51  ;;  %v7664_v42 = vadd.f32 %v10981_v47, %v7588_v3  ;;  %v6756_v9 = vadd.f32 %v6692_v63, %v6554_v11  ;;  %v7266_v60 = vpop.f32.mrf.mxu0  ;;  %v6700_v63 = vld [vmem:[#allocation3 + $0xb8] sm:$0xff] }
 0x327   : > { %7528 = vst.msk [vmem:[#allocation3 + $0x48] sm:$0xff] %vm1174_vm6, %v7464_v61  ;;  %v7402_v39 = vld [vmem:[#allocation3 + $0x58] sm:$0xff]  ;;  %v6558_v10 = vpop.f32.mrf.mxu1  ;;  %v11022_v57 = vadd.f32 %v7266_v60, %v6755_v31 }
 0x328   : > { %v8547_v55 = vpack.c.bf16 %v7664_v42, %v7663_v26  ;;  %v7466_v12 = vadd.f32 %v7402_v39, %v7258_v59  ;;  %6820 = vst.msk [vmem:[#allocation3 + $0x78] sm:$0xff] %vm1174_vm6, %v6756_v9  ;;  %v6757_v15 = vadd.f32 %v6693_v46, %v6558_v10  ;;  %v7268_v49 = vpop.f32.mrf.mxu0  ;;  %v7671_v26 = vadd.f32 %v10979_v0, %v11011_v38  ;;  %v6701_v46 = vld [vmem:[#allocation3 + $0xc0] sm:$0xff] }
 0x329   : > { %7533 = vst [vmem:[#allocation3 + $0x70] sm:$0xff] %v11022_v57  ;;  %v6560_v20 = vpop.f32.mrf.mxu1 }
 0x32a   : > { %v7590_v7 = vld [vmem:[#allocation3 + $0x38] sm:$0xff]  ;;  %7920 = vst.msk [vmem:[%s11002_s9 + $0x10] sm:$0xff] %vm10994_vm1, %v8547_v55  ;;  %v6758_v1 = vadd.f32 %v6694_v30, %v6560_v20  ;;  %v7272_v35 = vpop.f32.mrf.mxu0  ;;  %v6702_v30 = vld [vmem:[#allocation3 + $0xc8] sm:$0xff] }
 0x32b   : > { %v7666_v52 = vadd.f32 %v10981_v47, %v7590_v7  ;;  %7530 = vst.msk [vmem:[#allocation3 + $0x58] sm:$0xff] %vm1174_vm6, %v7466_v12  ;;  %v7404_v54 = vld [vmem:[#allocation3 + $0x68] sm:$0xff]  ;;  %v6562_v5 = vpop.f32.mrf.mxu1  ;;  %v11033_v17 = vadd.f32 %v7272_v35, %v6757_v15 }
 0x32c   : > { %v7468_v40 = vadd.f32 %v7404_v54, %v7264_v33  ;;  %6822 = vst.msk [vmem:[#allocation3 + $0x88] sm:$0xff] %vm1174_vm6, %v6758_v1  ;;  %v6759_v27 = vadd.f32 %v6695_v25, %v6562_v5  ;;  %v7274_v18 = vpop.f32.mrf.mxu0  ;;  %v6703_v25 = vld [vmem:[#allocation3 + $0xd0] sm:$0xff] }
 0x32d   : > { %v8548_v34 = vpack.c.bf16 %v7666_v52, %v7665_v22  ;;  %7535 = vst [vmem:[#allocation3 + $0x80] sm:$0xff] %v11033_v17  ;;  %v6564_v24 = vpop.f32.mrf.mxu1  ;;  %v7673_v22 = vadd.f32 %v10979_v0, %v11022_v57 }
 0x32e   : > { %v7592_v36 = vld [vmem:[#allocation3 + $0x48] sm:$0xff]  ;;  %7532 = vst.msk [vmem:[#allocation3 + $0x68] sm:$0xff] %vm1174_vm6, %v7468_v40  ;;  %v6760_v6 = vadd.f32 %v6696_v37, %v6564_v24  ;;  %v7276_v21 = vpop.f32.mrf.mxu0  ;;  %v6704_v37 = vld [vmem:[#allocation3 + $0xd8] sm:$0xff] }
 0x32f   : > { %7921 = vst.msk [vmem:[%s11002_s9 + $0x18] sm:$0xff] %vm10994_vm1, %v8548_v34  ;;  %v7668_v23 = vadd.f32 %v10981_v47, %v7592_v36  ;;  %v7406_v50 = vld [vmem:[#allocation3 + $0x78] sm:$0xff]  ;;  %v6568_v43 = vpop.f32.mrf.mxu1  ;;  %v11044_v53 = vadd.f32 %v7276_v21, %v6759_v27 }
 0x330   : > { %v7470_v28 = vadd.f32 %v7406_v50, %v7268_v49  ;;  %6824 = vst.msk [vmem:[#allocation3 + $0x98] sm:$0xff] %vm1174_vm6, %v6760_v6  ;;  %v6761_v59 = vadd.f32 %v6697_v45, %v6568_v43  ;;  %v7278_v13 = vpop.f32.mrf.mxu0  ;;  %v6705_v45 = vld [vmem:[#allocation3 + $0xe0] sm:$0xff] }
 0x331   : > { %v8549_v32 = vpack.c.bf16 %v7668_v23, %v7667_v19  ;;  %7537 = vst [vmem:[#allocation3 + $0x90] sm:$0xff] %v11044_v53  ;;  %v6570_v58 = vpop.f32.mrf.mxu1  ;;  %v7675_v19 = vadd.f32 %v10979_v0, %v11033_v17 }
 0x332   : > { %v7594_v62 = vld [vmem:[#allocation3 + $0x58] sm:$0xff]  ;;  %7534 = vst.msk [vmem:[#allocation3 + $0x78] sm:$0xff] %vm1174_vm6, %v7470_v28  ;;  %v6762_v41 = vadd.f32 %v6698_v44, %v6570_v58  ;;  %v7282_v56 = vpop.f32.mrf.mxu0  ;;  %v6706_v44 = vld [vmem:[#allocation3 + $0xe8] sm:$0xff] }
 0x333   : > { %7922 = vst.msk [vmem:[%s11002_s9 + $0x20] sm:$0xff] %vm10994_vm1, %v8549_v32  ;;  %v7670_v14 = vadd.f32 %v10981_v47, %v7594_v62  ;;  %v7408_v2 = vld [vmem:[#allocation3 + $0x88] sm:$0xff]  ;;  %v6572_v29 = vpop.f32.mrf.mxu1  ;;  %v11055_v51 = vadd.f32 %v7282_v56, %v6761_v59 }
 0x334   : > { %v7472_v31 = vadd.f32 %v7408_v2, %v7274_v18  ;;  %6826 = vst.msk [vmem:[#allocation3 + $0xa8] sm:$0xff] %vm1174_vm6, %v6762_v41  ;;  %v6763_v33 = vadd.f32 %v6699_v8, %v6572_v29  ;;  %v7284_v3 = vpop.f32.mrf.mxu0  ;;  %v6707_v8 = vld [vmem:[#allocation3 + $0xf0] sm:$0xff] }
 0x335   : > { %v8550_v61 = vpack.c.bf16 %v7670_v14, %v7669_v48  ;;  %v7596_v11 = vld [vmem:[#allocation3 + $0x68] sm:$0xff]  ;;  %7539 = vst [vmem:[#allocation3 + $0xa0] sm:$0xff] %v11055_v51  ;;  %v6574_v4 = vpop.f32.mrf.mxu1  ;;  %v7677_v48 = vadd.f32 %v10979_v0, %v11044_v53 }
 0x336   : > { %v7672_v42 = vadd.f32 %v10981_v47, %v7596_v11  ;;  %7536 = vst.msk [vmem:[#allocation3 + $0x88] sm:$0xff] %vm1174_vm6, %v7472_v31  ;;  %v6764_v9 = vadd.f32 %v6700_v63, %v6574_v4  ;;  %v7286_v60 = vpop.f32.mrf.mxu0  ;;  %v6708_v63 = vld [vmem:[#allocation3 + $0xf8] sm:$0xff] }
 0x337   : > { %7923 = vst.msk [vmem:[%s11002_s9 + $0x28] sm:$0xff] %vm10994_vm1, %v8550_v61  ;;  %v7410_v39 = vld [vmem:[#allocation3 + $0x98] sm:$0xff]  ;;  %v6578_v10 = vpop.f32.mrf.mxu1  ;;  %v11066_v55 = vadd.f32 %v7286_v60, %v6763_v33 }
 0x338   : > { %v8551_v12 = vpack.c.bf16 %v7672_v42, %v7671_v26  ;;  %v7474_v15 = vadd.f32 %v7410_v39, %v7278_v13  ;;  %6828 = vst.msk [vmem:[#allocation3 + $0xb8] sm:$0xff] %vm1174_vm6, %v6764_v9  ;;  %v6765_v49 = vadd.f32 %v6701_v46, %v6578_v10  ;;  %v7288_v7 = vpop.f32.mrf.mxu0  ;;  %v7679_v26 = vadd.f32 %v10979_v0, %v11055_v51  ;;  %v6709_v46 = vld [vmem:[#allocation3 + $0x100] sm:$0xff] }
 0x339   : > { %v7598_v20 = vld [vmem:[#allocation3 + $0x78] sm:$0xff]  ;;  %7541 = vst [vmem:[#allocation3 + $0xb0] sm:$0xff] %v11066_v55  ;;  %v6580_v38 = vpop.f32.mrf.mxu1 }
 0x33a   : > { %7924 = vst.msk [vmem:[%s11002_s9 + $0x30] sm:$0xff] %vm10994_vm1, %v8551_v12  ;;  %v7674_v52 = vadd.f32 %v10981_v47, %v7598_v20  ;;  %v6766_v1 = vadd.f32 %v6702_v30, %v6580_v38  ;;  %v7292_v35 = vpop.f32.mrf.mxu0  ;;  %v6710_v30 = vld [vmem:[#allocation3 + $0x108] sm:$0xff] }
 0x33b   : > { %7538 = vst.msk [vmem:[#allocation3 + $0x98] sm:$0xff] %vm1174_vm6, %v7474_v15  ;;  %v7412_v54 = vld [vmem:[#allocation3 + $0xa8] sm:$0xff]  ;;  %v6582_v5 = vpop.f32.mrf.mxu1  ;;  %v11077_v34 = vadd.f32 %v7292_v35, %v6765_v49 }
 0x33c   : > { %v8552_v40 = vpack.c.bf16 %v7674_v52, %v7673_v22  ;;  %v7476_v27 = vadd.f32 %v7412_v54, %v7284_v3  ;;  %6830 = vst.msk [vmem:[#allocation3 + $0xc8] sm:$0xff] %vm1174_vm6, %v6766_v1  ;;  %v6767_v18 = vadd.f32 %v6703_v25, %v6582_v5  ;;  %v7294_v36 = vpop.f32.mrf.mxu0  ;;  %v7681_v22 = vadd.f32 %v10979_v0, %v11066_v55  ;;  %v6711_v25 = vld [vmem:[#allocation3 + $0x110] sm:$0xff] }
 0x33d   : > { %v7600_v24 = vld [vmem:[#allocation3 + $0x88] sm:$0xff]  ;;  %7543 = vst [vmem:[#allocation3 + $0xc0] sm:$0xff] %v11077_v34  ;;  %v6584_v57 = vpop.f32.mrf.mxu1 }
 0x33e   : > { %7925 = vst.msk [vmem:[%s11002_s9 + $0x38] sm:$0xff] %vm10994_vm1, %v8552_v40  ;;  %v7676_v23 = vadd.f32 %v10981_v47, %v7600_v24  ;;  %v6768_v6 = vadd.f32 %v6704_v37, %v6584_v57  ;;  %v7296_v21 = vpop.f32.mrf.mxu0  ;;  %v6712_v37 = vld [vmem:[#allocation3 + $0x118] sm:$0xff] }
 0x33f   : > { %7540 = vst.msk [vmem:[#allocation3 + $0xa8] sm:$0xff] %vm1174_vm6, %v7476_v27  ;;  %v7414_v50 = vld [vmem:[#allocation3 + $0xb8] sm:$0xff]  ;;  %v6588_v43 = vpop.f32.mrf.mxu1  ;;  %v11088_v32 = vadd.f32 %v7296_v21, %v6767_v18 }
 0x340   : > { %v8553_v28 = vpack.c.bf16 %v7676_v23, %v7675_v19  ;;  %v7478_v59 = vadd.f32 %v7414_v50, %v7288_v7  ;;  %6832 = vst.msk [vmem:[#allocation3 + $0xd8] sm:$0xff] %vm1174_vm6, %v6768_v6  ;;  %v6769_v13 = vadd.f32 %v6705_v45, %v6588_v43  ;;  %v7298_v62 = vpop.f32.mrf.mxu0  ;;  %v7683_v19 = vadd.f32 %v10979_v0, %v11077_v34  ;;  %v6713_v45 = vld [vmem:[#allocation3 + $0x120] sm:$0xff] }
 0x341   : > { %7545 = vst [vmem:[#allocation3 + $0xd0] sm:$0xff] %v11088_v32  ;;  %v6590_v17 = vpop.f32.mrf.mxu1 }
 0x342   : > { %v7602_v58 = vld [vmem:[#allocation3 + $0x98] sm:$0xff]  ;;  %7926 = vst.msk [vmem:[%s11002_s9 + $0x40] sm:$0xff] %vm10994_vm1, %v8553_v28  ;;  %v6770_v41 = vadd.f32 %v6706_v44, %v6590_v17  ;;  %v7302_v56 = vpop.f32.mrf.mxu0  ;;  %v6714_v44 = vld [vmem:[#allocation3 + $0x128] sm:$0xff] }
 0x343   : > { %v7678_v14 = vadd.f32 %v10981_v47, %v7602_v58  ;;  %7542 = vst.msk [vmem:[#allocation3 + $0xb8] sm:$0xff] %vm1174_vm6, %v7478_v59  ;;  %v7416_v2 = vld [vmem:[#allocation3 + $0xc8] sm:$0xff]  ;;  %v6592_v29 = vpop.f32.mrf.mxu1  ;;  %v11099_v61 = vadd.f32 %v7302_v56, %v6769_v13 }
 0x344   : > { %v7480_v33 = vadd.f32 %v7416_v2, %v7294_v36  ;;  %6834 = vst.msk [vmem:[#allocation3 + $0xe8] sm:$0xff] %vm1174_vm6, %v6770_v41  ;;  %v6771_v3 = vadd.f32 %v6707_v8, %v6592_v29  ;;  %v7304_v11 = vpop.f32.mrf.mxu0  ;;  %v6715_v8 = vld [vmem:[#allocation3 + $0x130] sm:$0xff] }
 0x345   : > { %v8554_v31 = vpack.c.bf16 %v7678_v14, %v7677_v48  ;;  %7547 = vst [vmem:[#allocation3 + $0xe0] sm:$0xff] %v11099_v61  ;;  %v6594_v53 = vpop.f32.mrf.mxu1  ;;  %v7685_v48 = vadd.f32 %v10979_v0, %v11088_v32 }
 0x346   : > { %v7604_v4 = vld [vmem:[#allocation3 + $0xa8] sm:$0xff]  ;;  %7544 = vst.msk [vmem:[#allocation3 + $0xc8] sm:$0xff] %vm1174_vm6, %v7480_v33  ;;  %v6772_v9 = vadd.f32 %v6708_v63, %v6594_v53  ;;  %v7306_v60 = vpop.f32.mrf.mxu0  ;;  %v6716_v63 = vld [vmem:[#allocation3 + $0x138] sm:$0xff] }
 0x347   : > { %7927 = vst.msk [vmem:[%s11002_s9 + $0x48] sm:$0xff] %vm10994_vm1, %v8554_v31  ;;  %v7680_v42 = vadd.f32 %v10981_v47, %v7604_v4  ;;  %v7418_v39 = vld [vmem:[#allocation3 + $0xd8] sm:$0xff]  ;;  %v6598_v10 = vpop.f32.mrf.mxu1  ;;  %v11110_v12 = vadd.f32 %v7306_v60, %v6771_v3 }
 0x348   : > { %v7482_v49 = vadd.f32 %v7418_v39, %v7298_v62  ;;  %6836 = vst.msk [vmem:[#allocation3 + $0xf8] sm:$0xff] %vm1174_vm6, %v6772_v9  ;;  %v6773_v7 = vadd.f32 %v6709_v46, %v6598_v10  ;;  %v7308_v20 = vpop.f32.mrf.mxu0  ;;  %v6717_v46 = vld [vmem:[#allocation3 + $0x140] sm:$0xff] }
 0x349   : > { %v8555_v15 = vpack.c.bf16 %v7680_v42, %v7679_v26  ;;  %7549 = vst [vmem:[#allocation3 + $0xf0] sm:$0xff] %v11110_v12  ;;  %v6600_v51 = vpop.f32.mrf.mxu1  ;;  %v7687_v26 = vadd.f32 %v10979_v0, %v11099_v61 }
 0x34a   : > { %v7606_v38 = vld [vmem:[#allocation3 + $0xb8] sm:$0xff]  ;;  %7546 = vst.msk [vmem:[#allocation3 + $0xd8] sm:$0xff] %vm1174_vm6, %v7482_v49  ;;  %v6774_v1 = vadd.f32 %v6710_v30, %v6600_v51  ;;  %v7312_v35 = vpop.f32.mrf.mxu0  ;;  %v6718_v30 = vld [vmem:[#allocation3 + $0x148] sm:$0xff] }
 0x34b   : > { %7928 = vst.msk [vmem:[%s11002_s9 + $0x50] sm:$0xff] %vm10994_vm1, %v8555_v15  ;;  %v7682_v52 = vadd.f32 %v10981_v47, %v7606_v38  ;;  %v7420_v54 = vld [vmem:[#allocation3 + $0xe8] sm:$0xff]  ;;  %v6602_v5 = vpop.f32.mrf.mxu1  ;;  %v11121_v40 = vadd.f32 %v7312_v35, %v6773_v7 }
 0x34c   : > { %v7484_v18 = vadd.f32 %v7420_v54, %v7304_v11  ;;  %6838 = vst.msk [vmem:[#allocation3 + $0x108] sm:$0xff] %vm1174_vm6, %v6774_v1  ;;  %v6775_v36 = vadd.f32 %v6711_v25, %v6602_v5  ;;  %v7314_v24 = vpop.f32.mrf.mxu0  ;;  %v6719_v25 = vld [vmem:[#allocation3 + $0x150] sm:$0xff] }
 0x34d   : > { %v8556_v27 = vpack.c.bf16 %v7682_v52, %v7681_v22  ;;  %v7608_v57 = vld [vmem:[#allocation3 + $0xc8] sm:$0xff]  ;;  %7551 = vst [vmem:[#allocation3 + $0x100] sm:$0xff] %v11121_v40  ;;  %v6604_v55 = vpop.f32.mrf.mxu1  ;;  %v7689_v22 = vadd.f32 %v10979_v0, %v11110_v12 }
 0x34e   : > { %v7684_v23 = vadd.f32 %v10981_v47, %v7608_v57  ;;  %7548 = vst.msk [vmem:[#allocation3 + $0xe8] sm:$0xff] %vm1174_vm6, %v7484_v18  ;;  %v6776_v6 = vadd.f32 %v6712_v37, %v6604_v55  ;;  %v7316_v21 = vpop.f32.mrf.mxu0  ;;  %v6720_v37 = vld [vmem:[#allocation3 + $0x158] sm:$0xff] }
 0x34f   : > { %7929 = vst.msk [vmem:[%s11002_s9 + $0x58] sm:$0xff] %vm10994_vm1, %v8556_v27  ;;  %v7422_v50 = vld [vmem:[#allocation3 + $0xf8] sm:$0xff]  ;;  %v6608_v43 = vpop.f32.mrf.mxu1  ;;  %v11132_v28 = vadd.f32 %v7316_v21, %v6775_v36 }
 0x350   : > { %v8557_v59 = vpack.c.bf16 %v7684_v23, %v7683_v19  ;;  %v7486_v13 = vadd.f32 %v7422_v50, %v7308_v20  ;;  %6840 = vst.msk [vmem:[#allocation3 + $0x118] sm:$0xff] %vm1174_vm6, %v6776_v6  ;;  %v6777_v62 = vadd.f32 %v6713_v45, %v6608_v43  ;;  %v7318_v58 = vpop.f32.mrf.mxu0  ;;  %v7691_v19 = vadd.f32 %v10979_v0, %v11121_v40  ;;  %v6721_v45 = vld [vmem:[#allocation3 + $0x160] sm:$0xff] }
 0x351   : > { %v7610_v17 = vld [vmem:[#allocation3 + $0xd8] sm:$0xff]  ;;  %7553 = vst [vmem:[#allocation3 + $0x110] sm:$0xff] %v11132_v28  ;;  %v6610_v34 = vpop.f32.mrf.mxu1 }
 0x352   : > { %7930 = vst.msk [vmem:[%s11002_s9 + $0x60] sm:$0xff] %vm10994_vm1, %v8557_v59  ;;  %v7686_v14 = vadd.f32 %v10981_v47, %v7610_v17  ;;  %v6778_v41 = vadd.f32 %v6714_v44, %v6610_v34  ;;  %v7322_v56 = vpop.f32.mrf.mxu0  ;;  %v6722_v44 = vld [vmem:[#allocation3 + $0x168] sm:$0xff] }
 0x353   : > { %7550 = vst.msk [vmem:[#allocation3 + $0xf8] sm:$0xff] %vm1174_vm6, %v7486_v13  ;;  %v7424_v2 = vld [vmem:[#allocation3 + $0x108] sm:$0xff]  ;;  %v6612_v29 = vpop.f32.mrf.mxu1  ;;  %v11143_v31 = vadd.f32 %v7322_v56, %v6777_v62 }
 0x354   : > { %v8558_v33 = vpack.c.bf16 %v7686_v14, %v7685_v48  ;;  %v7488_v3 = vadd.f32 %v7424_v2, %v7314_v24  ;;  %6842 = vst.msk [vmem:[#allocation3 + $0x128] sm:$0xff] %vm1174_vm6, %v6778_v41  ;;  %v6779_v11 = vadd.f32 %v6715_v8, %v6612_v29  ;;  %v7324_v4 = vpop.f32.mrf.mxu0  ;;  %v7693_v48 = vadd.f32 %v10979_v0, %v11132_v28  ;;  %v6723_v8 = vld [vmem:[#allocation3 + $0x170] sm:$0xff] }
 0x355   : > { %v7612_v53 = vld [vmem:[#allocation3 + $0xe8] sm:$0xff]  ;;  %7555 = vst [vmem:[#allocation3 + $0x120] sm:$0xff] %v11143_v31  ;;  %v6614_v32 = vpop.f32.mrf.mxu1 }
 0x356   : > { %7931 = vst.msk [vmem:[%s11002_s9 + $0x68] sm:$0xff] %vm10994_vm1, %v8558_v33  ;;  %v7688_v42 = vadd.f32 %v10981_v47, %v7612_v53  ;;  %v6780_v9 = vadd.f32 %v6716_v63, %v6614_v32  ;;  %v7326_v60 = vpop.f32.mrf.mxu0  ;;  %v6724_v63 = vld [vmem:[#allocation3 + $0x178] sm:$0xff] }
 0x357   : > { %7552 = vst.msk [vmem:[#allocation3 + $0x108] sm:$0xff] %vm1174_vm6, %v7488_v3  ;;  %v7426_v39 = vld [vmem:[#allocation3 + $0x118] sm:$0xff]  ;;  %v6618_v10 = vpop.f32.mrf.mxu1  ;;  %v11154_v15 = vadd.f32 %v7326_v60, %v6779_v11 }
 0x358   : > { %v8559_v49 = vpack.c.bf16 %v7688_v42, %v7687_v26  ;;  %v7490_v7 = vadd.f32 %v7426_v39, %v7318_v58  ;;  %6844 = vst.msk [vmem:[#allocation3 + $0x138] sm:$0xff] %vm1174_vm6, %v6780_v9  ;;  %v6781_v20 = vadd.f32 %v6717_v46, %v6618_v10  ;;  %v7328_v38 = vpop.f32.mrf.mxu0  ;;  %v7695_v26 = vadd.f32 %v10979_v0, %v11143_v31  ;;  %v6725_v46 = vld [vmem:[#allocation3 + $0x180] sm:$0xff] }
 0x359   : > { %7557 = vst [vmem:[#allocation3 + $0x130] sm:$0xff] %v11154_v15  ;;  %v6620_v61 = vpop.f32.mrf.mxu1 }
 0x35a   : > { %v7614_v51 = vld [vmem:[#allocation3 + $0xf8] sm:$0xff]  ;;  %7932 = vst.msk [vmem:[%s11002_s9 + $0x70] sm:$0xff] %vm10994_vm1, %v8559_v49  ;;  %v6782_v1 = vadd.f32 %v6718_v30, %v6620_v61  ;;  %v7332_v35 = vpop.f32.mrf.mxu0  ;;  %v6726_v30 = vld [vmem:[#allocation3 + $0x188] sm:$0xff] }
 0x35b   : > { %v7690_v52 = vadd.f32 %v10981_v47, %v7614_v51  ;;  %7554 = vst.msk [vmem:[#allocation3 + $0x118] sm:$0xff] %vm1174_vm6, %v7490_v7  ;;  %v7428_v54 = vld [vmem:[#allocation3 + $0x128] sm:$0xff]  ;;  %v6622_v5 = vpop.f32.mrf.mxu1  ;;  %v11165_v27 = vadd.f32 %v7332_v35, %v6781_v20 }
 0x35c   : > { %v7492_v36 = vadd.f32 %v7428_v54, %v7324_v4  ;;  %6846 = vst.msk [vmem:[#allocation3 + $0x148] sm:$0xff] %vm1174_vm6, %v6782_v1  ;;  %v6783_v24 = vadd.f32 %v6719_v25, %v6622_v5  ;;  %v7334_v57 = vpop.f32.mrf.mxu0  ;;  %v6727_v25 = vld [vmem:[#allocation3 + $0x190] sm:$0xff] }
 0x35d   : > { %v8560_v18 = vpack.c.bf16 %v7690_v52, %v7689_v22  ;;  %7559 = vst [vmem:[#allocation3 + $0x140] sm:$0xff] %v11165_v27  ;;  %v6624_v12 = vpop.f32.mrf.mxu1  ;;  %v7697_v22 = vadd.f32 %v10979_v0, %v11154_v15 }
 0x35e   : > { %v7616_v55 = vld [vmem:[#allocation3 + $0x108] sm:$0xff]  ;;  %7556 = vst.msk [vmem:[#allocation3 + $0x128] sm:$0xff] %vm1174_vm6, %v7492_v36  ;;  %v6784_v6 = vadd.f32 %v6720_v37, %v6624_v12  ;;  %v7336_v21 = vpop.f32.mrf.mxu0  ;;  %v6728_v37 = vld [vmem:[#allocation3 + $0x198] sm:$0xff] }
 0x35f   : > { %7933 = vst.msk [vmem:[%s11002_s9 + $0x78] sm:$0xff] %vm10994_vm1, %v8560_v18  ;;  %v7692_v23 = vadd.f32 %v10981_v47, %v7616_v55  ;;  %v7430_v50 = vld [vmem:[#allocation3 + $0x138] sm:$0xff]  ;;  %v6628_v43 = vpop.f32.mrf.mxu1  ;;  %v11176_v59 = vadd.f32 %v7336_v21, %v6783_v24 }
 0x360   : > { %v7494_v62 = vadd.f32 %v7430_v50, %v7328_v38  ;;  %6848 = vst.msk [vmem:[#allocation3 + $0x158] sm:$0xff] %vm1174_vm6, %v6784_v6  ;;  %v6785_v58 = vadd.f32 %v6721_v45, %v6628_v43  ;;  %v7338_v17 = vpop.f32.mrf.mxu0  ;;  %v6729_v45 = vld [vmem:[#allocation3 + $0x1a0] sm:$0xff] }
 0x361   : > { %v8561_v13 = vpack.c.bf16 %v7692_v23, %v7691_v19  ;;  %7561 = vst [vmem:[#allocation3 + $0x150] sm:$0xff] %v11176_v59  ;;  %v6630_v40 = vpop.f32.mrf.mxu1  ;;  %v7699_v19 = vadd.f32 %v10979_v0, %v11165_v27 }
 0x362   : > { %v7618_v34 = vld [vmem:[#allocation3 + $0x118] sm:$0xff]  ;;  %7558 = vst.msk [vmem:[#allocation3 + $0x138] sm:$0xff] %vm1174_vm6, %v7494_v62  ;;  %v6786_v41 = vadd.f32 %v6722_v44, %v6630_v40  ;;  %v7342_v56 = vpop.f32.mrf.mxu0  ;;  %v6730_v44 = vld [vmem:[#allocation3 + $0x1a8] sm:$0xff] }
 0x363   : > { %7934 = vst.msk [vmem:[%s11002_s9 + $0x80] sm:$0xff] %vm10994_vm1, %v8561_v13  ;;  %v7694_v14 = vadd.f32 %v10981_v47, %v7618_v34  ;;  %v7432_v2 = vld [vmem:[#allocation3 + $0x148] sm:$0xff]  ;;  %v6632_v29 = vpop.f32.mrf.mxu1  ;;  %v11187_v33 = vadd.f32 %v7342_v56, %v6785_v58 }
 0x364   : > { %v7496_v11 = vadd.f32 %v7432_v2, %v7334_v57  ;;  %6850 = vst.msk [vmem:[#allocation3 + $0x168] sm:$0xff] %vm1174_vm6, %v6786_v41  ;;  %v6787_v4 = vadd.f32 %v6723_v8, %v6632_v29  ;;  %v7344_v53 = vpop.f32.mrf.mxu0  ;;  %v6731_v8 = vld [vmem:[#allocation3 + $0x1b0] sm:$0xff] }
 0x365   : > { %v8562_v3 = vpack.c.bf16 %v7694_v14, %v7693_v48  ;;  %v7620_v32 = vld [vmem:[#allocation3 + $0x128] sm:$0xff]  ;;  %7563 = vst [vmem:[#allocation3 + $0x160] sm:$0xff] %v11187_v33  ;;  %v6634_v28 = vpop.f32.mrf.mxu1  ;;  %v7701_v48 = vadd.f32 %v10979_v0, %v11176_v59 }
 0x366   : > { %v7696_v42 = vadd.f32 %v10981_v47, %v7620_v32  ;;  %7560 = vst.msk [vmem:[#allocation3 + $0x148] sm:$0xff] %vm1174_vm6, %v7496_v11  ;;  %v6788_v9 = vadd.f32 %v6724_v63, %v6634_v28  ;;  %v7346_v60 = vpop.f32.mrf.mxu0  ;;  %v6732_v63 = vld [vmem:[#allocation3 + $0x1b8] sm:$0xff] }
 0x367   : > { %7935 = vst.msk [vmem:[%s11002_s9 + $0x88] sm:$0xff] %vm10994_vm1, %v8562_v3  ;;  %v7434_v39 = vld [vmem:[#allocation3 + $0x158] sm:$0xff]  ;;  %v6638_v10 = vpop.f32.mrf.mxu1  ;;  %v11198_v49 = vadd.f32 %v7346_v60, %v6787_v4 }
 0x368   : > { %v8563_v7 = vpack.c.bf16 %v7696_v42, %v7695_v26  ;;  %v7498_v20 = vadd.f32 %v7434_v39, %v7338_v17  ;;  %6852 = vst.msk [vmem:[#allocation3 + $0x178] sm:$0xff] %vm1174_vm6, %v6788_v9  ;;  %v6789_v38 = vadd.f32 %v6725_v46, %v6638_v10  ;;  %v7348_v51 = vpop.f32.mrf.mxu0  ;;  %v7703_v26 = vadd.f32 %v10979_v0, %v11187_v33  ;;  %v6733_v46 = vld [vmem:[#allocation3 + $0x1c0] sm:$0xff] }
 0x369   : > { %v7622_v61 = vld [vmem:[#allocation3 + $0x138] sm:$0xff]  ;;  %7565 = vst [vmem:[#allocation3 + $0x170] sm:$0xff] %v11198_v49  ;;  %v6640_v31 = vpop.f32.mrf.mxu1 }
 0x36a   : > { %7936 = vst.msk [vmem:[%s11002_s9 + $0x90] sm:$0xff] %vm10994_vm1, %v8563_v7  ;;  %v7698_v52 = vadd.f32 %v10981_v47, %v7622_v61  ;;  %v6790_v1 = vadd.f32 %v6726_v30, %v6640_v31  ;;  %v7352_v35 = vpop.f32.mrf.mxu0  ;;  %v6734_v30 = vld [vmem:[#allocation3 + $0x1c8] sm:$0xff] }
 0x36b   : > { %7562 = vst.msk [vmem:[#allocation3 + $0x158] sm:$0xff] %vm1174_vm6, %v7498_v20  ;;  %v7436_v54 = vld [vmem:[#allocation3 + $0x168] sm:$0xff]  ;;  %v6642_v5 = vpop.f32.mrf.mxu1  ;;  %v11209_v18 = vadd.f32 %v7352_v35, %v6789_v38 }
 0x36c   : > { %v8564_v36 = vpack.c.bf16 %v7698_v52, %v7697_v22  ;;  %v7500_v24 = vadd.f32 %v7436_v54, %v7344_v53  ;;  %6854 = vst.msk [vmem:[#allocation3 + $0x188] sm:$0xff] %vm1174_vm6, %v6790_v1  ;;  %v6791_v57 = vadd.f32 %v6727_v25, %v6642_v5  ;;  %v7354_v55 = vpop.f32.mrf.mxu0  ;;  %v7705_v22 = vadd.f32 %v10979_v0, %v11198_v49  ;;  %v6735_v25 = vld [vmem:[#allocation3 + $0x1d0] sm:$0xff] }
 0x36d   : > { %v7624_v12 = vld [vmem:[#allocation3 + $0x148] sm:$0xff]  ;;  %7567 = vst [vmem:[#allocation3 + $0x180] sm:$0xff] %v11209_v18  ;;  %v6644_v15 = vpop.f32.mrf.mxu1 }
 0x36e   : > { %7937 = vst.msk [vmem:[%s11002_s9 + $0x98] sm:$0xff] %vm10994_vm1, %v8564_v36  ;;  %v7700_v23 = vadd.f32 %v10981_v47, %v7624_v12  ;;  %v6792_v6 = vadd.f32 %v6728_v37, %v6644_v15  ;;  %v7356_v21 = vpop.f32.mrf.mxu0  ;;  %v6736_v37 = vld [vmem:[#allocation3 + $0x1d8] sm:$0xff] }
 0x36f   : > { %7564 = vst.msk [vmem:[#allocation3 + $0x168] sm:$0xff] %vm1174_vm6, %v7500_v24  ;;  %v7438_v50 = vld [vmem:[#allocation3 + $0x178] sm:$0xff]  ;;  %v6648_v43 = vpop.f32.mrf.mxu1  ;;  %v11220_v13 = vadd.f32 %v7356_v21, %v6791_v57 }
 0x370   : > { %v8565_v62 = vpack.c.bf16 %v7700_v23, %v7699_v19  ;;  %v7502_v58 = vadd.f32 %v7438_v50, %v7348_v51  ;;  %6856 = vst.msk [vmem:[#allocation3 + $0x198] sm:$0xff] %vm1174_vm6, %v6792_v6  ;;  %v6793_v17 = vadd.f32 %v6729_v45, %v6648_v43  ;;  %v7358_v34 = vpop.f32.mrf.mxu0  ;;  %v7707_v19 = vadd.f32 %v10979_v0, %v11209_v18  ;;  %v6737_v45 = vld [vmem:[#allocation3 + $0x1e0] sm:$0xff] }
 0x371   : > { %7569 = vst [vmem:[#allocation3 + $0x190] sm:$0xff] %v11220_v13  ;;  %v6650_v27 = vpop.f32.mrf.mxu1 }
 0x372   : > { %v7626_v40 = vld [vmem:[#allocation3 + $0x158] sm:$0xff]  ;;  %7938 = vst.msk [vmem:[%s11002_s9 + $0xa0] sm:$0xff] %vm10994_vm1, %v8565_v62  ;;  %v6794_v41 = vadd.f32 %v6730_v44, %v6650_v27  ;;  %v7362_v56 = vpop.f32.mrf.mxu0  ;;  %v6738_v44 = vld [vmem:[#allocation3 + $0x1e8] sm:$0xff] }
 0x373   : > { %v7702_v14 = vadd.f32 %v10981_v47, %v7626_v40  ;;  %7566 = vst.msk [vmem:[#allocation3 + $0x178] sm:$0xff] %vm1174_vm6, %v7502_v58  ;;  %v7440_v2 = vld [vmem:[#allocation3 + $0x188] sm:$0xff]  ;;  %v6652_v29 = vpop.f32.mrf.mxu1  ;;  %v11231_v3 = vadd.f32 %v7362_v56, %v6793_v17 }
 0x374   : > { %v7504_v4 = vadd.f32 %v7440_v2, %v7354_v55  ;;  %6858 = vst.msk [vmem:[#allocation3 + $0x1a8] sm:$0xff] %vm1174_vm6, %v6794_v41  ;;  %v6795_v53 = vadd.f32 %v6731_v8, %v6652_v29  ;;  %v7364_v32 = vpop.f32.mrf.mxu0  ;;  %v6739_v8 = vld [vmem:[#allocation3 + $0x1f0] sm:$0xff] }
 0x375   : > { %v8566_v11 = vpack.c.bf16 %v7702_v14, %v7701_v48  ;;  %7571 = vst [vmem:[#allocation3 + $0x1a0] sm:$0xff] %v11231_v3  ;;  %v6654_v59 = vpop.f32.mrf.mxu1  ;;  %v7709_v48 = vadd.f32 %v10979_v0, %v11220_v13 }
 0x376   : > { %v7628_v28 = vld [vmem:[#allocation3 + $0x168] sm:$0xff]  ;;  %7568 = vst.msk [vmem:[#allocation3 + $0x188] sm:$0xff] %vm1174_vm6, %v7504_v4  ;;  %v6796_v9 = vadd.f32 %v6732_v63, %v6654_v59  ;;  %v7366_v60 = vpop.f32.mrf.mxu0  ;;  %v6740_v63 = vld [vmem:[#allocation3 + $0x1f8] sm:$0xff] }
 0x377   : > { %7939 = vst.msk [vmem:[%s11002_s9 + $0xa8] sm:$0xff] %vm10994_vm1, %v8566_v11  ;;  %v7704_v42 = vadd.f32 %v10981_v47, %v7628_v28  ;;  %v7442_v39 = vld [vmem:[#allocation3 + $0x198] sm:$0xff]  ;;  %v6658_v10 = vpop.f32.mrf.mxu1  ;;  %v11242_v7 = vadd.f32 %v7366_v60, %v6795_v53 }
 0x378   : > { %v7506_v38 = vadd.f32 %v7442_v39, %v7358_v34  ;;  %6860 = vst.msk [vmem:[#allocation3 + $0x1b8] sm:$0xff] %vm1174_vm6, %v6796_v9  ;;  %v6797_v51 = vadd.f32 %v6733_v46, %v6658_v10  ;;  %v7368_v61 = vpop.f32.mrf.mxu0 }
 0x379   : > { %v8567_v20 = vpack.c.bf16 %v7704_v42, %v7703_v26  ;;  %7573 = vst [vmem:[#allocation3 + $0x1b0] sm:$0xff] %v11242_v7  ;;  %v6660_v33 = vpop.f32.mrf.mxu1  ;;  %v7711_v26 = vadd.f32 %v10979_v0, %v11231_v3  ;;  %v7713_v3 = vadd.f32 %v10979_v0, %v11242_v7 }
 0x37a   : > { %v7630_v31 = vld [vmem:[#allocation3 + $0x178] sm:$0xff]  ;;  %7570 = vst.msk [vmem:[#allocation3 + $0x198] sm:$0xff] %vm1174_vm6, %v7506_v38  ;;  %v6798_v1 = vadd.f32 %v6734_v30, %v6660_v33  ;;  %v7372_v35 = vpop.f32.mrf.mxu0 }
 0x37b   : > { %7940 = vst.msk [vmem:[%s11002_s9 + $0xb0] sm:$0xff] %vm10994_vm1, %v8567_v20  ;;  %v7706_v52 = vadd.f32 %v10981_v47, %v7630_v31  ;;  %v7444_v54 = vld [vmem:[#allocation3 + $0x1a8] sm:$0xff]  ;;  %v6662_v5 = vpop.f32.mrf.mxu1  ;;  %v11253_v36 = vadd.f32 %v7372_v35, %v6797_v51 }
 0x37c   : > { %v7508_v57 = vadd.f32 %v7444_v54, %v7364_v32  ;;  %6862 = vst.msk [vmem:[#allocation3 + $0x1c8] sm:$0xff] %vm1174_vm6, %v6798_v1  ;;  %v6799_v55 = vadd.f32 %v6735_v25, %v6662_v5  ;;  %v7374_v12 = vpop.f32.mrf.mxu0 }
 0x37d   : > { %v8568_v24 = vpack.c.bf16 %v7706_v52, %v7705_v22  ;;  %v7632_v15 = vld [vmem:[#allocation3 + $0x188] sm:$0xff]  ;;  %7575 = vst [vmem:[#allocation3 + $0x1c0] sm:$0xff] %v11253_v36  ;;  %v6664_v49 = vpop.f32.mrf.mxu1  ;;  %v7715_v22 = vadd.f32 %v10979_v0, %v11253_v36 }
 0x37e   : > { %v7708_v23 = vadd.f32 %v10981_v47, %v7632_v15  ;;  %7572 = vst.msk [vmem:[#allocation3 + $0x1a8] sm:$0xff] %vm1174_vm6, %v7508_v57  ;;  %v6800_v6 = vadd.f32 %v6736_v37, %v6664_v49  ;;  %v7376_v21 = vpop.f32.mrf.mxu0 }
 0x37f   : > { %7941 = vst.msk [vmem:[%s11002_s9 + $0xb8] sm:$0xff] %vm10994_vm1, %v8568_v24  ;;  %v7446_v50 = vld [vmem:[#allocation3 + $0x1b8] sm:$0xff]  ;;  %v6668_v43 = vpop.f32.mrf.mxu1  ;;  %v7513_v62 = vadd.f32 %v7376_v21, %v6799_v55 }
 0x380   : > { %v8569_v58 = vpack.c.bf16 %v7708_v23, %v7707_v19  ;;  %v7510_v17 = vadd.f32 %v7446_v50, %v7368_v61  ;;  %6864 = vst.msk [vmem:[#allocation3 + $0x1d8] sm:$0xff] %vm1174_vm6, %v6800_v6  ;;  %v6801_v34 = vadd.f32 %v6737_v45, %v6668_v43  ;;  %v7378_v40 = vpop.f32.mrf.mxu0 }
 0x381   : > { %v7634_v27 = vld [vmem:[#allocation3 + $0x198] sm:$0xff]  ;;  %7577 = vst [vmem:[#allocation3 + $0x1d0] sm:$0xff] %v7513_v62  ;;  %v6670_v18 = vpop.f32.mrf.mxu1  ;;  %v7717_v25 = vadd.f32 %v10979_v0, %v7513_v62 }
 0x382   : > { %7942 = vst.msk [vmem:[%s11002_s9 + $0xc0] sm:$0xff] %vm10994_vm1, %v8569_v58  ;;  %v7710_v14 = vadd.f32 %v10981_v47, %v7634_v27  ;;  %v6802_v41 = vadd.f32 %v6738_v44, %v6670_v18  ;;  %v7382_v56 = vpop.f32.mrf.mxu0 }
 0x383   : > { %7574 = vst.msk [vmem:[#allocation3 + $0x1b8] sm:$0xff] %vm1174_vm6, %v7510_v17  ;;  %v7448_v2 = vld [vmem:[#allocation3 + $0x1c8] sm:$0xff]  ;;  %v6672_v29 = vpop.f32.mrf.mxu1  ;;  %v7515_v11 = vadd.f32 %v7382_v56, %v6801_v34 }
 0x384   : > { %v8570_v4 = vpack.c.bf16 %v7710_v14, %v7709_v48  ;;  %v7512_v53 = vadd.f32 %v7448_v2, %v7374_v12  ;;  %6866 = vst.msk [vmem:[#allocation3 + $0x1e8] sm:$0xff] %vm1174_vm6, %v6802_v41  ;;  %v6803_v32 = vadd.f32 %v6739_v8, %v6672_v29  ;;  %v7384_v28 = vpop.f32.mrf.mxu0 }
 0x385   : > { %v7636_v59 = vld [vmem:[#allocation3 + $0x1a8] sm:$0xff]  ;;  %7579 = vst [vmem:[#allocation3 + $0x1e0] sm:$0xff] %v7515_v11  ;;  %v6674_v13 = vpop.f32.mrf.mxu1  ;;  %v7719_v55 = vadd.f32 %v10979_v0, %v7515_v11 }
 0x386   : > { %7943 = vst.msk [vmem:[%s11002_s9 + $0xc8] sm:$0xff] %vm10994_vm1, %v8570_v4  ;;  %v7712_v42 = vadd.f32 %v10981_v47, %v7636_v59  ;;  %v6804_v9 = vadd.f32 %v6740_v63, %v6674_v13  ;;  %v7386_v60 = vpop.f32.mrf.mxu0 }
 0x387   : > { %7576 = vst.msk [vmem:[#allocation3 + $0x1c8] sm:$0xff] %vm1174_vm6, %v7512_v53  ;;  %v7450_v39 = vld [vmem:[#allocation3 + $0x1d8] sm:$0xff]  ;;  %v7517_v10 = vadd.f32 %v7386_v60, %v6803_v32 }
 0x388   : > { %v8571_v46 = vpack.c.bf16 %v7712_v42, %v7711_v26  ;;  %v7514_v20 = vadd.f32 %v7450_v39, %v7378_v40  ;;  %6868 = vst.msk [vmem:[#allocation3 + $0x1f8] sm:$0xff] %vm1174_vm6, %v6804_v9  ;;  %v7388_v7 = vpop.f32.mrf.mxu0 }
 0x389   : > { %7581 = vst [vmem:[#allocation3 + $0x1f0] sm:$0xff] %v7517_v10  ;;  %v7721_v37 = vadd.f32 %v10979_v0, %v7517_v10 }
 0x38a   : > { %v7638_v38 = vld [vmem:[#allocation3 + $0x1b8] sm:$0xff]  ;;  %7944 = vst.msk [vmem:[%s11002_s9 + $0xd0] sm:$0xff] %vm10994_vm1, %v8571_v46 }
 0x38b   : > { %v7714_v51 = vadd.f32 %v10981_v47, %v7638_v38  ;;  %7578 = vst.msk [vmem:[#allocation3 + $0x1d8] sm:$0xff] %vm1174_vm6, %v7514_v20  ;;  %v7452_v61 = vld [vmem:[#allocation3 + $0x1e8] sm:$0xff] }
 0x38c   : > { %v7516_v33 = vadd.f32 %v7452_v61, %v7384_v28 }
 0x38d   : > { %v8572_v31 = vpack.c.bf16 %v7714_v51, %v7713_v3 }
 0x38e   : > { %v7640_v30 = vld [vmem:[#allocation3 + $0x1c8] sm:$0xff]  ;;  %7580 = vst.msk [vmem:[#allocation3 + $0x1e8] sm:$0xff] %vm1174_vm6, %v7516_v33 }
 0x38f   : > { %7945 = vst.msk [vmem:[%s11002_s9 + $0xd8] sm:$0xff] %vm10994_vm1, %v8572_v31  ;;  %v7716_v52 = vadd.f32 %v10981_v47, %v7640_v30  ;;  %v7454_v1 = vld [vmem:[#allocation3 + $0x1f8] sm:$0xff] }
 0x390   : > { %v7518_v54 = vadd.f32 %v7454_v1, %v7388_v7 }
 0x391   : > { %v8573_v35 = vpack.c.bf16 %v7716_v52, %v7715_v22 }
 0x392   : > { %v7642_v5 = vld [vmem:[#allocation3 + $0x1d8] sm:$0xff]  ;;  %7582 = vst.msk [vmem:[#allocation3 + $0x1f8] sm:$0xff] %vm1174_vm6, %v7518_v54 }
 0x393   : > { %7946 = vst.msk [vmem:[%s11002_s9 + $0xe0] sm:$0xff] %vm10994_vm1, %v8573_v35  ;;  %v7718_v24 = vadd.f32 %v10981_v47, %v7642_v5 }
 0x395   : > { %v8574_v36 = vpack.c.bf16 %v7718_v24, %v7717_v25  ;;  %v7644_v57 = vld [vmem:[#allocation3 + $0x1e8] sm:$0xff] }
 0x396   : > { %v7720_v12 = vadd.f32 %v10981_v47, %v7644_v57 }
 0x397   : > { %7947 = vst.msk [vmem:[%s11002_s9 + $0xe8] sm:$0xff] %vm10994_vm1, %v8574_v36 }
 0x398   : > { %v8575_v15 = vpack.c.bf16 %v7720_v12, %v7719_v55 }
 0x399   : > { %v7646_v49 = vld [vmem:[#allocation3 + $0x1f8] sm:$0xff] }
 0x39a   : > { %7948 = vst.msk [vmem:[%s11002_s9 + $0xf0] sm:$0xff] %vm10994_vm1, %v8575_v15  ;;  %v7722_v19 = vadd.f32 %v10981_v47, %v7646_v49 }
 0x39c   : > { %v8576_v23 = vpack.c.bf16 %v7722_v19, %v7721_v37 }
 0x39e   : > { %7949 = vst.msk [vmem:[%s11002_s9 + $0xf8] sm:$0xff] %vm10994_vm1, %v8576_v23 }
 0x39f   : > { %8932 = shalt.err (!%p8929_p12)
}
 0x3a0   : > { %s8933_s2 = scalar_lea.hbm %s11316_s16, 4096  ;;  %s8937_s7 = scalar_lea.hbm %s11369_s5, 8192 }
 0x3a1   : > { %p8934_p6 = scmp.ne.s32.totalorder %s11316_s16, %s8933_s2  ;;  %p8938_p13 = scmp.lt.s32.totalorder %s11316_s16, %s11369_s5 }
 0x3a2   : > { %p8939_p3 = scmp.lt.s32.totalorder %s8937_s7, %s8933_s2 }
 0x3a3   : > { %p8935_p7 = pnand %p8934_p6, %p11401_p0 }
 0x3a4   : > { %p8940_p8 = por %p8939_p3, %p8938_p13 }
 0x3a5   : > { %p8936_p11 = pneg %p8935_p7 }
 0x3a7   : > { %p8941_p2 = pnand %p8940_p8, %p8936_p11 }
 0x3a9   : > { %8944 = shalt.err (!%p8941_p2)
}
 0x3aa   : > { %s8998_s8 = smov 128   ;;  %s8999_s9 = smov 8  }
 0x3ab   : > { %8671 = dma.vmem_to_hbm [thread:$0]  (%p11401_p0), %s11318_s12, 4096, %s11316_s16, %s7951_s22, %s8998_s8, %s8998_s8, %s8999_s9  }
 0x3ac PF: > { %s7979_s23 = sand.u32 1, %s8975_s18   ;;  %p11402_p4 = scmp.ne.s32.totalorder %s11379_s6, 0 }
 0x3ad   : > { %p11403_p5 = scmp.ge.s32.totalorder %s8987_s21, 2  ;;  %s7980_s14 = scalar_lea.sflag [#allocation6], %s7979_s23 }
 0x3af   : > { %p8685_p9 = pnand %p11403_p5, %p11402_p4 }
 0x3b1   : > { %p8686_p10 = pneg %p8685_p9 }
 0x3b3   : > { %8970 = dma.done.wait (%p8686_p10), %s7980_s14, 4096  }
 0x3b4   : > { %8972 = vsyncadd (%p8686_p10), %s7980_s14, 4294963200  ;;  %s11404_s15 = sld [smem:[#allocation14_spill]]  ;;  %p19_p1 = scmp.ge.s32.totalorder %s9055_s24, 4  }
 0x3b5   : > { %s11405_s18 = smov %s8979_s19  ;;  %s11406_s19 = smov %s8983_s20 }
 0x3b6   : > { %s11408_s21 = smov %s9055_s24  ;;  %21 = sbr.rel (!%p19_p1) target bundleno = 8 (0x8), region = 103 }
 0x3ba   : > { %s11407_s20 = smov %s11404_s15 }
 0x3bb   :  { %7985 = vsyncpa [#allocation5], 1 }
 0x3bc   :  { %7987 = vsyncpa [#allocation5 + $0x1], 1 }
 0x3bd   :  { %7988 = vsyncpa [#allocation8], 1 }
 0x3be   :  { %7989 = vsyncpa [#allocation6], 1 }
 0x3bf   :  { %7991 = vsyncpa [#allocation6 + $0x1], 1 }

</bundles_post_ra>
